<compile_context>
chip_gen: v5e
topology: v5e:2x2
jax: 0.10.0
libtpu: 0.0.40
codegen_flags: <defaults>
</compile_context>

<pallas_src>
import functools

import jax
import jax.numpy as jnp
from jax.experimental import pallas as pl
from jax.experimental.pallas import tpu as pltpu

_SQRT2_INV = 0.7071067811865475
_GN_EPS = 1e-5


def _round_up(x, m):
    return (x + m - 1) // m * m


def _gelu_exact(x):
    # PyTorch nn.GELU() default (exact / erf form).
    return 0.5 * x * (1.0 + jax.lax.erf(x * _SQRT2_INV))


# ----------------------------- Pallas kernel ---------------------------------


def _conv_gn_kernel(x_ref, m_ref, w_ref, g_ref, b_ref, *rest,
                    W, hw, pad_front, n_real, mode, mxu_dtype, eps):
    """Fused 3x3 conv + GroupNorm(1, C) + epilogue (GELU / residual-GELU / none).

    x_ref : (1, cin_p, L)       flat lane-padded sample (zeros outside the data)
    m_ref : (2, hw)             row 0: left-edge mask, row 1: right-edge mask
    w_ref : (9, cout_p, cin_p)  weights, tap-major (k = dy*3 + dx), MXU dtype
    g_ref, b_ref : (cout_p, 1)  GroupNorm affine (zero for padded channels)
    rest  : [res_ref (1, cout_p, L)] if mode == "res_gelu", then o_ref
    o_ref : (1, cout_p, L)      output, written in the same padded layout
    """
    if mode == "res_gelu":
        res_ref, o_ref = rest
    else:
        (o_ref,) = rest

    cout_p = o_ref.shape[1]
    L = o_ref.shape[2]

    xv = x_ref[0]                      # (cin_p, L) f32
    mv = m_ref[...]                    # (2, hw)   f32
    left = mv[0:1, :]                  # zero where output column x == 0
    right = mv[1:2, :]                 # zero where output column x == W-1

    # 3x3 conv as 9 accumulating matmuls on lane-shifted tap views.
    # Tap (dy, dx) of output flat-position p reads padded index
    # pad_front + p + (dy-1)*W + (dx-1); the left/right masks kill the
    # column-wrap positions, the zero halo handles row out-of-range.
    acc = None
    for dy in range(3):
        for dx in range(3):
            k = dy * 3 + dx
            off = pad_front + (dy - 1) * W + (dx - 1)
            tap = xv[:, off:off + hw].astype(mxu_dtype)      # (cin_p, hw)
            contrib = jnp.dot(w_ref[k], tap,
                              preferred_element_type=jnp.float32)
            if dx == 0:
                contrib = contrib * left
            elif dx == 2:
                contrib = contrib * right
            acc = contrib if acc is None else acc + contrib  # (cout_p, hw) f32

    # GroupNorm(num_groups=1), one pass over the sample.  Padded output
    # channels are exactly zero (zero weights) so dividing by the REAL element
    # count keeps the statistics exact.
    s = jnp.sum(acc)
    s2 = jnp.sum(acc * acc)
    mean = s / n_real
    var = jnp.maximum(s2 / n_real - mean * mean, 0.0)
    a = g_ref[...] * jax.lax.rsqrt(var + eps)                # (cout_p, 1)
    bshift = b_ref[...] - mean * a
    y = acc * a + bshift                                     # fused FMA affine

    if mode == "gelu":
        y = _gelu_exact(y)
    elif mode == "res_gelu":
        # fused residual of DoubleConv(residual=True): gelu(x + f(x))
        y = _gelu_exact(y + res_ref[0, :, pad_front:pad_front + hw])

    # Write the padded layout directly so the next stage needs no HBM pad copy.
    o_ref[0, :, 0:pad_front] = jnp.zeros((cout_p, pad_front), jnp.float32)
    o_ref[0, :, pad_front:pad_front + hw] = y
    o_ref[0, :, pad_front + hw:L] = jnp.zeros(
        (cout_p, L - pad_front - hw), jnp.float32)


# ------------------------------ Pallas wrapper --------------------------------


def conv3x3_gn(x_pad, w_oihw, gamma, beta, H, W, *, mode, residual=None,
               mxu_dtype=jnp.bfloat16):
    """3x3 conv (padding=1, no bias) + GroupNorm(1, Cout) + epilogue.

    x_pad   : (N, cin_p, L) f32, flat lane-padded layout (see up_forward).
    returns : (N, cout_p, L) f32 in the same padded layout.
    mode    : "gelu" | "none" | "res_gelu" (res_gelu adds `residual` then GELU)
    """
    n, cin_p, L = x_pad.shape
    hw = H * W
    pad_front = _round_up(W + 1, 128)
    assert L == _round_up(pad_front + hw + W + 1, 128)

    cout, cin = w_oihw.shape[0], w_oihw.shape[1]
    assert cin <= cin_p
    cout_p = _round_up(cout, 8)

    # (Cout, Cin, 3, 3) -> zero-pad channels -> (9, cout_p, cin_p), tap-major.
    w = jnp.zeros((cout_p, cin_p, 3, 3), jnp.float32)
    w = w.at[:cout, :cin].set(w_oihw.astype(jnp.float32))
    w_taps = jnp.transpose(w, (2, 3, 0, 1)).reshape(9, cout_p, cin_p)
    w_taps = w_taps.astype(mxu_dtype)

    # GroupNorm affine; padded channels get gamma = beta = 0 so they stay 0.
    g = jnp.zeros((cout_p, 1), jnp.float32).at[:cout, 0].set(
        gamma.astype(jnp.float32))
    b = jnp.zeros((cout_p, 1), jnp.float32).at[:cout, 0].set(
        beta.astype(jnp.float32))

    # Column-edge masks (kill the row-wrap reads of the dx=0 / dx=2 taps).
    col = jnp.arange(hw, dtype=jnp.int32) % W
    masks = jnp.stack([(col != 0), (col != W - 1)], axis=0).astype(jnp.float32)

    kernel = functools.partial(
        _conv_gn_kernel, W=W, hw=hw, pad_front=pad_front,
        n_real=float(cout * hw), mode=mode, mxu_dtype=mxu_dtype, eps=_GN_EPS)

    in_specs = [
        pl.BlockSpec((1, cin_p, L), lambda i: (i, 0, 0)),
        pl.BlockSpec((2, hw), lambda i: (0, 0)),
        pl.BlockSpec((9, cout_p, cin_p), lambda i: (0, 0, 0)),
        pl.BlockSpec((cout_p, 1), lambda i: (0, 0)),
        pl.BlockSpec((cout_p, 1), lambda i: (0, 0)),
    ]
    args = [x_pad, masks, w_taps, g, b]
    if mode == "res_gelu":
        assert residual is not None and residual.shape == (n, cout_p, L)
        in_specs.append(pl.BlockSpec((1, cout_p, L), lambda i: (i, 0, 0)))
        args.append(residual)

    # Explicit VMEM budget: double-buffered blocks + in-kernel temporaries,
    # with headroom, capped below the v7x 64 MiB physical VMEM.
    mxu_bytes = jnp.dtype(mxu_dtype).itemsize
    block_bytes = 2 * (cin_p * L * 4 + cout_p * L * 4 + 2 * hw * 4
                       + 9 * cout_p * cin_p * mxu_bytes + 2 * cout_p * 4)
    if mode == "res_gelu":
        block_bytes += 2 * cout_p * L * 4
    temp_bytes = cin_p * hw * (4 + mxu_bytes) + 4 * cout_p * hw * 4
    vmem_limit = int(min(48 * 2**20, max(16 * 2**20, 2 * (block_bytes + temp_bytes))))

    cost = pl.CostEstimate(
        flops=2 * n * cout_p * 9 * cin_p * hw,
        transcendentals=(n * cout_p * hw if mode in ("gelu", "res_gelu") else 0),
        bytes_accessed=n * (cin_p * L * 4 + cout_p * L * 4
                            + (cout_p * L * 4 if mode == "res_gelu" else 0))
                       + 9 * cout_p * cin_p * mxu_bytes + 2 * hw * 4,
    )

    return pl.pallas_call(
        kernel,
        out_shape=jax.ShapeDtypeStruct((n, cout_p, L), jnp.float32),
        grid_spec=pltpu.PrefetchScalarGridSpec(
            num_scalar_prefetch=0,
            grid=(n,),
            in_specs=in_specs,
            out_specs=pl.BlockSpec((1, cout_p, L), lambda i: (i, 0, 0)),
        ),
        compiler_params=pltpu.CompilerParams(
            dimension_semantics=("parallel",),
            vmem_limit_bytes=vmem_limit),
        cost_estimate=cost,
    )(*args)


# ------------------------------ plain-JAX glue --------------------------------


def _interp_matrix(size_in, size_out):
    """Static 1-D bilinear (align_corners=True) interpolation matrix."""
    pos = jnp.arange(size_out, dtype=jnp.float32) * (size_in - 1) / (size_out - 1)
    i0 = jnp.floor(pos).astype(jnp.int32)
    i1 = jnp.minimum(i0 + 1, size_in - 1)
    frac = pos - i0.astype(jnp.float32)
    oh0 = jax.nn.one_hot(i0, size_in, dtype=jnp.float32)
    oh1 = jax.nn.one_hot(i1, size_in, dtype=jnp.float32)
    return (1.0 - frac)[:, None] * oh0 + frac[:, None] * oh1   # (out, in)


def upsample_bilinear_x2_align_corners(x):
    """nn.Upsample(scale_factor=2, mode='bilinear', align_corners=True), NCHW.

    Gather-free: two static interpolation-matrix dots (MXU-friendly).
    """
    n, c, h, w = x.shape
    ah = _interp_matrix(h, 2 * h)
    aw = _interp_matrix(w, 2 * w)
    t = jnp.einsum("iy,ncyx->ncix", ah, x.astype(jnp.float32))
    return jnp.einsum("ncyx,jx->ncyj", t, aw)


def init_params(key, c_in, c_out):
    """Deterministic synthetic parameters matching Up(c_in, c_out) shapes."""
    c_mid = c_in // 2
    ks = jax.random.split(key, 8)

    def conv_w(k, co, ci):
        return 0.2 * jax.random.normal(k, (co, ci, 3, 3), jnp.float32)

    def gn_gb(k, c):
        k1, k2 = jax.random.split(k)
        g = 1.0 + 0.1 * jax.random.normal(k1, (c,), jnp.float32)
        b = 0.1 * jax.random.normal(k2, (c,), jnp.float32)
        return g, b

    p = {}
    p["w1a"] = conv_w(ks[0], c_in, c_in)
    p["g1a"], p["b1a"] = gn_gb(ks[1], c_in)
    p["w1b"] = conv_w(ks[2], c_in, c_in)
    p["g1b"], p["b1b"] = gn_gb(ks[3], c_in)
    p["w2a"] = conv_w(ks[4], c_mid, c_in)
    p["g2a"], p["b2a"] = gn_gb(ks[5], c_mid)
    p["w2b"] = conv_w(ks[6], c_out, c_mid)
    p["g2b"], p["b2b"] = gn_gb(ks[7], c_out)
    return p


def up_forward(x_nchw, p, *, mxu_dtype=jnp.bfloat16):
    """Pallas implementation of Up.forward: (N, C_in, H, W) -> (N, C_out, 2H, 2W)."""
    n, c, h0, w0 = x_nchw.shape
    H, W = 2 * h0, 2 * w0
    hw = H * W
    pad_front = _round_up(W + 1, 128)
    L = _round_up(pad_front + hw + W + 1, 128)
    cin_p = _round_up(c, 8)

    # Upsample, then build the flat lane-padded, channel-padded layout ONCE.
    xu = upsample_bilinear_x2_align_corners(x_nchw)            # (N, C, 2H, 2W)
    xu_pad = jnp.pad(xu.reshape(n, c, hw),
                     ((0, 0), (0, cin_p - c), (pad_front, L - pad_front - hw)))

    # DoubleConv(in, in, residual=True): gelu(x + GN(conv(GELU(GN(conv(x))))))
    h1 = conv3x3_gn(xu_pad, p["w1a"], p["g1a"], p["b1a"], H, W,
                    mode="gelu", mxu_dtype=mxu_dtype)
    y = conv3x3_gn(h1, p["w1b"], p["g1b"], p["b1b"], H, W,
                   mode="res_gelu", residual=xu_pad, mxu_dtype=mxu_dtype)

    # DoubleConv(in, out, mid=in//2)
    h2 = conv3x3_gn(y, p["w2a"], p["g2a"], p["b2a"], H, W,
                    mode="gelu", mxu_dtype=mxu_dtype)
    out_pad = conv3x3_gn(h2, p["w2b"], p["g2b"], p["b2b"], H, W,
                         mode="none", mxu_dtype=mxu_dtype)

    c_out = p["w2b"].shape[0]
    out = out_pad[:, :c_out, pad_front:pad_front + hw]
    return out.reshape(n, c_out, H, W)


# ------------------------------ pure-JAX reference ----------------------------


def _ref_upsample(x):
    # Gather-based bilinear upsample — independent check of the matmul path.
    n, c, h, w = x.shape
    ho, wo = 2 * h, 2 * w
    ys = jnp.arange(ho, dtype=jnp.float32) * (h - 1) / (ho - 1)
    xs = jnp.arange(wo, dtype=jnp.float32) * (w - 1) / (wo - 1)
    y0 = jnp.floor(ys).astype(jnp.int32)
    y1 = jnp.minimum(y0 + 1, h - 1)
    wy = (ys - y0.astype(jnp.float32))[None, None, :, None]
    x0 = jnp.floor(xs).astype(jnp.int32)
    x1 = jnp.minimum(x0 + 1, w - 1)
    wx = (xs - x0.astype(jnp.float32))[None, None, None, :]
    g00 = x[:, :, y0[:, None], x0[None, :]]
    g01 = x[:, :, y0[:, None], x1[None, :]]
    g10 = x[:, :, y1[:, None], x0[None, :]]
    g11 = x[:, :, y1[:, None], x1[None, :]]
    top = g00 * (1.0 - wx) + g01 * wx
    bot = g10 * (1.0 - wx) + g11 * wx
    return top * (1.0 - wy) + bot * wy


def _ref_conv_gn(x, w, g, b, apply_gelu):
    y = jax.lax.conv_general_dilated(
        x, w, (1, 1), ((1, 1), (1, 1)),
        dimension_numbers=("NCHW", "OIHW", "NCHW"),
    )
    mean = jnp.mean(y, axis=(1, 2, 3), keepdims=True)
    var = jnp.mean((y - mean) ** 2, axis=(1, 2, 3), keepdims=True)
    y = (y - mean) * jax.lax.rsqrt(var + _GN_EPS)
    y = y * g[None, :, None, None] + b[None, :, None, None]
    return jax.nn.gelu(y, approximate=False) if apply_gelu else y


def up_forward_ref(x, p):
    xu = _ref_upsample(x)
    h = _ref_conv_gn(xu, p["w1a"], p["g1a"], p["b1a"], True)
    h = _ref_conv_gn(h, p["w1b"], p["g1b"], p["b1b"], False)
    y = jax.nn.gelu(xu + h, approximate=False)
    h = _ref_conv_gn(y, p["w2a"], p["g2a"], p["b2a"], True)
    return _ref_conv_gn(h, p["w2b"], p["g2b"], p["b2b"], False)


# ------------------------------------ main ------------------------------------

if __name__ == "__main__":
    C_IN, C_OUT = 4, 8
    key = jax.random.PRNGKey(0)
    kx, kp = jax.random.split(key)
    x = jax.random.normal(kx, (2, C_IN, 16, 16), jnp.float32)
    params = init_params(kp, C_IN, C_OUT)

    up_fast = jax.jit(functools.partial(up_forward, mxu_dtype=jnp.bfloat16))
    up_exact = jax.jit(functools.partial(up_forward, mxu_dtype=jnp.float32))

    out = jax.block_until_ready(up_fast(x, params))
    assert out.shape == (2, C_OUT, 32, 32), out.shape

    ref = jax.block_until_ready(up_forward_ref(x, params))

    # f32-operand path: tight structural check of the kernel (taps, edge masks,
    # GroupNorm, fused residual, padded layout).
    out_exact = jax.block_until_ready(up_exact(x, params))
    err_exact = float(jnp.max(jnp.abs(out_exact - ref)))
    assert err_exact < 1e-3, f"f32-operand mismatch vs reference: {err_exact}"

    # bf16-MXU-operand path (the performance configuration): allow the bf16
    # operand-rounding noise floor accumulated across four conv stages.
    err_fast = float(jnp.max(jnp.abs(out - ref)))
    rel_fast = float(jnp.linalg.norm(out - ref) / jnp.linalg.norm(ref))
    assert err_fast < 1e-1 and rel_fast < 1e-2, (
        f"bf16-operand mismatch vs reference: max={err_fast} rel={rel_fast}")

    print("KERNEL_OK")
</pallas_src>

<mosaic_0001>
module attributes {stable_mosaic.version = 11 : i64} {
  func.func @_conv_gn_kernel(%arg0: i32, %arg1: memref<1x8x1280xf32, #tpu.memory_space<vmem>>, %arg2: memref<2x1024xf32, #tpu.memory_space<vmem>>, %arg3: memref<9x8x8xbf16, #tpu.memory_space<vmem>>, %arg4: memref<8x1xf32, #tpu.memory_space<vmem>>, %arg5: memref<8x1xf32, #tpu.memory_space<vmem>>, %arg6: memref<1x8x1280xf32, #tpu.memory_space<vmem>>, %arg7: memref<1x8x1280xf32, #tpu.memory_space<vmem>>) attributes {dimension_semantics = [#tpu.dimension_semantics<parallel>], iteration_bounds = array<i64: 2>, scalar_prefetch = 0 : i64, scratch_operands = 0 : i64, tpu.core_type = #tpu.core_type<tc>, window_params = [{transform_indices = @transform_0, window_bounds = array<i64: 1, 8, 1280>}, {pipeline_mode = #tpu.pipeline_mode<synchronous>, transform_indices = @transform_1, window_bounds = array<i64: 2, 1024>}, {pipeline_mode = #tpu.pipeline_mode<synchronous>, transform_indices = @transform_2, window_bounds = array<i64: 9, 8, 8>}, {pipeline_mode = #tpu.pipeline_mode<synchronous>, transform_indices = @transform_3, window_bounds = array<i64: 8, 1>}, {pipeline_mode = #tpu.pipeline_mode<synchronous>, transform_indices = @transform_4, window_bounds = array<i64: 8, 1>}, {transform_indices = @transform_5, window_bounds = array<i64: 1, 8, 1280>}, {transform_indices = @transform_6, window_bounds = array<i64: 1, 8, 1280>}]} {
    %c0 = arith.constant 0 : index
    %c0_0 = arith.constant 0 : index
    %c0_1 = arith.constant 0 : index
    %0 = vector.load %arg1[%c0, %c0_0, %c0_1] : memref<1x8x1280xf32, #tpu.memory_space<vmem>>, vector<1x8x1280xf32>
    %1 = vector.shape_cast %0 : vector<1x8x1280xf32> to vector<8x1280xf32>
    %c0_2 = arith.constant 0 : index
    %c0_3 = arith.constant 0 : index
    %2 = vector.load %arg2[%c0_2, %c0_3] : memref<2x1024xf32, #tpu.memory_space<vmem>>, vector<2x1024xf32>
    %3 = vector.extract_strided_slice %2 {offsets = [0, 0], sizes = [1, 1024], strides = [1, 1]} : vector<2x1024xf32> to vector<1x1024xf32>
    %4 = vector.extract_strided_slice %2 {offsets = [1, 0], sizes = [1, 1024], strides = [1, 1]} : vector<2x1024xf32> to vector<1x1024xf32>
    %5 = vector.extract_strided_slice %1 {offsets = [0, 95], sizes = [8, 1024], strides = [1, 1]} : vector<8x1280xf32> to vector<8x1024xf32>
    %6 = arith.truncf %5 : vector<8x1024xf32> to vector<8x1024xbf16>
    %c0_4 = arith.constant 0 : index
    %c0_5 = arith.constant 0 : index
    %c0_6 = arith.constant 0 : index
    %7 = vector.load %arg3[%c0_4, %c0_5, %c0_6] : memref<9x8x8xbf16, #tpu.memory_space<vmem>>, vector<1x8x8xbf16>
    %8 = vector.shape_cast %7 : vector<1x8x8xbf16> to vector<8x8xbf16>
    %cst = arith.constant dense<0.000000e+00> : vector<8x1024xf32>
    %9 = tpu.matmul %8, %6, %cst {dimension_numbers = #tpu.dot_dimension_numbers<[1], [0], [0], [1], [0, 0, 1, 1], [], []>} : vector<8x8xbf16>, vector<8x1024xbf16>, vector<8x1024xf32> -> vector<8x1024xf32>
    %10 = vector.broadcast %3 : vector<1x1024xf32> to vector<8x1024xf32>
    %11 = arith.mulf %9, %10 : vector<8x1024xf32>
    %12 = vector.extract_strided_slice %1 {offsets = [0, 96], sizes = [8, 1024], strides = [1, 1]} : vector<8x1280xf32> to vector<8x1024xf32>
    %13 = arith.truncf %12 : vector<8x1024xf32> to vector<8x1024xbf16>
    %c1 = arith.constant 1 : index
    %c0_7 = arith.constant 0 : index
    %c0_8 = arith.constant 0 : index
    %14 = vector.load %arg3[%c1, %c0_7, %c0_8] : memref<9x8x8xbf16, #tpu.memory_space<vmem>>, vector<1x8x8xbf16>
    %15 = vector.shape_cast %14 : vector<1x8x8xbf16> to vector<8x8xbf16>
    %cst_9 = arith.constant dense<0.000000e+00> : vector<8x1024xf32>
    %16 = tpu.matmul %15, %13, %cst_9 {dimension_numbers = #tpu.dot_dimension_numbers<[1], [0], [0], [1], [0, 0, 1, 1], [], []>} : vector<8x8xbf16>, vector<8x1024xbf16>, vector<8x1024xf32> -> vector<8x1024xf32>
    %17 = arith.addf %11, %16 : vector<8x1024xf32>
    %18 = vector.extract_strided_slice %1 {offsets = [0, 97], sizes = [8, 1024], strides = [1, 1]} : vector<8x1280xf32> to vector<8x1024xf32>
    %19 = arith.truncf %18 : vector<8x1024xf32> to vector<8x1024xbf16>
    %c2 = arith.constant 2 : index
    %c0_10 = arith.constant 0 : index
    %c0_11 = arith.constant 0 : index
    %20 = vector.load %arg3[%c2, %c0_10, %c0_11] : memref<9x8x8xbf16, #tpu.memory_space<vmem>>, vector<1x8x8xbf16>
    %21 = vector.shape_cast %20 : vector<1x8x8xbf16> to vector<8x8xbf16>
    %cst_12 = arith.constant dense<0.000000e+00> : vector<8x1024xf32>
    %22 = tpu.matmul %21, %19, %cst_12 {dimension_numbers = #tpu.dot_dimension_numbers<[1], [0], [0], [1], [0, 0, 1, 1], [], []>} : vector<8x8xbf16>, vector<8x1024xbf16>, vector<8x1024xf32> -> vector<8x1024xf32>
    %23 = vector.broadcast %4 : vector<1x1024xf32> to vector<8x1024xf32>
    %24 = arith.mulf %22, %23 : vector<8x1024xf32>
    %25 = arith.addf %17, %24 : vector<8x1024xf32>
    %26 = vector.extract_strided_slice %1 {offsets = [0, 127], sizes = [8, 1024], strides = [1, 1]} : vector<8x1280xf32> to vector<8x1024xf32>
    %27 = arith.truncf %26 : vector<8x1024xf32> to vector<8x1024xbf16>
    %c3 = arith.constant 3 : index
    %c0_13 = arith.constant 0 : index
    %c0_14 = arith.constant 0 : index
    %28 = vector.load %arg3[%c3, %c0_13, %c0_14] : memref<9x8x8xbf16, #tpu.memory_space<vmem>>, vector<1x8x8xbf16>
    %29 = vector.shape_cast %28 : vector<1x8x8xbf16> to vector<8x8xbf16>
    %cst_15 = arith.constant dense<0.000000e+00> : vector<8x1024xf32>
    %30 = tpu.matmul %29, %27, %cst_15 {dimension_numbers = #tpu.dot_dimension_numbers<[1], [0], [0], [1], [0, 0, 1, 1], [], []>} : vector<8x8xbf16>, vector<8x1024xbf16>, vector<8x1024xf32> -> vector<8x1024xf32>
    %31 = vector.broadcast %3 : vector<1x1024xf32> to vector<8x1024xf32>
    %32 = arith.mulf %30, %31 : vector<8x1024xf32>
    %33 = arith.addf %25, %32 : vector<8x1024xf32>
    %34 = vector.extract_strided_slice %1 {offsets = [0, 128], sizes = [8, 1024], strides = [1, 1]} : vector<8x1280xf32> to vector<8x1024xf32>
    %35 = arith.truncf %34 : vector<8x1024xf32> to vector<8x1024xbf16>
    %c4 = arith.constant 4 : index
    %c0_16 = arith.constant 0 : index
    %c0_17 = arith.constant 0 : index
    %36 = vector.load %arg3[%c4, %c0_16, %c0_17] : memref<9x8x8xbf16, #tpu.memory_space<vmem>>, vector<1x8x8xbf16>
    %37 = vector.shape_cast %36 : vector<1x8x8xbf16> to vector<8x8xbf16>
    %cst_18 = arith.constant dense<0.000000e+00> : vector<8x1024xf32>
    %38 = tpu.matmul %37, %35, %cst_18 {dimension_numbers = #tpu.dot_dimension_numbers<[1], [0], [0], [1], [0, 0, 1, 1], [], []>} : vector<8x8xbf16>, vector<8x1024xbf16>, vector<8x1024xf32> -> vector<8x1024xf32>
    %39 = arith.addf %33, %38 : vector<8x1024xf32>
    %40 = vector.extract_strided_slice %1 {offsets = [0, 129], sizes = [8, 1024], strides = [1, 1]} : vector<8x1280xf32> to vector<8x1024xf32>
    %41 = arith.truncf %40 : vector<8x1024xf32> to vector<8x1024xbf16>
    %c5 = arith.constant 5 : index
    %c0_19 = arith.constant 0 : index
    %c0_20 = arith.constant 0 : index
    %42 = vector.load %arg3[%c5, %c0_19, %c0_20] : memref<9x8x8xbf16, #tpu.memory_space<vmem>>, vector<1x8x8xbf16>
    %43 = vector.shape_cast %42 : vector<1x8x8xbf16> to vector<8x8xbf16>
    %cst_21 = arith.constant dense<0.000000e+00> : vector<8x1024xf32>
    %44 = tpu.matmul %43, %41, %cst_21 {dimension_numbers = #tpu.dot_dimension_numbers<[1], [0], [0], [1], [0, 0, 1, 1], [], []>} : vector<8x8xbf16>, vector<8x1024xbf16>, vector<8x1024xf32> -> vector<8x1024xf32>
    %45 = vector.broadcast %4 : vector<1x1024xf32> to vector<8x1024xf32>
    %46 = arith.mulf %44, %45 : vector<8x1024xf32>
    %47 = arith.addf %39, %46 : vector<8x1024xf32>
    %48 = vector.extract_strided_slice %1 {offsets = [0, 159], sizes = [8, 1024], strides = [1, 1]} : vector<8x1280xf32> to vector<8x1024xf32>
    %49 = arith.truncf %48 : vector<8x1024xf32> to vector<8x1024xbf16>
    %c6 = arith.constant 6 : index
    %c0_22 = arith.constant 0 : index
    %c0_23 = arith.constant 0 : index
    %50 = vector.load %arg3[%c6, %c0_22, %c0_23] : memref<9x8x8xbf16, #tpu.memory_space<vmem>>, vector<1x8x8xbf16>
    %51 = vector.shape_cast %50 : vector<1x8x8xbf16> to vector<8x8xbf16>
    %cst_24 = arith.constant dense<0.000000e+00> : vector<8x1024xf32>
    %52 = tpu.matmul %51, %49, %cst_24 {dimension_numbers = #tpu.dot_dimension_numbers<[1], [0], [0], [1], [0, 0, 1, 1], [], []>} : vector<8x8xbf16>, vector<8x1024xbf16>, vector<8x1024xf32> -> vector<8x1024xf32>
    %53 = vector.broadcast %3 : vector<1x1024xf32> to vector<8x1024xf32>
    %54 = arith.mulf %52, %53 : vector<8x1024xf32>
    %55 = arith.addf %47, %54 : vector<8x1024xf32>
    %56 = vector.extract_strided_slice %1 {offsets = [0, 160], sizes = [8, 1024], strides = [1, 1]} : vector<8x1280xf32> to vector<8x1024xf32>
    %57 = arith.truncf %56 : vector<8x1024xf32> to vector<8x1024xbf16>
    %c7 = arith.constant 7 : index
    %c0_25 = arith.constant 0 : index
    %c0_26 = arith.constant 0 : index
    %58 = vector.load %arg3[%c7, %c0_25, %c0_26] : memref<9x8x8xbf16, #tpu.memory_space<vmem>>, vector<1x8x8xbf16>
    %59 = vector.shape_cast %58 : vector<1x8x8xbf16> to vector<8x8xbf16>
    %cst_27 = arith.constant dense<0.000000e+00> : vector<8x1024xf32>
    %60 = tpu.matmul %59, %57, %cst_27 {dimension_numbers = #tpu.dot_dimension_numbers<[1], [0], [0], [1], [0, 0, 1, 1], [], []>} : vector<8x8xbf16>, vector<8x1024xbf16>, vector<8x1024xf32> -> vector<8x1024xf32>
    %61 = arith.addf %55, %60 : vector<8x1024xf32>
    %62 = vector.extract_strided_slice %1 {offsets = [0, 161], sizes = [8, 1024], strides = [1, 1]} : vector<8x1280xf32> to vector<8x1024xf32>
    %63 = arith.truncf %62 : vector<8x1024xf32> to vector<8x1024xbf16>
    %c8 = arith.constant 8 : index
    %c0_28 = arith.constant 0 : index
    %c0_29 = arith.constant 0 : index
    %64 = vector.load %arg3[%c8, %c0_28, %c0_29] : memref<9x8x8xbf16, #tpu.memory_space<vmem>>, vector<1x8x8xbf16>
    %65 = vector.shape_cast %64 : vector<1x8x8xbf16> to vector<8x8xbf16>
    %cst_30 = arith.constant dense<0.000000e+00> : vector<8x1024xf32>
    %66 = tpu.matmul %65, %63, %cst_30 {dimension_numbers = #tpu.dot_dimension_numbers<[1], [0], [0], [1], [0, 0, 1, 1], [], []>} : vector<8x8xbf16>, vector<8x1024xbf16>, vector<8x1024xf32> -> vector<8x1024xf32>
    %67 = vector.broadcast %4 : vector<1x1024xf32> to vector<8x1024xf32>
    %68 = arith.mulf %66, %67 : vector<8x1024xf32>
    %69 = arith.addf %61, %68 : vector<8x1024xf32>
    %70 = vector.shape_cast %69 : vector<8x1024xf32> to vector<1x8x1024xf32>
    %cst_31 = arith.constant dense<0.000000e+00> : vector<1xf32>
    %71 = vector.multi_reduction <add>, %70, %cst_31 [1, 2] : vector<1x8x1024xf32> to vector<1xf32>
    %72 = vector.shape_cast %71 : vector<1xf32> to vector<1x1x1xf32>
    %73 = vector.extract %72[0, 0, 0] : f32 from vector<1x1x1xf32>
    %74 = arith.mulf %69, %69 : vector<8x1024xf32>
    %75 = vector.shape_cast %74 : vector<8x1024xf32> to vector<1x8x1024xf32>
    %cst_32 = arith.constant dense<0.000000e+00> : vector<1xf32>
    %76 = vector.multi_reduction <add>, %75, %cst_32 [1, 2] : vector<1x8x1024xf32> to vector<1xf32>
    %77 = vector.shape_cast %76 : vector<1xf32> to vector<1x1x1xf32>
    %78 = vector.extract %77[0, 0, 0] : f32 from vector<1x1x1xf32>
    %cst_33 = arith.constant 4.096000e+03 : f32
    %79 = arith.divf %73, %cst_33 : f32
    %cst_34 = arith.constant 4.096000e+03 : f32
    %80 = arith.divf %78, %cst_34 : f32
    %81 = arith.mulf %79, %79 : f32
    %82 = arith.subf %80, %81 : f32
    %cst_35 = arith.constant 0.000000e+00 : f32
    %83 = arith.maximumf %82, %cst_35 : f32
    %c0_36 = arith.constant 0 : index
    %c0_37 = arith.constant 0 : index
    %84 = vector.load %arg4[%c0_36, %c0_37] : memref<8x1xf32, #tpu.memory_space<vmem>>, vector<8x1xf32>
    %cst_38 = arith.constant 9.99999974E-6 : f32
    %85 = arith.addf %83, %cst_38 : f32
    %86 = math.rsqrt %85 : f32
    %87 = vector.broadcast %86 : f32 to vector<8x1xf32>
    %88 = arith.mulf %84, %87 : vector<8x1xf32>
    %c0_39 = arith.constant 0 : index
    %c0_40 = arith.constant 0 : index
    %89 = vector.load %arg5[%c0_39, %c0_40] : memref<8x1xf32, #tpu.memory_space<vmem>>, vector<8x1xf32>
    %90 = vector.broadcast %79 : f32 to vector<8x1xf32>
    %91 = arith.mulf %90, %88 : vector<8x1xf32>
    %92 = arith.subf %89, %91 : vector<8x1xf32>
    %93 = vector.broadcast %88 : vector<8x1xf32> to vector<8x1024xf32>
    %94 = arith.mulf %69, %93 : vector<8x1024xf32>
    %95 = vector.broadcast %92 : vector<8x1xf32> to vector<8x1024xf32>
    %96 = arith.addf %94, %95 : vector<8x1024xf32>
    %c0_41 = arith.constant 0 : index
    %c0_42 = arith.constant 0 : index
    %c128 = arith.constant 128 : index
    %97 = vector.load %arg6[%c0_41, %c0_42, %c128] : memref<1x8x1280xf32, #tpu.memory_space<vmem>>, vector<1x8x1024xf32>
    %98 = vector.shape_cast %97 : vector<1x8x1024xf32> to vector<8x1024xf32>
    %99 = arith.addf %96, %98 : vector<8x1024xf32>
    %cst_43 = arith.constant 5.000000e-01 : f32
    %100 = vector.broadcast %cst_43 : f32 to vector<8x1024xf32>
    %101 = arith.mulf %100, %99 : vector<8x1024xf32>
    %cst_44 = arith.constant 0.707106769 : f32
    %102 = vector.broadcast %cst_44 : f32 to vector<8x1024xf32>
    %103 = arith.mulf %99, %102 : vector<8x1024xf32>
    %104 = math.erf %103 : vector<8x1024xf32>
    %cst_45 = arith.constant 1.000000e+00 : f32
    %105 = vector.broadcast %cst_45 : f32 to vector<8x1024xf32>
    %106 = arith.addf %105, %104 : vector<8x1024xf32>
    %107 = arith.mulf %101, %106 : vector<8x1024xf32>
    %cst_46 = arith.constant 0.000000e+00 : f32
    %108 = vector.broadcast %cst_46 : f32 to vector<8x128xf32>
    %c0_47 = arith.constant 0 : index
    %c0_48 = arith.constant 0 : index
    %c0_49 = arith.constant 0 : index
    %109 = vector.load %arg7[%c0_47, %c0_48, %c0_49] : memref<1x8x1280xf32, #tpu.memory_space<vmem>>, vector<1x8x128xf32>
    %110 = vector.shape_cast %109 : vector<1x8x128xf32> to vector<8x128xf32>
    %111 = vector.shape_cast %108 : vector<8x128xf32> to vector<1x8x128xf32>
    tpu.vector_store %arg7[%c0_47, %c0_48, %c0_49], %111 {strides = array<i32>} : memref<1x8x1280xf32, #tpu.memory_space<vmem>>, vector<1x8x128xf32>,
    %c0_50 = arith.constant 0 : index
    %c0_51 = arith.constant 0 : index
    %c128_52 = arith.constant 128 : index
    %112 = vector.load %arg7[%c0_50, %c0_51, %c128_52] : memref<1x8x1280xf32, #tpu.memory_space<vmem>>, vector<1x8x1024xf32>
    %113 = vector.shape_cast %112 : vector<1x8x1024xf32> to vector<8x1024xf32>
    %114 = vector.shape_cast %107 : vector<8x1024xf32> to vector<1x8x1024xf32>
    tpu.vector_store %arg7[%c0_50, %c0_51, %c128_52], %114 {strides = array<i32>} : memref<1x8x1280xf32, #tpu.memory_space<vmem>>, vector<1x8x1024xf32>,
    %cst_53 = arith.constant 0.000000e+00 : f32
    %115 = vector.broadcast %cst_53 : f32 to vector<8x128xf32>
    %c0_54 = arith.constant 0 : index
    %c0_55 = arith.constant 0 : index
    %c1152 = arith.constant 1152 : index
    %116 = vector.load %arg7[%c0_54, %c0_55, %c1152] : memref<1x8x1280xf32, #tpu.memory_space<vmem>>, vector<1x8x128xf32>
    %117 = vector.shape_cast %116 : vector<1x8x128xf32> to vector<8x128xf32>
    %118 = vector.shape_cast %115 : vector<8x128xf32> to vector<1x8x128xf32>
    tpu.vector_store %arg7[%c0_54, %c0_55, %c1152], %118 {strides = array<i32>} : memref<1x8x1280xf32, #tpu.memory_space<vmem>>, vector<1x8x128xf32>,
    return
  }
  func.func @transform_0(%arg0: i32) -> (i32, i32, i32) {
    %c0_i32 = arith.constant 0 : i32
    %c0_i32_0 = arith.constant 0 : i32
    %c0_i32_1 = arith.constant 0 : i32
    return %arg0, %c0_i32, %c0_i32_0 : i32, i32, i32
  }
  func.func @transform_1(%arg0: i32) -> (i32, i32) {
    %c0_i32 = arith.constant 0 : i32
    %c0_i32_0 = arith.constant 0 : i32
    %c0_i32_1 = arith.constant 0 : i32
    return %c0_i32, %c0_i32_0 : i32, i32
  }
  func.func @transform_2(%arg0: i32) -> (i32, i32, i32) {
    %c0_i32 = arith.constant 0 : i32
    %c0_i32_0 = arith.constant 0 : i32
    %c0_i32_1 = arith.constant 0 : i32
    %c0_i32_2 = arith.constant 0 : i32
    return %c0_i32, %c0_i32_0, %c0_i32_1 : i32, i32, i32
  }
  func.func @transform_3(%arg0: i32) -> (i32, i32) {
    %c0_i32 = arith.constant 0 : i32
    %c0_i32_0 = arith.constant 0 : i32
    %c0_i32_1 = arith.constant 0 : i32
    return %c0_i32, %c0_i32_0 : i32, i32
  }
  func.func @transform_4(%arg0: i32) -> (i32, i32) {
    %c0_i32 = arith.constant 0 : i32
    %c0_i32_0 = arith.constant 0 : i32
    %c0_i32_1 = arith.constant 0 : i32
    return %c0_i32, %c0_i32_0 : i32, i32
  }
  func.func @transform_5(%arg0: i32) -> (i32, i32, i32) {
    %c0_i32 = arith.constant 0 : i32
    %c0_i32_0 = arith.constant 0 : i32
    %c0_i32_1 = arith.constant 0 : i32
    return %arg0, %c0_i32, %c0_i32_0 : i32, i32, i32
  }
  func.func @transform_6(%arg0: i32) -> (i32, i32, i32) {
    %c0_i32 = arith.constant 0 : i32
    %c0_i32_0 = arith.constant 0 : i32
    %c0_i32_1 = arith.constant 0 : i32
    return %arg0, %c0_i32, %c0_i32_0 : i32, i32, i32
  }
}

module attributes {stable_mosaic.version = 11 : i64} {
  func.func @_conv_gn_kernel(%arg0: i32, %arg1: memref<1x8x1280xf32, #tpu.memory_space<vmem>>, %arg2: memref<2x1024xf32, #tpu.memory_space<vmem>>, %arg3: memref<9x8x8xbf16, #tpu.memory_space<vmem>>, %arg4: memref<8x1xf32, #tpu.memory_space<vmem>>, %arg5: memref<8x1xf32, #tpu.memory_space<vmem>>, %arg6: memref<1x8x1280xf32, #tpu.memory_space<vmem>>) attributes {dimension_semantics = [#tpu.dimension_semantics<parallel>], iteration_bounds = array<i64: 2>, scalar_prefetch = 0 : i64, scratch_operands = 0 : i64, tpu.core_type = #tpu.core_type<tc>, window_params = [{transform_indices = @transform_0, window_bounds = array<i64: 1, 8, 1280>}, {pipeline_mode = #tpu.pipeline_mode<synchronous>, transform_indices = @transform_1, window_bounds = array<i64: 2, 1024>}, {pipeline_mode = #tpu.pipeline_mode<synchronous>, transform_indices = @transform_2, window_bounds = array<i64: 9, 8, 8>}, {pipeline_mode = #tpu.pipeline_mode<synchronous>, transform_indices = @transform_3, window_bounds = array<i64: 8, 1>}, {pipeline_mode = #tpu.pipeline_mode<synchronous>, transform_indices = @transform_4, window_bounds = array<i64: 8, 1>}, {transform_indices = @transform_5, window_bounds = array<i64: 1, 8, 1280>}]} {
    %c0 = arith.constant 0 : index
    %c0_0 = arith.constant 0 : index
    %c0_1 = arith.constant 0 : index
    %0 = vector.load %arg1[%c0, %c0_0, %c0_1] : memref<1x8x1280xf32, #tpu.memory_space<vmem>>, vector<1x8x1280xf32>
    %1 = vector.shape_cast %0 : vector<1x8x1280xf32> to vector<8x1280xf32>
    %c0_2 = arith.constant 0 : index
    %c0_3 = arith.constant 0 : index
    %2 = vector.load %arg2[%c0_2, %c0_3] : memref<2x1024xf32, #tpu.memory_space<vmem>>, vector<2x1024xf32>
    %3 = vector.extract_strided_slice %2 {offsets = [0, 0], sizes = [1, 1024], strides = [1, 1]} : vector<2x1024xf32> to vector<1x1024xf32>
    %4 = vector.extract_strided_slice %2 {offsets = [1, 0], sizes = [1, 1024], strides = [1, 1]} : vector<2x1024xf32> to vector<1x1024xf32>
    %5 = vector.extract_strided_slice %1 {offsets = [0, 95], sizes = [8, 1024], strides = [1, 1]} : vector<8x1280xf32> to vector<8x1024xf32>
    %6 = arith.truncf %5 : vector<8x1024xf32> to vector<8x1024xbf16>
    %c0_4 = arith.constant 0 : index
    %c0_5 = arith.constant 0 : index
    %c0_6 = arith.constant 0 : index
    %7 = vector.load %arg3[%c0_4, %c0_5, %c0_6] : memref<9x8x8xbf16, #tpu.memory_space<vmem>>, vector<1x8x8xbf16>
    %8 = vector.shape_cast %7 : vector<1x8x8xbf16> to vector<8x8xbf16>
    %cst = arith.constant dense<0.000000e+00> : vector<8x1024xf32>
    %9 = tpu.matmul %8, %6, %cst {dimension_numbers = #tpu.dot_dimension_numbers<[1], [0], [0], [1], [0, 0, 1, 1], [], []>} : vector<8x8xbf16>, vector<8x1024xbf16>, vector<8x1024xf32> -> vector<8x1024xf32>
    %10 = vector.broadcast %3 : vector<1x1024xf32> to vector<8x1024xf32>
    %11 = arith.mulf %9, %10 : vector<8x1024xf32>
    %12 = vector.extract_strided_slice %1 {offsets = [0, 96], sizes = [8, 1024], strides = [1, 1]} : vector<8x1280xf32> to vector<8x1024xf32>
    %13 = arith.truncf %12 : vector<8x1024xf32> to vector<8x1024xbf16>
    %c1 = arith.constant 1 : index
    %c0_7 = arith.constant 0 : index
    %c0_8 = arith.constant 0 : index
    %14 = vector.load %arg3[%c1, %c0_7, %c0_8] : memref<9x8x8xbf16, #tpu.memory_space<vmem>>, vector<1x8x8xbf16>
    %15 = vector.shape_cast %14 : vector<1x8x8xbf16> to vector<8x8xbf16>
    %cst_9 = arith.constant dense<0.000000e+00> : vector<8x1024xf32>
    %16 = tpu.matmul %15, %13, %cst_9 {dimension_numbers = #tpu.dot_dimension_numbers<[1], [0], [0], [1], [0, 0, 1, 1], [], []>} : vector<8x8xbf16>, vector<8x1024xbf16>, vector<8x1024xf32> -> vector<8x1024xf32>
    %17 = arith.addf %11, %16 : vector<8x1024xf32>
    %18 = vector.extract_strided_slice %1 {offsets = [0, 97], sizes = [8, 1024], strides = [1, 1]} : vector<8x1280xf32> to vector<8x1024xf32>
    %19 = arith.truncf %18 : vector<8x1024xf32> to vector<8x1024xbf16>
    %c2 = arith.constant 2 : index
    %c0_10 = arith.constant 0 : index
    %c0_11 = arith.constant 0 : index
    %20 = vector.load %arg3[%c2, %c0_10, %c0_11] : memref<9x8x8xbf16, #tpu.memory_space<vmem>>, vector<1x8x8xbf16>
    %21 = vector.shape_cast %20 : vector<1x8x8xbf16> to vector<8x8xbf16>
    %cst_12 = arith.constant dense<0.000000e+00> : vector<8x1024xf32>
    %22 = tpu.matmul %21, %19, %cst_12 {dimension_numbers = #tpu.dot_dimension_numbers<[1], [0], [0], [1], [0, 0, 1, 1], [], []>} : vector<8x8xbf16>, vector<8x1024xbf16>, vector<8x1024xf32> -> vector<8x1024xf32>
    %23 = vector.broadcast %4 : vector<1x1024xf32> to vector<8x1024xf32>
    %24 = arith.mulf %22, %23 : vector<8x1024xf32>
    %25 = arith.addf %17, %24 : vector<8x1024xf32>
    %26 = vector.extract_strided_slice %1 {offsets = [0, 127], sizes = [8, 1024], strides = [1, 1]} : vector<8x1280xf32> to vector<8x1024xf32>
    %27 = arith.truncf %26 : vector<8x1024xf32> to vector<8x1024xbf16>
    %c3 = arith.constant 3 : index
    %c0_13 = arith.constant 0 : index
    %c0_14 = arith.constant 0 : index
    %28 = vector.load %arg3[%c3, %c0_13, %c0_14] : memref<9x8x8xbf16, #tpu.memory_space<vmem>>, vector<1x8x8xbf16>
    %29 = vector.shape_cast %28 : vector<1x8x8xbf16> to vector<8x8xbf16>
    %cst_15 = arith.constant dense<0.000000e+00> : vector<8x1024xf32>
    %30 = tpu.matmul %29, %27, %cst_15 {dimension_numbers = #tpu.dot_dimension_numbers<[1], [0], [0], [1], [0, 0, 1, 1], [], []>} : vector<8x8xbf16>, vector<8x1024xbf16>, vector<8x1024xf32> -> vector<8x1024xf32>
    %31 = vector.broadcast %3 : vector<1x1024xf32> to vector<8x1024xf32>
    %32 = arith.mulf %30, %31 : vector<8x1024xf32>
    %33 = arith.addf %25, %32 : vector<8x1024xf32>
    %34 = vector.extract_strided_slice %1 {offsets = [0, 128], sizes = [8, 1024], strides = [1, 1]} : vector<8x1280xf32> to vector<8x1024xf32>
    %35 = arith.truncf %34 : vector<8x1024xf32> to vector<8x1024xbf16>
    %c4 = arith.constant 4 : index
    %c0_16 = arith.constant 0 : index
    %c0_17 = arith.constant 0 : index
    %36 = vector.load %arg3[%c4, %c0_16, %c0_17] : memref<9x8x8xbf16, #tpu.memory_space<vmem>>, vector<1x8x8xbf16>
    %37 = vector.shape_cast %36 : vector<1x8x8xbf16> to vector<8x8xbf16>
    %cst_18 = arith.constant dense<0.000000e+00> : vector<8x1024xf32>
    %38 = tpu.matmul %37, %35, %cst_18 {dimension_numbers = #tpu.dot_dimension_numbers<[1], [0], [0], [1], [0, 0, 1, 1], [], []>} : vector<8x8xbf16>, vector<8x1024xbf16>, vector<8x1024xf32> -> vector<8x1024xf32>
    %39 = arith.addf %33, %38 : vector<8x1024xf32>
    %40 = vector.extract_strided_slice %1 {offsets = [0, 129], sizes = [8, 1024], strides = [1, 1]} : vector<8x1280xf32> to vector<8x1024xf32>
    %41 = arith.truncf %40 : vector<8x1024xf32> to vector<8x1024xbf16>
    %c5 = arith.constant 5 : index
    %c0_19 = arith.constant 0 : index
    %c0_20 = arith.constant 0 : index
    %42 = vector.load %arg3[%c5, %c0_19, %c0_20] : memref<9x8x8xbf16, #tpu.memory_space<vmem>>, vector<1x8x8xbf16>
    %43 = vector.shape_cast %42 : vector<1x8x8xbf16> to vector<8x8xbf16>
    %cst_21 = arith.constant dense<0.000000e+00> : vector<8x1024xf32>
    %44 = tpu.matmul %43, %41, %cst_21 {dimension_numbers = #tpu.dot_dimension_numbers<[1], [0], [0], [1], [0, 0, 1, 1], [], []>} : vector<8x8xbf16>, vector<8x1024xbf16>, vector<8x1024xf32> -> vector<8x1024xf32>
    %45 = vector.broadcast %4 : vector<1x1024xf32> to vector<8x1024xf32>
    %46 = arith.mulf %44, %45 : vector<8x1024xf32>
    %47 = arith.addf %39, %46 : vector<8x1024xf32>
    %48 = vector.extract_strided_slice %1 {offsets = [0, 159], sizes = [8, 1024], strides = [1, 1]} : vector<8x1280xf32> to vector<8x1024xf32>
    %49 = arith.truncf %48 : vector<8x1024xf32> to vector<8x1024xbf16>
    %c6 = arith.constant 6 : index
    %c0_22 = arith.constant 0 : index
    %c0_23 = arith.constant 0 : index
    %50 = vector.load %arg3[%c6, %c0_22, %c0_23] : memref<9x8x8xbf16, #tpu.memory_space<vmem>>, vector<1x8x8xbf16>
    %51 = vector.shape_cast %50 : vector<1x8x8xbf16> to vector<8x8xbf16>
    %cst_24 = arith.constant dense<0.000000e+00> : vector<8x1024xf32>
    %52 = tpu.matmul %51, %49, %cst_24 {dimension_numbers = #tpu.dot_dimension_numbers<[1], [0], [0], [1], [0, 0, 1, 1], [], []>} : vector<8x8xbf16>, vector<8x1024xbf16>, vector<8x1024xf32> -> vector<8x1024xf32>
    %53 = vector.broadcast %3 : vector<1x1024xf32> to vector<8x1024xf32>
    %54 = arith.mulf %52, %53 : vector<8x1024xf32>
    %55 = arith.addf %47, %54 : vector<8x1024xf32>
    %56 = vector.extract_strided_slice %1 {offsets = [0, 160], sizes = [8, 1024], strides = [1, 1]} : vector<8x1280xf32> to vector<8x1024xf32>
    %57 = arith.truncf %56 : vector<8x1024xf32> to vector<8x1024xbf16>
    %c7 = arith.constant 7 : index
    %c0_25 = arith.constant 0 : index
    %c0_26 = arith.constant 0 : index
    %58 = vector.load %arg3[%c7, %c0_25, %c0_26] : memref<9x8x8xbf16, #tpu.memory_space<vmem>>, vector<1x8x8xbf16>
    %59 = vector.shape_cast %58 : vector<1x8x8xbf16> to vector<8x8xbf16>
    %cst_27 = arith.constant dense<0.000000e+00> : vector<8x1024xf32>
    %60 = tpu.matmul %59, %57, %cst_27 {dimension_numbers = #tpu.dot_dimension_numbers<[1], [0], [0], [1], [0, 0, 1, 1], [], []>} : vector<8x8xbf16>, vector<8x1024xbf16>, vector<8x1024xf32> -> vector<8x1024xf32>
    %61 = arith.addf %55, %60 : vector<8x1024xf32>
    %62 = vector.extract_strided_slice %1 {offsets = [0, 161], sizes = [8, 1024], strides = [1, 1]} : vector<8x1280xf32> to vector<8x1024xf32>
    %63 = arith.truncf %62 : vector<8x1024xf32> to vector<8x1024xbf16>
    %c8 = arith.constant 8 : index
    %c0_28 = arith.constant 0 : index
    %c0_29 = arith.constant 0 : index
    %64 = vector.load %arg3[%c8, %c0_28, %c0_29] : memref<9x8x8xbf16, #tpu.memory_space<vmem>>, vector<1x8x8xbf16>
    %65 = vector.shape_cast %64 : vector<1x8x8xbf16> to vector<8x8xbf16>
    %cst_30 = arith.constant dense<0.000000e+00> : vector<8x1024xf32>
    %66 = tpu.matmul %65, %63, %cst_30 {dimension_numbers = #tpu.dot_dimension_numbers<[1], [0], [0], [1], [0, 0, 1, 1], [], []>} : vector<8x8xbf16>, vector<8x1024xbf16>, vector<8x1024xf32> -> vector<8x1024xf32>
    %67 = vector.broadcast %4 : vector<1x1024xf32> to vector<8x1024xf32>
    %68 = arith.mulf %66, %67 : vector<8x1024xf32>
    %69 = arith.addf %61, %68 : vector<8x1024xf32>
    %70 = vector.shape_cast %69 : vector<8x1024xf32> to vector<1x8x1024xf32>
    %cst_31 = arith.constant dense<0.000000e+00> : vector<1xf32>
    %71 = vector.multi_reduction <add>, %70, %cst_31 [1, 2] : vector<1x8x1024xf32> to vector<1xf32>
    %72 = vector.shape_cast %71 : vector<1xf32> to vector<1x1x1xf32>
    %73 = vector.extract %72[0, 0, 0] : f32 from vector<1x1x1xf32>
    %74 = arith.mulf %69, %69 : vector<8x1024xf32>
    %75 = vector.shape_cast %74 : vector<8x1024xf32> to vector<1x8x1024xf32>
    %cst_32 = arith.constant dense<0.000000e+00> : vector<1xf32>
    %76 = vector.multi_reduction <add>, %75, %cst_32 [1, 2] : vector<1x8x1024xf32> to vector<1xf32>
    %77 = vector.shape_cast %76 : vector<1xf32> to vector<1x1x1xf32>
    %78 = vector.extract %77[0, 0, 0] : f32 from vector<1x1x1xf32>
    %cst_33 = arith.constant 4.096000e+03 : f32
    %79 = arith.divf %73, %cst_33 : f32
    %cst_34 = arith.constant 4.096000e+03 : f32
    %80 = arith.divf %78, %cst_34 : f32
    %81 = arith.mulf %79, %79 : f32
    %82 = arith.subf %80, %81 : f32
    %cst_35 = arith.constant 0.000000e+00 : f32
    %83 = arith.maximumf %82, %cst_35 : f32
    %c0_36 = arith.constant 0 : index
    %c0_37 = arith.constant 0 : index
    %84 = vector.load %arg4[%c0_36, %c0_37] : memref<8x1xf32, #tpu.memory_space<vmem>>, vector<8x1xf32>
    %cst_38 = arith.constant 9.99999974E-6 : f32
    %85 = arith.addf %83, %cst_38 : f32
    %86 = math.rsqrt %85 : f32
    %87 = vector.broadcast %86 : f32 to vector<8x1xf32>
    %88 = arith.mulf %84, %87 : vector<8x1xf32>
    %c0_39 = arith.constant 0 : index
    %c0_40 = arith.constant 0 : index
    %89 = vector.load %arg5[%c0_39, %c0_40] : memref<8x1xf32, #tpu.memory_space<vmem>>, vector<8x1xf32>
    %90 = vector.broadcast %79 : f32 to vector<8x1xf32>
    %91 = arith.mulf %90, %88 : vector<8x1xf32>
    %92 = arith.subf %89, %91 : vector<8x1xf32>
    %93 = vector.broadcast %88 : vector<8x1xf32> to vector<8x1024xf32>
    %94 = arith.mulf %69, %93 : vector<8x1024xf32>
    %95 = vector.broadcast %92 : vector<8x1xf32> to vector<8x1024xf32>
    %96 = arith.addf %94, %95 : vector<8x1024xf32>
    %cst_41 = arith.constant 5.000000e-01 : f32
    %97 = vector.broadcast %cst_41 : f32 to vector<8x1024xf32>
    %98 = arith.mulf %97, %96 : vector<8x1024xf32>
    %cst_42 = arith.constant 0.707106769 : f32
    %99 = vector.broadcast %cst_42 : f32 to vector<8x1024xf32>
    %100 = arith.mulf %96, %99 : vector<8x1024xf32>
    %101 = math.erf %100 : vector<8x1024xf32>
    %cst_43 = arith.constant 1.000000e+00 : f32
    %102 = vector.broadcast %cst_43 : f32 to vector<8x1024xf32>
    %103 = arith.addf %102, %101 : vector<8x1024xf32>
    %104 = arith.mulf %98, %103 : vector<8x1024xf32>
    %cst_44 = arith.constant 0.000000e+00 : f32
    %105 = vector.broadcast %cst_44 : f32 to vector<8x128xf32>
    %c0_45 = arith.constant 0 : index
    %c0_46 = arith.constant 0 : index
    %c0_47 = arith.constant 0 : index
    %106 = vector.load %arg6[%c0_45, %c0_46, %c0_47] : memref<1x8x1280xf32, #tpu.memory_space<vmem>>, vector<1x8x128xf32>
    %107 = vector.shape_cast %106 : vector<1x8x128xf32> to vector<8x128xf32>
    %108 = vector.shape_cast %105 : vector<8x128xf32> to vector<1x8x128xf32>
    tpu.vector_store %arg6[%c0_45, %c0_46, %c0_47], %108 {strides = array<i32>} : memref<1x8x1280xf32, #tpu.memory_space<vmem>>, vector<1x8x128xf32>,
    %c0_48 = arith.constant 0 : index
    %c0_49 = arith.constant 0 : index
    %c128 = arith.constant 128 : index
    %109 = vector.load %arg6[%c0_48, %c0_49, %c128] : memref<1x8x1280xf32, #tpu.memory_space<vmem>>, vector<1x8x1024xf32>
    %110 = vector.shape_cast %109 : vector<1x8x1024xf32> to vector<8x1024xf32>
    %111 = vector.shape_cast %104 : vector<8x1024xf32> to vector<1x8x1024xf32>
    tpu.vector_store %arg6[%c0_48, %c0_49, %c128], %111 {strides = array<i32>} : memref<1x8x1280xf32, #tpu.memory_space<vmem>>, vector<1x8x1024xf32>,
    %cst_50 = arith.constant 0.000000e+00 : f32
    %112 = vector.broadcast %cst_50 : f32 to vector<8x128xf32>
    %c0_51 = arith.constant 0 : index
    %c0_52 = arith.constant 0 : index
    %c1152 = arith.constant 1152 : index
    %113 = vector.load %arg6[%c0_51, %c0_52, %c1152] : memref<1x8x1280xf32, #tpu.memory_space<vmem>>, vector<1x8x128xf32>
    %114 = vector.shape_cast %113 : vector<1x8x128xf32> to vector<8x128xf32>
    %115 = vector.shape_cast %112 : vector<8x128xf32> to vector<1x8x128xf32>
    tpu.vector_store %arg6[%c0_51, %c0_52, %c1152], %115 {strides = array<i32>} : memref<1x8x1280xf32, #tpu.memory_space<vmem>>, vector<1x8x128xf32>,
    return
  }
  func.func @transform_0(%arg0: i32) -> (i32, i32, i32) {
    %c0_i32 = arith.constant 0 : i32
    %c0_i32_0 = arith.constant 0 : i32
    %c0_i32_1 = arith.constant 0 : i32
    return %arg0, %c0_i32, %c0_i32_0 : i32, i32, i32
  }
  func.func @transform_1(%arg0: i32) -> (i32, i32) {
    %c0_i32 = arith.constant 0 : i32
    %c0_i32_0 = arith.constant 0 : i32
    %c0_i32_1 = arith.constant 0 : i32
    return %c0_i32, %c0_i32_0 : i32, i32
  }
  func.func @transform_2(%arg0: i32) -> (i32, i32, i32) {
    %c0_i32 = arith.constant 0 : i32
    %c0_i32_0 = arith.constant 0 : i32
    %c0_i32_1 = arith.constant 0 : i32
    %c0_i32_2 = arith.constant 0 : i32
    return %c0_i32, %c0_i32_0, %c0_i32_1 : i32, i32, i32
  }
  func.func @transform_3(%arg0: i32) -> (i32, i32) {
    %c0_i32 = arith.constant 0 : i32
    %c0_i32_0 = arith.constant 0 : i32
    %c0_i32_1 = arith.constant 0 : i32
    return %c0_i32, %c0_i32_0 : i32, i32
  }
  func.func @transform_4(%arg0: i32) -> (i32, i32) {
    %c0_i32 = arith.constant 0 : i32
    %c0_i32_0 = arith.constant 0 : i32
    %c0_i32_1 = arith.constant 0 : i32
    return %c0_i32, %c0_i32_0 : i32, i32
  }
  func.func @transform_5(%arg0: i32) -> (i32, i32, i32) {
    %c0_i32 = arith.constant 0 : i32
    %c0_i32_0 = arith.constant 0 : i32
    %c0_i32_1 = arith.constant 0 : i32
    return %arg0, %c0_i32, %c0_i32_0 : i32, i32, i32
  }
}

module attributes {stable_mosaic.version = 11 : i64} {
  func.func @_conv_gn_kernel(%arg0: i32, %arg1: memref<1x8x1280xf32, #tpu.memory_space<vmem>>, %arg2: memref<2x1024xf32, #tpu.memory_space<vmem>>, %arg3: memref<9x8x8xbf16, #tpu.memory_space<vmem>>, %arg4: memref<8x1xf32, #tpu.memory_space<vmem>>, %arg5: memref<8x1xf32, #tpu.memory_space<vmem>>, %arg6: memref<1x8x1280xf32, #tpu.memory_space<vmem>>) attributes {dimension_semantics = [#tpu.dimension_semantics<parallel>], iteration_bounds = array<i64: 2>, scalar_prefetch = 0 : i64, scratch_operands = 0 : i64, tpu.core_type = #tpu.core_type<tc>, window_params = [{transform_indices = @transform_0, window_bounds = array<i64: 1, 8, 1280>}, {pipeline_mode = #tpu.pipeline_mode<synchronous>, transform_indices = @transform_1, window_bounds = array<i64: 2, 1024>}, {pipeline_mode = #tpu.pipeline_mode<synchronous>, transform_indices = @transform_2, window_bounds = array<i64: 9, 8, 8>}, {pipeline_mode = #tpu.pipeline_mode<synchronous>, transform_indices = @transform_3, window_bounds = array<i64: 8, 1>}, {pipeline_mode = #tpu.pipeline_mode<synchronous>, transform_indices = @transform_4, window_bounds = array<i64: 8, 1>}, {transform_indices = @transform_5, window_bounds = array<i64: 1, 8, 1280>}]} {
    %c0 = arith.constant 0 : index
    %c0_0 = arith.constant 0 : index
    %c0_1 = arith.constant 0 : index
    %0 = vector.load %arg1[%c0, %c0_0, %c0_1] : memref<1x8x1280xf32, #tpu.memory_space<vmem>>, vector<1x8x1280xf32>
    %1 = vector.shape_cast %0 : vector<1x8x1280xf32> to vector<8x1280xf32>
    %c0_2 = arith.constant 0 : index
    %c0_3 = arith.constant 0 : index
    %2 = vector.load %arg2[%c0_2, %c0_3] : memref<2x1024xf32, #tpu.memory_space<vmem>>, vector<2x1024xf32>
    %3 = vector.extract_strided_slice %2 {offsets = [0, 0], sizes = [1, 1024], strides = [1, 1]} : vector<2x1024xf32> to vector<1x1024xf32>
    %4 = vector.extract_strided_slice %2 {offsets = [1, 0], sizes = [1, 1024], strides = [1, 1]} : vector<2x1024xf32> to vector<1x1024xf32>
    %5 = vector.extract_strided_slice %1 {offsets = [0, 95], sizes = [8, 1024], strides = [1, 1]} : vector<8x1280xf32> to vector<8x1024xf32>
    %6 = arith.truncf %5 : vector<8x1024xf32> to vector<8x1024xbf16>
    %c0_4 = arith.constant 0 : index
    %c0_5 = arith.constant 0 : index
    %c0_6 = arith.constant 0 : index
    %7 = vector.load %arg3[%c0_4, %c0_5, %c0_6] : memref<9x8x8xbf16, #tpu.memory_space<vmem>>, vector<1x8x8xbf16>
    %8 = vector.shape_cast %7 : vector<1x8x8xbf16> to vector<8x8xbf16>
    %cst = arith.constant dense<0.000000e+00> : vector<8x1024xf32>
    %9 = tpu.matmul %8, %6, %cst {dimension_numbers = #tpu.dot_dimension_numbers<[1], [0], [0], [1], [0, 0, 1, 1], [], []>} : vector<8x8xbf16>, vector<8x1024xbf16>, vector<8x1024xf32> -> vector<8x1024xf32>
    %10 = vector.broadcast %3 : vector<1x1024xf32> to vector<8x1024xf32>
    %11 = arith.mulf %9, %10 : vector<8x1024xf32>
    %12 = vector.extract_strided_slice %1 {offsets = [0, 96], sizes = [8, 1024], strides = [1, 1]} : vector<8x1280xf32> to vector<8x1024xf32>
    %13 = arith.truncf %12 : vector<8x1024xf32> to vector<8x1024xbf16>
    %c1 = arith.constant 1 : index
    %c0_7 = arith.constant 0 : index
    %c0_8 = arith.constant 0 : index
    %14 = vector.load %arg3[%c1, %c0_7, %c0_8] : memref<9x8x8xbf16, #tpu.memory_space<vmem>>, vector<1x8x8xbf16>
    %15 = vector.shape_cast %14 : vector<1x8x8xbf16> to vector<8x8xbf16>
    %cst_9 = arith.constant dense<0.000000e+00> : vector<8x1024xf32>
    %16 = tpu.matmul %15, %13, %cst_9 {dimension_numbers = #tpu.dot_dimension_numbers<[1], [0], [0], [1], [0, 0, 1, 1], [], []>} : vector<8x8xbf16>, vector<8x1024xbf16>, vector<8x1024xf32> -> vector<8x1024xf32>
    %17 = arith.addf %11, %16 : vector<8x1024xf32>
    %18 = vector.extract_strided_slice %1 {offsets = [0, 97], sizes = [8, 1024], strides = [1, 1]} : vector<8x1280xf32> to vector<8x1024xf32>
    %19 = arith.truncf %18 : vector<8x1024xf32> to vector<8x1024xbf16>
    %c2 = arith.constant 2 : index
    %c0_10 = arith.constant 0 : index
    %c0_11 = arith.constant 0 : index
    %20 = vector.load %arg3[%c2, %c0_10, %c0_11] : memref<9x8x8xbf16, #tpu.memory_space<vmem>>, vector<1x8x8xbf16>
    %21 = vector.shape_cast %20 : vector<1x8x8xbf16> to vector<8x8xbf16>
    %cst_12 = arith.constant dense<0.000000e+00> : vector<8x1024xf32>
    %22 = tpu.matmul %21, %19, %cst_12 {dimension_numbers = #tpu.dot_dimension_numbers<[1], [0], [0], [1], [0, 0, 1, 1], [], []>} : vector<8x8xbf16>, vector<8x1024xbf16>, vector<8x1024xf32> -> vector<8x1024xf32>
    %23 = vector.broadcast %4 : vector<1x1024xf32> to vector<8x1024xf32>
    %24 = arith.mulf %22, %23 : vector<8x1024xf32>
    %25 = arith.addf %17, %24 : vector<8x1024xf32>
    %26 = vector.extract_strided_slice %1 {offsets = [0, 127], sizes = [8, 1024], strides = [1, 1]} : vector<8x1280xf32> to vector<8x1024xf32>
    %27 = arith.truncf %26 : vector<8x1024xf32> to vector<8x1024xbf16>
    %c3 = arith.constant 3 : index
    %c0_13 = arith.constant 0 : index
    %c0_14 = arith.constant 0 : index
    %28 = vector.load %arg3[%c3, %c0_13, %c0_14] : memref<9x8x8xbf16, #tpu.memory_space<vmem>>, vector<1x8x8xbf16>
    %29 = vector.shape_cast %28 : vector<1x8x8xbf16> to vector<8x8xbf16>
    %cst_15 = arith.constant dense<0.000000e+00> : vector<8x1024xf32>
    %30 = tpu.matmul %29, %27, %cst_15 {dimension_numbers = #tpu.dot_dimension_numbers<[1], [0], [0], [1], [0, 0, 1, 1], [], []>} : vector<8x8xbf16>, vector<8x1024xbf16>, vector<8x1024xf32> -> vector<8x1024xf32>
    %31 = vector.broadcast %3 : vector<1x1024xf32> to vector<8x1024xf32>
    %32 = arith.mulf %30, %31 : vector<8x1024xf32>
    %33 = arith.addf %25, %32 : vector<8x1024xf32>
    %34 = vector.extract_strided_slice %1 {offsets = [0, 128], sizes = [8, 1024], strides = [1, 1]} : vector<8x1280xf32> to vector<8x1024xf32>
    %35 = arith.truncf %34 : vector<8x1024xf32> to vector<8x1024xbf16>
    %c4 = arith.constant 4 : index
    %c0_16 = arith.constant 0 : index
    %c0_17 = arith.constant 0 : index
    %36 = vector.load %arg3[%c4, %c0_16, %c0_17] : memref<9x8x8xbf16, #tpu.memory_space<vmem>>, vector<1x8x8xbf16>
    %37 = vector.shape_cast %36 : vector<1x8x8xbf16> to vector<8x8xbf16>
    %cst_18 = arith.constant dense<0.000000e+00> : vector<8x1024xf32>
    %38 = tpu.matmul %37, %35, %cst_18 {dimension_numbers = #tpu.dot_dimension_numbers<[1], [0], [0], [1], [0, 0, 1, 1], [], []>} : vector<8x8xbf16>, vector<8x1024xbf16>, vector<8x1024xf32> -> vector<8x1024xf32>
    %39 = arith.addf %33, %38 : vector<8x1024xf32>
    %40 = vector.extract_strided_slice %1 {offsets = [0, 129], sizes = [8, 1024], strides = [1, 1]} : vector<8x1280xf32> to vector<8x1024xf32>
    %41 = arith.truncf %40 : vector<8x1024xf32> to vector<8x1024xbf16>
    %c5 = arith.constant 5 : index
    %c0_19 = arith.constant 0 : index
    %c0_20 = arith.constant 0 : index
    %42 = vector.load %arg3[%c5, %c0_19, %c0_20] : memref<9x8x8xbf16, #tpu.memory_space<vmem>>, vector<1x8x8xbf16>
    %43 = vector.shape_cast %42 : vector<1x8x8xbf16> to vector<8x8xbf16>
    %cst_21 = arith.constant dense<0.000000e+00> : vector<8x1024xf32>
    %44 = tpu.matmul %43, %41, %cst_21 {dimension_numbers = #tpu.dot_dimension_numbers<[1], [0], [0], [1], [0, 0, 1, 1], [], []>} : vector<8x8xbf16>, vector<8x1024xbf16>, vector<8x1024xf32> -> vector<8x1024xf32>
    %45 = vector.broadcast %4 : vector<1x1024xf32> to vector<8x1024xf32>
    %46 = arith.mulf %44, %45 : vector<8x1024xf32>
    %47 = arith.addf %39, %46 : vector<8x1024xf32>
    %48 = vector.extract_strided_slice %1 {offsets = [0, 159], sizes = [8, 1024], strides = [1, 1]} : vector<8x1280xf32> to vector<8x1024xf32>
    %49 = arith.truncf %48 : vector<8x1024xf32> to vector<8x1024xbf16>
    %c6 = arith.constant 6 : index
    %c0_22 = arith.constant 0 : index
    %c0_23 = arith.constant 0 : index
    %50 = vector.load %arg3[%c6, %c0_22, %c0_23] : memref<9x8x8xbf16, #tpu.memory_space<vmem>>, vector<1x8x8xbf16>
    %51 = vector.shape_cast %50 : vector<1x8x8xbf16> to vector<8x8xbf16>
    %cst_24 = arith.constant dense<0.000000e+00> : vector<8x1024xf32>
    %52 = tpu.matmul %51, %49, %cst_24 {dimension_numbers = #tpu.dot_dimension_numbers<[1], [0], [0], [1], [0, 0, 1, 1], [], []>} : vector<8x8xbf16>, vector<8x1024xbf16>, vector<8x1024xf32> -> vector<8x1024xf32>
    %53 = vector.broadcast %3 : vector<1x1024xf32> to vector<8x1024xf32>
    %54 = arith.mulf %52, %53 : vector<8x1024xf32>
    %55 = arith.addf %47, %54 : vector<8x1024xf32>
    %56 = vector.extract_strided_slice %1 {offsets = [0, 160], sizes = [8, 1024], strides = [1, 1]} : vector<8x1280xf32> to vector<8x1024xf32>
    %57 = arith.truncf %56 : vector<8x1024xf32> to vector<8x1024xbf16>
    %c7 = arith.constant 7 : index
    %c0_25 = arith.constant 0 : index
    %c0_26 = arith.constant 0 : index
    %58 = vector.load %arg3[%c7, %c0_25, %c0_26] : memref<9x8x8xbf16, #tpu.memory_space<vmem>>, vector<1x8x8xbf16>
    %59 = vector.shape_cast %58 : vector<1x8x8xbf16> to vector<8x8xbf16>
    %cst_27 = arith.constant dense<0.000000e+00> : vector<8x1024xf32>
    %60 = tpu.matmul %59, %57, %cst_27 {dimension_numbers = #tpu.dot_dimension_numbers<[1], [0], [0], [1], [0, 0, 1, 1], [], []>} : vector<8x8xbf16>, vector<8x1024xbf16>, vector<8x1024xf32> -> vector<8x1024xf32>
    %61 = arith.addf %55, %60 : vector<8x1024xf32>
    %62 = vector.extract_strided_slice %1 {offsets = [0, 161], sizes = [8, 1024], strides = [1, 1]} : vector<8x1280xf32> to vector<8x1024xf32>
    %63 = arith.truncf %62 : vector<8x1024xf32> to vector<8x1024xbf16>
    %c8 = arith.constant 8 : index
    %c0_28 = arith.constant 0 : index
    %c0_29 = arith.constant 0 : index
    %64 = vector.load %arg3[%c8, %c0_28, %c0_29] : memref<9x8x8xbf16, #tpu.memory_space<vmem>>, vector<1x8x8xbf16>
    %65 = vector.shape_cast %64 : vector<1x8x8xbf16> to vector<8x8xbf16>
    %cst_30 = arith.constant dense<0.000000e+00> : vector<8x1024xf32>
    %66 = tpu.matmul %65, %63, %cst_30 {dimension_numbers = #tpu.dot_dimension_numbers<[1], [0], [0], [1], [0, 0, 1, 1], [], []>} : vector<8x8xbf16>, vector<8x1024xbf16>, vector<8x1024xf32> -> vector<8x1024xf32>
    %67 = vector.broadcast %4 : vector<1x1024xf32> to vector<8x1024xf32>
    %68 = arith.mulf %66, %67 : vector<8x1024xf32>
    %69 = arith.addf %61, %68 : vector<8x1024xf32>
    %70 = vector.shape_cast %69 : vector<8x1024xf32> to vector<1x8x1024xf32>
    %cst_31 = arith.constant dense<0.000000e+00> : vector<1xf32>
    %71 = vector.multi_reduction <add>, %70, %cst_31 [1, 2] : vector<1x8x1024xf32> to vector<1xf32>
    %72 = vector.shape_cast %71 : vector<1xf32> to vector<1x1x1xf32>
    %73 = vector.extract %72[0, 0, 0] : f32 from vector<1x1x1xf32>
    %74 = arith.mulf %69, %69 : vector<8x1024xf32>
    %75 = vector.shape_cast %74 : vector<8x1024xf32> to vector<1x8x1024xf32>
    %cst_32 = arith.constant dense<0.000000e+00> : vector<1xf32>
    %76 = vector.multi_reduction <add>, %75, %cst_32 [1, 2] : vector<1x8x1024xf32> to vector<1xf32>
    %77 = vector.shape_cast %76 : vector<1xf32> to vector<1x1x1xf32>
    %78 = vector.extract %77[0, 0, 0] : f32 from vector<1x1x1xf32>
    %cst_33 = arith.constant 2.048000e+03 : f32
    %79 = arith.divf %73, %cst_33 : f32
    %cst_34 = arith.constant 2.048000e+03 : f32
    %80 = arith.divf %78, %cst_34 : f32
    %81 = arith.mulf %79, %79 : f32
    %82 = arith.subf %80, %81 : f32
    %cst_35 = arith.constant 0.000000e+00 : f32
    %83 = arith.maximumf %82, %cst_35 : f32
    %c0_36 = arith.constant 0 : index
    %c0_37 = arith.constant 0 : index
    %84 = vector.load %arg4[%c0_36, %c0_37] : memref<8x1xf32, #tpu.memory_space<vmem>>, vector<8x1xf32>
    %cst_38 = arith.constant 9.99999974E-6 : f32
    %85 = arith.addf %83, %cst_38 : f32
    %86 = math.rsqrt %85 : f32
    %87 = vector.broadcast %86 : f32 to vector<8x1xf32>
    %88 = arith.mulf %84, %87 : vector<8x1xf32>
    %c0_39 = arith.constant 0 : index
    %c0_40 = arith.constant 0 : index
    %89 = vector.load %arg5[%c0_39, %c0_40] : memref<8x1xf32, #tpu.memory_space<vmem>>, vector<8x1xf32>
    %90 = vector.broadcast %79 : f32 to vector<8x1xf32>
    %91 = arith.mulf %90, %88 : vector<8x1xf32>
    %92 = arith.subf %89, %91 : vector<8x1xf32>
    %93 = vector.broadcast %88 : vector<8x1xf32> to vector<8x1024xf32>
    %94 = arith.mulf %69, %93 : vector<8x1024xf32>
    %95 = vector.broadcast %92 : vector<8x1xf32> to vector<8x1024xf32>
    %96 = arith.addf %94, %95 : vector<8x1024xf32>
    %cst_41 = arith.constant 5.000000e-01 : f32
    %97 = vector.broadcast %cst_41 : f32 to vector<8x1024xf32>
    %98 = arith.mulf %97, %96 : vector<8x1024xf32>
    %cst_42 = arith.constant 0.707106769 : f32
    %99 = vector.broadcast %cst_42 : f32 to vector<8x1024xf32>
    %100 = arith.mulf %96, %99 : vector<8x1024xf32>
    %101 = math.erf %100 : vector<8x1024xf32>
    %cst_43 = arith.constant 1.000000e+00 : f32
    %102 = vector.broadcast %cst_43 : f32 to vector<8x1024xf32>
    %103 = arith.addf %102, %101 : vector<8x1024xf32>
    %104 = arith.mulf %98, %103 : vector<8x1024xf32>
    %cst_44 = arith.constant 0.000000e+00 : f32
    %105 = vector.broadcast %cst_44 : f32 to vector<8x128xf32>
    %c0_45 = arith.constant 0 : index
    %c0_46 = arith.constant 0 : index
    %c0_47 = arith.constant 0 : index
    %106 = vector.load %arg6[%c0_45, %c0_46, %c0_47] : memref<1x8x1280xf32, #tpu.memory_space<vmem>>, vector<1x8x128xf32>
    %107 = vector.shape_cast %106 : vector<1x8x128xf32> to vector<8x128xf32>
    %108 = vector.shape_cast %105 : vector<8x128xf32> to vector<1x8x128xf32>
    tpu.vector_store %arg6[%c0_45, %c0_46, %c0_47], %108 {strides = array<i32>} : memref<1x8x1280xf32, #tpu.memory_space<vmem>>, vector<1x8x128xf32>,
    %c0_48 = arith.constant 0 : index
    %c0_49 = arith.constant 0 : index
    %c128 = arith.constant 128 : index
    %109 = vector.load %arg6[%c0_48, %c0_49, %c128] : memref<1x8x1280xf32, #tpu.memory_space<vmem>>, vector<1x8x1024xf32>
    %110 = vector.shape_cast %109 : vector<1x8x1024xf32> to vector<8x1024xf32>
    %111 = vector.shape_cast %104 : vector<8x1024xf32> to vector<1x8x1024xf32>
    tpu.vector_store %arg6[%c0_48, %c0_49, %c128], %111 {strides = array<i32>} : memref<1x8x1280xf32, #tpu.memory_space<vmem>>, vector<1x8x1024xf32>,
    %cst_50 = arith.constant 0.000000e+00 : f32
    %112 = vector.broadcast %cst_50 : f32 to vector<8x128xf32>
    %c0_51 = arith.constant 0 : index
    %c0_52 = arith.constant 0 : index
    %c1152 = arith.constant 1152 : index
    %113 = vector.load %arg6[%c0_51, %c0_52, %c1152] : memref<1x8x1280xf32, #tpu.memory_space<vmem>>, vector<1x8x128xf32>
    %114 = vector.shape_cast %113 : vector<1x8x128xf32> to vector<8x128xf32>
    %115 = vector.shape_cast %112 : vector<8x128xf32> to vector<1x8x128xf32>
    tpu.vector_store %arg6[%c0_51, %c0_52, %c1152], %115 {strides = array<i32>} : memref<1x8x1280xf32, #tpu.memory_space<vmem>>, vector<1x8x128xf32>,
    return
  }
  func.func @transform_0(%arg0: i32) -> (i32, i32, i32) {
    %c0_i32 = arith.constant 0 : i32
    %c0_i32_0 = arith.constant 0 : i32
    %c0_i32_1 = arith.constant 0 : i32
    return %arg0, %c0_i32, %c0_i32_0 : i32, i32, i32
  }
  func.func @transform_1(%arg0: i32) -> (i32, i32) {
    %c0_i32 = arith.constant 0 : i32
    %c0_i32_0 = arith.constant 0 : i32
    %c0_i32_1 = arith.constant 0 : i32
    return %c0_i32, %c0_i32_0 : i32, i32
  }
  func.func @transform_2(%arg0: i32) -> (i32, i32, i32) {
    %c0_i32 = arith.constant 0 : i32
    %c0_i32_0 = arith.constant 0 : i32
    %c0_i32_1 = arith.constant 0 : i32
    %c0_i32_2 = arith.constant 0 : i32
    return %c0_i32, %c0_i32_0, %c0_i32_1 : i32, i32, i32
  }
  func.func @transform_3(%arg0: i32) -> (i32, i32) {
    %c0_i32 = arith.constant 0 : i32
    %c0_i32_0 = arith.constant 0 : i32
    %c0_i32_1 = arith.constant 0 : i32
    return %c0_i32, %c0_i32_0 : i32, i32
  }
  func.func @transform_4(%arg0: i32) -> (i32, i32) {
    %c0_i32 = arith.constant 0 : i32
    %c0_i32_0 = arith.constant 0 : i32
    %c0_i32_1 = arith.constant 0 : i32
    return %c0_i32, %c0_i32_0 : i32, i32
  }
  func.func @transform_5(%arg0: i32) -> (i32, i32, i32) {
    %c0_i32 = arith.constant 0 : i32
    %c0_i32_0 = arith.constant 0 : i32
    %c0_i32_1 = arith.constant 0 : i32
    return %arg0, %c0_i32, %c0_i32_0 : i32, i32, i32
  }
}

module attributes {stable_mosaic.version = 11 : i64} {
  func.func @_conv_gn_kernel(%arg0: i32, %arg1: memref<1x8x1280xf32, #tpu.memory_space<vmem>>, %arg2: memref<2x1024xf32, #tpu.memory_space<vmem>>, %arg3: memref<9x8x8xbf16, #tpu.memory_space<vmem>>, %arg4: memref<8x1xf32, #tpu.memory_space<vmem>>, %arg5: memref<8x1xf32, #tpu.memory_space<vmem>>, %arg6: memref<1x8x1280xf32, #tpu.memory_space<vmem>>) attributes {dimension_semantics = [#tpu.dimension_semantics<parallel>], iteration_bounds = array<i64: 2>, scalar_prefetch = 0 : i64, scratch_operands = 0 : i64, tpu.core_type = #tpu.core_type<tc>, window_params = [{transform_indices = @transform_0, window_bounds = array<i64: 1, 8, 1280>}, {pipeline_mode = #tpu.pipeline_mode<synchronous>, transform_indices = @transform_1, window_bounds = array<i64: 2, 1024>}, {pipeline_mode = #tpu.pipeline_mode<synchronous>, transform_indices = @transform_2, window_bounds = array<i64: 9, 8, 8>}, {pipeline_mode = #tpu.pipeline_mode<synchronous>, transform_indices = @transform_3, window_bounds = array<i64: 8, 1>}, {pipeline_mode = #tpu.pipeline_mode<synchronous>, transform_indices = @transform_4, window_bounds = array<i64: 8, 1>}, {transform_indices = @transform_5, window_bounds = array<i64: 1, 8, 1280>}]} {
    %c0 = arith.constant 0 : index
    %c0_0 = arith.constant 0 : index
    %c0_1 = arith.constant 0 : index
    %0 = vector.load %arg1[%c0, %c0_0, %c0_1] : memref<1x8x1280xf32, #tpu.memory_space<vmem>>, vector<1x8x1280xf32>
    %1 = vector.shape_cast %0 : vector<1x8x1280xf32> to vector<8x1280xf32>
    %c0_2 = arith.constant 0 : index
    %c0_3 = arith.constant 0 : index
    %2 = vector.load %arg2[%c0_2, %c0_3] : memref<2x1024xf32, #tpu.memory_space<vmem>>, vector<2x1024xf32>
    %3 = vector.extract_strided_slice %2 {offsets = [0, 0], sizes = [1, 1024], strides = [1, 1]} : vector<2x1024xf32> to vector<1x1024xf32>
    %4 = vector.extract_strided_slice %2 {offsets = [1, 0], sizes = [1, 1024], strides = [1, 1]} : vector<2x1024xf32> to vector<1x1024xf32>
    %5 = vector.extract_strided_slice %1 {offsets = [0, 95], sizes = [8, 1024], strides = [1, 1]} : vector<8x1280xf32> to vector<8x1024xf32>
    %6 = arith.truncf %5 : vector<8x1024xf32> to vector<8x1024xbf16>
    %c0_4 = arith.constant 0 : index
    %c0_5 = arith.constant 0 : index
    %c0_6 = arith.constant 0 : index
    %7 = vector.load %arg3[%c0_4, %c0_5, %c0_6] : memref<9x8x8xbf16, #tpu.memory_space<vmem>>, vector<1x8x8xbf16>
    %8 = vector.shape_cast %7 : vector<1x8x8xbf16> to vector<8x8xbf16>
    %cst = arith.constant dense<0.000000e+00> : vector<8x1024xf32>
    %9 = tpu.matmul %8, %6, %cst {dimension_numbers = #tpu.dot_dimension_numbers<[1], [0], [0], [1], [0, 0, 1, 1], [], []>} : vector<8x8xbf16>, vector<8x1024xbf16>, vector<8x1024xf32> -> vector<8x1024xf32>
    %10 = vector.broadcast %3 : vector<1x1024xf32> to vector<8x1024xf32>
    %11 = arith.mulf %9, %10 : vector<8x1024xf32>
    %12 = vector.extract_strided_slice %1 {offsets = [0, 96], sizes = [8, 1024], strides = [1, 1]} : vector<8x1280xf32> to vector<8x1024xf32>
    %13 = arith.truncf %12 : vector<8x1024xf32> to vector<8x1024xbf16>
    %c1 = arith.constant 1 : index
    %c0_7 = arith.constant 0 : index
    %c0_8 = arith.constant 0 : index
    %14 = vector.load %arg3[%c1, %c0_7, %c0_8] : memref<9x8x8xbf16, #tpu.memory_space<vmem>>, vector<1x8x8xbf16>
    %15 = vector.shape_cast %14 : vector<1x8x8xbf16> to vector<8x8xbf16>
    %cst_9 = arith.constant dense<0.000000e+00> : vector<8x1024xf32>
    %16 = tpu.matmul %15, %13, %cst_9 {dimension_numbers = #tpu.dot_dimension_numbers<[1], [0], [0], [1], [0, 0, 1, 1], [], []>} : vector<8x8xbf16>, vector<8x1024xbf16>, vector<8x1024xf32> -> vector<8x1024xf32>
    %17 = arith.addf %11, %16 : vector<8x1024xf32>
    %18 = vector.extract_strided_slice %1 {offsets = [0, 97], sizes = [8, 1024], strides = [1, 1]} : vector<8x1280xf32> to vector<8x1024xf32>
    %19 = arith.truncf %18 : vector<8x1024xf32> to vector<8x1024xbf16>
    %c2 = arith.constant 2 : index
    %c0_10 = arith.constant 0 : index
    %c0_11 = arith.constant 0 : index
    %20 = vector.load %arg3[%c2, %c0_10, %c0_11] : memref<9x8x8xbf16, #tpu.memory_space<vmem>>, vector<1x8x8xbf16>
    %21 = vector.shape_cast %20 : vector<1x8x8xbf16> to vector<8x8xbf16>
    %cst_12 = arith.constant dense<0.000000e+00> : vector<8x1024xf32>
    %22 = tpu.matmul %21, %19, %cst_12 {dimension_numbers = #tpu.dot_dimension_numbers<[1], [0], [0], [1], [0, 0, 1, 1], [], []>} : vector<8x8xbf16>, vector<8x1024xbf16>, vector<8x1024xf32> -> vector<8x1024xf32>
    %23 = vector.broadcast %4 : vector<1x1024xf32> to vector<8x1024xf32>
    %24 = arith.mulf %22, %23 : vector<8x1024xf32>
    %25 = arith.addf %17, %24 : vector<8x1024xf32>
    %26 = vector.extract_strided_slice %1 {offsets = [0, 127], sizes = [8, 1024], strides = [1, 1]} : vector<8x1280xf32> to vector<8x1024xf32>
    %27 = arith.truncf %26 : vector<8x1024xf32> to vector<8x1024xbf16>
    %c3 = arith.constant 3 : index
    %c0_13 = arith.constant 0 : index
    %c0_14 = arith.constant 0 : index
    %28 = vector.load %arg3[%c3, %c0_13, %c0_14] : memref<9x8x8xbf16, #tpu.memory_space<vmem>>, vector<1x8x8xbf16>
    %29 = vector.shape_cast %28 : vector<1x8x8xbf16> to vector<8x8xbf16>
    %cst_15 = arith.constant dense<0.000000e+00> : vector<8x1024xf32>
    %30 = tpu.matmul %29, %27, %cst_15 {dimension_numbers = #tpu.dot_dimension_numbers<[1], [0], [0], [1], [0, 0, 1, 1], [], []>} : vector<8x8xbf16>, vector<8x1024xbf16>, vector<8x1024xf32> -> vector<8x1024xf32>
    %31 = vector.broadcast %3 : vector<1x1024xf32> to vector<8x1024xf32>
    %32 = arith.mulf %30, %31 : vector<8x1024xf32>
    %33 = arith.addf %25, %32 : vector<8x1024xf32>
    %34 = vector.extract_strided_slice %1 {offsets = [0, 128], sizes = [8, 1024], strides = [1, 1]} : vector<8x1280xf32> to vector<8x1024xf32>
    %35 = arith.truncf %34 : vector<8x1024xf32> to vector<8x1024xbf16>
    %c4 = arith.constant 4 : index
    %c0_16 = arith.constant 0 : index
    %c0_17 = arith.constant 0 : index
    %36 = vector.load %arg3[%c4, %c0_16, %c0_17] : memref<9x8x8xbf16, #tpu.memory_space<vmem>>, vector<1x8x8xbf16>
    %37 = vector.shape_cast %36 : vector<1x8x8xbf16> to vector<8x8xbf16>
    %cst_18 = arith.constant dense<0.000000e+00> : vector<8x1024xf32>
    %38 = tpu.matmul %37, %35, %cst_18 {dimension_numbers = #tpu.dot_dimension_numbers<[1], [0], [0], [1], [0, 0, 1, 1], [], []>} : vector<8x8xbf16>, vector<8x1024xbf16>, vector<8x1024xf32> -> vector<8x1024xf32>
    %39 = arith.addf %33, %38 : vector<8x1024xf32>
    %40 = vector.extract_strided_slice %1 {offsets = [0, 129], sizes = [8, 1024], strides = [1, 1]} : vector<8x1280xf32> to vector<8x1024xf32>
    %41 = arith.truncf %40 : vector<8x1024xf32> to vector<8x1024xbf16>
    %c5 = arith.constant 5 : index
    %c0_19 = arith.constant 0 : index
    %c0_20 = arith.constant 0 : index
    %42 = vector.load %arg3[%c5, %c0_19, %c0_20] : memref<9x8x8xbf16, #tpu.memory_space<vmem>>, vector<1x8x8xbf16>
    %43 = vector.shape_cast %42 : vector<1x8x8xbf16> to vector<8x8xbf16>
    %cst_21 = arith.constant dense<0.000000e+00> : vector<8x1024xf32>
    %44 = tpu.matmul %43, %41, %cst_21 {dimension_numbers = #tpu.dot_dimension_numbers<[1], [0], [0], [1], [0, 0, 1, 1], [], []>} : vector<8x8xbf16>, vector<8x1024xbf16>, vector<8x1024xf32> -> vector<8x1024xf32>
    %45 = vector.broadcast %4 : vector<1x1024xf32> to vector<8x1024xf32>
    %46 = arith.mulf %44, %45 : vector<8x1024xf32>
    %47 = arith.addf %39, %46 : vector<8x1024xf32>
    %48 = vector.extract_strided_slice %1 {offsets = [0, 159], sizes = [8, 1024], strides = [1, 1]} : vector<8x1280xf32> to vector<8x1024xf32>
    %49 = arith.truncf %48 : vector<8x1024xf32> to vector<8x1024xbf16>
    %c6 = arith.constant 6 : index
    %c0_22 = arith.constant 0 : index
    %c0_23 = arith.constant 0 : index
    %50 = vector.load %arg3[%c6, %c0_22, %c0_23] : memref<9x8x8xbf16, #tpu.memory_space<vmem>>, vector<1x8x8xbf16>
    %51 = vector.shape_cast %50 : vector<1x8x8xbf16> to vector<8x8xbf16>
    %cst_24 = arith.constant dense<0.000000e+00> : vector<8x1024xf32>
    %52 = tpu.matmul %51, %49, %cst_24 {dimension_numbers = #tpu.dot_dimension_numbers<[1], [0], [0], [1], [0, 0, 1, 1], [], []>} : vector<8x8xbf16>, vector<8x1024xbf16>, vector<8x1024xf32> -> vector<8x1024xf32>
    %53 = vector.broadcast %3 : vector<1x1024xf32> to vector<8x1024xf32>
    %54 = arith.mulf %52, %53 : vector<8x1024xf32>
    %55 = arith.addf %47, %54 : vector<8x1024xf32>
    %56 = vector.extract_strided_slice %1 {offsets = [0, 160], sizes = [8, 1024], strides = [1, 1]} : vector<8x1280xf32> to vector<8x1024xf32>
    %57 = arith.truncf %56 : vector<8x1024xf32> to vector<8x1024xbf16>
    %c7 = arith.constant 7 : index
    %c0_25 = arith.constant 0 : index
    %c0_26 = arith.constant 0 : index
    %58 = vector.load %arg3[%c7, %c0_25, %c0_26] : memref<9x8x8xbf16, #tpu.memory_space<vmem>>, vector<1x8x8xbf16>
    %59 = vector.shape_cast %58 : vector<1x8x8xbf16> to vector<8x8xbf16>
    %cst_27 = arith.constant dense<0.000000e+00> : vector<8x1024xf32>
    %60 = tpu.matmul %59, %57, %cst_27 {dimension_numbers = #tpu.dot_dimension_numbers<[1], [0], [0], [1], [0, 0, 1, 1], [], []>} : vector<8x8xbf16>, vector<8x1024xbf16>, vector<8x1024xf32> -> vector<8x1024xf32>
    %61 = arith.addf %55, %60 : vector<8x1024xf32>
    %62 = vector.extract_strided_slice %1 {offsets = [0, 161], sizes = [8, 1024], strides = [1, 1]} : vector<8x1280xf32> to vector<8x1024xf32>
    %63 = arith.truncf %62 : vector<8x1024xf32> to vector<8x1024xbf16>
    %c8 = arith.constant 8 : index
    %c0_28 = arith.constant 0 : index
    %c0_29 = arith.constant 0 : index
    %64 = vector.load %arg3[%c8, %c0_28, %c0_29] : memref<9x8x8xbf16, #tpu.memory_space<vmem>>, vector<1x8x8xbf16>
    %65 = vector.shape_cast %64 : vector<1x8x8xbf16> to vector<8x8xbf16>
    %cst_30 = arith.constant dense<0.000000e+00> : vector<8x1024xf32>
    %66 = tpu.matmul %65, %63, %cst_30 {dimension_numbers = #tpu.dot_dimension_numbers<[1], [0], [0], [1], [0, 0, 1, 1], [], []>} : vector<8x8xbf16>, vector<8x1024xbf16>, vector<8x1024xf32> -> vector<8x1024xf32>
    %67 = vector.broadcast %4 : vector<1x1024xf32> to vector<8x1024xf32>
    %68 = arith.mulf %66, %67 : vector<8x1024xf32>
    %69 = arith.addf %61, %68 : vector<8x1024xf32>
    %70 = vector.shape_cast %69 : vector<8x1024xf32> to vector<1x8x1024xf32>
    %cst_31 = arith.constant dense<0.000000e+00> : vector<1xf32>
    %71 = vector.multi_reduction <add>, %70, %cst_31 [1, 2] : vector<1x8x1024xf32> to vector<1xf32>
    %72 = vector.shape_cast %71 : vector<1xf32> to vector<1x1x1xf32>
    %73 = vector.extract %72[0, 0, 0] : f32 from vector<1x1x1xf32>
    %74 = arith.mulf %69, %69 : vector<8x1024xf32>
    %75 = vector.shape_cast %74 : vector<8x1024xf32> to vector<1x8x1024xf32>
    %cst_32 = arith.constant dense<0.000000e+00> : vector<1xf32>
    %76 = vector.multi_reduction <add>, %75, %cst_32 [1, 2] : vector<1x8x1024xf32> to vector<1xf32>
    %77 = vector.shape_cast %76 : vector<1xf32> to vector<1x1x1xf32>
    %78 = vector.extract %77[0, 0, 0] : f32 from vector<1x1x1xf32>
    %cst_33 = arith.constant 8.192000e+03 : f32
    %79 = arith.divf %73, %cst_33 : f32
    %cst_34 = arith.constant 8.192000e+03 : f32
    %80 = arith.divf %78, %cst_34 : f32
    %81 = arith.mulf %79, %79 : f32
    %82 = arith.subf %80, %81 : f32
    %cst_35 = arith.constant 0.000000e+00 : f32
    %83 = arith.maximumf %82, %cst_35 : f32
    %c0_36 = arith.constant 0 : index
    %c0_37 = arith.constant 0 : index
    %84 = vector.load %arg4[%c0_36, %c0_37] : memref<8x1xf32, #tpu.memory_space<vmem>>, vector<8x1xf32>
    %cst_38 = arith.constant 9.99999974E-6 : f32
    %85 = arith.addf %83, %cst_38 : f32
    %86 = math.rsqrt %85 : f32
    %87 = vector.broadcast %86 : f32 to vector<8x1xf32>
    %88 = arith.mulf %84, %87 : vector<8x1xf32>
    %c0_39 = arith.constant 0 : index
    %c0_40 = arith.constant 0 : index
    %89 = vector.load %arg5[%c0_39, %c0_40] : memref<8x1xf32, #tpu.memory_space<vmem>>, vector<8x1xf32>
    %90 = vector.broadcast %79 : f32 to vector<8x1xf32>
    %91 = arith.mulf %90, %88 : vector<8x1xf32>
    %92 = arith.subf %89, %91 : vector<8x1xf32>
    %93 = vector.broadcast %88 : vector<8x1xf32> to vector<8x1024xf32>
    %94 = arith.mulf %69, %93 : vector<8x1024xf32>
    %95 = vector.broadcast %92 : vector<8x1xf32> to vector<8x1024xf32>
    %96 = arith.addf %94, %95 : vector<8x1024xf32>
    %cst_41 = arith.constant 0.000000e+00 : f32
    %97 = vector.broadcast %cst_41 : f32 to vector<8x128xf32>
    %c0_42 = arith.constant 0 : index
    %c0_43 = arith.constant 0 : index
    %c0_44 = arith.constant 0 : index
    %98 = vector.load %arg6[%c0_42, %c0_43, %c0_44] : memref<1x8x1280xf32, #tpu.memory_space<vmem>>, vector<1x8x128xf32>
    %99 = vector.shape_cast %98 : vector<1x8x128xf32> to vector<8x128xf32>
    %100 = vector.shape_cast %97 : vector<8x128xf32> to vector<1x8x128xf32>
    tpu.vector_store %arg6[%c0_42, %c0_43, %c0_44], %100 {strides = array<i32>} : memref<1x8x1280xf32, #tpu.memory_space<vmem>>, vector<1x8x128xf32>,
    %c0_45 = arith.constant 0 : index
    %c0_46 = arith.constant 0 : index
    %c128 = arith.constant 128 : index
    %101 = vector.load %arg6[%c0_45, %c0_46, %c128] : memref<1x8x1280xf32, #tpu.memory_space<vmem>>, vector<1x8x1024xf32>
    %102 = vector.shape_cast %101 : vector<1x8x1024xf32> to vector<8x1024xf32>
    %103 = vector.shape_cast %96 : vector<8x1024xf32> to vector<1x8x1024xf32>
    tpu.vector_store %arg6[%c0_45, %c0_46, %c128], %103 {strides = array<i32>} : memref<1x8x1280xf32, #tpu.memory_space<vmem>>, vector<1x8x1024xf32>,
    %cst_47 = arith.constant 0.000000e+00 : f32
    %104 = vector.broadcast %cst_47 : f32 to vector<8x128xf32>
    %c0_48 = arith.constant 0 : index
    %c0_49 = arith.constant 0 : index
    %c1152 = arith.constant 1152 : index
    %105 = vector.load %arg6[%c0_48, %c0_49, %c1152] : memref<1x8x1280xf32, #tpu.memory_space<vmem>>, vector<1x8x128xf32>
    %106 = vector.shape_cast %105 : vector<1x8x128xf32> to vector<8x128xf32>
    %107 = vector.shape_cast %104 : vector<8x128xf32> to vector<1x8x128xf32>
    tpu.vector_store %arg6[%c0_48, %c0_49, %c1152], %107 {strides = array<i32>} : memref<1x8x1280xf32, #tpu.memory_space<vmem>>, vector<1x8x128xf32>,
    return
  }
  func.func @transform_0(%arg0: i32) -> (i32, i32, i32) {
    %c0_i32 = arith.constant 0 : i32
    %c0_i32_0 = arith.constant 0 : i32
    %c0_i32_1 = arith.constant 0 : i32
    return %arg0, %c0_i32, %c0_i32_0 : i32, i32, i32
  }
  func.func @transform_1(%arg0: i32) -> (i32, i32) {
    %c0_i32 = arith.constant 0 : i32
    %c0_i32_0 = arith.constant 0 : i32
    %c0_i32_1 = arith.constant 0 : i32
    return %c0_i32, %c0_i32_0 : i32, i32
  }
  func.func @transform_2(%arg0: i32) -> (i32, i32, i32) {
    %c0_i32 = arith.constant 0 : i32
    %c0_i32_0 = arith.constant 0 : i32
    %c0_i32_1 = arith.constant 0 : i32
    %c0_i32_2 = arith.constant 0 : i32
    return %c0_i32, %c0_i32_0, %c0_i32_1 : i32, i32, i32
  }
  func.func @transform_3(%arg0: i32) -> (i32, i32) {
    %c0_i32 = arith.constant 0 : i32
    %c0_i32_0 = arith.constant 0 : i32
    %c0_i32_1 = arith.constant 0 : i32
    return %c0_i32, %c0_i32_0 : i32, i32
  }
  func.func @transform_4(%arg0: i32) -> (i32, i32) {
    %c0_i32 = arith.constant 0 : i32
    %c0_i32_0 = arith.constant 0 : i32
    %c0_i32_1 = arith.constant 0 : i32
    return %c0_i32, %c0_i32_0 : i32, i32
  }
  func.func @transform_5(%arg0: i32) -> (i32, i32, i32) {
    %c0_i32 = arith.constant 0 : i32
    %c0_i32_0 = arith.constant 0 : i32
    %c0_i32_1 = arith.constant 0 : i32
    return %arg0, %c0_i32, %c0_i32_0 : i32, i32, i32
  }
}

</mosaic_0001>

<bundles_post_ra>
// kernel: up_forward.5
= control target key start
LH: loop header
LB: loop body
LE: loop exit
PB: predicated region body
PF: predicated region fallthrough
CT: control target
= control target key end

     0   :  { %s2637_s21 = smov 0   ;;  %s3638_s0 = inlined_call_operand.vmem [shape: f32[2,8,1280], index: 0, kind: input, shape index: {}]   ;;  %s3639_s1 = inlined_call_operand.vmem [shape: f32[2,1024], index: 1, kind: input, shape index: {}]   ;;  %s3640_s2 = inlined_call_operand.vmem [shape: bf16[9,8,8], index: 2, kind: input, shape index: {}]   ;;  %s3641_s3 = inlined_call_operand.vmem [shape: f32[8,1], index: 3, kind: input, shape index: {}]   ;;  %s3642_s4 = inlined_call_operand.vmem [shape: f32[8,1], index: 4, kind: input, shape index: {}]   ;;  %s3643_s5 = inlined_call_operand.vmem [shape: f32[2,8,1280], index: 5, kind: input, shape index: {}]   ;;  %s3644_s6 = inlined_call_operand.vmem [shape: f32[2,8,1280], index: 6, kind: output, shape index: {}]  }
   0x1 LB: > { %s2433_s22 = sadd.s32 4294967295, %s2588_s21   ;;  %p2437_p0 = scmp.ge.s32.totalorder %s2588_s21, 1  ;;  %s2588_s21 = sphi %s2637_s21, %s16_s21  }
   0x2   : > { %p222_p1 = scmp.lt.s32.totalorder %s2588_s21, 3 }
   0x4   : > { %p223_p2 = pnand %p2437_p0, %p222_p1 }
   0x5   : > { %p257_p3 = scmp.lt.s32.totalorder (!%p223_p2), %s2433_s22, 1  ;;  %s2590_s27 = smov (!%p223_p2), 33  }
   0x6   : > { %226 = sbr.rel (%p223_p2) target bundleno = 1029 (0x405), region = 44  ;;  %s2591_s28 = smov (!%p223_p2), 32  }
   0x7   : > { %s2592_s29 = smov (!%p223_p2), 31   ;;  %s2593_s30 = smov (!%p223_p2), 1  }
   0x8   : > { %s2594_s7 = smov (!%p223_p2), 127   ;;  %s2595_s8 = smov (!%p223_p2), 97  }
   0x9   : > { %s2596_s11 = smov (!%p223_p2), 96   ;;  %s2597_s14 = smov (!%p223_p2), 95  }
   0xa   : > { %s2599_s18 = smov (!%p223_p2), 0.0  }
   0xb   : > { %s3660_s22 = smov (!%p257_p3, %s2433_s22), 1  ;;  %vm322_vm0 = vcmask 269312   ;;  %vm335_vm1 = vcmask 1043456   ;;  %v294_v33 = vld [vmem:[%s3640_s2] sm:$0xf]  ;;  %vm331_vm2 = vcmask 64512  }
   0xc   : > { %s2645_s23 = smul.u32 80, %s3660_s22  ;;  %vm518_vm3 = vcmask 261120   ;;  %vm686_vm4 = vcmask 252928   ;;  %vm886_vm5 = vcmask 7168   ;;  %vm1205_vm6 = vcmask 1039360  }
   0xd   : > { %vm1381_vm7 = vcmask 793600   ;;  %vm1557_vm8 = vcmask 785408   ;;  %vm1725_vm9 = vcmask 777216  }
   0xe   : > { %s2651_s26 = scalar_lea.vmem %s3638_s0, %s2645_s23  ;;  %s3269_s9 = scalar_lea.vmem %s3643_s5, %s2645_s23 }
   0xf   : > { %v275_v0 = vld [vmem:[%s2651_s26 + $0x10] sm:$0xff]  ;;  %v273_v1 = vld [vmem:[%s2651_s26] sm:$0xff]  ;;  %v276_v6 = vld [vmem:[%s2651_s26 + $0x18] sm:$0xff] }
  0x10   : > { %v2655_v2 = vpack.c.bf16 %v275_v0, %v275_v0  ;;  %v285_v3 = vpack.c.bf16 %v273_v1, %v273_v1  ;;  %v277_v4 = vld [vmem:[%s2651_s26 + $0x20] sm:$0xff]  ;;  %v274_v7 = vld [vmem:[%s2651_s26 + $0x8] sm:$0xff]  ;;  %v279_v8 = vld [vmem:[%s2651_s26 + $0x30] sm:$0xff]  ;;  %v2665_v9 = vpack.c.bf16 %v276_v6, %v276_v6 }
  0x11   : > { %v2659_v5 = vpack.c.bf16 %v277_v4, %v277_v4  ;;  %v2667_v10 = vpack.c.bf16 %v274_v7, %v274_v7  ;;  %v2669_v11 = vpack.c.bf16 %v279_v8, %v279_v8  ;;  %v280_v12 = vld [vmem:[%s2651_s26 + $0x38] sm:$0xff]  ;;  %v278_v13 = vld [vmem:[%s2651_s26 + $0x28] sm:$0xff]  ;;  %v281_v14 = vld [vmem:[%s2651_s26 + $0x40] sm:$0xff] }
  0x12   : > { %308 = vrot.lane.b32.xlu0 %v2655_v2, %s2590_s27  ;;  %304 = vrot.lane.b32.xlu1 %v285_v3, %s2590_s27  ;;  %v2677_v15 = vpack.c.bf16 %v280_v12, %v280_v12  ;;  %v2679_v16 = vpack.c.bf16 %v278_v13, %v278_v13  ;;  %v2681_v17 = vpack.c.bf16 %v281_v14, %v281_v14  ;;  %v2449_v8 = vld [vmem:[%s3640_s2 + $0x4] sm:$0xf]  ;;  %v282_v12 = vld [vmem:[%s2651_s26 + $0x48] sm:$0xff] }
  0x13   : > { %312 = vrot.lane.b32.xlu2 %v2659_v5, %s2590_s27 }
  0x1a   : > { %310 = vrot.lane.b32.xlu0 %v2665_v9, %s2590_s27  ;;  %306 = vrot.lane.b32.xlu1 %v2667_v10, %s2590_s27 }
  0x1b   : > { %316 = vrot.lane.b32.xlu2 %v2669_v11, %s2590_s27 }
  0x22   : > { %318 = vrot.lane.b32.xlu0 %v2677_v15, %s2590_s27  ;;  %314 = vrot.lane.b32.xlu1 %v2679_v16, %s2590_s27 }
  0x23   : > { %320 = vrot.lane.b32.xlu2 %v2681_v17, %s2590_s27 }
  0x2a   : > { %504 = vrot.lane.b32.xlu0 %v2655_v2, %s2591_s28  ;;  %506 = vrot.lane.b32.xlu1 %v2665_v9, %s2591_s28 }
  0x2b   : > { %500 = vrot.lane.b32.xlu2 %v285_v3, %s2591_s28 }
  0x32   : > { %502 = vrot.lane.b32.xlu0 %v2667_v10, %s2591_s28  ;;  %508 = vrot.lane.b32.xlu1 %v2659_v5, %s2591_s28 }
  0x33   : > { %512 = vrot.lane.b32.xlu2 %v2669_v11, %s2591_s28 }
  0x3a   : > { %510 = vrot.lane.b32.xlu1 %v2679_v16, %s2591_s28  ;;  %514 = vrot.lane.b32.xlu0 %v2677_v15, %s2591_s28 }
  0x3b   : > { %516 = vrot.lane.b32.xlu2 %v2681_v17, %s2591_s28 }
  0x42   : > { %672 = vrot.lane.b32.xlu0 %v2655_v2, %s2592_s29  ;;  %674 = vrot.lane.b32.xlu1 %v2665_v9, %s2592_s29 }
  0x43   : > { %668 = vrot.lane.b32.xlu2 %v285_v3, %s2592_s29 }
  0x4a   : > { %670 = vrot.lane.b32.xlu0 %v2667_v10, %s2592_s29  ;;  %676 = vrot.lane.b32.xlu1 %v2659_v5, %s2592_s29 }
  0x4b   : > { %680 = vrot.lane.b32.xlu2 %v2669_v11, %s2592_s29 }
  0x52   : > { %678 = vrot.lane.b32.xlu1 %v2679_v16, %s2592_s29  ;;  %682 = vrot.lane.b32.xlu0 %v2677_v15, %s2592_s29 }
  0x53   : > { %684 = vrot.lane.b32.xlu2 %v2681_v17, %s2592_s29 }
  0x5a   : > { %872 = vrot.lane.b32.xlu0 %v2655_v2, %s2593_s30  ;;  %874 = vrot.lane.b32.xlu1 %v2665_v9, %s2593_s30 }
  0x5b   : > { %868 = vrot.lane.b32.xlu2 %v285_v3, %s2593_s30 }
  0x62   : > { %870 = vrot.lane.b32.xlu0 %v2667_v10, %s2593_s30  ;;  %876 = vrot.lane.b32.xlu1 %v2659_v5, %s2593_s30 }
  0x63   : > { %880 = vrot.lane.b32.xlu2 %v2669_v11, %s2593_s30 }
  0x6a   : > { %878 = vrot.lane.b32.xlu1 %v2679_v16, %s2593_s30  ;;  %882 = vrot.lane.b32.xlu0 %v2677_v15, %s2593_s30 }
  0x6b   : > { %884 = vrot.lane.b32.xlu2 %v2681_v17, %s2593_s30  ;;  %s3259_s30 = scalar_lea.vmem %s3644_s6, %s2645_s23 }
  0x6d   : > { %v313_v18 = vpop.permute.xlu2 %312 }
  0x72   : > { %1191 = vrot.lane.b32.xlu0 %v2665_v9, %s2594_s7  ;;  %1193 = vrot.lane.b32.xlu1 %v2659_v5, %s2594_s7 }
  0x73   : > { %1187 = vrot.lane.b32.xlu2 %v2667_v10, %s2594_s7 }
  0x75   : > { %v317_v19 = vpop.permute.xlu2 %316 }
  0x7a   : > { %1189 = vrot.lane.b32.xlu0 %v2655_v2, %s2594_s7  ;;  %1195 = vrot.lane.b32.xlu1 %v2679_v16, %s2594_s7 }
  0x7b   : > { %1199 = vrot.lane.b32.xlu2 %v2677_v15, %s2594_s7 }
  0x7d   : > { %v321_v22 = vpop.permute.xlu2 %320 }
  0x82   : > { %1197 = vrot.lane.b32.xlu1 %v2669_v11, %s2594_s7  ;;  %1201 = vrot.lane.b32.xlu0 %v2681_v17, %s2594_s7 }
  0x84   : > { %v309_v20 = vpop.permute.xlu0 %308  ;;  %v305_v21 = vpop.permute.xlu1 %304 }
  0x85   : > { %v501_v34 = vpop.permute.xlu2 %500 }
  0x8a   : > { %1367 = vrot.lane.b32.xlu0 %v2665_v9, %s2595_s8  ;;  %1369 = vrot.lane.b32.xlu1 %v2659_v5, %s2595_s8 }
  0x8c   : > { %v311_v23 = vpop.permute.xlu0 %310  ;;  %v307_v24 = vpop.permute.xlu1 %306 }
  0x8d   : > { %v323_v25 = vsel %vm322_vm0, %v305_v21, %v307_v24  ;;  %v324_v26 = vsel %vm322_vm0, %v307_v24, %v309_v20  ;;  %v325_v27 = vsel %vm322_vm0, %v309_v20, %v311_v23  ;;  %v326_v28 = vsel %vm322_vm0, %v311_v23, %v313_v18  ;;  %v513_v45 = vpop.permute.xlu2 %512 }
  0x8e   : > { %v337_v29 = vsel %vm335_vm1, %v323_v25, 0  ;;  %v340_v30 = vsel %vm335_vm1, %v324_v26, 0  ;;  %v343_v31 = vsel %vm335_vm1, %v325_v27, 0  ;;  %v346_v32 = vsel %vm335_vm1, %v326_v28, 0 }
  0x8f   : > { %367 = vmatpush.bf16.msra.mxu0 %v337_v29  ;;  %380 = vmatpush.bf16.msra.mxu1 %v340_v30 }
  0x90   : > { %393 = vmatpush.bf16.msra.mxu2 %v343_v31  ;;  %406 = vmatpush.bf16.msra.mxu3 %v346_v32 }
  0x92   : > { %2441 = vmatmul.msk.bf16.vlgmr.msra.gmra.mxu0 %vm331_vm2, %v294_v33  ;;  %2442 = vmatmul.msk.bf16.vlgmr.msra.gmra.mxu1 %vm331_vm2, %v294_v33 }
  0x93   : > { %2443 = vmatmul.msk.bf16.vlgmr.msra.gmra.mxu2 %vm331_vm2, %v294_v33  ;;  %2444 = vmatmul.msk.bf16.vlgmr.msra.gmra.mxu3 %vm331_vm2, %v294_v33 }
  0x94   : > { %v319_v35 = vpop.permute.xlu0 %318  ;;  %v315_v36 = vpop.permute.xlu1 %314  ;;  %1365 = vrot.lane.b32.xlu0 %v2655_v2, %s2595_s8  ;;  %1371 = vrot.lane.b32.xlu1 %v2679_v16, %s2595_s8 }
  0x95   : > { %v327_v37 = vsel %vm322_vm0, %v313_v18, %v315_v36  ;;  %v328_v38 = vsel %vm322_vm0, %v315_v36, %v317_v19  ;;  %v329_v39 = vsel %vm322_vm0, %v317_v19, %v319_v35  ;;  %v330_v40 = vsel %vm322_vm0, %v319_v35, %v321_v22  ;;  %v517_v50 = vpop.permute.xlu2 %516 }
  0x96   : > { %v349_v41 = vsel %vm335_vm1, %v327_v37, 0  ;;  %v352_v42 = vsel %vm335_vm1, %v328_v38, 0  ;;  %v355_v43 = vsel %vm335_vm1, %v329_v39, 0  ;;  %v358_v44 = vsel %vm335_vm1, %v330_v40, 0 }
  0x97   : > { %419 = vmatpush.bf16.msrb.mxu0 %v349_v41  ;;  %432 = vmatpush.bf16.msrb.mxu1 %v352_v42  ;;  %v2797_v18 = vpack.c.bf16 %v282_v12, %v282_v12  ;;  %v1051_v12 = vsel %vm335_vm1, %v2655_v2, 0 }
  0x98   : > { %445 = vmatpush.bf16.msrb.mxu2 %v355_v43  ;;  %458 = vmatpush.bf16.msrb.mxu3 %v358_v44 }
  0x99   : > { %1203 = vrot.lane.b32.xlu2 %v2797_v18, %s2594_s7 }
  0x9c   : > { %v505_v46 = vpop.permute.xlu0 %504  ;;  %v507_v47 = vpop.permute.xlu1 %506  ;;  %1373 = vrot.lane.b32.xlu1 %v2669_v11, %s2595_s8  ;;  %1377 = vrot.lane.b32.xlu0 %v2681_v17, %s2595_s8 }
  0x9d   : > { %v521_v48 = vsel %vm518_vm3, %v505_v46, %v507_v47  ;;  %v669_v59 = vpop.permute.xlu2 %668 }
  0x9e   : > { %v537_v49 = vsel %vm335_vm1, %v521_v48, 0 }
  0x9f   : > { %587 = vmatpush.bf16.msra.mxu2 %v537_v49 }
  0xa1   : > { %1363 = vrot.lane.b32.xlu2 %v2667_v10, %s2595_s8 }
  0xa2   : > { %2445 = vmatmul.msk.bf16.vlgmr.msrb.gmra.mxu0 %vm331_vm2, %v294_v33  ;;  %2446 = vmatmul.msk.bf16.vlgmr.msrb.gmra.mxu1 %vm331_vm2, %v294_v33 }
  0xa3   : > { %2447 = vmatmul.msk.bf16.vlgmr.msrb.gmra.mxu2 %vm331_vm2, %v294_v33  ;;  %2448 = vmatmul.msk.bf16.vlgmr.msrb.gmra.mxu3 %vm331_vm2, %v294_v33 }
  0xa4   : > { %v503_v51 = vpop.permute.xlu0 %502  ;;  %v509_v52 = vpop.permute.xlu1 %508  ;;  %1543 = vrot.lane.b32.xlu0 %v2665_v9, %s2596_s11  ;;  %1545 = vrot.lane.b32.xlu1 %v2659_v5, %s2596_s11 }
  0xa5   : > { %v520_v53 = vsel %vm518_vm3, %v503_v51, %v505_v46  ;;  %v519_v54 = vsel %vm518_vm3, %v501_v34, %v503_v51  ;;  %v522_v55 = vsel %vm518_vm3, %v507_v47, %v509_v52  ;;  %v681_v20 = vpop.permute.xlu2 %680 }
  0xa6   : > { %v534_v56 = vsel %vm335_vm1, %v520_v53, 0  ;;  %v531_v57 = vsel %vm335_vm1, %v519_v54, 0  ;;  %v540_v58 = vsel %vm335_vm1, %v522_v55, 0 }
  0xa7   : > { %574 = vmatpush.bf16.msra.mxu1 %v534_v56  ;;  %600 = vmatpush.bf16.msra.mxu3 %v540_v58 }
  0xa8   : > { %561 = vmatpush.bf16.msra.mxu0 %v531_v57 }
  0xa9   : > { %1375 = vrot.lane.b32.xlu2 %v2677_v15, %s2595_s8 }
  0xac   : > { %v511_v60 = vpop.permute.xlu1 %510  ;;  %v515_v61 = vpop.permute.xlu0 %514  ;;  %1541 = vrot.lane.b32.xlu0 %v2655_v2, %s2596_s11  ;;  %1547 = vrot.lane.b32.xlu1 %v2679_v16, %s2596_s11 }
  0xad   : > { %v523_v62 = vsel %vm518_vm3, %v509_v52, %v511_v60  ;;  %v524_v63 = vsel %vm518_vm3, %v511_v60, %v513_v45  ;;  %v525_v0 = vsel %vm518_vm3, %v513_v45, %v515_v61  ;;  %v526_v1 = vsel %vm518_vm3, %v515_v61, %v517_v50  ;;  %v685_v30 = vpop.permute.xlu2 %684  ;;  %v2458_v45 = vld [vmem:[%s3640_s2 + $0x8] sm:$0xf] }
  0xae   : > { %v543_v3 = vsel %vm335_vm1, %v523_v62, 0  ;;  %v546_v4 = vsel %vm335_vm1, %v524_v63, 0  ;;  %v549_v6 = vsel %vm335_vm1, %v525_v0, 0  ;;  %v552_v7 = vsel %vm335_vm1, %v526_v1, 0 }
  0xaf   : > { %613 = vmatpush.bf16.msrb.mxu0 %v543_v3  ;;  %626 = vmatpush.bf16.msrb.mxu1 %v546_v4  ;;  %v2467_v4 = vld [vmem:[%s3640_s2 + $0xc] sm:$0xf] }
  0xb0   : > { %639 = vmatpush.bf16.msrb.mxu2 %v549_v6  ;;  %652 = vmatpush.bf16.msrb.mxu3 %v552_v7  ;;  %v1054_v6 = vsel %vm335_vm1, %v2665_v9, 0  ;;  %v1048_v7 = vsel %vm335_vm1, %v2667_v10, 0 }
  0xb1   : > { %1379 = vrot.lane.b32.xlu2 %v2797_v18, %s2595_s8 }
  0xb2   : > { %2450 = vmatmul.msk.bf16.vlgmr.msra.gmra.mxu0 %vm331_vm2, %v2449_v8  ;;  %2451 = vmatmul.msk.bf16.vlgmr.msra.gmra.mxu1 %vm331_vm2, %v2449_v8 }
  0xb3   : > { %2452 = vmatmul.msk.bf16.vlgmr.msra.gmra.mxu2 %vm331_vm2, %v2449_v8  ;;  %2453 = vmatmul.msk.bf16.vlgmr.msra.gmra.mxu3 %vm331_vm2, %v2449_v8 }
  0xb4   : > { %v673_v13 = vpop.permute.xlu0 %672  ;;  %v675_v14 = vpop.permute.xlu1 %674  ;;  %1549 = vrot.lane.b32.xlu1 %v2669_v11, %s2596_s11  ;;  %1553 = vrot.lane.b32.xlu0 %v2681_v17, %s2596_s11 }
  0xb5   : > { %v689_v19 = vsel %vm686_vm4, %v673_v13, %v675_v14  ;;  %v869_v41 = vpop.permute.xlu2 %868 }
  0xb6   : > { %v705_v21 = vsel %vm335_vm1, %v689_v19, 0 }
  0xb7   : > { %755 = vmatpush.bf16.msra.mxu2 %v705_v21 }
  0xb9   : > { %1539 = vrot.lane.b32.xlu2 %v2667_v10, %s2596_s11 }
  0xbc   : > { %v671_v22 = vpop.permute.xlu0 %670  ;;  %v677_v23 = vpop.permute.xlu1 %676  ;;  %1711 = vrot.lane.b32.xlu0 %v2665_v9, %s2597_s14  ;;  %1713 = vrot.lane.b32.xlu1 %v2659_v5, %s2597_s14 }
  0xbd   : > { %v688_v24 = vsel %vm686_vm4, %v671_v22, %v673_v13  ;;  %v690_v25 = vsel %vm686_vm4, %v675_v14, %v677_v23  ;;  %v687_v26 = vsel %vm686_vm4, %v669_v59, %v671_v22  ;;  %v881_v47 = vpop.permute.xlu2 %880  ;;  %v1069_v13 = vsel %vm335_vm1, %v2681_v17, 0 }
  0xbe   : > { %v702_v27 = vsel %vm335_vm1, %v688_v24, 0  ;;  %v708_v28 = vsel %vm335_vm1, %v690_v25, 0  ;;  %v699_v29 = vsel %vm335_vm1, %v687_v26, 0  ;;  %v1063_v14 = vsel %vm335_vm1, %v2669_v11, 0 }
  0xbf   : > { %742 = vmatpush.bf16.msra.mxu1 %v702_v27  ;;  %768 = vmatpush.bf16.msra.mxu3 %v708_v28 }
  0xc0   : > { %729 = vmatpush.bf16.msra.mxu0 %v699_v29 }
  0xc1   : > { %1551 = vrot.lane.b32.xlu2 %v2677_v15, %s2596_s11 }
  0xc2   : > { %2454 = vmatmul.msk.bf16.vlgmr.msrb.gmra.mxu0 %vm331_vm2, %v2449_v8  ;;  %2455 = vmatmul.msk.bf16.vlgmr.msrb.gmra.mxu1 %vm331_vm2, %v2449_v8 }
  0xc3   : > { %2456 = vmatmul.msk.bf16.vlgmr.msrb.gmra.mxu2 %vm331_vm2, %v2449_v8  ;;  %2457 = vmatmul.msk.bf16.vlgmr.msrb.gmra.mxu3 %vm331_vm2, %v2449_v8  ;;  %v1057_v8 = vsel %vm335_vm1, %v2659_v5, 0  ;;  %v1066_v5 = vsel %vm335_vm1, %v2677_v15, 0 }
  0xc4   : > { %v679_v31 = vpop.permute.xlu1 %678  ;;  %v683_v32 = vpop.permute.xlu0 %682  ;;  %1709 = vrot.lane.b32.xlu0 %v2655_v2, %s2597_s14  ;;  %1715 = vrot.lane.b32.xlu1 %v2679_v16, %s2597_s14  ;;  %v1060_v2 = vsel %vm335_vm1, %v2679_v16, 0 }
  0xc5   : > { %v691_v33 = vsel %vm686_vm4, %v677_v23, %v679_v31  ;;  %v692_v34 = vsel %vm686_vm4, %v679_v31, %v681_v20  ;;  %v693_v35 = vsel %vm686_vm4, %v681_v20, %v683_v32  ;;  %v694_v36 = vsel %vm686_vm4, %v683_v32, %v685_v30  ;;  %v885_v56 = vpop.permute.xlu2 %884 }
  0xc6   : > { %v711_v37 = vsel %vm335_vm1, %v691_v33, 0  ;;  %v714_v38 = vsel %vm335_vm1, %v692_v34, 0  ;;  %v717_v39 = vsel %vm335_vm1, %v693_v35, 0  ;;  %v720_v40 = vsel %vm335_vm1, %v694_v36, 0 }
  0xc7   : > { %781 = vmatpush.bf16.msrb.mxu0 %v711_v37  ;;  %794 = vmatpush.bf16.msrb.mxu1 %v714_v38 }
  0xc8   : > { %807 = vmatpush.bf16.msrb.mxu2 %v717_v39  ;;  %820 = vmatpush.bf16.msrb.mxu3 %v720_v40 }
  0xc9   : > { %1555 = vrot.lane.b32.xlu2 %v2797_v18, %s2596_s11 }
  0xcc   : > { %v873_v42 = vpop.permute.xlu0 %872  ;;  %v875_v43 = vpop.permute.xlu1 %874  ;;  %1717 = vrot.lane.b32.xlu1 %v2669_v11, %s2597_s14  ;;  %1721 = vrot.lane.b32.xlu0 %v2681_v17, %s2597_s14  ;;  %v2476_v11 = vld [vmem:[%s3640_s2 + $0x10] sm:$0xf] }
  0xcd   : > { %v889_v44 = vsel %vm886_vm5, %v873_v42, %v875_v43 }
  0xce   : > { %v905_v46 = vsel %vm335_vm1, %v889_v44, 0 }
  0xd1   : > { %1707 = vrot.lane.b32.xlu2 %v2667_v10, %s2597_s14 }
  0xd2   : > { %2459 = vmatmul.msk.bf16.vlgmr.msra.gmra.mxu0 %vm331_vm2, %v2458_v45  ;;  %2460 = vmatmul.msk.bf16.vlgmr.msra.gmra.mxu1 %vm331_vm2, %v2458_v45 }
  0xd3   : > { %2461 = vmatmul.msk.bf16.vlgmr.msra.gmra.mxu2 %vm331_vm2, %v2458_v45  ;;  %2462 = vmatmul.msk.bf16.vlgmr.msra.gmra.mxu3 %vm331_vm2, %v2458_v45 }
  0xd4   : > { %v871_v48 = vpop.permute.xlu0 %870  ;;  %v877_v49 = vpop.permute.xlu1 %876  ;;  %955 = vmatpush.bf16.msra.mxu2 %v905_v46 }
  0xd5   : > { %v888_v50 = vsel %vm886_vm5, %v871_v48, %v873_v42  ;;  %v890_v51 = vsel %vm886_vm5, %v875_v43, %v877_v49  ;;  %v887_v52 = vsel %vm886_vm5, %v869_v41, %v871_v48 }
  0xd6   : > { %v902_v53 = vsel %vm335_vm1, %v888_v50, 0  ;;  %v908_v54 = vsel %vm335_vm1, %v890_v51, 0  ;;  %v899_v55 = vsel %vm335_vm1, %v887_v52, 0  ;;  %v2945_v50 = vld [vmem:[%s3639_s1] sm:$0xff] }
  0xd7   : > { %942 = vmatpush.bf16.msra.mxu1 %v902_v53  ;;  %968 = vmatpush.bf16.msra.mxu3 %v908_v54  ;;  %v466_v51 = vperm.slane %v2945_v50, 0  ;;  %v467_v52 = vperm.slane %v2945_v50, 2 }
  0xd8   : > { %929 = vmatpush.bf16.msra.mxu0 %v899_v55 }
  0xd9   : > { %1719 = vrot.lane.b32.xlu2 %v2677_v15, %s2597_s14  ;;  %v1188_v15 = vpop.permute.xlu2 %1187 }
  0xdc   : > { %v879_v57 = vpop.permute.xlu1 %878  ;;  %v883_v58 = vpop.permute.xlu0 %882 }
  0xdd   : > { %v891_v59 = vsel %vm886_vm5, %v877_v49, %v879_v57  ;;  %v892_v60 = vsel %vm886_vm5, %v879_v57, %v881_v47  ;;  %v893_v61 = vsel %vm886_vm5, %v881_v47, %v883_v58  ;;  %v894_v62 = vsel %vm886_vm5, %v883_v58, %v885_v56 }
  0xde   : > { %v911_v63 = vsel %vm335_vm1, %v891_v59, 0  ;;  %v914_v0 = vsel %vm335_vm1, %v892_v60, 0  ;;  %v917_v1 = vsel %vm335_vm1, %v893_v61, 0  ;;  %v920_v3 = vsel %vm335_vm1, %v894_v62, 0 }
  0xdf   : > { %v2955_v58 = vperm.slane %v466_v51, 0  ;;  %v2957_v59 = vperm.slane %v467_v52, 0  ;;  %v468_v62 = vperm.slane %v2945_v50, 4 }
  0xe1   : > { %1723 = vrot.lane.b32.xlu2 %v2797_v18, %s2597_s14  ;;  %v1200_v28 = vpop.permute.xlu2 %1199 }
  0xe2   : > { %2463 = vmatmul.msk.bf16.vlgmr.msrb.gmra.mxu0 %vm331_vm2, %v2458_v45  ;;  %2464 = vmatmul.msk.bf16.vlgmr.msrb.gmra.mxu1 %vm331_vm2, %v2458_v45 }
  0xe3   : > { %2465 = vmatmul.msk.bf16.vlgmr.msrb.gmra.mxu2 %vm331_vm2, %v2458_v45  ;;  %2466 = vmatmul.msk.bf16.vlgmr.msrb.gmra.mxu3 %vm331_vm2, %v2458_v45 }
  0xe4   : > { %981 = vmatpush.bf16.msrb.mxu0 %v911_v63  ;;  %994 = vmatpush.bf16.msrb.mxu1 %v914_v0  ;;  %v1192_v9 = vpop.permute.xlu0 %1191  ;;  %v1194_v10 = vpop.permute.xlu1 %1193  ;;  %v469_v63 = vperm.slane %v2945_v50, 6 }
  0xe5   : > { %1007 = vmatpush.bf16.msrb.mxu2 %v917_v1  ;;  %1020 = vmatpush.bf16.msrb.mxu3 %v920_v3  ;;  %v1208_v19 = vsel %vm1205_vm6, %v1192_v9, %v1194_v10 }
  0xe6   : > { %v1224_v24 = vsel %vm335_vm1, %v1208_v19, 0 }
  0xec   : > { %v1190_v16 = vpop.permute.xlu0 %1189  ;;  %v1196_v18 = vpop.permute.xlu1 %1195 }
  0xed   : > { %v1207_v20 = vsel %vm1205_vm6, %v1190_v16, %v1192_v9  ;;  %v1209_v22 = vsel %vm1205_vm6, %v1194_v10, %v1196_v18  ;;  %v1206_v23 = vsel %vm1205_vm6, %v1188_v15, %v1190_v16  ;;  %v2485_v9 = vld [vmem:[%s3640_s2 + $0x14] sm:$0xf]  ;;  %v2976_v15 = vperm.slane %v469_v63, 0 }
  0xee   : > { %v1221_v25 = vsel %vm335_vm1, %v1207_v20, 0  ;;  %v1227_v26 = vsel %vm335_vm1, %v1209_v22, 0  ;;  %v1218_v27 = vsel %vm335_vm1, %v1206_v23, 0 }
  0xf2   : > { %2468 = vmatmul.msk.bf16.vlgmr.msra.gmra.mxu0 %vm331_vm2, %v2467_v4  ;;  %2469 = vmatmul.msk.bf16.vlgmr.msra.gmra.mxu1 %vm331_vm2, %v2467_v4 }
  0xf3   : > { %2470 = vmatmul.msk.bf16.vlgmr.msra.gmra.mxu2 %vm331_vm2, %v2467_v4  ;;  %2471 = vmatmul.msk.bf16.vlgmr.msra.gmra.mxu3 %vm331_vm2, %v2467_v4  ;;  %v1204_v35 = vpop.permute.xlu2 %1203 }
  0xf4   : > { %1104 = vmatpush.bf16.msra.mxu2 %v1054_v6  ;;  %1078 = vmatpush.bf16.msra.mxu0 %v1048_v7  ;;  %v1202_v29 = vpop.permute.xlu0 %1201  ;;  %v1198_v34 = vpop.permute.xlu1 %1197 }
  0xf5   : > { %1117 = vmatpush.bf16.msra.mxu3 %v1057_v8  ;;  %1091 = vmatpush.bf16.msra.mxu1 %v1051_v12  ;;  %v1210_v38 = vsel %vm1205_vm6, %v1196_v18, %v1198_v34  ;;  %v1211_v39 = vsel %vm1205_vm6, %v1198_v34, %v1200_v28  ;;  %v1212_v42 = vsel %vm1205_vm6, %v1200_v28, %v1202_v29 }
  0xf6   : > { %v1213_v43 = vsel %vm1205_vm6, %v1202_v29, %v1204_v35  ;;  %v1230_v44 = vsel %vm335_vm1, %v1210_v38, 0  ;;  %v1233_v45 = vsel %vm335_vm1, %v1211_v39, 0  ;;  %v1236_v47 = vsel %vm335_vm1, %v1212_v42, 0 }
  0xf7   : > { %v1239_v48 = vsel %vm335_vm1, %v1213_v43, 0 }
  0xfb   : > { %v1364_v57 = vpop.permute.xlu2 %1363 }
  0xfc   : > { %v1368_v46 = vpop.permute.xlu0 %1367  ;;  %v1370_v49 = vpop.permute.xlu1 %1369 }
  0xfd   : > { %v1384_v6 = vsel %vm1381_vm7, %v1368_v46, %v1370_v49 }
  0xfe   : > { %v1400_v16 = vsel %vm335_vm1, %v1384_v6, 0 }
 0x102   : > { %2472 = vmatmul.msk.bf16.vlgmr.msrb.gmra.mxu0 %vm331_vm2, %v2467_v4  ;;  %2473 = vmatmul.msk.bf16.vlgmr.msrb.gmra.mxu1 %vm331_vm2, %v2467_v4 }
 0x103   : > { %2474 = vmatmul.msk.bf16.vlgmr.msrb.gmra.mxu2 %vm331_vm2, %v2467_v4  ;;  %2475 = vmatmul.msk.bf16.vlgmr.msrb.gmra.mxu3 %vm331_vm2, %v2467_v4 }
 0x104   : > { %1156 = vmatpush.bf16.msrb.mxu2 %v1066_v5  ;;  %1130 = vmatpush.bf16.msrb.mxu0 %v1060_v2 }
 0x105   : > { %1169 = vmatpush.bf16.msrb.mxu3 %v1069_v13  ;;  %1143 = vmatpush.bf16.msrb.mxu1 %v1063_v14  ;;  %v2974_v14 = vperm.slane %v468_v62, 0 }
 0x106   : > { %v1366_v60 = vpop.permute.xlu0 %1365  ;;  %v1372_v61 = vpop.permute.xlu1 %1371 }
 0x107   : > { %v1383_v7 = vsel %vm1381_vm7, %v1366_v60, %v1368_v46  ;;  %v1385_v5 = vsel %vm1381_vm7, %v1370_v49, %v1372_v61  ;;  %v1382_v2 = vsel %vm1381_vm7, %v1364_v57, %v1366_v60 }
 0x108   : > { %v1397_v18 = vsel %vm335_vm1, %v1383_v7, 0  ;;  %v1403_v19 = vsel %vm335_vm1, %v1385_v5, 0  ;;  %v1394_v20 = vsel %vm335_vm1, %v1382_v2, 0 }
 0x10e   : > { %v1378_v23 = vpop.permute.xlu0 %1377 }
 0x10f   : > { %v369_v17 = vpop.f32.mrf.mxu0  ;;  %v382_v21 = vpop.f32.mrf.mxu1 }
 0x110   : > { %v490_v0 = vmul.f32 %v2955_v58, %v369_v17  ;;  %v491_v1 = vmul.f32 %v2957_v59, %v382_v21  ;;  %v1376_v17 = vpop.permute.xlu2 %1375  ;;  %v2987_v21 = vld [vmem:[%s3639_s1 + $0x8] sm:$0xff] }
 0x112   : > { %2477 = vmatmul.msk.bf16.vlgmr.msra.gmra.mxu0 %vm331_vm2, %v2476_v11  ;;  %2478 = vmatmul.msk.bf16.vlgmr.msra.gmra.mxu1 %vm331_vm2, %v2476_v11 }
 0x113   : > { %2479 = vmatmul.msk.bf16.vlgmr.msra.gmra.mxu2 %vm331_vm2, %v2476_v11  ;;  %2480 = vmatmul.msk.bf16.vlgmr.msra.gmra.mxu3 %vm331_vm2, %v2476_v11 }
 0x114   : > { %1261 = vmatpush.bf16.msra.mxu1 %v1221_v25  ;;  %1274 = vmatpush.bf16.msra.mxu2 %v1224_v24  ;;  %v470_v24 = vperm.slane %v2987_v21, 0  ;;  %v471_v25 = vperm.slane %v2987_v21, 2 }
 0x115   : > { %1287 = vmatpush.bf16.msra.mxu3 %v1227_v26  ;;  %1248 = vmatpush.bf16.msra.mxu0 %v1218_v27 }
 0x116   : > { %v2924_v30 = vpop.f32.mrf.mxu2  ;;  %v2926_v31 = vpop.f32.mrf.mxu3  ;;  %v3001_v34 = vperm.slane %v470_v24, 0  ;;  %v828_v24 = vperm.slane %v2945_v50, 5 }
 0x117   : > { %v371_v32 = vpop.f32.mrf.mxu0  ;;  %v384_v33 = vpop.f32.mrf.mxu1  ;;  %v493_v22 = vmul.f32 %v2976_v15, %v2926_v31 }
 0x118   : > { %v1374_v31 = vpop.permute.xlu1 %1373  ;;  %v1380_v35 = vpop.permute.xlu2 %1379 }
 0x119   : > { %v1389_v49 = vsel %vm1381_vm7, %v1378_v23, %v1380_v35  ;;  %v1544_v57 = vpop.permute.xlu0 %1543 }
 0x11e   : > { %v397_v36 = vpop.f32.mrf.mxu2  ;;  %v410_v37 = vpop.f32.mrf.mxu3 }
 0x11f   : > { %v2930_v40 = vpop.f32.mrf.mxu0  ;;  %v2932_v41 = vpop.f32.mrf.mxu1  ;;  %v472_v36 = vperm.slane %v2987_v21, 4  ;;  %v473_v37 = vperm.slane %v2987_v21, 6 }
 0x120   : > { %v494_v38 = vmul.f32 %v3001_v34, %v2930_v40  ;;  %v1546_v62 = vpop.permute.xlu1 %1545  ;;  %v1540_v5 = vpop.permute.xlu2 %1539 }
 0x121   : > { %v3019_v40 = vperm.slane %v472_v36, 0 }
 0x122   : > { %2481 = vmatmul.msk.bf16.vlgmr.msrb.gmra.mxu0 %vm331_vm2, %v2476_v11  ;;  %2482 = vmatmul.msk.bf16.vlgmr.msrb.gmra.mxu1 %vm331_vm2, %v2476_v11 }
 0x123   : > { %2483 = vmatmul.msk.bf16.vlgmr.msrb.gmra.mxu2 %vm331_vm2, %v2476_v11  ;;  %2484 = vmatmul.msk.bf16.vlgmr.msrb.gmra.mxu3 %vm331_vm2, %v2476_v11  ;;  %v492_v11 = vmul.f32 %v2974_v14, %v2924_v30  ;;  %v3003_v30 = vperm.slane %v471_v25, 0  ;;  %v829_v25 = vperm.slane %v2945_v50, 7 }
 0x124   : > { %1300 = vmatpush.bf16.msrb.mxu0 %v1230_v44  ;;  %1313 = vmatpush.bf16.msrb.mxu1 %v1233_v45  ;;  %v1386_v44 = vsel %vm1381_vm7, %v1372_v61, %v1374_v31  ;;  %v1387_v45 = vsel %vm1381_vm7, %v1374_v31, %v1376_v17  ;;  %v1415_v61 = vsel %vm335_vm1, %v1389_v49, 0  ;;  %v830_v49 = vperm.slane %v2987_v21, 1 }
 0x125   : > { %1326 = vmatpush.bf16.msrb.mxu2 %v1236_v47  ;;  %1339 = vmatpush.bf16.msrb.mxu3 %v1239_v48  ;;  %v495_v39 = vmul.f32 %v3003_v30, %v2932_v41  ;;  %v1388_v48 = vsel %vm1381_vm7, %v1376_v17, %v1378_v23  ;;  %v1406_v41 = vsel %vm335_vm1, %v1386_v44, 0  ;;  %v2494_v23 = vld [vmem:[%s3640_s2 + $0x18] sm:$0xf] }
 0x126   : > { %v2951_v53 = vpop.f32.mrf.mxu2  ;;  %v2953_v54 = vpop.f32.mrf.mxu3  ;;  %v1412_v60 = vsel %vm335_vm1, %v1388_v48, 0 }
 0x127   : > { %v423_v55 = vpop.f32.mrf.mxu0  ;;  %v436_v56 = vpop.f32.mrf.mxu1  ;;  %v496_v63 = vmul.f32 %v3019_v40, %v2951_v53 }
 0x128   : > { %v3021_v55 = vperm.slane %v473_v37, 0  ;;  %v1409_v56 = vsel %vm335_vm1, %v1387_v45, 0  ;;  %v1542_v53 = vpop.permute.xlu0 %1541 }
 0x129   : > { %v1559_v17 = vsel %vm1557_vm8, %v1542_v53, %v1544_v57 }
 0x12a   : > { %v1573_v35 = vsel %vm335_vm1, %v1559_v17, 0 }
 0x12e   : > { %v449_v3 = vpop.f32.mrf.mxu2  ;;  %v462_v4 = vpop.f32.mrf.mxu3 }
 0x12f   : > { %v563_v8 = vpop.f32.mrf.mxu0  ;;  %v576_v12 = vpop.f32.mrf.mxu1 }
 0x130   : > { %v2970_v10 = vadd.f32 %v563_v8, %v490_v0  ;;  %v2972_v13 = vadd.f32 %v576_v12, %v491_v1  ;;  %v497_v0 = vmul.f32 %v3021_v55, %v2953_v54  ;;  %v826_v12 = vperm.slane %v2945_v50, 1 }
 0x132   : > { %2486 = vmatmul.msk.bf16.vlgmr.msra.gmra.mxu0 %vm331_vm2, %v2485_v9  ;;  %2487 = vmatmul.msk.bf16.vlgmr.msra.gmra.mxu1 %vm331_vm2, %v2485_v9  ;;  %v3041_v2 = vperm.slane %v826_v12, 1 }
 0x133   : > { %2488 = vmatmul.msk.bf16.vlgmr.msra.gmra.mxu2 %vm331_vm2, %v2485_v9  ;;  %2489 = vmatmul.msk.bf16.vlgmr.msra.gmra.mxu3 %vm331_vm2, %v2485_v9 }
 0x134   : > { %1437 = vmatpush.bf16.msra.mxu1 %v1397_v18  ;;  %1450 = vmatpush.bf16.msra.mxu2 %v1400_v16  ;;  %v1548_v16 = vpop.permute.xlu1 %1547 }
 0x135   : > { %1463 = vmatpush.bf16.msra.mxu3 %v1403_v19  ;;  %1424 = vmatpush.bf16.msra.mxu0 %v1394_v20  ;;  %v1560_v20 = vsel %vm1557_vm8, %v1544_v57, %v1546_v62 }
 0x136   : > { %v589_v26 = vpop.f32.mrf.mxu2  ;;  %v602_v27 = vpop.f32.mrf.mxu3  ;;  %v1576_v31 = vsel %vm335_vm1, %v1560_v20, 0 }
 0x137   : > { %v2997_v28 = vadd.f32 %v589_v26, %v492_v11  ;;  %v2999_v29 = vadd.f32 %v602_v27, %v493_v22  ;;  %v565_v32 = vpop.f32.mrf.mxu0  ;;  %v578_v33 = vpop.f32.mrf.mxu1  ;;  %v1561_v26 = vsel %vm1557_vm8, %v1546_v62, %v1548_v16  ;;  %v1558_v27 = vsel %vm1557_vm8, %v1540_v5, %v1542_v53 }
 0x13e   : > { %v591_v42 = vpop.f32.mrf.mxu2  ;;  %v604_v43 = vpop.f32.mrf.mxu3 }
 0x13f   : > { %v615_v46 = vpop.f32.mrf.mxu0  ;;  %v628_v47 = vpop.f32.mrf.mxu1  ;;  %v3070_v42 = vperm.slane %v828_v24, 1 }
 0x140   : > { %v3015_v51 = vadd.f32 %v615_v46, %v494_v38  ;;  %v3017_v52 = vadd.f32 %v628_v47, %v495_v39  ;;  %v1570_v38 = vsel %vm335_vm1, %v1558_v27, 0  ;;  %v1552_v39 = vpop.permute.xlu2 %1551 }
 0x142   : > { %2490 = vmatmul.msk.bf16.vlgmr.msrb.gmra.mxu0 %vm331_vm2, %v2485_v9  ;;  %2491 = vmatmul.msk.bf16.vlgmr.msrb.gmra.mxu1 %vm331_vm2, %v2485_v9 }
 0x143   : > { %2492 = vmatmul.msk.bf16.vlgmr.msrb.gmra.mxu2 %vm331_vm2, %v2485_v9  ;;  %2493 = vmatmul.msk.bf16.vlgmr.msrb.gmra.mxu3 %vm331_vm2, %v2485_v9  ;;  %v827_v9 = vperm.slane %v2945_v50, 3  ;;  %v1579_v50 = vsel %vm335_vm1, %v1561_v26, 0 }
 0x144   : > { %1476 = vmatpush.bf16.msrb.mxu0 %v1406_v41  ;;  %1489 = vmatpush.bf16.msrb.mxu1 %v1409_v56  ;;  %v831_v41 = vperm.slane %v2987_v21, 3 }
 0x145   : > { %1502 = vmatpush.bf16.msrb.mxu2 %v1412_v60  ;;  %1515 = vmatpush.bf16.msrb.mxu3 %v1415_v61  ;;  %v3043_v54 = vperm.slane %v827_v9, 1  ;;  %v1550_v60 = vpop.permute.xlu1 %1549  ;;  %v3084_v61 = vperm.slane %v830_v49, 1  ;;  %v833_v9 = vperm.slane %v2987_v21, 7 }
 0x146   : > { %v641_v1 = vpop.f32.mrf.mxu2  ;;  %v654_v3 = vpop.f32.mrf.mxu3  ;;  %v3086_v62 = vperm.slane %v831_v41, 1 }
 0x147   : > { %v3035_v4 = vadd.f32 %v641_v1, %v496_v63  ;;  %v3037_v6 = vadd.f32 %v654_v3, %v497_v0  ;;  %v617_v7 = vpop.f32.mrf.mxu0  ;;  %v630_v8 = vpop.f32.mrf.mxu1  ;;  %v1562_v3 = vsel %vm1557_vm8, %v1548_v16, %v1550_v60 }
 0x148   : > { %v1556_v63 = vpop.permute.xlu2 %1555  ;;  %v1563_v7 = vsel %vm1557_vm8, %v1550_v60, %v1552_v39 }
 0x149   : > { %v1585_v16 = vsel %vm335_vm1, %v1563_v7, 0 }
 0x14d   : > { %v1714_v24 = vpop.permute.xlu1 %1713 }
 0x14e   : > { %v643_v18 = vpop.f32.mrf.mxu2  ;;  %v656_v19 = vpop.f32.mrf.mxu3 }
 0x14f   : > { %v731_v11 = vpop.f32.mrf.mxu0  ;;  %v744_v22 = vpop.f32.mrf.mxu1  ;;  %v1582_v19 = vsel %vm335_vm1, %v1562_v3, 0 }
 0x150   : > { %v850_v32 = vmul.f32 %v3041_v2, %v731_v11  ;;  %v851_v33 = vmul.f32 %v3043_v54, %v744_v22 }
 0x152   : > { %v3059_v36 = vadd.f32 %v850_v32, %v2970_v10  ;;  %v3062_v37 = vadd.f32 %v851_v33, %v2972_v13  ;;  %2495 = vmatmul.msk.bf16.vlgmr.msra.gmra.mxu0 %vm331_vm2, %v2494_v23  ;;  %2496 = vmatmul.msk.bf16.vlgmr.msra.gmra.mxu1 %vm331_vm2, %v2494_v23  ;;  %v3072_v10 = vperm.slane %v829_v25, 1  ;;  %v1554_v13 = vpop.permute.xlu0 %1553 }
 0x153   : > { %2497 = vmatmul.msk.bf16.vlgmr.msra.gmra.mxu2 %vm331_vm2, %v2494_v23  ;;  %2498 = vmatmul.msk.bf16.vlgmr.msra.gmra.mxu3 %vm331_vm2, %v2494_v23  ;;  %v1565_v5 = vsel %vm1557_vm8, %v1554_v13, %v1556_v63 }
 0x154   : > { %1613 = vmatpush.bf16.msra.mxu1 %v1573_v35  ;;  %1626 = vmatpush.bf16.msra.mxu2 %v1576_v31  ;;  %v1591_v22 = vsel %vm335_vm1, %v1565_v5, 0  ;;  %v1708_v35 = vpop.permute.xlu2 %1707 }
 0x155   : > { %1639 = vmatpush.bf16.msra.mxu3 %v1579_v50  ;;  %1600 = vmatpush.bf16.msra.mxu0 %v1570_v38 }
 0x156   : > { %v757_v43 = vpop.f32.mrf.mxu2  ;;  %v770_v44 = vpop.f32.mrf.mxu3 }
 0x157   : > { %v852_v45 = vmul.f32 %v3070_v42, %v757_v43  ;;  %v853_v46 = vmul.f32 %v3072_v10, %v770_v44  ;;  %v733_v47 = vpop.f32.mrf.mxu0  ;;  %v746_v48 = vpop.f32.mrf.mxu1 }
 0x158   : > { %v2503_v48 = vld [vmem:[%s3640_s2 + $0x1c] sm:$0xf] }
 0x159   : > { %v3079_v56 = vadd.f32 %v852_v45, %v2997_v28  ;;  %v3082_v57 = vadd.f32 %v853_v46, %v2999_v29  ;;  %v832_v28 = vperm.slane %v2987_v21, 5  ;;  %v1564_v29 = vsel %vm1557_vm8, %v1552_v39, %v1554_v13  ;;  %v1716_v39 = vpop.permute.xlu1 %1715 }
 0x15a   : > { %v1712_v20 = vpop.permute.xlu0 %1711  ;;  %v1588_v21 = vsel %vm335_vm1, %v1564_v29, 0 }
 0x15b   : > { %v3110_v25 = vperm.slane %v832_v28, 1  ;;  %v1728_v44 = vsel %vm1725_vm9, %v1712_v20, %v1714_v24 }
 0x15c   : > { %v1744_v60 = vsel %vm335_vm1, %v1728_v44, 0  ;;  %v1720_v3 = vpop.permute.xlu2 %1719 }
 0x15e   : > { %v759_v0 = vpop.f32.mrf.mxu2  ;;  %v772_v1 = vpop.f32.mrf.mxu3 }
 0x15f   : > { %v783_v8 = vpop.f32.mrf.mxu0  ;;  %v796_v12 = vpop.f32.mrf.mxu1 }
 0x160   : > { %v854_v53 = vmul.f32 %v3084_v61, %v783_v8  ;;  %v855_v18 = vmul.f32 %v3086_v62, %v796_v12 }
 0x162   : > { %v3099_v17 = vadd.f32 %v854_v53, %v3015_v51  ;;  %v3102_v11 = vadd.f32 %v855_v18, %v3017_v52  ;;  %2499 = vmatmul.msk.bf16.vlgmr.msrb.gmra.mxu0 %vm331_vm2, %v2494_v23  ;;  %2500 = vmatmul.msk.bf16.vlgmr.msrb.gmra.mxu1 %vm331_vm2, %v2494_v23  ;;  %v3112_v51 = vperm.slane %v833_v9, 1  ;;  %v1710_v38 = vpop.permute.xlu0 %1709  ;;  %v1718_v18 = vpop.permute.xlu1 %1717 }
 0x163   : > { %2501 = vmatmul.msk.bf16.vlgmr.msrb.gmra.mxu2 %vm331_vm2, %v2494_v23  ;;  %2502 = vmatmul.msk.bf16.vlgmr.msrb.gmra.mxu3 %vm331_vm2, %v2494_v23  ;;  %v1727_v45 = vsel %vm1725_vm9, %v1710_v38, %v1712_v20 }
 0x164   : > { %1652 = vmatpush.bf16.msrb.mxu0 %v1582_v19  ;;  %1665 = vmatpush.bf16.msrb.mxu1 %v1585_v16  ;;  %v1741_v63 = vsel %vm335_vm1, %v1727_v45, 0  ;;  %v1724_v16 = vpop.permute.xlu2 %1723 }
 0x165   : > { %1678 = vmatpush.bf16.msrb.mxu2 %v1588_v21  ;;  %1691 = vmatpush.bf16.msrb.mxu3 %v1591_v22  ;;  %v1730_v22 = vsel %vm1725_vm9, %v1716_v39, %v1718_v18 }
 0x166   : > { %v809_v52 = vpop.f32.mrf.mxu2  ;;  %v822_v26 = vpop.f32.mrf.mxu3 }
 0x167   : > { %v856_v27 = vmul.f32 %v3110_v25, %v809_v52  ;;  %v857_v32 = vmul.f32 %v3112_v51, %v822_v26  ;;  %v785_v33 = vpop.f32.mrf.mxu0  ;;  %v798_v31 = vpop.f32.mrf.mxu1 }
 0x169   : > { %v3117_v50 = vadd.f32 %v856_v27, %v3035_v4  ;;  %v3120_v23 = vadd.f32 %v857_v32, %v3037_v6  ;;  %v1729_v4 = vsel %vm1725_vm9, %v1714_v24, %v1716_v39  ;;  %v1726_v6 = vsel %vm1725_vm9, %v1708_v35, %v1710_v38 }
 0x16a   : > { %v1747_v0 = vsel %vm335_vm1, %v1729_v4, 0  ;;  %v1738_v1 = vsel %vm335_vm1, %v1726_v6, 0  ;;  %v1722_v19 = vpop.permute.xlu0 %1721  ;;  %v1731_v24 = vsel %vm1725_vm9, %v1718_v18, %v1720_v3 }
 0x16b   : > { %v1732_v27 = vsel %vm1725_vm9, %v1720_v3, %v1722_v19  ;;  %v1733_v32 = vsel %vm1725_vm9, %v1722_v19, %v1724_v16  ;;  %v1753_v31 = vsel %vm335_vm1, %v1731_v24, 0 }
 0x16c   : > { %v1756_v35 = vsel %vm335_vm1, %v1732_v27, 0  ;;  %v1759_v38 = vsel %vm335_vm1, %v1733_v32, 0 }
 0x16e   : > { %v811_v13 = vpop.f32.mrf.mxu2  ;;  %v824_v43 = vpop.f32.mrf.mxu3 }
 0x16f   : > { %v931_v46 = vpop.f32.mrf.mxu0  ;;  %v944_v47 = vpop.f32.mrf.mxu1 }
 0x170   : > { %v1026_v49 = vmul.f32 %v931_v46, %v2955_v58  ;;  %v1027_v41 = vmul.f32 %v944_v47, %v2957_v59 }
 0x172   : > { %2504 = vmatmul.msk.bf16.vlgmr.msra.gmra.mxu0 %vm331_vm2, %v2503_v48  ;;  %2505 = vmatmul.msk.bf16.vlgmr.msra.gmra.mxu1 %vm331_vm2, %v2503_v48  ;;  %v1034_v7 = vadd.f32 %v1026_v49, %v3059_v36  ;;  %v1035_v8 = vadd.f32 %v1027_v41, %v3062_v37 }
 0x173   : > { %2506 = vmatmul.msk.bf16.vlgmr.msra.gmra.mxu2 %vm331_vm2, %v2503_v48  ;;  %2507 = vmatmul.msk.bf16.vlgmr.msra.gmra.mxu3 %vm331_vm2, %v2503_v48 }
 0x174   : > { %1781 = vmatpush.bf16.msra.mxu1 %v1741_v63  ;;  %1794 = vmatpush.bf16.msra.mxu2 %v1744_v60  ;;  %v2512_v60 = vld [vmem:[%s3640_s2 + $0x20] sm:$0xf] }
 0x175   : > { %1807 = vmatpush.bf16.msra.mxu3 %v1747_v0  ;;  %1768 = vmatpush.bf16.msra.mxu0 %v1738_v1 }
 0x176   : > { %v957_v12 = vpop.f32.mrf.mxu2  ;;  %v970_v28 = vpop.f32.mrf.mxu3 }
 0x177   : > { %v1028_v9 = vmul.f32 %v957_v12, %v2974_v14  ;;  %v1029_v29 = vmul.f32 %v970_v28, %v2976_v15  ;;  %v933_v5 = vpop.f32.mrf.mxu0  ;;  %v946_v53 = vpop.f32.mrf.mxu1 }
 0x179   : > { %v1036_v36 = vadd.f32 %v1028_v9, %v3079_v56  ;;  %v1037_v37 = vadd.f32 %v1029_v29, %v3082_v57  ;;  %v1750_v57 = vsel %vm335_vm1, %v1730_v22, 0 }
 0x17e   : > { %v959_v20 = vpop.f32.mrf.mxu2  ;;  %v972_v21 = vpop.f32.mrf.mxu3 }
 0x17f   : > { %v983_v52 = vpop.f32.mrf.mxu0  ;;  %v996_v26 = vpop.f32.mrf.mxu1 }
 0x180   : > { %v1030_v33 = vmul.f32 %v983_v52, %v3001_v34  ;;  %v1031_v56 = vmul.f32 %v996_v26, %v3003_v30 }
 0x182   : > { %2508 = vmatmul.msk.bf16.vlgmr.msrb.gmra.mxu0 %vm331_vm2, %v2503_v48  ;;  %2509 = vmatmul.msk.bf16.vlgmr.msrb.gmra.mxu1 %vm331_vm2, %v2503_v48  ;;  %v1038_v39 = vadd.f32 %v1030_v33, %v3099_v17  ;;  %v1039_v13 = vadd.f32 %v1031_v56, %v3102_v11 }
 0x183   : > { %2510 = vmatmul.msk.bf16.vlgmr.msrb.gmra.mxu2 %vm331_vm2, %v2503_v48  ;;  %2511 = vmatmul.msk.bf16.vlgmr.msrb.gmra.mxu3 %vm331_vm2, %v2503_v48 }
 0x184   : > { %1820 = vmatpush.bf16.msrb.mxu0 %v1750_v57  ;;  %1833 = vmatpush.bf16.msrb.mxu1 %v1753_v31 }
 0x185   : > { %1846 = vmatpush.bf16.msrb.mxu2 %v1756_v35  ;;  %1859 = vmatpush.bf16.msrb.mxu3 %v1759_v38 }
 0x186   : > { %v1009_v43 = vpop.f32.mrf.mxu2  ;;  %v1022_v44 = vpop.f32.mrf.mxu3 }
 0x187   : > { %v1032_v45 = vmul.f32 %v1009_v43, %v3019_v40  ;;  %v1033_v46 = vmul.f32 %v1022_v44, %v3021_v55  ;;  %v985_v47 = vpop.f32.mrf.mxu0  ;;  %v998_v4 = vpop.f32.mrf.mxu1 }
 0x189   : > { %v1040_v17 = vadd.f32 %v1032_v45, %v3117_v50  ;;  %v1041_v11 = vadd.f32 %v1033_v46, %v3120_v23 }
 0x18e   : > { %v1011_v6 = vpop.f32.mrf.mxu2  ;;  %v1024_v49 = vpop.f32.mrf.mxu3 }
 0x18f   : > { %v1080_v41 = vpop.f32.mrf.mxu0  ;;  %v1093_v48 = vpop.f32.mrf.mxu1 }
 0x190   : > { %v1175_v63 = vadd.f32 %v1080_v41, %v1034_v7  ;;  %v1176_v0 = vadd.f32 %v1093_v48, %v1035_v8 }
 0x192   : > { %2513 = vmatmul.msk.bf16.vlgmr.msra.gmra.mxu0 %vm331_vm2, %v2512_v60  ;;  %2514 = vmatmul.msk.bf16.vlgmr.msra.gmra.mxu1 %vm331_vm2, %v2512_v60 }
 0x193   : > { %2515 = vmatmul.msk.bf16.vlgmr.msra.gmra.mxu2 %vm331_vm2, %v2512_v60  ;;  %2516 = vmatmul.msk.bf16.vlgmr.msra.gmra.mxu3 %vm331_vm2, %v2512_v60 }
 0x196   : > { %v1106_v50 = vpop.f32.mrf.mxu2  ;;  %v1119_v23 = vpop.f32.mrf.mxu3 }
 0x197   : > { %v1177_v1 = vadd.f32 %v1106_v50, %v1036_v36  ;;  %v1178_v3 = vadd.f32 %v1119_v23, %v1037_v37  ;;  %v1082_v12 = vpop.f32.mrf.mxu0  ;;  %v1095_v28 = vpop.f32.mrf.mxu1 }
 0x19e   : > { %v1108_v9 = vpop.f32.mrf.mxu2  ;;  %v1121_v29 = vpop.f32.mrf.mxu3 }
 0x19f   : > { %v1132_v5 = vpop.f32.mrf.mxu0  ;;  %v1145_v53 = vpop.f32.mrf.mxu1 }
 0x1a0   : > { %v1179_v7 = vadd.f32 %v1132_v5, %v1038_v39  ;;  %v1180_v8 = vadd.f32 %v1145_v53, %v1039_v13 }
 0x1a2   : > { %2517 = vmatmul.msk.bf16.vlgmr.msrb.gmra.mxu0 %vm331_vm2, %v2512_v60  ;;  %2518 = vmatmul.msk.bf16.vlgmr.msrb.gmra.mxu1 %vm331_vm2, %v2512_v60 }
 0x1a3   : > { %2519 = vmatmul.msk.bf16.vlgmr.msrb.gmra.mxu2 %vm331_vm2, %v2512_v60  ;;  %2520 = vmatmul.msk.bf16.vlgmr.msrb.gmra.mxu3 %vm331_vm2, %v2512_v60 }
 0x1a6   : > { %v1158_v18 = vpop.f32.mrf.mxu2  ;;  %v1171_v19 = vpop.f32.mrf.mxu3 }
 0x1a7   : > { %v1181_v36 = vadd.f32 %v1158_v18, %v1040_v17  ;;  %v1182_v37 = vadd.f32 %v1171_v19, %v1041_v11  ;;  %v1134_v16 = vpop.f32.mrf.mxu0  ;;  %v1147_v20 = vpop.f32.mrf.mxu1 }
 0x1ae   : > { %v1160_v21 = vpop.f32.mrf.mxu2  ;;  %v1173_v22 = vpop.f32.mrf.mxu3 }
 0x1af   : > { %v1250_v24 = vpop.f32.mrf.mxu0  ;;  %v1263_v52 = vpop.f32.mrf.mxu1 }
 0x1b0   : > { %v1345_v26 = vmul.f32 %v1250_v24, %v3041_v2  ;;  %v1346_v27 = vmul.f32 %v1263_v52, %v3043_v54 }
 0x1b2   : > { %v1353_v32 = vadd.f32 %v1345_v26, %v1175_v63  ;;  %v1354_v33 = vadd.f32 %v1346_v27, %v1176_v0 }
 0x1b6   : > { %v1276_v56 = vpop.f32.mrf.mxu2  ;;  %v1289_v57 = vpop.f32.mrf.mxu3 }
 0x1b7   : > { %v1347_v31 = vmul.f32 %v1276_v56, %v3070_v42  ;;  %v1348_v35 = vmul.f32 %v1289_v57, %v3072_v10  ;;  %v1252_v38 = vpop.f32.mrf.mxu0  ;;  %v1265_v39 = vpop.f32.mrf.mxu1 }
 0x1b9   : > { %v1355_v13 = vadd.f32 %v1347_v31, %v1177_v1  ;;  %v1356_v43 = vadd.f32 %v1348_v35, %v1178_v3 }
 0x1be   : > { %v1278_v44 = vpop.f32.mrf.mxu2  ;;  %v1291_v45 = vpop.f32.mrf.mxu3 }
 0x1bf   : > { %v1302_v46 = vpop.f32.mrf.mxu0  ;;  %v1315_v47 = vpop.f32.mrf.mxu1 }
 0x1c0   : > { %v1349_v4 = vmul.f32 %v1302_v46, %v3084_v61  ;;  %v1350_v17 = vmul.f32 %v1315_v47, %v3086_v62 }
 0x1c2   : > { %v3182_v11 = vadd.f32 %v1349_v4, %v1179_v7  ;;  %v1358_v6 = vadd.f32 %v1350_v17, %v1180_v8 }
 0x1c6   : > { %v1328_v49 = vpop.f32.mrf.mxu2  ;;  %v1341_v41 = vpop.f32.mrf.mxu3 }
 0x1c7   : > { %v1351_v48 = vmul.f32 %v1328_v49, %v3110_v25  ;;  %v1352_v60 = vmul.f32 %v1341_v41, %v3112_v51  ;;  %v1304_v63 = vpop.f32.mrf.mxu0  ;;  %v1317_v0 = vpop.f32.mrf.mxu1 }
 0x1c9   : > { %v3186_v50 = vadd.f32 %v1351_v48, %v1181_v36  ;;  %v3188_v23 = vadd.f32 %v1352_v60, %v1182_v37 }
 0x1ce   : > { %v1330_v1 = vpop.f32.mrf.mxu2  ;;  %v1343_v3 = vpop.f32.mrf.mxu3 }
 0x1cf   : > { %v1426_v12 = vpop.f32.mrf.mxu0  ;;  %v1439_v28 = vpop.f32.mrf.mxu1 }
 0x1d0   : > { %v1521_v9 = vmul.f32 %v1426_v12, %v2955_v58  ;;  %v1522_v29 = vmul.f32 %v1439_v28, %v2957_v59 }
 0x1d2   : > { %v1529_v5 = vadd.f32 %v1521_v9, %v1353_v32  ;;  %v1530_v53 = vadd.f32 %v1522_v29, %v1354_v33 }
 0x1d6   : > { %v1452_v7 = vpop.f32.mrf.mxu2  ;;  %v1465_v8 = vpop.f32.mrf.mxu3 }
 0x1d7   : > { %v1523_v18 = vmul.f32 %v1452_v7, %v2974_v14  ;;  %v1524_v19 = vmul.f32 %v1465_v8, %v2976_v15  ;;  %v1428_v36 = vpop.f32.mrf.mxu0  ;;  %v1441_v16 = vpop.f32.mrf.mxu1 }
 0x1d9   : > { %v1531_v37 = vadd.f32 %v1523_v18, %v1355_v13  ;;  %v1532_v20 = vadd.f32 %v1524_v19, %v1356_v43 }
 0x1de   : > { %v1454_v21 = vpop.f32.mrf.mxu2  ;;  %v1467_v22 = vpop.f32.mrf.mxu3 }
 0x1df   : > { %v1478_v24 = vpop.f32.mrf.mxu0  ;;  %v1491_v52 = vpop.f32.mrf.mxu1 }
 0x1e0   : > { %v1526_v58 = vmul.f32 %v1491_v52, %v3003_v30  ;;  %v1525_v19 = vmul.f32 %v1478_v24, %v3001_v34 }
 0x1e2   : > { %v1534_v26 = vadd.f32 %v1526_v58, %v1358_v6  ;;  %v1533_v16 = vadd.f32 %v1525_v19, %v3182_v11 }
 0x1e6   : > { %v1504_v59 = vpop.f32.mrf.mxu2  ;;  %v1517_v27 = vpop.f32.mrf.mxu3 }
 0x1e7   : > { %v1480_v32 = vpop.f32.mrf.mxu0  ;;  %v1493_v33 = vpop.f32.mrf.mxu1 }
 0x1e8   : > { %v1528_v33 = vmul.f32 %v1517_v27, %v3021_v55 }
 0x1ee   : > { %v1506_v56 = vpop.f32.mrf.mxu2  ;;  %v1519_v57 = vpop.f32.mrf.mxu3 }
 0x1ef   : > { %v1602_v14 = vpop.f32.mrf.mxu0  ;;  %v1615_v31 = vpop.f32.mrf.mxu1 }
 0x1f0   : > { %v1697_v63 = vadd.f32 %v1602_v14, %v1529_v5  ;;  %v1698_v0 = vadd.f32 %v1615_v31, %v1530_v53 }
 0x1f6   : > { %v1628_v15 = vpop.f32.mrf.mxu2  ;;  %v1641_v35 = vpop.f32.mrf.mxu3 }
 0x1f7   : > { %v1604_v38 = vpop.f32.mrf.mxu0  ;;  %v1617_v39 = vpop.f32.mrf.mxu1  ;;  %v1699_v12 = vadd.f32 %v1628_v15, %v1531_v37  ;;  %v1700_v53 = vadd.f32 %v1641_v35, %v1532_v20 }
 0x1fe   : > { %v1630_v13 = vpop.f32.mrf.mxu2  ;;  %v1643_v43 = vpop.f32.mrf.mxu3 }
 0x1ff   : > { %v1654_v44 = vpop.f32.mrf.mxu0  ;;  %v1667_v45 = vpop.f32.mrf.mxu1 }
 0x200   : > { %v1701_v20 = vadd.f32 %v1654_v44, %v1533_v16  ;;  %v1702_v14 = vadd.f32 %v1667_v45, %v1534_v26 }
 0x206   : > { %v1680_v46 = vpop.f32.mrf.mxu2  ;;  %v1693_v47 = vpop.f32.mrf.mxu3 }
 0x207   : > { %v1656_v30 = vpop.f32.mrf.mxu0  ;;  %v1669_v4 = vpop.f32.mrf.mxu1 }
 0x20e   : > { %v1682_v17 = vpop.f32.mrf.mxu2  ;;  %v1695_v6 = vpop.f32.mrf.mxu3 }
 0x20f   : > { %v1770_v49 = vpop.f32.mrf.mxu0  ;;  %v1783_v41 = vpop.f32.mrf.mxu1 }
 0x210   : > { %v1865_v48 = vmul.f32 %v1770_v49, %v3041_v2  ;;  %v1866_v60 = vmul.f32 %v1783_v41, %v3043_v54 }
 0x212   : > { %v3197_v28 = vadd.f32 %v1865_v48, %v1697_v63  ;;  %v3199_v9 = vadd.f32 %v1866_v60, %v1698_v0  ;;  %v2598_v63 = vmov 4096.0  }
 0x213   : > { %2562 = vrcp.f32 %v2598_v63 }
 0x214   : > { %v1897_v2 = vmul.f32 %v3197_v28, %v3197_v28  ;;  %v1898_v54 = vmul.f32 %v3199_v9, %v3199_v9  ;;  %v1881_v36 = vadd.f32 %v3199_v9, %v3197_v28 }
 0x216   : > { %v1796_v1 = vpop.f32.mrf.mxu2  ;;  %v1809_v3 = vpop.f32.mrf.mxu3  ;;  %v1905_v34 = vadd.f32 %v1898_v54, %v1897_v2 }
 0x217   : > { %v1867_v29 = vmul.f32 %v1796_v1, %v3070_v42  ;;  %v1772_v7 = vpop.f32.mrf.mxu0  ;;  %v1785_v8 = vpop.f32.mrf.mxu1  ;;  %v1868_v5 = vmul.f32 %v1809_v3, %v3072_v10  ;;  %v1527_v10 = vmul.f32 %v1504_v59, %v3019_v40 }
 0x219   : > { %v3202_v18 = vadd.f32 %v1867_v29, %v1699_v12  ;;  %v3216_v24 = vadd.f32 %v1868_v5, %v1700_v53  ;;  %v1535_v35 = vadd.f32 %v1527_v10, %v3186_v50  ;;  %v2563_v0 = vpop.eup %2562 }
 0x21a   : > { %v1922_v1 = vmul.f32 4096.0, %v2563_v0  ;;  %vm1926_vm10 = vweird.f32 %v2563_v0 }
 0x21b   : > { %v1899_v42 = vmul.f32 %v3202_v18, %v3202_v18  ;;  %v1882_v22 = vadd.f32 %v1881_v36, %v3202_v18  ;;  %v1900_v15 = vmul.f32 %v3216_v24, %v3216_v24 }
 0x21c   : > { %v1923_v29 = vsub.f32 1.0, %v1922_v1 }
 0x21d   : > { %v1906_v56 = vadd.f32 %v1905_v34, %v1899_v42  ;;  %v1883_v31 = vadd.f32 %v1882_v22, %v3216_v24 }
 0x21e   : > { %v1798_v37 = vpop.f32.mrf.mxu2  ;;  %v1811_v21 = vpop.f32.mrf.mxu3  ;;  %v1924_v5 = vmul.f32 %v2563_v0, %v1923_v29 }
 0x21f   : > { %v1822_v52 = vpop.f32.mrf.mxu0  ;;  %v1835_v58 = vpop.f32.mrf.mxu1  ;;  %v1907_v59 = vadd.f32 %v1906_v56, %v1900_v15  ;;  %v1942_v15 = vld [vmem:[%s3641_s3] sm:$0xff] }
 0x220   : > { %v1869_v32 = vmul.f32 %v1822_v52, %v3084_v61  ;;  %v1870_v57 = vmul.f32 %v1835_v58, %v3086_v62  ;;  %v1536_v61 = vadd.f32 %v1528_v33, %v3188_v23  ;;  %v1703_v62 = vadd.f32 %v1680_v46, %v1535_v35 }
 0x221   : > { %v1925_v37 = vadd.f32 %v2563_v0, %v1924_v5 }
 0x222   : > { %v3222_v11 = vadd.f32 %v1869_v32, %v1701_v20  ;;  %v3232_v27 = vadd.f32 %v1870_v57, %v1702_v14  ;;  %v1704_v39 = vadd.f32 %v1693_v47, %v1536_v61 }
 0x223   : > { %v1927_v52 = vsel %vm1926_vm10, %v2563_v0, %v1925_v37 }
 0x224   : > { %v1901_v40 = vmul.f32 %v3222_v11, %v3222_v11  ;;  %v1884_v55 = vadd.f32 %v1883_v31, %v3222_v11  ;;  %v1902_v30 = vmul.f32 %v3232_v27, %v3232_v27  ;;  %v2600_v31 = vmov 0  }
 0x225   : > { %2560 = vset.pattern.permute.xlu2 %v2600_v31  ;;  %2561 = vset.pattern.permute.xlu0 %v2600_v31 }
 0x226   : > { %v1848_v38 = vpop.f32.mrf.mxu2  ;;  %v1861_v26 = vpop.f32.mrf.mxu3  ;;  %v1908_v45 = vadd.f32 %v1907_v59, %v1901_v40  ;;  %v1885_v17 = vadd.f32 %v1884_v55, %v3232_v27  ;;  %v1958_v55 = vld [vmem:[%s3642_s4] sm:$0xff] }
 0x227   : > { %v1871_v13 = vmul.f32 %v1848_v38, %v3110_v25  ;;  %v1872_v43 = vmul.f32 %v1861_v26, %v3112_v51  ;;  %v1824_v44 = vpop.f32.mrf.mxu0  ;;  %v1837_v50 = vpop.f32.mrf.mxu1  ;;  %v2601_v38 = vmov 0.0  }
 0x228   : > { %v1909_v25 = vadd.f32 %v1908_v45, %v1902_v30  ;;  %2356 = vst [vmem:[%s3259_s30] sm:$0xff] %v2601_v38  ;;  %v1988_v50 = vld [vmem:[%s3269_s9 + $0x8] sm:$0xff]  ;;  %v1989_v45 = vld [vmem:[%s3269_s9 + $0x10] sm:$0xff]  ;;  %v1990_v30 = vld [vmem:[%s3269_s9 + $0x18] sm:$0xff] }
 0x229   : > { %v3238_v23 = vadd.f32 %v1871_v13, %v1703_v62  ;;  %v3240_v4 = vadd.f32 %v1872_v43, %v1704_v39  ;;  %2365 = vst [vmem:[%s3259_s30 + $0x48] sm:$0xff] %v2601_v38 }
 0x22b   : > { %v1886_v46 = vadd.f32 %v1885_v17, %v3238_v23  ;;  %v1903_v47 = vmul.f32 %v3238_v23, %v3238_v23  ;;  %v1904_v6 = vmul.f32 %v3240_v4, %v3240_v4 }
 0x22d   : > { %v1887_v51 = vadd.f32 %v1886_v46, %v3240_v4  ;;  %v1910_v49 = vadd.f32 %v1909_v25, %v1903_v47  ;;  %v1991_v46 = vld [vmem:[%s3269_s9 + $0x20] sm:$0xff] }
 0x22e   : > { %v1850_v41 = vpop.f32.mrf.mxu2  ;;  %v1863_v48 = vpop.f32.mrf.mxu3 }
 0x22f   : > { %1888 = vadd.xlane.f32.xlu0 %v1887_v51  ;;  %v1911_v60 = vadd.f32 %v1910_v49, %v1904_v6 }
 0x231   : > { %1912 = vadd.xlane.f32.xlu1 %v1911_v60 }
 0x2a2   : > { %v1889_v3 = vpop.xlane.xlu0 %1888 }
 0x2a3   : > { %v1890_v12 = vrot.slane %v1889_v3, 4 }
 0x2a4   : > { %v1913_v7 = vpop.xlane.xlu1 %1912 }
 0x2a5   : > { %v1891_v8 = vadd.f32 %v1890_v12, %v1889_v3  ;;  %v1914_v19 = vrot.slane %v1913_v7, 4 }
 0x2a7   : > { %v1892_v2 = vrot.slane %v1891_v8, 2  ;;  %v1915_v54 = vadd.f32 %v1914_v19, %v1913_v7 }
 0x2a9   : > { %v1916_v53 = vrot.slane %v1915_v54, 2  ;;  %v1893_v36 = vadd.f32 %v1892_v2, %v1891_v8 }
 0x2ab   : > { %v1917_v42 = vadd.f32 %v1916_v53, %v1915_v54  ;;  %v1894_v16 = vrot.slane %v1893_v36, 1 }
 0x2ad   : > { %v1895_v21 = vadd.f32 %v1894_v16, %v1893_v36  ;;  %v1918_v34 = vrot.slane %v1917_v42, 1 }
 0x2af   : > { %2532 = vpush %v1895_v21  ;;  %v1919_v22 = vadd.f32 %v1918_v34, %v1917_v42 }
 0x2b1   : > { %2534 = vpush %v1919_v22 }
 0x2b2   : > { %2536 = vpush %v1927_v52 }
 0x2e0   : > { %s2533_s11 = spop %2532 }
 0x2e2   : > { %s2535_s12 = spop %2534 }
 0x2e3   : > { %s2537_s13 = spop %2536 }
 0x2e4   : > { %s1929_s14 = smul.f32 %s2537_s13, %s2533_s11 }
 0x2e5   : > { %s1938_s15 = smul.f32 %s2537_s13, %s2535_s12 }
 0x2e6   : > { %s1939_s16 = smul.f32 %s1929_s14, %s1929_s14  ;;  %v1959_v61 = vstv %s1929_s14 }
 0x2e8   : > { %s1940_s17 = ssub.f32 %s1938_s15, %s1939_s16 }
 0x2ea   : > { %s1941_s19 = smax.f32 %s2599_s18, %s1940_s17 }
 0x2eb   : > { %s1943_s20 = sadd.f32 1e-05, %s1941_s19 }
 0x2ed   : > { %v1944_v58 = vstv %s1943_s20 }
 0x2ee   : > { %2564 = vrsqrt.f32 %v1944_v58  ;;  %vm1951_vm12 = vweird.f32 %v1944_v58 }
 0x2f4   : > { %v2565_v10 = vpop.eup %2564 }
 0x2f5   : > { %v1946_v20 = vmul.f32 %v2565_v10, %v1944_v58  ;;  %vm1952_vm11 = vweird.f32 %v2565_v10 }
 0x2f6   : > { %vm1953_vm13 = vmor %vm1951_vm12, %vm1952_vm11 }
 0x2f7   : > { %v1947_v32 = vmul.f32 %v2565_v10, %v1946_v20 }
 0x2f9   : > { %v1948_v33 = vmul.f32 0.5, %v1947_v32 }
 0x2fb   : > { %v1949_v56 = vsub.f32 1.5, %v1948_v33  ;;  %v1992_v33 = vld [vmem:[%s3269_s9 + $0x28] sm:$0xff] }
 0x2fd   : > { %v1950_v57 = vmul.f32 %v2565_v10, %v1949_v56 }
 0x2ff   : > { %v1954_v14 = vsel %vm1953_vm13, %v2565_v10, %v1950_v57 }
 0x300   : > { %2538 = vpush %v1954_v14 }
 0x331   : > { %s2539_s25 = spop %2538 }
 0x332   : > { %v1956_v35 = vstv %s2539_s25 }
 0x333   : > { %v1957_v40 = vmul.f32 %v1956_v35, %v1942_v15 }
 0x335   : > { %1964 = vperm.xlu2 %2560, %v1957_v40   ;;  %v1960_v59 = vmul.f32 %v1959_v61, %v1957_v40 }
 0x337   : > { %v1961_v62 = vsub.f32 %v1958_v55, %v1960_v59 }
 0x33d   : > { %1977 = vperm.xlu2 %2560, %v1961_v62  }
 0x38f   : > { %v3263_v26 = vpop.permute.xlu2 %1964 }
 0x390   : > { %v1967_v39 = vmul.f32 %v3263_v26, %v3197_v28  ;;  %v1968_v13 = vmul.f32 %v3263_v26, %v3199_v9  ;;  %v1969_v43 = vmul.f32 %v3263_v26, %v3202_v18  ;;  %v1970_v44 = vmul.f32 %v3263_v26, %v3216_v24 }
 0x391   : > { %v1971_v5 = vmul.f32 %v3263_v26, %v3222_v11  ;;  %v1972_v61 = vmul.f32 %v3263_v26, %v3232_v27 }
 0x397   : > { %v3282_v17 = vpop.permute.xlu2 %1977 }
 0x398   : > { %v1980_v47 = vadd.f32 %v3282_v17, %v1967_v39  ;;  %v1981_v25 = vadd.f32 %v3282_v17, %v1968_v13  ;;  %v1982_v28 = vadd.f32 %v3282_v17, %v1969_v43  ;;  %v1983_v9 = vadd.f32 %v3282_v17, %v1970_v44 }
 0x399   : > { %v1984_v34 = vadd.f32 %v3282_v17, %v1971_v5  ;;  %v1985_v27 = vadd.f32 %v3282_v17, %v1972_v61 }
 0x39a   : > { %v3289_v51 = vadd.f32 %v1988_v50, %v1980_v47  ;;  %v3291_v18 = vadd.f32 %v1989_v45, %v1981_v25  ;;  %v3293_v6 = vadd.f32 %v1990_v30, %v1982_v28  ;;  %v3295_v24 = vadd.f32 %v1991_v46, %v1983_v9  ;;  %v1993_v46 = vld [vmem:[%s3269_s9 + $0x30] sm:$0xff] }
 0x39b   : > { %v3345_v38 = vadd.f32 %v1992_v33, %v1984_v34 }
 0x39c   : > { %v3298_v49 = vmul.f32 0.70710677, %v3289_v51  ;;  %v3301_v41 = vmul.f32 0.70710677, %v3291_v18  ;;  %v3304_v48 = vmul.f32 0.70710677, %v3293_v6 }
 0x39d   : > { %v3307_v60 = vmul.f32 0.70710677, %v3295_v24 }
 0x39e   : > { %v2020_v63 = vmul.f32 %v3298_v49, %v3298_v49  ;;  %v2060_v0 = vmul.f32 %v3301_v41, %v3301_v41  ;;  %v2100_v1 = vmul.f32 %v3304_v48, %v3304_v48 }
 0x39f   : > { %v2140_v3 = vmul.f32 %v3307_v60, %v3307_v60 }
 0x3a0   : > { %v3317_v12 = vmin.f32 %v2020_v63, 16.0  ;;  %v3319_v29 = vmin.f32 %v2060_v0, 16.0  ;;  %v3321_v7 = vmin.f32 %v2100_v1, 16.0 }
 0x3a1   : > { %v3323_v8 = vmin.f32 %v2140_v3, 16.0  ;;  %v1973_v3 = vmul.f32 %v3263_v26, %v3238_v23 }
 0x3a2   : > { %v2022_v19 = vmul.f32 2.1237322e-06, %v3317_v12  ;;  %v2033_v2 = vmul.f32 3.8918573e-05, %v3317_v12  ;;  %v2062_v54 = vmul.f32 2.1237322e-06, %v3319_v29 }
 0x3a3   : > { %v2073_v53 = vmul.f32 3.8918573e-05, %v3319_v29  ;;  %v2102_v36 = vmul.f32 2.1237322e-06, %v3321_v7  ;;  %v2113_v42 = vmul.f32 3.8918573e-05, %v3321_v7 }
 0x3a4   : > { %v2023_v16 = vadd.f32 0.00028619796, %v2022_v19  ;;  %v2034_v37 = vadd.f32 0.001143296, %v2033_v2  ;;  %v2063_v21 = vadd.f32 0.00028619796, %v2062_v54 }
 0x3a5   : > { %v2074_v22 = vadd.f32 0.001143296, %v2073_v53  ;;  %v2103_v52 = vadd.f32 0.00028619796, %v2102_v36  ;;  %v2114_v58 = vadd.f32 0.001143296, %v2113_v42  ;;  %v3365_v42 = vadd.f32 %v1993_v46, %v1985_v27 }
 0x3a6   : > { %v2024_v10 = vmul.f32 %v2023_v16, %v3317_v12  ;;  %v2035_v20 = vmul.f32 %v2034_v37, %v3317_v12  ;;  %v2064_v11 = vmul.f32 %v2063_v21, %v3319_v29  ;;  %v2142_v32 = vmul.f32 2.1237322e-06, %v3323_v8 }
 0x3a7   : > { %v2075_v56 = vmul.f32 %v2074_v22, %v3319_v29  ;;  %v2104_v57 = vmul.f32 %v2103_v52, %v3321_v7  ;;  %v2115_v14 = vmul.f32 %v2114_v58, %v3321_v7  ;;  %v2153_v31 = vmul.f32 3.8918573e-05, %v3323_v8 }
 0x3a8   : > { %v2025_v15 = vadd.f32 0.0036580483, %v2024_v10  ;;  %v2036_v35 = vadd.f32 0.014752088, %v2035_v20  ;;  %v2065_v40 = vadd.f32 0.0036580483, %v2064_v11  ;;  %v1974_v58 = vmul.f32 %v3263_v26, %v3240_v4 }
 0x3a9   : > { %v2076_v59 = vadd.f32 0.014752088, %v2075_v56  ;;  %v2105_v55 = vadd.f32 0.0036580483, %v2104_v57  ;;  %v2116_v62 = vadd.f32 0.014752088, %v2115_v14  ;;  %v1986_v10 = vadd.f32 %v3282_v17, %v1973_v3 }
 0x3aa   : > { %v2026_v39 = vmul.f32 %v2025_v15, %v3317_v12  ;;  %v2037_v13 = vmul.f32 %v2036_v35, %v3317_v12  ;;  %v2143_v43 = vadd.f32 0.00028619796, %v2142_v32  ;;  %v2066_v44 = vmul.f32 %v2065_v40, %v3319_v29  ;;  %v1994_v32 = vld [vmem:[%s3269_s9 + $0x38] sm:$0xff] }
 0x3ab   : > { %v2077_v50 = vmul.f32 %v2076_v59, %v3319_v29  ;;  %v2117_v45 = vmul.f32 %v2116_v62, %v3321_v7  ;;  %v2154_v30 = vadd.f32 0.001143296, %v2153_v31  ;;  %v2106_v25 = vmul.f32 %v2105_v55, %v3321_v7  ;;  %v1995_v62 = vld [vmem:[%s3269_s9 + $0x40] sm:$0xff] }
 0x3ac   : > { %v2038_v47 = vadd.f32 0.112945676, %v2037_v13  ;;  %v2144_v28 = vmul.f32 %v2143_v43, %v3323_v8  ;;  %v2027_v9 = vadd.f32 0.05243302, %v2026_v39  ;;  %v3360_v19 = vmul.f32 0.70710677, %v3345_v38 }
 0x3ad   : > { %v2078_v63 = vadd.f32 0.112945676, %v2077_v50  ;;  %v2118_v0 = vadd.f32 0.112945676, %v2117_v45  ;;  %v2155_v1 = vmul.f32 %v2154_v30, %v3323_v8  ;;  %v2067_v54 = vadd.f32 0.05243302, %v2066_v44 }
 0x3ae   : > { %v2039_v2 = vmul.f32 %v2038_v47, %v3317_v12  ;;  %v2107_v37 = vadd.f32 0.05243302, %v2106_v25  ;;  %v2145_v21 = vadd.f32 0.0036580483, %v2144_v28  ;;  %v2028_v34 = vmul.f32 %v2027_v9, %v3317_v12 }
 0x3af   : > { %v2079_v5 = vmul.f32 %v2078_v63, %v3319_v29  ;;  %v2119_v53 = vmul.f32 %v2118_v0, %v3321_v7  ;;  %v2156_v36 = vadd.f32 0.014752088, %v2155_v1  ;;  %v2180_v11 = vmul.f32 %v3360_v19, %v3360_v19 }
 0x3b0   : > { %v2040_v16 = vadd.f32 0.4994258, %v2039_v2  ;;  %v2068_v33 = vmul.f32 %v2067_v54, %v3319_v29  ;;  %v3380_v31 = vmul.f32 0.70710677, %v3365_v42  ;;  %v2108_v26 = vmul.f32 %v2107_v37, %v3321_v7 }
 0x3b1   : > { %v2080_v23 = vadd.f32 0.4994258, %v2079_v5  ;;  %v2120_v22 = vadd.f32 0.4994258, %v2119_v53  ;;  %v2157_v52 = vmul.f32 %v2156_v36, %v3323_v8  ;;  %v2146_v15 = vmul.f32 %v2145_v21, %v3323_v8 }
 0x3b2   : > { %v2041_v20 = vmul.f32 %v2040_v16, %v3317_v12  ;;  %v2029_v35 = vadd.f32 0.18741608, %v2028_v34  ;;  %v1987_v59 = vadd.f32 %v3282_v17, %v1974_v58  ;;  %v3391_v55 = vadd.f32 %v1994_v32, %v1986_v10 }
 0x3b3   : > { %v2081_v56 = vmul.f32 %v2080_v23, %v3319_v29  ;;  %v2121_v57 = vmul.f32 %v2120_v22, %v3321_v7  ;;  %v2158_v14 = vadd.f32 0.112945676, %v2157_v52  ;;  %v2069_v39 = vadd.f32 0.18741608, %v2068_v33 }
 0x3b4   : > { %v3382_v4 = vadd.f32 1.0, %v2041_v20  ;;  %v3397_v43 = vmin.f32 %v2180_v11, 16.0  ;;  %v2109_v44 = vadd.f32 0.18741608, %v2108_v26  ;;  %v2147_v50 = vadd.f32 0.05243302, %v2146_v15 }
 0x3b5   : > { %v3386_v40 = vadd.f32 1.0, %v2081_v56  ;;  %v3388_v61 = vadd.f32 1.0, %v2121_v57  ;;  %v2159_v13 = vmul.f32 %v2158_v14, %v3323_v8  ;;  %v2220_v45 = vmul.f32 %v3380_v31, %v3380_v31 }
 0x3b6   : > { %2566 = vrcp.f32 %v3382_v4  ;;  %v2030_v30 = vmul.f32 %v2029_v35, %v3317_v12  ;;  %v3403_v17 = vadd.f32 %v1995_v62, %v1987_v59  ;;  %v3406_v46 = vmul.f32 0.70710677, %v3391_v55 }
 0x3b7   : > { %2568 = vrcp.f32 %v3386_v40  ;;  %v2070_v27 = vmul.f32 %v2069_v39, %v3319_v29  ;;  %v2160_v47 = vadd.f32 0.4994258, %v2159_v13  ;;  %v2182_v25 = vmul.f32 2.1237322e-06, %v3397_v43 }
 0x3b8   : > { %2570 = vrcp.f32 %v3388_v61  ;;  %v2110_v9 = vmul.f32 %v2109_v44, %v3321_v7  ;;  %v2148_v63 = vmul.f32 %v2147_v50, %v3323_v8  ;;  %v2193_v12 = vmul.f32 3.8918573e-05, %v3397_v43 }
 0x3b9   : > { %v3415_v0 = vmin.f32 %v2220_v45, 16.0  ;;  %v2031_v3 = vadd.f32 1.1283791, %v2030_v30  ;;  %v2161_v29 = vmul.f32 %v2160_v47, %v3323_v8  ;;  %v2183_v54 = vadd.f32 0.00028619796, %v2182_v25 }
 0x3ba   : > { %v3423_v5 = vmul.f32 0.5, %v3289_v51  ;;  %v3426_v7 = vmul.f32 0.5, %v3291_v18  ;;  %v3429_v53 = vmul.f32 0.5, %v3293_v6  ;;  %v3432_v36 = vmul.f32 0.70710677, %v3403_v17 }
 0x3bb   : > { %v2071_v37 = vadd.f32 1.1283791, %v2070_v27  ;;  %v3436_v21 = vadd.f32 1.0, %v2161_v29  ;;  %v2184_v34 = vmul.f32 %v2183_v54, %v3397_v43  ;;  %v2194_v23 = vadd.f32 0.001143296, %v2193_v12 }
 0x3bc   : > { %v3410_v28 = vpop.eup %2566  ;;  %v2149_v18 = vadd.f32 0.18741608, %v2148_v63  ;;  %v2260_v6 = vmul.f32 %v3406_v46, %v3406_v46  ;;  %v3444_v52 = vmul.f32 %v2031_v3, %v3298_v49  ;;  %v2111_v58 = vadd.f32 1.1283791, %v2110_v9 }
 0x3bd   : > { %v3417_v1 = vpop.eup %2568  ;;  %v2044_v2 = vmul.f32 %v3410_v28, %v3382_v4  ;;  %2572 = vrcp.f32 %v3436_v21  ;;  %v2222_v10 = vmul.f32 2.1237322e-06, %v3415_v0  ;;  %vm2048_vm14 = vweird.f32 %v3382_v4 }
 0x3be   : > { %v3434_v16 = vpop.eup %2570  ;;  %v2084_v51 = vmul.f32 %v3417_v1, %v3386_v40  ;;  %v2052_v20 = vand.u32 2147483647, %v3382_v4  ;;  %v2054_v11 = vand.u32 2147483648, %v3382_v4  ;;  %v3454_v33 = vmul.f32 %v2071_v37, %v3301_v41 }
 0x3bf   : > { %v2045_v22 = vsub.f32 1.0, %v2044_v2  ;;  %v2124_v32 = vmul.f32 %v3434_v16, %v3388_v61  ;;  %v2092_v49 = vand.u32 2147483647, %v3386_v40  ;;  %v2185_v56 = vadd.f32 0.0036580483, %v2184_v34 }
 0x3c0   : > { %v2195_v57 = vmul.f32 %v2194_v23, %v3397_v43  ;;  %v2085_v26 = vsub.f32 1.0, %v2084_v51  ;;  %v2094_v15 = vand.u32 2147483648, %v3386_v40  ;;  %v2150_v35 = vmul.f32 %v2149_v18, %v3323_v8 }
 0x3c1   : > { %v2046_v14 = vmul.f32 %v3410_v28, %v2045_v22  ;;  %v3462_v59 = vmul.f32 %v2111_v58, %v3304_v48  ;;  %v2134_v62 = vand.u32 2147483648, %v3388_v61  ;;  %v2223_v41 = vadd.f32 0.00028619796, %v2222_v10 }
 0x3c2   : > { %v2196_v39 = vadd.f32 0.014752088, %v2195_v57  ;;  %v2055_v13 = vor.u32 1.1754944e-38, %v2054_v11  ;;  %v2125_v44 = vsub.f32 1.0, %v2124_v32  ;;  %v2132_v50 = vand.u32 2147483647, %v3388_v61 }
 0x3c3   : > { %v3466_v45 = vmin.f32 %v2260_v6, 16.0  ;;  %v3468_v30 = vpop.eup %2572  ;;  %vm2049_vm15 = vweird.f32 %v3410_v28  ;;  %vm3471_vm0 = vcmp.eq.f32.partialorder %v2052_v20, 8.507059e+37  ;;  %vm2088_vm1 = vweird.f32 %v3386_v40 }
 0x3c4   : > { %v2186_v48 = vmul.f32 %v2185_v56, %v3397_v43  ;;  %v2197_v8 = vmul.f32 %v2196_v39, %v3397_v43  ;;  %v2233_v47 = vmul.f32 3.8918573e-05, %v3415_v0  ;;  %v2047_v25 = vadd.f32 %v3410_v28, %v2046_v14  ;;  %vm3492_vm5 = vmor %vm2048_vm14, %vm2049_vm15 }
 0x3c5   : > { %v2086_v9 = vmul.f32 %v3417_v1, %v2085_v26  ;;  %v2151_v63 = vadd.f32 1.1283791, %v2150_v35  ;;  %v2164_v12 = vmul.f32 %v3468_v30, %v3436_v21  ;;  %v2095_v3 = vor.u32 1.1754944e-38, %v2094_v15 }
 0x3c6   : > { %vm2128_vm2 = vweird.f32 %v3388_v61  ;;  %v2135_v2 = vor.u32 1.1754944e-38, %v2134_v62  ;;  %v2198_v29 = vadd.f32 0.112945676, %v2197_v8  ;;  %v2224_v54 = vmul.f32 %v2223_v41, %v3415_v0 }
 0x3c7   : > { %vm2089_vm3 = vweird.f32 %v3417_v1  ;;  %v2126_v37 = vmul.f32 %v3434_v16, %v2125_v44  ;;  %vm2129_vm4 = vweird.f32 %v3434_v16  ;;  %v2165_v34 = vsub.f32 1.0, %v2164_v12 }
 0x3c8   : > { %v2187_v22 = vadd.f32 0.05243302, %v2186_v48  ;;  %v2199_v51 = vmul.f32 %v2198_v29, %v3397_v43  ;;  %v2234_v18 = vadd.f32 0.001143296, %v2233_v47  ;;  %v2262_v6 = vmul.f32 2.1237322e-06, %v3466_v45  ;;  %vm3528_vm8 = vmor %vm2088_vm1, %vm2089_vm3 }
 0x3c9   : > { %v2051_v58 = vsel %vm3492_vm5, %v3410_v28, %v2047_v25  ;;  %v2087_v10 = vadd.f32 %v3417_v1, %v2086_v9  ;;  %vm3502_vm6 = vcmp.eq.f32.partialorder %v2092_v49, 8.507059e+37  ;;  %v3507_v4 = vmul.f32 %v2151_v63, %v3307_v60  ;;  %vm3547_vm10 = vmor %vm2128_vm2, %vm2129_vm4 }
 0x3ca   : > { %v2273_v11 = vmul.f32 3.8918573e-05, %v3466_v45  ;;  %vm3510_vm7 = vcmp.eq.f32.partialorder %v2132_v50, 8.507059e+37  ;;  %v2200_v56 = vadd.f32 0.4994258, %v2199_v51  ;;  %v2235_v14 = vmul.f32 %v2234_v18, %v3415_v0 }
 0x3cb   : > { %v2225_v57 = vadd.f32 0.0036580483, %v2224_v54  ;;  %v2263_v28 = vadd.f32 0.00028619796, %v2262_v6  ;;  %v2127_v26 = vadd.f32 %v3434_v16, %v2126_v37  ;;  %v2166_v49 = vmul.f32 %v3468_v30, %v2165_v34 }
 0x3cc   : > { %v2274_v15 = vadd.f32 0.001143296, %v2273_v11  ;;  %v2300_v60 = vmul.f32 %v3432_v36, %v3432_v36  ;;  %v2188_v35 = vmul.f32 %v2187_v22, %v3397_v43  ;;  %v2201_v62 = vmul.f32 %v2200_v56, %v3397_v43 }
 0x3cd   : > { %v2236_v39 = vadd.f32 0.014752088, %v2235_v14  ;;  %v2264_v41 = vmul.f32 %v2263_v28, %v3466_v45  ;;  %v2056_v44 = vsel %vm3471_vm0, %v2055_v13, %v2051_v58  ;;  %vm2168_vm9 = vweird.f32 %v3436_v21 }
 0x3ce   : > { %v2174_v48 = vand.u32 2147483648, %v3436_v21  ;;  %v2275_v8 = vmul.f32 %v2274_v15, %v3466_v45  ;;  %v2091_v47 = vsel %vm3528_vm8, %v3417_v1, %v2087_v10  ;;  %v3538_v27 = vadd.f32 1.0, %v2201_v62 }
 0x3cf   : > { %v2237_v13 = vmul.f32 %v2236_v39, %v3415_v0  ;;  %v3541_v25 = vmin.f32 %v2300_v60, 16.0  ;;  %v2167_v9 = vadd.f32 %v3468_v30, %v2166_v49  ;;  %vm2169_vm11 = vweird.f32 %v3468_v30 }
 0x3d0   : > { %v2265_v63 = vadd.f32 0.0036580483, %v2264_v41  ;;  %v2276_v1 = vadd.f32 0.014752088, %v2275_v8  ;;  %v2131_v12 = vsel %vm3547_vm10, %v3434_v16, %v2127_v26  ;;  %v2189_v29 = vadd.f32 0.18741608, %v2188_v35  ;;  %vm3564_vm12 = vmor %vm2168_vm9, %vm2169_vm11 }
 0x3d1   : > { %2574 = vrcp.f32 %v3538_v27  ;;  %v2226_v54 = vmul.f32 %v2225_v57, %v3415_v0  ;;  %v2057_v61 = vmul.f32 %v2056_v44, %v3444_v52  ;;  %v2172_v37 = vand.u32 2147483647, %v3436_v21 }
 0x3d2   : > { %v2175_v34 = vor.u32 1.1754944e-38, %v2174_v48  ;;  %v2238_v23 = vadd.f32 0.112945676, %v2237_v13  ;;  %v2096_v22 = vsel %vm3502_vm6, %v2095_v3, %v2091_v47  ;;  %v2266_v16 = vmul.f32 %v2265_v63, %v3466_v45 }
 0x3d3   : > { %v2277_v18 = vmul.f32 %v2276_v1, %v3466_v45  ;;  %v2302_v6 = vmul.f32 2.1237322e-06, %v3541_v25  ;;  %v2136_v52 = vsel %vm3510_vm7, %v2135_v2, %v2131_v12  ;;  %v2171_v58 = vsel %vm3564_vm12, %v3468_v30, %v2167_v9 }
 0x3d4   : > { %v2239_v3 = vmul.f32 %v2238_v23, %v3415_v0  ;;  %v2313_v21 = vmul.f32 3.8918573e-05, %v3541_v25  ;;  %v2190_v10 = vmul.f32 %v2189_v29, %v3397_v43  ;;  %v2227_v20 = vadd.f32 0.05243302, %v2226_v54 }
 0x3d5   : > { %v2278_v11 = vadd.f32 0.112945676, %v2277_v18  ;;  %v2303_v56 = vadd.f32 0.00028619796, %v2302_v6  ;;  %v2097_v57 = vmul.f32 %v2096_v22, %v3454_v33  ;;  %vm2173_vm13 = vcmp.eq.f32.partialorder %v2172_v37, 8.507059e+37 }
 0x3d6   : > { %v2240_v14 = vadd.f32 0.4994258, %v2239_v3  ;;  %v2314_v28 = vadd.f32 0.001143296, %v2313_v21  ;;  %v2521_v2 = vclamps-f32 %v2057_v61, 1.0  ;;  %v2176_v26 = vsel %vm2173_vm13, %v2175_v34, %v2171_v58 }
 0x3d7   : > { %v2575_v32 = vpop.eup %2574  ;;  %v2267_v49 = vadd.f32 0.05243302, %v2266_v16  ;;  %v2279_v30 = vmul.f32 %v2278_v11, %v3466_v45  ;;  %v2137_v15 = vmul.f32 %v2136_v52, %v3462_v59  ;;  %v2304_v35 = vmul.f32 %v2303_v56, %v3541_v25 }
 0x3d8   : > { %v2204_v60 = vmul.f32 %v2575_v32, %v3538_v27  ;;  %v2241_v43 = vmul.f32 %v2240_v14, %v3415_v0  ;;  %v2191_v62 = vadd.f32 1.1283791, %v2190_v10  ;;  %v2228_v33 = vmul.f32 %v2227_v20, %v3415_v0 }
 0x3d9   : > { %v2280_v39 = vadd.f32 0.4994258, %v2279_v30  ;;  %v2315_v41 = vmul.f32 %v2314_v28, %v3541_v25  ;;  %v2177_v44 = vmul.f32 %v2176_v26, %v3507_v4  ;;  %v2212_v48 = vand.u32 2147483647, %v3538_v27 }
 0x3da   : > { %v2205_v50 = vsub.f32 1.0, %v2204_v60  ;;  %v3589_v8 = vadd.f32 1.0, %v2241_v43  ;;  %v2214_v59 = vand.u32 2147483648, %v3538_v27  ;;  %v2268_v47 = vmul.f32 %v2267_v49, %v3466_v45 }
 0x3db   : > { %v2281_v13 = vmul.f32 %v2280_v39, %v3466_v45  ;;  %v2316_v40 = vadd.f32 0.014752088, %v2315_v41  ;;  %vm2209_vm14 = vweird.f32 %v2575_v32  ;;  %v2305_v63 = vadd.f32 0.0036580483, %v2304_v35 }
 0x3dc   : > { %v2206_v9 = vmul.f32 %v2575_v32, %v2205_v50  ;;  %2576 = vrcp.f32 %v3589_v8  ;;  %v2522_v1 = vclamps-f32 %v2097_v57, 1.0  ;;  %v2523_v12 = vclamps-f32 %v2137_v15, 1.0 }
 0x3dd   : > { %v2229_v4 = vadd.f32 0.18741608, %v2228_v33  ;;  %v3595_v29 = vadd.f32 1.0, %v2281_v13  ;;  %v2192_v54 = vmul.f32 %v2191_v62, %v3360_v19  ;;  %vm2208_vm15 = vweird.f32 %v3538_v27 }
 0x3de   : > { %v2207_v61 = vadd.f32 %v2575_v32, %v2206_v9  ;;  %v2317_v37 = vmul.f32 %v2316_v40, %v3541_v25  ;;  %v2524_v34 = vclamps-f32 %v2177_v44, 1.0  ;;  %vm2210_vm0 = vmor %vm2208_vm15, %vm2209_vm14  ;;  %v2215_v23 = vor.u32 1.1754944e-38, %v2214_v59 }
 0x3df   : > { %v2269_v22 = vadd.f32 0.18741608, %v2268_v47  ;;  %2578 = vrcp.f32 %v3595_v29  ;;  %vm2213_vm1 = vcmp.eq.f32.partialorder %v2212_v48, 8.507059e+37  ;;  %v2306_v16 = vmul.f32 %v2305_v63, %v3541_v25 }
 0x3e0   : > { %v2211_v51 = vsel %vm2210_vm0, %v2575_v32, %v2207_v61  ;;  %v2340_v18 = vadd.f32 1.0, %v2521_v2  ;;  %v2318_v52 = vadd.f32 0.112945676, %v2317_v37  ;;  %v2341_v58 = vadd.f32 1.0, %v2522_v1 }
 0x3e1   : > { %v2216_v6 = vsel %vm2213_vm1, %v2215_v23, %v2211_v51  ;;  %v2342_v19 = vadd.f32 1.0, %v2523_v12  ;;  %v2007_v27 = vmul.f32 0.5, %v3295_v24  ;;  %v2008_v21 = vmul.f32 0.5, %v3345_v38 }
 0x3e2   : > { %v2577_v3 = vpop.eup %2576  ;;  %v2217_v10 = vmul.f32 %v2216_v6, %v2192_v54  ;;  %v2230_v20 = vmul.f32 %v2229_v4, %v3415_v0  ;;  %v2270_v56 = vmul.f32 %v2269_v22, %v3466_v45  ;;  %v2319_v57 = vmul.f32 %v2318_v52, %v3541_v25 }
 0x3e3   : > { %v2244_v11 = vmul.f32 %v2577_v3, %v3589_v8  ;;  %v2343_v14 = vadd.f32 1.0, %v2524_v34  ;;  %v2307_v32 = vadd.f32 0.05243302, %v2306_v16  ;;  %v2348_v2 = vmul.f32 %v2340_v18, %v3423_v5 }
 0x3e4   : > { %v2525_v28 = vclamps-f32 %v2217_v10, 1.0  ;;  %v2349_v24 = vmul.f32 %v2341_v58, %v3426_v7  ;;  %v2320_v49 = vadd.f32 0.4994258, %v2319_v57  ;;  %v2350_v0 = vmul.f32 %v2342_v19, %v3429_v53 }
 0x3e5   : > { %v2579_v26 = vpop.eup %2578  ;;  %v2245_v38 = vsub.f32 1.0, %v2244_v11  ;;  %v2351_v30 = vmul.f32 %v2343_v14, %v2007_v27  ;;  %v2231_v15 = vadd.f32 1.1283791, %v2230_v20  ;;  %v2254_v45 = vand.u32 2147483648, %v3589_v8  ;;  %2357 = vst [vmem:[%s3259_s30 + $0x8] sm:$0xff] %v2348_v2 }
 0x3e6   : > { %v2284_v60 = vmul.f32 %v2579_v26, %v3595_v29  ;;  %v2344_v43 = vadd.f32 1.0, %v2525_v28  ;;  %vm2249_vm2 = vweird.f32 %v2577_v3  ;;  %v2252_v5 = vand.u32 2147483647, %v3589_v8  ;;  %2358 = vst [vmem:[%s3259_s30 + $0x10] sm:$0xff] %v2349_v24 }
 0x3e7   : > { %v2246_v35 = vmul.f32 %v2577_v3, %v2245_v38  ;;  %v2321_v7 = vmul.f32 %v2320_v49, %v3541_v25  ;;  %vm2248_vm3 = vweird.f32 %v3589_v8  ;;  %v2271_v53 = vadd.f32 1.1283791, %v2270_v56  ;;  %2359 = vst [vmem:[%s3259_s30 + $0x18] sm:$0xff] %v2350_v0 }
 0x3e8   : > { %v2285_v62 = vsub.f32 1.0, %v2284_v60  ;;  %v2352_v33 = vmul.f32 %v2344_v43, %v2008_v21  ;;  %v2294_v41 = vand.u32 2147483648, %v3595_v29  ;;  %v2308_v44 = vmul.f32 %v2307_v32, %v3541_v25  ;;  %2360 = vst [vmem:[%s3259_s30 + $0x20] sm:$0xff] %v2351_v30  ;;  %vm2250_vm4 = vmor %vm2248_vm3, %vm2249_vm2 }
 0x3e9   : > { %v2247_v39 = vadd.f32 %v2577_v3, %v2246_v35  ;;  %v2322_v50 = vadd.f32 1.0, %v2321_v7  ;;  %v2255_v48 = vor.u32 1.1754944e-38, %v2254_v45  ;;  %vm2289_vm5 = vweird.f32 %v2579_v26 }
 0x3ea   : > { %v2286_v59 = vmul.f32 %v2579_v26, %v2285_v62  ;;  %v2292_v47 = vand.u32 2147483647, %v3595_v29  ;;  %2361 = vst [vmem:[%s3259_s30 + $0x28] sm:$0xff] %v2352_v33  ;;  %v2232_v8 = vmul.f32 %v2231_v15, %v3380_v31  ;;  %vm2253_vm6 = vcmp.eq.f32.partialorder %v2252_v5, 8.507059e+37 }
 0x3eb   : > { %v2251_v13 = vsel %vm2250_vm4, %v2577_v3, %v2247_v39  ;;  %2580 = vrcp.f32 %v2322_v50  ;;  %vm2288_vm7 = vweird.f32 %v3595_v29  ;;  %v2295_v1 = vor.u32 1.1754944e-38, %v2294_v41 }
 0x3ec   : > { %v2256_v40 = vsel %vm2253_vm6, %v2255_v48, %v2251_v13  ;;  %v2287_v9 = vadd.f32 %v2579_v26, %v2286_v59  ;;  %vm2290_vm8 = vmor %vm2288_vm7, %vm2289_vm5  ;;  %v2309_v12 = vadd.f32 0.18741608, %v2308_v44  ;;  %v2272_v4 = vmul.f32 %v2271_v53, %v3406_v46 }
 0x3ed   : > { %v2257_v63 = vmul.f32 %v2256_v40, %v2232_v8  ;;  %vm2293_vm9 = vcmp.eq.f32.partialorder %v2292_v47, 8.507059e+37  ;;  %v2009_v23 = vmul.f32 0.5, %v3365_v42  ;;  %v2010_v6 = vmul.f32 0.5, %v3391_v55 }
 0x3ee   : > { %v2291_v54 = vsel %vm2290_vm8, %v2579_v26, %v2287_v9  ;;  %v2310_v22 = vmul.f32 %v2309_v12, %v3541_v25  ;;  %v2334_v19 = vand.u32 2147483648, %v2322_v50  ;;  %v2332_v27 = vand.u32 2147483647, %v2322_v50 }
 0x3ef   : > { %v2526_v61 = vclamps-f32 %v2257_v63, 1.0  ;;  %v2296_v37 = vsel %vm2293_vm9, %v2295_v1, %v2291_v54  ;;  %vm2328_vm11 = vweird.f32 %v2322_v50  ;;  %v2011_v57 = vmul.f32 0.5, %v3403_v17 }
 0x3f0   : > { %v2297_v34 = vmul.f32 %v2296_v37, %v2272_v4  ;;  %v2311_v58 = vadd.f32 1.1283791, %v2310_v22  ;;  %v2335_v25 = vor.u32 1.1754944e-38, %v2334_v19  ;;  %vm2333_vm13 = vcmp.eq.f32.partialorder %v2332_v27, 8.507059e+37 }
 0x3f1   : > { %v2581_v31 = vpop.eup %2580  ;;  %v2345_v51 = vadd.f32 1.0, %v2526_v61 }
 0x3f2   : > { %v2527_v29 = vclamps-f32 %v2297_v34, 1.0  ;;  %v2324_v16 = vmul.f32 %v2581_v31, %v2322_v50  ;;  %vm2329_vm10 = vweird.f32 %v2581_v31  ;;  %v2312_v10 = vmul.f32 %v2311_v58, %v3432_v36 }
 0x3f3   : > { %v2353_v18 = vmul.f32 %v2345_v51, %v2009_v23  ;;  %vm2330_vm12 = vmor %vm2328_vm11, %vm2329_vm10 }
 0x3f4   : > { %v2325_v52 = vsub.f32 1.0, %v2324_v16  ;;  %v2346_v46 = vadd.f32 1.0, %v2527_v29 }
 0x3f5   : > { %2362 = vst [vmem:[%s3259_s30 + $0x30] sm:$0xff] %v2353_v18 }
 0x3f6   : > { %v2326_v3 = vmul.f32 %v2581_v31, %v2325_v52  ;;  %v2354_v21 = vmul.f32 %v2346_v46, %v2010_v6 }
 0x3f8   : > { %v2327_v42 = vadd.f32 %v2581_v31, %v2326_v3  ;;  %2363 = vst [vmem:[%s3259_s30 + $0x38] sm:$0xff] %v2354_v21 }
 0x3fa   : > { %v2331_v20 = vsel %vm2330_vm12, %v2581_v31, %v2327_v42 }
 0x3fb   : > { %v2336_v55 = vsel %vm2333_vm13, %v2335_v25, %v2331_v20 }
 0x3fc   : > { %v2337_v11 = vmul.f32 %v2336_v55, %v2312_v10 }
 0x3fe   : > { %v2528_v56 = vclamps-f32 %v2337_v11, 1.0 }
 0x400   : > { %v2347_v14 = vadd.f32 1.0, %v2528_v56 }
 0x402   : > { %v2355_v28 = vmul.f32 %v2347_v14, %v2011_v57 }
 0x404   : > { %2364 = vst [vmem:[%s3259_s30 + $0x40] sm:$0xff] %v2355_v28 }
 0x405 PF: > { %s16_s21 = sadd.s32 1, %s2588_s21  }
 0x406   : > { %p13_p4 = scmp.ge.s32.totalorder %s16_s21, 4  }
 0x408   :  { %15 = sbr.rel (!%p13_p4) target bundleno = 1 (0x1), region = 85 }

// kernel: up_forward.4
= control target key start
LH: loop header
LB: loop body
LE: loop exit
PB: predicated region body
PF: predicated region fallthrough
CT: control target
= control target key end

     0   :  { %s2556_s18 = smov 0   ;;  %s3546_s0 = inlined_call_operand.vmem [shape: f32[2,8,1280], index: 0, kind: input, shape index: {}]   ;;  %s3547_s1 = inlined_call_operand.vmem [shape: f32[2,1024], index: 1, kind: input, shape index: {}]   ;;  %s3548_s2 = inlined_call_operand.vmem [shape: bf16[9,8,8], index: 2, kind: input, shape index: {}]   ;;  %s3549_s3 = inlined_call_operand.vmem [shape: f32[8,1], index: 3, kind: input, shape index: {}]   ;;  %s3550_s4 = inlined_call_operand.vmem [shape: f32[8,1], index: 4, kind: input, shape index: {}]   ;;  %s3551_s5 = inlined_call_operand.vmem [shape: f32[2,8,1280], index: 5, kind: output, shape index: {}]  }
   0x1 LB: > { %s2358_s19 = sadd.s32 4294967295, %s2512_s18   ;;  %p2362_p0 = scmp.ge.s32.totalorder %s2512_s18, 1  ;;  %s2512_s18 = sphi %s2556_s18, %s15_s18  }
   0x2   : > { %p187_p1 = scmp.lt.s32.totalorder %s2512_s18, 3 }
   0x4   : > { %p188_p2 = pnand %p2362_p0, %p187_p1 }
   0x5   : > { %p215_p3 = scmp.lt.s32.totalorder (!%p188_p2), %s2358_s19, 1  ;;  %s2514_s24 = smov (!%p188_p2), 33  }
   0x6   : > { %191 = sbr.rel (%p188_p2) target bundleno = 1026 (0x402), region = 40  ;;  %s2515_s25 = smov (!%p188_p2), 32  }
   0x7   : > { %s2516_s26 = smov (!%p188_p2), 31   ;;  %s2517_s27 = smov (!%p188_p2), 1  }
   0x8   : > { %s2518_s28 = smov (!%p188_p2), 127   ;;  %s2519_s29 = smov (!%p188_p2), 97  }
   0x9   : > { %s2520_s7 = smov (!%p188_p2), 96   ;;  %s2521_s10 = smov (!%p188_p2), 95  }
   0xa   : > { %s2523_s14 = smov (!%p188_p2), 0.0  }
   0xb   : > { %s3567_s19 = smov (!%p215_p3, %s2358_s19), 1  ;;  %vm275_vm0 = vcmask 269312   ;;  %vm288_vm1 = vcmask 1043456   ;;  %v247_v33 = vld [vmem:[%s3548_s2] sm:$0xf]  ;;  %vm284_vm2 = vcmask 64512  }
   0xc   : > { %s2455_s20 = smul.u32 80, %s3567_s19  ;;  %vm471_vm3 = vcmask 261120   ;;  %vm639_vm4 = vcmask 252928   ;;  %vm839_vm5 = vcmask 7168   ;;  %vm1158_vm6 = vcmask 1039360  }
   0xd   : > { %vm1334_vm7 = vcmask 793600   ;;  %vm1510_vm8 = vcmask 785408   ;;  %vm1678_vm9 = vcmask 777216  }
   0xe   : > { %s2572_s23 = scalar_lea.vmem %s3546_s0, %s2455_s20 }
   0xf   : > { %v228_v0 = vld [vmem:[%s2572_s23 + $0x10] sm:$0xff]  ;;  %v226_v1 = vld [vmem:[%s2572_s23] sm:$0xff]  ;;  %v229_v6 = vld [vmem:[%s2572_s23 + $0x18] sm:$0xff] }
  0x10   : > { %v2576_v2 = vpack.c.bf16 %v228_v0, %v228_v0  ;;  %v238_v3 = vpack.c.bf16 %v226_v1, %v226_v1  ;;  %v230_v4 = vld [vmem:[%s2572_s23 + $0x20] sm:$0xff]  ;;  %v227_v7 = vld [vmem:[%s2572_s23 + $0x8] sm:$0xff]  ;;  %v232_v8 = vld [vmem:[%s2572_s23 + $0x30] sm:$0xff]  ;;  %v2586_v9 = vpack.c.bf16 %v229_v6, %v229_v6 }
  0x11   : > { %v2580_v5 = vpack.c.bf16 %v230_v4, %v230_v4  ;;  %v2588_v10 = vpack.c.bf16 %v227_v7, %v227_v7  ;;  %v2590_v11 = vpack.c.bf16 %v232_v8, %v232_v8  ;;  %v233_v12 = vld [vmem:[%s2572_s23 + $0x38] sm:$0xff]  ;;  %v231_v13 = vld [vmem:[%s2572_s23 + $0x28] sm:$0xff]  ;;  %v234_v14 = vld [vmem:[%s2572_s23 + $0x40] sm:$0xff] }
  0x12   : > { %261 = vrot.lane.b32.xlu0 %v2576_v2, %s2514_s24  ;;  %257 = vrot.lane.b32.xlu1 %v238_v3, %s2514_s24  ;;  %v2598_v15 = vpack.c.bf16 %v233_v12, %v233_v12  ;;  %v2600_v16 = vpack.c.bf16 %v231_v13, %v231_v13  ;;  %v2602_v17 = vpack.c.bf16 %v234_v14, %v234_v14  ;;  %v2373_v8 = vld [vmem:[%s3548_s2 + $0x4] sm:$0xf]  ;;  %v235_v12 = vld [vmem:[%s2572_s23 + $0x48] sm:$0xff] }
  0x13   : > { %265 = vrot.lane.b32.xlu2 %v2580_v5, %s2514_s24 }
  0x1a   : > { %263 = vrot.lane.b32.xlu0 %v2586_v9, %s2514_s24  ;;  %259 = vrot.lane.b32.xlu1 %v2588_v10, %s2514_s24 }
  0x1b   : > { %269 = vrot.lane.b32.xlu2 %v2590_v11, %s2514_s24 }
  0x22   : > { %271 = vrot.lane.b32.xlu0 %v2598_v15, %s2514_s24  ;;  %267 = vrot.lane.b32.xlu1 %v2600_v16, %s2514_s24 }
  0x23   : > { %273 = vrot.lane.b32.xlu2 %v2602_v17, %s2514_s24 }
  0x2a   : > { %457 = vrot.lane.b32.xlu0 %v2576_v2, %s2515_s25  ;;  %459 = vrot.lane.b32.xlu1 %v2586_v9, %s2515_s25 }
  0x2b   : > { %453 = vrot.lane.b32.xlu2 %v238_v3, %s2515_s25 }
  0x32   : > { %455 = vrot.lane.b32.xlu0 %v2588_v10, %s2515_s25  ;;  %461 = vrot.lane.b32.xlu1 %v2580_v5, %s2515_s25 }
  0x33   : > { %465 = vrot.lane.b32.xlu2 %v2590_v11, %s2515_s25 }
  0x3a   : > { %463 = vrot.lane.b32.xlu1 %v2600_v16, %s2515_s25  ;;  %467 = vrot.lane.b32.xlu0 %v2598_v15, %s2515_s25 }
  0x3b   : > { %469 = vrot.lane.b32.xlu2 %v2602_v17, %s2515_s25 }
  0x42   : > { %625 = vrot.lane.b32.xlu0 %v2576_v2, %s2516_s26  ;;  %627 = vrot.lane.b32.xlu1 %v2586_v9, %s2516_s26 }
  0x43   : > { %621 = vrot.lane.b32.xlu2 %v238_v3, %s2516_s26 }
  0x4a   : > { %623 = vrot.lane.b32.xlu0 %v2588_v10, %s2516_s26  ;;  %629 = vrot.lane.b32.xlu1 %v2580_v5, %s2516_s26 }
  0x4b   : > { %633 = vrot.lane.b32.xlu2 %v2590_v11, %s2516_s26 }
  0x52   : > { %631 = vrot.lane.b32.xlu1 %v2600_v16, %s2516_s26  ;;  %635 = vrot.lane.b32.xlu0 %v2598_v15, %s2516_s26 }
  0x53   : > { %637 = vrot.lane.b32.xlu2 %v2602_v17, %s2516_s26 }
  0x5a   : > { %825 = vrot.lane.b32.xlu0 %v2576_v2, %s2517_s27  ;;  %827 = vrot.lane.b32.xlu1 %v2586_v9, %s2517_s27 }
  0x5b   : > { %821 = vrot.lane.b32.xlu2 %v238_v3, %s2517_s27 }
  0x62   : > { %823 = vrot.lane.b32.xlu0 %v2588_v10, %s2517_s27  ;;  %829 = vrot.lane.b32.xlu1 %v2580_v5, %s2517_s27 }
  0x63   : > { %833 = vrot.lane.b32.xlu2 %v2590_v11, %s2517_s27 }
  0x6a   : > { %831 = vrot.lane.b32.xlu1 %v2600_v16, %s2517_s27  ;;  %835 = vrot.lane.b32.xlu0 %v2598_v15, %s2517_s27 }
  0x6b   : > { %837 = vrot.lane.b32.xlu2 %v2602_v17, %s2517_s27  ;;  %s3181_s27 = scalar_lea.vmem %s3551_s5, %s2455_s20 }
  0x6d   : > { %v266_v18 = vpop.permute.xlu2 %265 }
  0x72   : > { %1144 = vrot.lane.b32.xlu0 %v2586_v9, %s2518_s28  ;;  %1146 = vrot.lane.b32.xlu1 %v2580_v5, %s2518_s28 }
  0x73   : > { %1140 = vrot.lane.b32.xlu2 %v2588_v10, %s2518_s28 }
  0x75   : > { %v270_v19 = vpop.permute.xlu2 %269 }
  0x7a   : > { %1142 = vrot.lane.b32.xlu0 %v2576_v2, %s2518_s28  ;;  %1148 = vrot.lane.b32.xlu1 %v2600_v16, %s2518_s28 }
  0x7b   : > { %1152 = vrot.lane.b32.xlu2 %v2598_v15, %s2518_s28 }
  0x7d   : > { %v274_v22 = vpop.permute.xlu2 %273 }
  0x82   : > { %1150 = vrot.lane.b32.xlu1 %v2590_v11, %s2518_s28  ;;  %1154 = vrot.lane.b32.xlu0 %v2602_v17, %s2518_s28 }
  0x84   : > { %v262_v20 = vpop.permute.xlu0 %261  ;;  %v258_v21 = vpop.permute.xlu1 %257 }
  0x85   : > { %v454_v34 = vpop.permute.xlu2 %453 }
  0x8a   : > { %1320 = vrot.lane.b32.xlu0 %v2586_v9, %s2519_s29  ;;  %1322 = vrot.lane.b32.xlu1 %v2580_v5, %s2519_s29 }
  0x8c   : > { %v264_v23 = vpop.permute.xlu0 %263  ;;  %v260_v24 = vpop.permute.xlu1 %259 }
  0x8d   : > { %v276_v25 = vsel %vm275_vm0, %v258_v21, %v260_v24  ;;  %v277_v26 = vsel %vm275_vm0, %v260_v24, %v262_v20  ;;  %v278_v27 = vsel %vm275_vm0, %v262_v20, %v264_v23  ;;  %v279_v28 = vsel %vm275_vm0, %v264_v23, %v266_v18  ;;  %v466_v45 = vpop.permute.xlu2 %465 }
  0x8e   : > { %v290_v29 = vsel %vm288_vm1, %v276_v25, 0  ;;  %v293_v30 = vsel %vm288_vm1, %v277_v26, 0  ;;  %v296_v31 = vsel %vm288_vm1, %v278_v27, 0  ;;  %v299_v32 = vsel %vm288_vm1, %v279_v28, 0 }
  0x8f   : > { %320 = vmatpush.bf16.msra.mxu0 %v290_v29  ;;  %333 = vmatpush.bf16.msra.mxu1 %v293_v30 }
  0x90   : > { %346 = vmatpush.bf16.msra.mxu2 %v296_v31  ;;  %359 = vmatpush.bf16.msra.mxu3 %v299_v32 }
  0x92   : > { %2365 = vmatmul.msk.bf16.vlgmr.msra.gmra.mxu0 %vm284_vm2, %v247_v33  ;;  %2366 = vmatmul.msk.bf16.vlgmr.msra.gmra.mxu1 %vm284_vm2, %v247_v33 }
  0x93   : > { %2367 = vmatmul.msk.bf16.vlgmr.msra.gmra.mxu2 %vm284_vm2, %v247_v33  ;;  %2368 = vmatmul.msk.bf16.vlgmr.msra.gmra.mxu3 %vm284_vm2, %v247_v33 }
  0x94   : > { %v272_v35 = vpop.permute.xlu0 %271  ;;  %v268_v36 = vpop.permute.xlu1 %267  ;;  %1318 = vrot.lane.b32.xlu0 %v2576_v2, %s2519_s29  ;;  %1324 = vrot.lane.b32.xlu1 %v2600_v16, %s2519_s29 }
  0x95   : > { %v280_v37 = vsel %vm275_vm0, %v266_v18, %v268_v36  ;;  %v281_v38 = vsel %vm275_vm0, %v268_v36, %v270_v19  ;;  %v282_v39 = vsel %vm275_vm0, %v270_v19, %v272_v35  ;;  %v283_v40 = vsel %vm275_vm0, %v272_v35, %v274_v22  ;;  %v470_v50 = vpop.permute.xlu2 %469 }
  0x96   : > { %v302_v41 = vsel %vm288_vm1, %v280_v37, 0  ;;  %v305_v42 = vsel %vm288_vm1, %v281_v38, 0  ;;  %v308_v43 = vsel %vm288_vm1, %v282_v39, 0  ;;  %v311_v44 = vsel %vm288_vm1, %v283_v40, 0 }
  0x97   : > { %372 = vmatpush.bf16.msrb.mxu0 %v302_v41  ;;  %385 = vmatpush.bf16.msrb.mxu1 %v305_v42  ;;  %v2718_v18 = vpack.c.bf16 %v235_v12, %v235_v12  ;;  %v1004_v12 = vsel %vm288_vm1, %v2576_v2, 0 }
  0x98   : > { %398 = vmatpush.bf16.msrb.mxu2 %v308_v43  ;;  %411 = vmatpush.bf16.msrb.mxu3 %v311_v44 }
  0x99   : > { %1156 = vrot.lane.b32.xlu2 %v2718_v18, %s2518_s28 }
  0x9c   : > { %v458_v46 = vpop.permute.xlu0 %457  ;;  %v460_v47 = vpop.permute.xlu1 %459  ;;  %1326 = vrot.lane.b32.xlu1 %v2590_v11, %s2519_s29  ;;  %1330 = vrot.lane.b32.xlu0 %v2602_v17, %s2519_s29 }
  0x9d   : > { %v474_v48 = vsel %vm471_vm3, %v458_v46, %v460_v47  ;;  %v622_v59 = vpop.permute.xlu2 %621 }
  0x9e   : > { %v490_v49 = vsel %vm288_vm1, %v474_v48, 0 }
  0x9f   : > { %540 = vmatpush.bf16.msra.mxu2 %v490_v49 }
  0xa1   : > { %1316 = vrot.lane.b32.xlu2 %v2588_v10, %s2519_s29 }
  0xa2   : > { %2369 = vmatmul.msk.bf16.vlgmr.msrb.gmra.mxu0 %vm284_vm2, %v247_v33  ;;  %2370 = vmatmul.msk.bf16.vlgmr.msrb.gmra.mxu1 %vm284_vm2, %v247_v33 }
  0xa3   : > { %2371 = vmatmul.msk.bf16.vlgmr.msrb.gmra.mxu2 %vm284_vm2, %v247_v33  ;;  %2372 = vmatmul.msk.bf16.vlgmr.msrb.gmra.mxu3 %vm284_vm2, %v247_v33 }
  0xa4   : > { %v456_v51 = vpop.permute.xlu0 %455  ;;  %v462_v52 = vpop.permute.xlu1 %461  ;;  %1496 = vrot.lane.b32.xlu0 %v2586_v9, %s2520_s7  ;;  %1498 = vrot.lane.b32.xlu1 %v2580_v5, %s2520_s7 }
  0xa5   : > { %v473_v53 = vsel %vm471_vm3, %v456_v51, %v458_v46  ;;  %v472_v54 = vsel %vm471_vm3, %v454_v34, %v456_v51  ;;  %v475_v55 = vsel %vm471_vm3, %v460_v47, %v462_v52  ;;  %v634_v20 = vpop.permute.xlu2 %633 }
  0xa6   : > { %v487_v56 = vsel %vm288_vm1, %v473_v53, 0  ;;  %v484_v57 = vsel %vm288_vm1, %v472_v54, 0  ;;  %v493_v58 = vsel %vm288_vm1, %v475_v55, 0 }
  0xa7   : > { %527 = vmatpush.bf16.msra.mxu1 %v487_v56  ;;  %553 = vmatpush.bf16.msra.mxu3 %v493_v58 }
  0xa8   : > { %514 = vmatpush.bf16.msra.mxu0 %v484_v57 }
  0xa9   : > { %1328 = vrot.lane.b32.xlu2 %v2598_v15, %s2519_s29 }
  0xac   : > { %v464_v60 = vpop.permute.xlu1 %463  ;;  %v468_v61 = vpop.permute.xlu0 %467  ;;  %1494 = vrot.lane.b32.xlu0 %v2576_v2, %s2520_s7  ;;  %1500 = vrot.lane.b32.xlu1 %v2600_v16, %s2520_s7 }
  0xad   : > { %v476_v62 = vsel %vm471_vm3, %v462_v52, %v464_v60  ;;  %v477_v63 = vsel %vm471_vm3, %v464_v60, %v466_v45  ;;  %v478_v0 = vsel %vm471_vm3, %v466_v45, %v468_v61  ;;  %v479_v1 = vsel %vm471_vm3, %v468_v61, %v470_v50  ;;  %v638_v30 = vpop.permute.xlu2 %637  ;;  %v2382_v45 = vld [vmem:[%s3548_s2 + $0x8] sm:$0xf] }
  0xae   : > { %v496_v3 = vsel %vm288_vm1, %v476_v62, 0  ;;  %v499_v4 = vsel %vm288_vm1, %v477_v63, 0  ;;  %v502_v6 = vsel %vm288_vm1, %v478_v0, 0  ;;  %v505_v7 = vsel %vm288_vm1, %v479_v1, 0 }
  0xaf   : > { %566 = vmatpush.bf16.msrb.mxu0 %v496_v3  ;;  %579 = vmatpush.bf16.msrb.mxu1 %v499_v4  ;;  %v2391_v4 = vld [vmem:[%s3548_s2 + $0xc] sm:$0xf] }
  0xb0   : > { %592 = vmatpush.bf16.msrb.mxu2 %v502_v6  ;;  %605 = vmatpush.bf16.msrb.mxu3 %v505_v7  ;;  %v1007_v6 = vsel %vm288_vm1, %v2586_v9, 0  ;;  %v1001_v7 = vsel %vm288_vm1, %v2588_v10, 0 }
  0xb1   : > { %1332 = vrot.lane.b32.xlu2 %v2718_v18, %s2519_s29 }
  0xb2   : > { %2374 = vmatmul.msk.bf16.vlgmr.msra.gmra.mxu0 %vm284_vm2, %v2373_v8  ;;  %2375 = vmatmul.msk.bf16.vlgmr.msra.gmra.mxu1 %vm284_vm2, %v2373_v8 }
  0xb3   : > { %2376 = vmatmul.msk.bf16.vlgmr.msra.gmra.mxu2 %vm284_vm2, %v2373_v8  ;;  %2377 = vmatmul.msk.bf16.vlgmr.msra.gmra.mxu3 %vm284_vm2, %v2373_v8 }
  0xb4   : > { %v626_v13 = vpop.permute.xlu0 %625  ;;  %v628_v14 = vpop.permute.xlu1 %627  ;;  %1502 = vrot.lane.b32.xlu1 %v2590_v11, %s2520_s7  ;;  %1506 = vrot.lane.b32.xlu0 %v2602_v17, %s2520_s7 }
  0xb5   : > { %v642_v19 = vsel %vm639_vm4, %v626_v13, %v628_v14  ;;  %v822_v41 = vpop.permute.xlu2 %821 }
  0xb6   : > { %v658_v21 = vsel %vm288_vm1, %v642_v19, 0 }
  0xb7   : > { %708 = vmatpush.bf16.msra.mxu2 %v658_v21 }
  0xb9   : > { %1492 = vrot.lane.b32.xlu2 %v2588_v10, %s2520_s7 }
  0xbc   : > { %v624_v22 = vpop.permute.xlu0 %623  ;;  %v630_v23 = vpop.permute.xlu1 %629  ;;  %1664 = vrot.lane.b32.xlu0 %v2586_v9, %s2521_s10  ;;  %1666 = vrot.lane.b32.xlu1 %v2580_v5, %s2521_s10 }
  0xbd   : > { %v641_v24 = vsel %vm639_vm4, %v624_v22, %v626_v13  ;;  %v643_v25 = vsel %vm639_vm4, %v628_v14, %v630_v23  ;;  %v640_v26 = vsel %vm639_vm4, %v622_v59, %v624_v22  ;;  %v834_v47 = vpop.permute.xlu2 %833  ;;  %v1022_v13 = vsel %vm288_vm1, %v2602_v17, 0 }
  0xbe   : > { %v655_v27 = vsel %vm288_vm1, %v641_v24, 0  ;;  %v661_v28 = vsel %vm288_vm1, %v643_v25, 0  ;;  %v652_v29 = vsel %vm288_vm1, %v640_v26, 0  ;;  %v1016_v14 = vsel %vm288_vm1, %v2590_v11, 0 }
  0xbf   : > { %695 = vmatpush.bf16.msra.mxu1 %v655_v27  ;;  %721 = vmatpush.bf16.msra.mxu3 %v661_v28 }
  0xc0   : > { %682 = vmatpush.bf16.msra.mxu0 %v652_v29 }
  0xc1   : > { %1504 = vrot.lane.b32.xlu2 %v2598_v15, %s2520_s7 }
  0xc2   : > { %2378 = vmatmul.msk.bf16.vlgmr.msrb.gmra.mxu0 %vm284_vm2, %v2373_v8  ;;  %2379 = vmatmul.msk.bf16.vlgmr.msrb.gmra.mxu1 %vm284_vm2, %v2373_v8 }
  0xc3   : > { %2380 = vmatmul.msk.bf16.vlgmr.msrb.gmra.mxu2 %vm284_vm2, %v2373_v8  ;;  %2381 = vmatmul.msk.bf16.vlgmr.msrb.gmra.mxu3 %vm284_vm2, %v2373_v8  ;;  %v1010_v8 = vsel %vm288_vm1, %v2580_v5, 0  ;;  %v1019_v5 = vsel %vm288_vm1, %v2598_v15, 0 }
  0xc4   : > { %v632_v31 = vpop.permute.xlu1 %631  ;;  %v636_v32 = vpop.permute.xlu0 %635  ;;  %1662 = vrot.lane.b32.xlu0 %v2576_v2, %s2521_s10  ;;  %1668 = vrot.lane.b32.xlu1 %v2600_v16, %s2521_s10  ;;  %v1013_v2 = vsel %vm288_vm1, %v2600_v16, 0 }
  0xc5   : > { %v644_v33 = vsel %vm639_vm4, %v630_v23, %v632_v31  ;;  %v645_v34 = vsel %vm639_vm4, %v632_v31, %v634_v20  ;;  %v646_v35 = vsel %vm639_vm4, %v634_v20, %v636_v32  ;;  %v647_v36 = vsel %vm639_vm4, %v636_v32, %v638_v30  ;;  %v838_v56 = vpop.permute.xlu2 %837 }
  0xc6   : > { %v664_v37 = vsel %vm288_vm1, %v644_v33, 0  ;;  %v667_v38 = vsel %vm288_vm1, %v645_v34, 0  ;;  %v670_v39 = vsel %vm288_vm1, %v646_v35, 0  ;;  %v673_v40 = vsel %vm288_vm1, %v647_v36, 0 }
  0xc7   : > { %734 = vmatpush.bf16.msrb.mxu0 %v664_v37  ;;  %747 = vmatpush.bf16.msrb.mxu1 %v667_v38 }
  0xc8   : > { %760 = vmatpush.bf16.msrb.mxu2 %v670_v39  ;;  %773 = vmatpush.bf16.msrb.mxu3 %v673_v40 }
  0xc9   : > { %1508 = vrot.lane.b32.xlu2 %v2718_v18, %s2520_s7 }
  0xcc   : > { %v826_v42 = vpop.permute.xlu0 %825  ;;  %v828_v43 = vpop.permute.xlu1 %827  ;;  %1670 = vrot.lane.b32.xlu1 %v2590_v11, %s2521_s10  ;;  %1674 = vrot.lane.b32.xlu0 %v2602_v17, %s2521_s10  ;;  %v2400_v11 = vld [vmem:[%s3548_s2 + $0x10] sm:$0xf] }
  0xcd   : > { %v842_v44 = vsel %vm839_vm5, %v826_v42, %v828_v43 }
  0xce   : > { %v858_v46 = vsel %vm288_vm1, %v842_v44, 0 }
  0xd1   : > { %1660 = vrot.lane.b32.xlu2 %v2588_v10, %s2521_s10 }
  0xd2   : > { %2383 = vmatmul.msk.bf16.vlgmr.msra.gmra.mxu0 %vm284_vm2, %v2382_v45  ;;  %2384 = vmatmul.msk.bf16.vlgmr.msra.gmra.mxu1 %vm284_vm2, %v2382_v45 }
  0xd3   : > { %2385 = vmatmul.msk.bf16.vlgmr.msra.gmra.mxu2 %vm284_vm2, %v2382_v45  ;;  %2386 = vmatmul.msk.bf16.vlgmr.msra.gmra.mxu3 %vm284_vm2, %v2382_v45 }
  0xd4   : > { %v824_v48 = vpop.permute.xlu0 %823  ;;  %v830_v49 = vpop.permute.xlu1 %829  ;;  %908 = vmatpush.bf16.msra.mxu2 %v858_v46 }
  0xd5   : > { %v841_v50 = vsel %vm839_vm5, %v824_v48, %v826_v42  ;;  %v843_v51 = vsel %vm839_vm5, %v828_v43, %v830_v49  ;;  %v840_v52 = vsel %vm839_vm5, %v822_v41, %v824_v48 }
  0xd6   : > { %v855_v53 = vsel %vm288_vm1, %v841_v50, 0  ;;  %v861_v54 = vsel %vm288_vm1, %v843_v51, 0  ;;  %v852_v55 = vsel %vm288_vm1, %v840_v52, 0  ;;  %v2866_v50 = vld [vmem:[%s3547_s1] sm:$0xff] }
  0xd7   : > { %895 = vmatpush.bf16.msra.mxu1 %v855_v53  ;;  %921 = vmatpush.bf16.msra.mxu3 %v861_v54  ;;  %v419_v51 = vperm.slane %v2866_v50, 0  ;;  %v420_v52 = vperm.slane %v2866_v50, 2 }
  0xd8   : > { %882 = vmatpush.bf16.msra.mxu0 %v852_v55 }
  0xd9   : > { %1672 = vrot.lane.b32.xlu2 %v2598_v15, %s2521_s10  ;;  %v1141_v15 = vpop.permute.xlu2 %1140 }
  0xdc   : > { %v832_v57 = vpop.permute.xlu1 %831  ;;  %v836_v58 = vpop.permute.xlu0 %835 }
  0xdd   : > { %v844_v59 = vsel %vm839_vm5, %v830_v49, %v832_v57  ;;  %v845_v60 = vsel %vm839_vm5, %v832_v57, %v834_v47  ;;  %v846_v61 = vsel %vm839_vm5, %v834_v47, %v836_v58  ;;  %v847_v62 = vsel %vm839_vm5, %v836_v58, %v838_v56 }
  0xde   : > { %v864_v63 = vsel %vm288_vm1, %v844_v59, 0  ;;  %v867_v0 = vsel %vm288_vm1, %v845_v60, 0  ;;  %v870_v1 = vsel %vm288_vm1, %v846_v61, 0  ;;  %v873_v3 = vsel %vm288_vm1, %v847_v62, 0 }
  0xdf   : > { %v2876_v58 = vperm.slane %v419_v51, 0  ;;  %v2878_v59 = vperm.slane %v420_v52, 0  ;;  %v421_v62 = vperm.slane %v2866_v50, 4 }
  0xe1   : > { %1676 = vrot.lane.b32.xlu2 %v2718_v18, %s2521_s10  ;;  %v1153_v28 = vpop.permute.xlu2 %1152 }
  0xe2   : > { %2387 = vmatmul.msk.bf16.vlgmr.msrb.gmra.mxu0 %vm284_vm2, %v2382_v45  ;;  %2388 = vmatmul.msk.bf16.vlgmr.msrb.gmra.mxu1 %vm284_vm2, %v2382_v45 }
  0xe3   : > { %2389 = vmatmul.msk.bf16.vlgmr.msrb.gmra.mxu2 %vm284_vm2, %v2382_v45  ;;  %2390 = vmatmul.msk.bf16.vlgmr.msrb.gmra.mxu3 %vm284_vm2, %v2382_v45 }
  0xe4   : > { %934 = vmatpush.bf16.msrb.mxu0 %v864_v63  ;;  %947 = vmatpush.bf16.msrb.mxu1 %v867_v0  ;;  %v1145_v9 = vpop.permute.xlu0 %1144  ;;  %v1147_v10 = vpop.permute.xlu1 %1146  ;;  %v422_v63 = vperm.slane %v2866_v50, 6 }
  0xe5   : > { %960 = vmatpush.bf16.msrb.mxu2 %v870_v1  ;;  %973 = vmatpush.bf16.msrb.mxu3 %v873_v3  ;;  %v1161_v19 = vsel %vm1158_vm6, %v1145_v9, %v1147_v10 }
  0xe6   : > { %v1177_v24 = vsel %vm288_vm1, %v1161_v19, 0 }
  0xec   : > { %v1143_v16 = vpop.permute.xlu0 %1142  ;;  %v1149_v18 = vpop.permute.xlu1 %1148 }
  0xed   : > { %v1160_v20 = vsel %vm1158_vm6, %v1143_v16, %v1145_v9  ;;  %v1162_v22 = vsel %vm1158_vm6, %v1147_v10, %v1149_v18  ;;  %v1159_v23 = vsel %vm1158_vm6, %v1141_v15, %v1143_v16  ;;  %v2409_v9 = vld [vmem:[%s3548_s2 + $0x14] sm:$0xf]  ;;  %v2897_v15 = vperm.slane %v422_v63, 0 }
  0xee   : > { %v1174_v25 = vsel %vm288_vm1, %v1160_v20, 0  ;;  %v1180_v26 = vsel %vm288_vm1, %v1162_v22, 0  ;;  %v1171_v27 = vsel %vm288_vm1, %v1159_v23, 0 }
  0xf2   : > { %2392 = vmatmul.msk.bf16.vlgmr.msra.gmra.mxu0 %vm284_vm2, %v2391_v4  ;;  %2393 = vmatmul.msk.bf16.vlgmr.msra.gmra.mxu1 %vm284_vm2, %v2391_v4 }
  0xf3   : > { %2394 = vmatmul.msk.bf16.vlgmr.msra.gmra.mxu2 %vm284_vm2, %v2391_v4  ;;  %2395 = vmatmul.msk.bf16.vlgmr.msra.gmra.mxu3 %vm284_vm2, %v2391_v4  ;;  %v1157_v35 = vpop.permute.xlu2 %1156 }
  0xf4   : > { %1057 = vmatpush.bf16.msra.mxu2 %v1007_v6  ;;  %1031 = vmatpush.bf16.msra.mxu0 %v1001_v7  ;;  %v1155_v29 = vpop.permute.xlu0 %1154  ;;  %v1151_v34 = vpop.permute.xlu1 %1150 }
  0xf5   : > { %1070 = vmatpush.bf16.msra.mxu3 %v1010_v8  ;;  %1044 = vmatpush.bf16.msra.mxu1 %v1004_v12  ;;  %v1163_v38 = vsel %vm1158_vm6, %v1149_v18, %v1151_v34  ;;  %v1164_v39 = vsel %vm1158_vm6, %v1151_v34, %v1153_v28  ;;  %v1165_v42 = vsel %vm1158_vm6, %v1153_v28, %v1155_v29 }
  0xf6   : > { %v1166_v43 = vsel %vm1158_vm6, %v1155_v29, %v1157_v35  ;;  %v1183_v44 = vsel %vm288_vm1, %v1163_v38, 0  ;;  %v1186_v45 = vsel %vm288_vm1, %v1164_v39, 0  ;;  %v1189_v47 = vsel %vm288_vm1, %v1165_v42, 0 }
  0xf7   : > { %v1192_v48 = vsel %vm288_vm1, %v1166_v43, 0 }
  0xfb   : > { %v1317_v57 = vpop.permute.xlu2 %1316 }
  0xfc   : > { %v1321_v46 = vpop.permute.xlu0 %1320  ;;  %v1323_v49 = vpop.permute.xlu1 %1322 }
  0xfd   : > { %v1337_v6 = vsel %vm1334_vm7, %v1321_v46, %v1323_v49 }
  0xfe   : > { %v1353_v16 = vsel %vm288_vm1, %v1337_v6, 0 }
 0x102   : > { %2396 = vmatmul.msk.bf16.vlgmr.msrb.gmra.mxu0 %vm284_vm2, %v2391_v4  ;;  %2397 = vmatmul.msk.bf16.vlgmr.msrb.gmra.mxu1 %vm284_vm2, %v2391_v4 }
 0x103   : > { %2398 = vmatmul.msk.bf16.vlgmr.msrb.gmra.mxu2 %vm284_vm2, %v2391_v4  ;;  %2399 = vmatmul.msk.bf16.vlgmr.msrb.gmra.mxu3 %vm284_vm2, %v2391_v4 }
 0x104   : > { %1109 = vmatpush.bf16.msrb.mxu2 %v1019_v5  ;;  %1083 = vmatpush.bf16.msrb.mxu0 %v1013_v2 }
 0x105   : > { %1122 = vmatpush.bf16.msrb.mxu3 %v1022_v13  ;;  %1096 = vmatpush.bf16.msrb.mxu1 %v1016_v14  ;;  %v2895_v14 = vperm.slane %v421_v62, 0 }
 0x106   : > { %v1319_v60 = vpop.permute.xlu0 %1318  ;;  %v1325_v61 = vpop.permute.xlu1 %1324 }
 0x107   : > { %v1336_v7 = vsel %vm1334_vm7, %v1319_v60, %v1321_v46  ;;  %v1338_v5 = vsel %vm1334_vm7, %v1323_v49, %v1325_v61  ;;  %v1335_v2 = vsel %vm1334_vm7, %v1317_v57, %v1319_v60 }
 0x108   : > { %v1350_v18 = vsel %vm288_vm1, %v1336_v7, 0  ;;  %v1356_v19 = vsel %vm288_vm1, %v1338_v5, 0  ;;  %v1347_v20 = vsel %vm288_vm1, %v1335_v2, 0 }
 0x10e   : > { %v1331_v23 = vpop.permute.xlu0 %1330 }
 0x10f   : > { %v322_v17 = vpop.f32.mrf.mxu0  ;;  %v335_v21 = vpop.f32.mrf.mxu1 }
 0x110   : > { %v443_v0 = vmul.f32 %v2876_v58, %v322_v17  ;;  %v444_v1 = vmul.f32 %v2878_v59, %v335_v21  ;;  %v1329_v17 = vpop.permute.xlu2 %1328  ;;  %v2908_v21 = vld [vmem:[%s3547_s1 + $0x8] sm:$0xff] }
 0x112   : > { %2401 = vmatmul.msk.bf16.vlgmr.msra.gmra.mxu0 %vm284_vm2, %v2400_v11  ;;  %2402 = vmatmul.msk.bf16.vlgmr.msra.gmra.mxu1 %vm284_vm2, %v2400_v11 }
 0x113   : > { %2403 = vmatmul.msk.bf16.vlgmr.msra.gmra.mxu2 %vm284_vm2, %v2400_v11  ;;  %2404 = vmatmul.msk.bf16.vlgmr.msra.gmra.mxu3 %vm284_vm2, %v2400_v11 }
 0x114   : > { %1214 = vmatpush.bf16.msra.mxu1 %v1174_v25  ;;  %1227 = vmatpush.bf16.msra.mxu2 %v1177_v24  ;;  %v423_v24 = vperm.slane %v2908_v21, 0  ;;  %v424_v25 = vperm.slane %v2908_v21, 2 }
 0x115   : > { %1240 = vmatpush.bf16.msra.mxu3 %v1180_v26  ;;  %1201 = vmatpush.bf16.msra.mxu0 %v1171_v27 }
 0x116   : > { %v2845_v30 = vpop.f32.mrf.mxu2  ;;  %v2847_v31 = vpop.f32.mrf.mxu3  ;;  %v2922_v34 = vperm.slane %v423_v24, 0  ;;  %v781_v24 = vperm.slane %v2866_v50, 5 }
 0x117   : > { %v324_v32 = vpop.f32.mrf.mxu0  ;;  %v337_v33 = vpop.f32.mrf.mxu1  ;;  %v446_v22 = vmul.f32 %v2897_v15, %v2847_v31 }
 0x118   : > { %v1327_v31 = vpop.permute.xlu1 %1326  ;;  %v1333_v35 = vpop.permute.xlu2 %1332 }
 0x119   : > { %v1342_v49 = vsel %vm1334_vm7, %v1331_v23, %v1333_v35  ;;  %v1497_v57 = vpop.permute.xlu0 %1496 }
 0x11e   : > { %v350_v36 = vpop.f32.mrf.mxu2  ;;  %v363_v37 = vpop.f32.mrf.mxu3 }
 0x11f   : > { %v2851_v40 = vpop.f32.mrf.mxu0  ;;  %v2853_v41 = vpop.f32.mrf.mxu1  ;;  %v425_v36 = vperm.slane %v2908_v21, 4  ;;  %v426_v37 = vperm.slane %v2908_v21, 6 }
 0x120   : > { %v447_v38 = vmul.f32 %v2922_v34, %v2851_v40  ;;  %v1499_v62 = vpop.permute.xlu1 %1498  ;;  %v1493_v5 = vpop.permute.xlu2 %1492 }
 0x121   : > { %v2940_v40 = vperm.slane %v425_v36, 0 }
 0x122   : > { %2405 = vmatmul.msk.bf16.vlgmr.msrb.gmra.mxu0 %vm284_vm2, %v2400_v11  ;;  %2406 = vmatmul.msk.bf16.vlgmr.msrb.gmra.mxu1 %vm284_vm2, %v2400_v11 }
 0x123   : > { %2407 = vmatmul.msk.bf16.vlgmr.msrb.gmra.mxu2 %vm284_vm2, %v2400_v11  ;;  %2408 = vmatmul.msk.bf16.vlgmr.msrb.gmra.mxu3 %vm284_vm2, %v2400_v11  ;;  %v445_v11 = vmul.f32 %v2895_v14, %v2845_v30  ;;  %v2924_v30 = vperm.slane %v424_v25, 0  ;;  %v782_v25 = vperm.slane %v2866_v50, 7 }
 0x124   : > { %1253 = vmatpush.bf16.msrb.mxu0 %v1183_v44  ;;  %1266 = vmatpush.bf16.msrb.mxu1 %v1186_v45  ;;  %v1339_v44 = vsel %vm1334_vm7, %v1325_v61, %v1327_v31  ;;  %v1340_v45 = vsel %vm1334_vm7, %v1327_v31, %v1329_v17  ;;  %v1368_v61 = vsel %vm288_vm1, %v1342_v49, 0  ;;  %v783_v49 = vperm.slane %v2908_v21, 1 }
 0x125   : > { %1279 = vmatpush.bf16.msrb.mxu2 %v1189_v47  ;;  %1292 = vmatpush.bf16.msrb.mxu3 %v1192_v48  ;;  %v448_v39 = vmul.f32 %v2924_v30, %v2853_v41  ;;  %v1341_v48 = vsel %vm1334_vm7, %v1329_v17, %v1331_v23  ;;  %v1359_v41 = vsel %vm288_vm1, %v1339_v44, 0  ;;  %v2418_v23 = vld [vmem:[%s3548_s2 + $0x18] sm:$0xf] }
 0x126   : > { %v2872_v53 = vpop.f32.mrf.mxu2  ;;  %v2874_v54 = vpop.f32.mrf.mxu3  ;;  %v1365_v60 = vsel %vm288_vm1, %v1341_v48, 0 }
 0x127   : > { %v376_v55 = vpop.f32.mrf.mxu0  ;;  %v389_v56 = vpop.f32.mrf.mxu1  ;;  %v449_v63 = vmul.f32 %v2940_v40, %v2872_v53 }
 0x128   : > { %v2942_v55 = vperm.slane %v426_v37, 0  ;;  %v1362_v56 = vsel %vm288_vm1, %v1340_v45, 0  ;;  %v1495_v53 = vpop.permute.xlu0 %1494 }
 0x129   : > { %v1512_v17 = vsel %vm1510_vm8, %v1495_v53, %v1497_v57 }
 0x12a   : > { %v1526_v35 = vsel %vm288_vm1, %v1512_v17, 0 }
 0x12e   : > { %v402_v3 = vpop.f32.mrf.mxu2  ;;  %v415_v4 = vpop.f32.mrf.mxu3 }
 0x12f   : > { %v516_v8 = vpop.f32.mrf.mxu0  ;;  %v529_v12 = vpop.f32.mrf.mxu1 }
 0x130   : > { %v2891_v10 = vadd.f32 %v516_v8, %v443_v0  ;;  %v2893_v13 = vadd.f32 %v529_v12, %v444_v1  ;;  %v450_v0 = vmul.f32 %v2942_v55, %v2874_v54  ;;  %v779_v12 = vperm.slane %v2866_v50, 1 }
 0x132   : > { %2410 = vmatmul.msk.bf16.vlgmr.msra.gmra.mxu0 %vm284_vm2, %v2409_v9  ;;  %2411 = vmatmul.msk.bf16.vlgmr.msra.gmra.mxu1 %vm284_vm2, %v2409_v9  ;;  %v2962_v2 = vperm.slane %v779_v12, 1 }
 0x133   : > { %2412 = vmatmul.msk.bf16.vlgmr.msra.gmra.mxu2 %vm284_vm2, %v2409_v9  ;;  %2413 = vmatmul.msk.bf16.vlgmr.msra.gmra.mxu3 %vm284_vm2, %v2409_v9 }
 0x134   : > { %1390 = vmatpush.bf16.msra.mxu1 %v1350_v18  ;;  %1403 = vmatpush.bf16.msra.mxu2 %v1353_v16  ;;  %v1501_v16 = vpop.permute.xlu1 %1500 }
 0x135   : > { %1416 = vmatpush.bf16.msra.mxu3 %v1356_v19  ;;  %1377 = vmatpush.bf16.msra.mxu0 %v1347_v20  ;;  %v1513_v20 = vsel %vm1510_vm8, %v1497_v57, %v1499_v62 }
 0x136   : > { %v542_v26 = vpop.f32.mrf.mxu2  ;;  %v555_v27 = vpop.f32.mrf.mxu3  ;;  %v1529_v31 = vsel %vm288_vm1, %v1513_v20, 0 }
 0x137   : > { %v2918_v28 = vadd.f32 %v542_v26, %v445_v11  ;;  %v2920_v29 = vadd.f32 %v555_v27, %v446_v22  ;;  %v518_v32 = vpop.f32.mrf.mxu0  ;;  %v531_v33 = vpop.f32.mrf.mxu1  ;;  %v1514_v26 = vsel %vm1510_vm8, %v1499_v62, %v1501_v16  ;;  %v1511_v27 = vsel %vm1510_vm8, %v1493_v5, %v1495_v53 }
 0x13e   : > { %v544_v42 = vpop.f32.mrf.mxu2  ;;  %v557_v43 = vpop.f32.mrf.mxu3 }
 0x13f   : > { %v568_v46 = vpop.f32.mrf.mxu0  ;;  %v581_v47 = vpop.f32.mrf.mxu1  ;;  %v2991_v42 = vperm.slane %v781_v24, 1 }
 0x140   : > { %v2936_v51 = vadd.f32 %v568_v46, %v447_v38  ;;  %v2938_v52 = vadd.f32 %v581_v47, %v448_v39  ;;  %v1523_v38 = vsel %vm288_vm1, %v1511_v27, 0  ;;  %v1505_v39 = vpop.permute.xlu2 %1504 }
 0x142   : > { %2414 = vmatmul.msk.bf16.vlgmr.msrb.gmra.mxu0 %vm284_vm2, %v2409_v9  ;;  %2415 = vmatmul.msk.bf16.vlgmr.msrb.gmra.mxu1 %vm284_vm2, %v2409_v9 }
 0x143   : > { %2416 = vmatmul.msk.bf16.vlgmr.msrb.gmra.mxu2 %vm284_vm2, %v2409_v9  ;;  %2417 = vmatmul.msk.bf16.vlgmr.msrb.gmra.mxu3 %vm284_vm2, %v2409_v9  ;;  %v780_v9 = vperm.slane %v2866_v50, 3  ;;  %v1532_v50 = vsel %vm288_vm1, %v1514_v26, 0 }
 0x144   : > { %1429 = vmatpush.bf16.msrb.mxu0 %v1359_v41  ;;  %1442 = vmatpush.bf16.msrb.mxu1 %v1362_v56  ;;  %v784_v41 = vperm.slane %v2908_v21, 3 }
 0x145   : > { %1455 = vmatpush.bf16.msrb.mxu2 %v1365_v60  ;;  %1468 = vmatpush.bf16.msrb.mxu3 %v1368_v61  ;;  %v2964_v54 = vperm.slane %v780_v9, 1  ;;  %v1503_v60 = vpop.permute.xlu1 %1502  ;;  %v3005_v61 = vperm.slane %v783_v49, 1  ;;  %v786_v9 = vperm.slane %v2908_v21, 7 }
 0x146   : > { %v594_v1 = vpop.f32.mrf.mxu2  ;;  %v607_v3 = vpop.f32.mrf.mxu3  ;;  %v3007_v62 = vperm.slane %v784_v41, 1 }
 0x147   : > { %v2956_v4 = vadd.f32 %v594_v1, %v449_v63  ;;  %v2958_v6 = vadd.f32 %v607_v3, %v450_v0  ;;  %v570_v7 = vpop.f32.mrf.mxu0  ;;  %v583_v8 = vpop.f32.mrf.mxu1  ;;  %v1515_v3 = vsel %vm1510_vm8, %v1501_v16, %v1503_v60 }
 0x148   : > { %v1509_v63 = vpop.permute.xlu2 %1508  ;;  %v1516_v7 = vsel %vm1510_vm8, %v1503_v60, %v1505_v39 }
 0x149   : > { %v1538_v16 = vsel %vm288_vm1, %v1516_v7, 0 }
 0x14d   : > { %v1667_v24 = vpop.permute.xlu1 %1666 }
 0x14e   : > { %v596_v18 = vpop.f32.mrf.mxu2  ;;  %v609_v19 = vpop.f32.mrf.mxu3 }
 0x14f   : > { %v684_v11 = vpop.f32.mrf.mxu0  ;;  %v697_v22 = vpop.f32.mrf.mxu1  ;;  %v1535_v19 = vsel %vm288_vm1, %v1515_v3, 0 }
 0x150   : > { %v803_v32 = vmul.f32 %v2962_v2, %v684_v11  ;;  %v804_v33 = vmul.f32 %v2964_v54, %v697_v22 }
 0x152   : > { %v2980_v36 = vadd.f32 %v803_v32, %v2891_v10  ;;  %v2983_v37 = vadd.f32 %v804_v33, %v2893_v13  ;;  %2419 = vmatmul.msk.bf16.vlgmr.msra.gmra.mxu0 %vm284_vm2, %v2418_v23  ;;  %2420 = vmatmul.msk.bf16.vlgmr.msra.gmra.mxu1 %vm284_vm2, %v2418_v23  ;;  %v2993_v10 = vperm.slane %v782_v25, 1  ;;  %v1507_v13 = vpop.permute.xlu0 %1506 }
 0x153   : > { %2421 = vmatmul.msk.bf16.vlgmr.msra.gmra.mxu2 %vm284_vm2, %v2418_v23  ;;  %2422 = vmatmul.msk.bf16.vlgmr.msra.gmra.mxu3 %vm284_vm2, %v2418_v23  ;;  %v1518_v5 = vsel %vm1510_vm8, %v1507_v13, %v1509_v63 }
 0x154   : > { %1566 = vmatpush.bf16.msra.mxu1 %v1526_v35  ;;  %1579 = vmatpush.bf16.msra.mxu2 %v1529_v31  ;;  %v1544_v22 = vsel %vm288_vm1, %v1518_v5, 0  ;;  %v1661_v35 = vpop.permute.xlu2 %1660 }
 0x155   : > { %1592 = vmatpush.bf16.msra.mxu3 %v1532_v50  ;;  %1553 = vmatpush.bf16.msra.mxu0 %v1523_v38 }
 0x156   : > { %v710_v43 = vpop.f32.mrf.mxu2  ;;  %v723_v44 = vpop.f32.mrf.mxu3 }
 0x157   : > { %v805_v45 = vmul.f32 %v2991_v42, %v710_v43  ;;  %v806_v46 = vmul.f32 %v2993_v10, %v723_v44  ;;  %v686_v47 = vpop.f32.mrf.mxu0  ;;  %v699_v48 = vpop.f32.mrf.mxu1 }
 0x158   : > { %v2427_v48 = vld [vmem:[%s3548_s2 + $0x1c] sm:$0xf] }
 0x159   : > { %v3000_v56 = vadd.f32 %v805_v45, %v2918_v28  ;;  %v3003_v57 = vadd.f32 %v806_v46, %v2920_v29  ;;  %v785_v28 = vperm.slane %v2908_v21, 5  ;;  %v1517_v29 = vsel %vm1510_vm8, %v1505_v39, %v1507_v13  ;;  %v1669_v39 = vpop.permute.xlu1 %1668 }
 0x15a   : > { %v1665_v20 = vpop.permute.xlu0 %1664  ;;  %v1541_v21 = vsel %vm288_vm1, %v1517_v29, 0 }
 0x15b   : > { %v3031_v25 = vperm.slane %v785_v28, 1  ;;  %v1681_v44 = vsel %vm1678_vm9, %v1665_v20, %v1667_v24 }
 0x15c   : > { %v1697_v60 = vsel %vm288_vm1, %v1681_v44, 0  ;;  %v1673_v3 = vpop.permute.xlu2 %1672 }
 0x15e   : > { %v712_v0 = vpop.f32.mrf.mxu2  ;;  %v725_v1 = vpop.f32.mrf.mxu3 }
 0x15f   : > { %v736_v8 = vpop.f32.mrf.mxu0  ;;  %v749_v12 = vpop.f32.mrf.mxu1 }
 0x160   : > { %v807_v53 = vmul.f32 %v3005_v61, %v736_v8  ;;  %v808_v18 = vmul.f32 %v3007_v62, %v749_v12 }
 0x162   : > { %v3020_v17 = vadd.f32 %v807_v53, %v2936_v51  ;;  %v3023_v11 = vadd.f32 %v808_v18, %v2938_v52  ;;  %2423 = vmatmul.msk.bf16.vlgmr.msrb.gmra.mxu0 %vm284_vm2, %v2418_v23  ;;  %2424 = vmatmul.msk.bf16.vlgmr.msrb.gmra.mxu1 %vm284_vm2, %v2418_v23  ;;  %v3033_v51 = vperm.slane %v786_v9, 1  ;;  %v1663_v38 = vpop.permute.xlu0 %1662  ;;  %v1671_v18 = vpop.permute.xlu1 %1670 }
 0x163   : > { %2425 = vmatmul.msk.bf16.vlgmr.msrb.gmra.mxu2 %vm284_vm2, %v2418_v23  ;;  %2426 = vmatmul.msk.bf16.vlgmr.msrb.gmra.mxu3 %vm284_vm2, %v2418_v23  ;;  %v1680_v45 = vsel %vm1678_vm9, %v1663_v38, %v1665_v20 }
 0x164   : > { %1605 = vmatpush.bf16.msrb.mxu0 %v1535_v19  ;;  %1618 = vmatpush.bf16.msrb.mxu1 %v1538_v16  ;;  %v1694_v63 = vsel %vm288_vm1, %v1680_v45, 0  ;;  %v1677_v16 = vpop.permute.xlu2 %1676 }
 0x165   : > { %1631 = vmatpush.bf16.msrb.mxu2 %v1541_v21  ;;  %1644 = vmatpush.bf16.msrb.mxu3 %v1544_v22  ;;  %v1683_v22 = vsel %vm1678_vm9, %v1669_v39, %v1671_v18 }
 0x166   : > { %v762_v52 = vpop.f32.mrf.mxu2  ;;  %v775_v26 = vpop.f32.mrf.mxu3 }
 0x167   : > { %v809_v27 = vmul.f32 %v3031_v25, %v762_v52  ;;  %v810_v32 = vmul.f32 %v3033_v51, %v775_v26  ;;  %v738_v33 = vpop.f32.mrf.mxu0  ;;  %v751_v31 = vpop.f32.mrf.mxu1 }
 0x169   : > { %v3038_v50 = vadd.f32 %v809_v27, %v2956_v4  ;;  %v3041_v23 = vadd.f32 %v810_v32, %v2958_v6  ;;  %v1682_v4 = vsel %vm1678_vm9, %v1667_v24, %v1669_v39  ;;  %v1679_v6 = vsel %vm1678_vm9, %v1661_v35, %v1663_v38 }
 0x16a   : > { %v1700_v0 = vsel %vm288_vm1, %v1682_v4, 0  ;;  %v1691_v1 = vsel %vm288_vm1, %v1679_v6, 0  ;;  %v1675_v19 = vpop.permute.xlu0 %1674  ;;  %v1684_v24 = vsel %vm1678_vm9, %v1671_v18, %v1673_v3 }
 0x16b   : > { %v1685_v27 = vsel %vm1678_vm9, %v1673_v3, %v1675_v19  ;;  %v1686_v32 = vsel %vm1678_vm9, %v1675_v19, %v1677_v16  ;;  %v1706_v31 = vsel %vm288_vm1, %v1684_v24, 0 }
 0x16c   : > { %v1709_v35 = vsel %vm288_vm1, %v1685_v27, 0  ;;  %v1712_v38 = vsel %vm288_vm1, %v1686_v32, 0 }
 0x16e   : > { %v764_v13 = vpop.f32.mrf.mxu2  ;;  %v777_v43 = vpop.f32.mrf.mxu3 }
 0x16f   : > { %v884_v46 = vpop.f32.mrf.mxu0  ;;  %v897_v47 = vpop.f32.mrf.mxu1 }
 0x170   : > { %v979_v49 = vmul.f32 %v884_v46, %v2876_v58  ;;  %v980_v41 = vmul.f32 %v897_v47, %v2878_v59 }
 0x172   : > { %2428 = vmatmul.msk.bf16.vlgmr.msra.gmra.mxu0 %vm284_vm2, %v2427_v48  ;;  %2429 = vmatmul.msk.bf16.vlgmr.msra.gmra.mxu1 %vm284_vm2, %v2427_v48  ;;  %v987_v7 = vadd.f32 %v979_v49, %v2980_v36  ;;  %v988_v8 = vadd.f32 %v980_v41, %v2983_v37 }
 0x173   : > { %2430 = vmatmul.msk.bf16.vlgmr.msra.gmra.mxu2 %vm284_vm2, %v2427_v48  ;;  %2431 = vmatmul.msk.bf16.vlgmr.msra.gmra.mxu3 %vm284_vm2, %v2427_v48 }
 0x174   : > { %1734 = vmatpush.bf16.msra.mxu1 %v1694_v63  ;;  %1747 = vmatpush.bf16.msra.mxu2 %v1697_v60  ;;  %v2436_v60 = vld [vmem:[%s3548_s2 + $0x20] sm:$0xf] }
 0x175   : > { %1760 = vmatpush.bf16.msra.mxu3 %v1700_v0  ;;  %1721 = vmatpush.bf16.msra.mxu0 %v1691_v1 }
 0x176   : > { %v910_v12 = vpop.f32.mrf.mxu2  ;;  %v923_v28 = vpop.f32.mrf.mxu3 }
 0x177   : > { %v981_v9 = vmul.f32 %v910_v12, %v2895_v14  ;;  %v982_v29 = vmul.f32 %v923_v28, %v2897_v15  ;;  %v886_v5 = vpop.f32.mrf.mxu0  ;;  %v899_v53 = vpop.f32.mrf.mxu1 }
 0x179   : > { %v989_v36 = vadd.f32 %v981_v9, %v3000_v56  ;;  %v990_v37 = vadd.f32 %v982_v29, %v3003_v57  ;;  %v1703_v57 = vsel %vm288_vm1, %v1683_v22, 0 }
 0x17e   : > { %v912_v20 = vpop.f32.mrf.mxu2  ;;  %v925_v21 = vpop.f32.mrf.mxu3 }
 0x17f   : > { %v936_v52 = vpop.f32.mrf.mxu0  ;;  %v949_v26 = vpop.f32.mrf.mxu1 }
 0x180   : > { %v983_v33 = vmul.f32 %v936_v52, %v2922_v34  ;;  %v984_v56 = vmul.f32 %v949_v26, %v2924_v30 }
 0x182   : > { %2432 = vmatmul.msk.bf16.vlgmr.msrb.gmra.mxu0 %vm284_vm2, %v2427_v48  ;;  %2433 = vmatmul.msk.bf16.vlgmr.msrb.gmra.mxu1 %vm284_vm2, %v2427_v48  ;;  %v991_v39 = vadd.f32 %v983_v33, %v3020_v17  ;;  %v992_v13 = vadd.f32 %v984_v56, %v3023_v11 }
 0x183   : > { %2434 = vmatmul.msk.bf16.vlgmr.msrb.gmra.mxu2 %vm284_vm2, %v2427_v48  ;;  %2435 = vmatmul.msk.bf16.vlgmr.msrb.gmra.mxu3 %vm284_vm2, %v2427_v48 }
 0x184   : > { %1773 = vmatpush.bf16.msrb.mxu0 %v1703_v57  ;;  %1786 = vmatpush.bf16.msrb.mxu1 %v1706_v31 }
 0x185   : > { %1799 = vmatpush.bf16.msrb.mxu2 %v1709_v35  ;;  %1812 = vmatpush.bf16.msrb.mxu3 %v1712_v38 }
 0x186   : > { %v962_v43 = vpop.f32.mrf.mxu2  ;;  %v975_v44 = vpop.f32.mrf.mxu3 }
 0x187   : > { %v985_v45 = vmul.f32 %v962_v43, %v2940_v40  ;;  %v986_v46 = vmul.f32 %v975_v44, %v2942_v55  ;;  %v938_v47 = vpop.f32.mrf.mxu0  ;;  %v951_v4 = vpop.f32.mrf.mxu1 }
 0x189   : > { %v993_v17 = vadd.f32 %v985_v45, %v3038_v50  ;;  %v994_v11 = vadd.f32 %v986_v46, %v3041_v23 }
 0x18e   : > { %v964_v6 = vpop.f32.mrf.mxu2  ;;  %v977_v49 = vpop.f32.mrf.mxu3 }
 0x18f   : > { %v1033_v41 = vpop.f32.mrf.mxu0  ;;  %v1046_v48 = vpop.f32.mrf.mxu1 }
 0x190   : > { %v1128_v63 = vadd.f32 %v1033_v41, %v987_v7  ;;  %v1129_v0 = vadd.f32 %v1046_v48, %v988_v8 }
 0x192   : > { %2437 = vmatmul.msk.bf16.vlgmr.msra.gmra.mxu0 %vm284_vm2, %v2436_v60  ;;  %2438 = vmatmul.msk.bf16.vlgmr.msra.gmra.mxu1 %vm284_vm2, %v2436_v60 }
 0x193   : > { %2439 = vmatmul.msk.bf16.vlgmr.msra.gmra.mxu2 %vm284_vm2, %v2436_v60  ;;  %2440 = vmatmul.msk.bf16.vlgmr.msra.gmra.mxu3 %vm284_vm2, %v2436_v60 }
 0x196   : > { %v1059_v50 = vpop.f32.mrf.mxu2  ;;  %v1072_v23 = vpop.f32.mrf.mxu3 }
 0x197   : > { %v1130_v1 = vadd.f32 %v1059_v50, %v989_v36  ;;  %v1131_v3 = vadd.f32 %v1072_v23, %v990_v37  ;;  %v1035_v12 = vpop.f32.mrf.mxu0  ;;  %v1048_v28 = vpop.f32.mrf.mxu1 }
 0x19e   : > { %v1061_v9 = vpop.f32.mrf.mxu2  ;;  %v1074_v29 = vpop.f32.mrf.mxu3 }
 0x19f   : > { %v1085_v5 = vpop.f32.mrf.mxu0  ;;  %v1098_v53 = vpop.f32.mrf.mxu1 }
 0x1a0   : > { %v1132_v7 = vadd.f32 %v1085_v5, %v991_v39  ;;  %v1133_v8 = vadd.f32 %v1098_v53, %v992_v13 }
 0x1a2   : > { %2441 = vmatmul.msk.bf16.vlgmr.msrb.gmra.mxu0 %vm284_vm2, %v2436_v60  ;;  %2442 = vmatmul.msk.bf16.vlgmr.msrb.gmra.mxu1 %vm284_vm2, %v2436_v60 }
 0x1a3   : > { %2443 = vmatmul.msk.bf16.vlgmr.msrb.gmra.mxu2 %vm284_vm2, %v2436_v60  ;;  %2444 = vmatmul.msk.bf16.vlgmr.msrb.gmra.mxu3 %vm284_vm2, %v2436_v60 }
 0x1a6   : > { %v1111_v18 = vpop.f32.mrf.mxu2  ;;  %v1124_v19 = vpop.f32.mrf.mxu3 }
 0x1a7   : > { %v1134_v36 = vadd.f32 %v1111_v18, %v993_v17  ;;  %v1135_v37 = vadd.f32 %v1124_v19, %v994_v11  ;;  %v1087_v16 = vpop.f32.mrf.mxu0  ;;  %v1100_v20 = vpop.f32.mrf.mxu1 }
 0x1ae   : > { %v1113_v21 = vpop.f32.mrf.mxu2  ;;  %v1126_v22 = vpop.f32.mrf.mxu3 }
 0x1af   : > { %v1203_v24 = vpop.f32.mrf.mxu0  ;;  %v1216_v52 = vpop.f32.mrf.mxu1 }
 0x1b0   : > { %v1298_v26 = vmul.f32 %v1203_v24, %v2962_v2  ;;  %v1299_v27 = vmul.f32 %v1216_v52, %v2964_v54 }
 0x1b2   : > { %v1306_v32 = vadd.f32 %v1298_v26, %v1128_v63  ;;  %v1307_v33 = vadd.f32 %v1299_v27, %v1129_v0 }
 0x1b6   : > { %v1229_v56 = vpop.f32.mrf.mxu2  ;;  %v1242_v57 = vpop.f32.mrf.mxu3 }
 0x1b7   : > { %v1300_v31 = vmul.f32 %v1229_v56, %v2991_v42  ;;  %v1301_v35 = vmul.f32 %v1242_v57, %v2993_v10  ;;  %v1205_v38 = vpop.f32.mrf.mxu0  ;;  %v1218_v39 = vpop.f32.mrf.mxu1 }
 0x1b9   : > { %v1308_v13 = vadd.f32 %v1300_v31, %v1130_v1  ;;  %v1309_v43 = vadd.f32 %v1301_v35, %v1131_v3 }
 0x1be   : > { %v1231_v44 = vpop.f32.mrf.mxu2  ;;  %v1244_v45 = vpop.f32.mrf.mxu3 }
 0x1bf   : > { %v1255_v46 = vpop.f32.mrf.mxu0  ;;  %v1268_v47 = vpop.f32.mrf.mxu1 }
 0x1c0   : > { %v1302_v4 = vmul.f32 %v1255_v46, %v3005_v61  ;;  %v1303_v17 = vmul.f32 %v1268_v47, %v3007_v62 }
 0x1c2   : > { %v3103_v11 = vadd.f32 %v1302_v4, %v1132_v7  ;;  %v1311_v6 = vadd.f32 %v1303_v17, %v1133_v8 }
 0x1c6   : > { %v1281_v49 = vpop.f32.mrf.mxu2  ;;  %v1294_v41 = vpop.f32.mrf.mxu3 }
 0x1c7   : > { %v1304_v48 = vmul.f32 %v1281_v49, %v3031_v25  ;;  %v1305_v60 = vmul.f32 %v1294_v41, %v3033_v51  ;;  %v1257_v63 = vpop.f32.mrf.mxu0  ;;  %v1270_v0 = vpop.f32.mrf.mxu1 }
 0x1c9   : > { %v3107_v50 = vadd.f32 %v1304_v48, %v1134_v36  ;;  %v3109_v23 = vadd.f32 %v1305_v60, %v1135_v37 }
 0x1ce   : > { %v1283_v1 = vpop.f32.mrf.mxu2  ;;  %v1296_v3 = vpop.f32.mrf.mxu3 }
 0x1cf   : > { %v1379_v12 = vpop.f32.mrf.mxu0  ;;  %v1392_v28 = vpop.f32.mrf.mxu1 }
 0x1d0   : > { %v1474_v9 = vmul.f32 %v1379_v12, %v2876_v58  ;;  %v1475_v29 = vmul.f32 %v1392_v28, %v2878_v59 }
 0x1d2   : > { %v1482_v5 = vadd.f32 %v1474_v9, %v1306_v32  ;;  %v1483_v53 = vadd.f32 %v1475_v29, %v1307_v33 }
 0x1d6   : > { %v1405_v7 = vpop.f32.mrf.mxu2  ;;  %v1418_v8 = vpop.f32.mrf.mxu3 }
 0x1d7   : > { %v1476_v18 = vmul.f32 %v1405_v7, %v2895_v14  ;;  %v1477_v19 = vmul.f32 %v1418_v8, %v2897_v15  ;;  %v1381_v36 = vpop.f32.mrf.mxu0  ;;  %v1394_v16 = vpop.f32.mrf.mxu1 }
 0x1d9   : > { %v1484_v37 = vadd.f32 %v1476_v18, %v1308_v13  ;;  %v1485_v20 = vadd.f32 %v1477_v19, %v1309_v43 }
 0x1de   : > { %v1407_v21 = vpop.f32.mrf.mxu2  ;;  %v1420_v22 = vpop.f32.mrf.mxu3 }
 0x1df   : > { %v1431_v24 = vpop.f32.mrf.mxu0  ;;  %v1444_v52 = vpop.f32.mrf.mxu1 }
 0x1e0   : > { %v1479_v58 = vmul.f32 %v1444_v52, %v2924_v30  ;;  %v1478_v19 = vmul.f32 %v1431_v24, %v2922_v34 }
 0x1e2   : > { %v1487_v26 = vadd.f32 %v1479_v58, %v1311_v6  ;;  %v1486_v16 = vadd.f32 %v1478_v19, %v3103_v11 }
 0x1e6   : > { %v1457_v59 = vpop.f32.mrf.mxu2  ;;  %v1470_v27 = vpop.f32.mrf.mxu3 }
 0x1e7   : > { %v1433_v32 = vpop.f32.mrf.mxu0  ;;  %v1446_v33 = vpop.f32.mrf.mxu1 }
 0x1e8   : > { %v1481_v33 = vmul.f32 %v1470_v27, %v2942_v55 }
 0x1ee   : > { %v1459_v56 = vpop.f32.mrf.mxu2  ;;  %v1472_v57 = vpop.f32.mrf.mxu3 }
 0x1ef   : > { %v1555_v14 = vpop.f32.mrf.mxu0  ;;  %v1568_v31 = vpop.f32.mrf.mxu1 }
 0x1f0   : > { %v1650_v63 = vadd.f32 %v1555_v14, %v1482_v5  ;;  %v1651_v0 = vadd.f32 %v1568_v31, %v1483_v53 }
 0x1f6   : > { %v1581_v15 = vpop.f32.mrf.mxu2  ;;  %v1594_v35 = vpop.f32.mrf.mxu3 }
 0x1f7   : > { %v1557_v38 = vpop.f32.mrf.mxu0  ;;  %v1570_v39 = vpop.f32.mrf.mxu1  ;;  %v1652_v12 = vadd.f32 %v1581_v15, %v1484_v37  ;;  %v1653_v53 = vadd.f32 %v1594_v35, %v1485_v20 }
 0x1fe   : > { %v1583_v13 = vpop.f32.mrf.mxu2  ;;  %v1596_v43 = vpop.f32.mrf.mxu3 }
 0x1ff   : > { %v1607_v44 = vpop.f32.mrf.mxu0  ;;  %v1620_v45 = vpop.f32.mrf.mxu1 }
 0x200   : > { %v1654_v20 = vadd.f32 %v1607_v44, %v1486_v16  ;;  %v1655_v14 = vadd.f32 %v1620_v45, %v1487_v26 }
 0x206   : > { %v1633_v46 = vpop.f32.mrf.mxu2  ;;  %v1646_v47 = vpop.f32.mrf.mxu3 }
 0x207   : > { %v1609_v30 = vpop.f32.mrf.mxu0  ;;  %v1622_v4 = vpop.f32.mrf.mxu1 }
 0x20e   : > { %v1635_v17 = vpop.f32.mrf.mxu2  ;;  %v1648_v6 = vpop.f32.mrf.mxu3 }
 0x20f   : > { %v1723_v49 = vpop.f32.mrf.mxu0  ;;  %v1736_v41 = vpop.f32.mrf.mxu1 }
 0x210   : > { %v1818_v48 = vmul.f32 %v1723_v49, %v2962_v2  ;;  %v1819_v60 = vmul.f32 %v1736_v41, %v2964_v54 }
 0x212   : > { %v3118_v28 = vadd.f32 %v1818_v48, %v1650_v63  ;;  %v3120_v9 = vadd.f32 %v1819_v60, %v1651_v0  ;;  %v2522_v63 = vmov 4096.0  }
 0x213   : > { %2486 = vrcp.f32 %v2522_v63 }
 0x214   : > { %v1850_v2 = vmul.f32 %v3118_v28, %v3118_v28  ;;  %v1851_v54 = vmul.f32 %v3120_v9, %v3120_v9  ;;  %v1834_v36 = vadd.f32 %v3120_v9, %v3118_v28 }
 0x216   : > { %v1749_v1 = vpop.f32.mrf.mxu2  ;;  %v1762_v3 = vpop.f32.mrf.mxu3  ;;  %v1858_v34 = vadd.f32 %v1851_v54, %v1850_v2 }
 0x217   : > { %v1820_v29 = vmul.f32 %v1749_v1, %v2991_v42  ;;  %v1725_v7 = vpop.f32.mrf.mxu0  ;;  %v1738_v8 = vpop.f32.mrf.mxu1  ;;  %v1821_v5 = vmul.f32 %v1762_v3, %v2993_v10  ;;  %v1480_v10 = vmul.f32 %v1457_v59, %v2940_v40 }
 0x219   : > { %v3123_v18 = vadd.f32 %v1820_v29, %v1652_v12  ;;  %v3137_v24 = vadd.f32 %v1821_v5, %v1653_v53  ;;  %v1488_v35 = vadd.f32 %v1480_v10, %v3107_v50  ;;  %v2487_v0 = vpop.eup %2486 }
 0x21a   : > { %v1875_v1 = vmul.f32 4096.0, %v2487_v0  ;;  %vm1879_vm10 = vweird.f32 %v2487_v0 }
 0x21b   : > { %v1852_v42 = vmul.f32 %v3123_v18, %v3123_v18  ;;  %v1835_v22 = vadd.f32 %v1834_v36, %v3123_v18  ;;  %v1853_v15 = vmul.f32 %v3137_v24, %v3137_v24 }
 0x21c   : > { %v1876_v29 = vsub.f32 1.0, %v1875_v1 }
 0x21d   : > { %v1859_v56 = vadd.f32 %v1858_v34, %v1852_v42  ;;  %v1836_v31 = vadd.f32 %v1835_v22, %v3137_v24 }
 0x21e   : > { %v1751_v37 = vpop.f32.mrf.mxu2  ;;  %v1764_v21 = vpop.f32.mrf.mxu3  ;;  %v1877_v5 = vmul.f32 %v2487_v0, %v1876_v29 }
 0x21f   : > { %v1775_v52 = vpop.f32.mrf.mxu0  ;;  %v1788_v58 = vpop.f32.mrf.mxu1  ;;  %v1860_v59 = vadd.f32 %v1859_v56, %v1853_v15  ;;  %v1895_v15 = vld [vmem:[%s3549_s3] sm:$0xff] }
 0x220   : > { %v1822_v32 = vmul.f32 %v1775_v52, %v3005_v61  ;;  %v1823_v57 = vmul.f32 %v1788_v58, %v3007_v62  ;;  %v1489_v61 = vadd.f32 %v1481_v33, %v3109_v23  ;;  %v1656_v62 = vadd.f32 %v1633_v46, %v1488_v35 }
 0x221   : > { %v1878_v37 = vadd.f32 %v2487_v0, %v1877_v5 }
 0x222   : > { %v3143_v11 = vadd.f32 %v1822_v32, %v1654_v20  ;;  %v3153_v27 = vadd.f32 %v1823_v57, %v1655_v14  ;;  %v1657_v39 = vadd.f32 %v1646_v47, %v1489_v61 }
 0x223   : > { %v1880_v52 = vsel %vm1879_vm10, %v2487_v0, %v1878_v37 }
 0x224   : > { %v1854_v40 = vmul.f32 %v3143_v11, %v3143_v11  ;;  %v1837_v55 = vadd.f32 %v1836_v31, %v3143_v11  ;;  %v1855_v30 = vmul.f32 %v3153_v27, %v3153_v27  ;;  %v2524_v31 = vmov 0  }
 0x225   : > { %2484 = vset.pattern.permute.xlu2 %v2524_v31  ;;  %2485 = vset.pattern.permute.xlu0 %v2524_v31 }
 0x226   : > { %v1801_v38 = vpop.f32.mrf.mxu2  ;;  %v1814_v26 = vpop.f32.mrf.mxu3  ;;  %v1861_v45 = vadd.f32 %v1860_v59, %v1854_v40  ;;  %v1838_v17 = vadd.f32 %v1837_v55, %v3153_v27  ;;  %v1911_v55 = vld [vmem:[%s3550_s4] sm:$0xff] }
 0x227   : > { %v1824_v13 = vmul.f32 %v1801_v38, %v3031_v25  ;;  %v1825_v43 = vmul.f32 %v1814_v26, %v3033_v51  ;;  %v1777_v44 = vpop.f32.mrf.mxu0  ;;  %v1790_v50 = vpop.f32.mrf.mxu1  ;;  %v2525_v38 = vmov 0.0  }
 0x228   : > { %v1862_v25 = vadd.f32 %v1861_v45, %v1855_v30  ;;  %2293 = vst [vmem:[%s3181_s27] sm:$0xff] %v2525_v38 }
 0x229   : > { %v3159_v23 = vadd.f32 %v1824_v13, %v1656_v62  ;;  %v3161_v4 = vadd.f32 %v1825_v43, %v1657_v39  ;;  %2302 = vst [vmem:[%s3181_s27 + $0x48] sm:$0xff] %v2525_v38 }
 0x22b   : > { %v1839_v46 = vadd.f32 %v1838_v17, %v3159_v23  ;;  %v1856_v47 = vmul.f32 %v3159_v23, %v3159_v23  ;;  %v1857_v6 = vmul.f32 %v3161_v4, %v3161_v4 }
 0x22d   : > { %v1840_v51 = vadd.f32 %v1839_v46, %v3161_v4  ;;  %v1863_v49 = vadd.f32 %v1862_v25, %v1856_v47 }
 0x22e   : > { %v1803_v41 = vpop.f32.mrf.mxu2  ;;  %v1816_v48 = vpop.f32.mrf.mxu3 }
 0x22f   : > { %1841 = vadd.xlane.f32.xlu0 %v1840_v51  ;;  %v1864_v60 = vadd.f32 %v1863_v49, %v1857_v6 }
 0x231   : > { %1865 = vadd.xlane.f32.xlu1 %v1864_v60 }
 0x2a2   : > { %v1842_v3 = vpop.xlane.xlu0 %1841 }
 0x2a3   : > { %v1843_v12 = vrot.slane %v1842_v3, 4 }
 0x2a4   : > { %v1866_v7 = vpop.xlane.xlu1 %1865 }
 0x2a5   : > { %v1844_v8 = vadd.f32 %v1843_v12, %v1842_v3  ;;  %v1867_v19 = vrot.slane %v1866_v7, 4 }
 0x2a7   : > { %v1845_v2 = vrot.slane %v1844_v8, 2  ;;  %v1868_v54 = vadd.f32 %v1867_v19, %v1866_v7 }
 0x2a9   : > { %v1869_v53 = vrot.slane %v1868_v54, 2  ;;  %v1846_v36 = vadd.f32 %v1845_v2, %v1844_v8 }
 0x2ab   : > { %v1870_v42 = vadd.f32 %v1869_v53, %v1868_v54  ;;  %v1847_v16 = vrot.slane %v1846_v36, 1 }
 0x2ad   : > { %v1848_v21 = vadd.f32 %v1847_v16, %v1846_v36  ;;  %v1871_v34 = vrot.slane %v1870_v42, 1 }
 0x2af   : > { %2456 = vpush %v1848_v21  ;;  %v1872_v22 = vadd.f32 %v1871_v34, %v1870_v42 }
 0x2b1   : > { %2458 = vpush %v1872_v22 }
 0x2b2   : > { %2460 = vpush %v1880_v52 }
 0x2e0   : > { %s2457_s7 = spop %2456 }
 0x2e2   : > { %s2459_s8 = spop %2458 }
 0x2e3   : > { %s2461_s9 = spop %2460 }
 0x2e4   : > { %s1882_s10 = smul.f32 %s2461_s9, %s2457_s7 }
 0x2e5   : > { %s1891_s11 = smul.f32 %s2461_s9, %s2459_s8 }
 0x2e6   : > { %s1892_s12 = smul.f32 %s1882_s10, %s1882_s10  ;;  %v1912_v61 = vstv %s1882_s10 }
 0x2e8   : > { %s1893_s13 = ssub.f32 %s1891_s11, %s1892_s12 }
 0x2ea   : > { %s1894_s15 = smax.f32 %s2523_s14, %s1893_s13 }
 0x2eb   : > { %s1896_s16 = sadd.f32 1e-05, %s1894_s15 }
 0x2ed   : > { %v1897_v58 = vstv %s1896_s16 }
 0x2ee   : > { %2488 = vrsqrt.f32 %v1897_v58  ;;  %vm1904_vm12 = vweird.f32 %v1897_v58 }
 0x2f4   : > { %v2489_v10 = vpop.eup %2488 }
 0x2f5   : > { %v1899_v20 = vmul.f32 %v2489_v10, %v1897_v58  ;;  %vm1905_vm11 = vweird.f32 %v2489_v10 }
 0x2f6   : > { %vm1906_vm13 = vmor %vm1904_vm12, %vm1905_vm11 }
 0x2f7   : > { %v1900_v32 = vmul.f32 %v2489_v10, %v1899_v20 }
 0x2f9   : > { %v1901_v33 = vmul.f32 0.5, %v1900_v32 }
 0x2fb   : > { %v1902_v56 = vsub.f32 1.5, %v1901_v33 }
 0x2fd   : > { %v1903_v57 = vmul.f32 %v2489_v10, %v1902_v56 }
 0x2ff   : > { %v1907_v14 = vsel %vm1906_vm13, %v2489_v10, %v1903_v57 }
 0x300   : > { %2462 = vpush %v1907_v14 }
 0x331   : > { %s2463_s22 = spop %2462 }
 0x332   : > { %v1909_v35 = vstv %s2463_s22 }
 0x333   : > { %v1910_v40 = vmul.f32 %v1909_v35, %v1895_v15 }
 0x335   : > { %1917 = vperm.xlu2 %2484, %v1910_v40   ;;  %v1913_v59 = vmul.f32 %v1912_v61, %v1910_v40 }
 0x337   : > { %v1914_v62 = vsub.f32 %v1911_v55, %v1913_v59 }
 0x33d   : > { %1930 = vperm.xlu2 %2484, %v1914_v62  }
 0x38f   : > { %v3185_v26 = vpop.permute.xlu2 %1917 }
 0x390   : > { %v1920_v39 = vmul.f32 %v3185_v26, %v3118_v28  ;;  %v1921_v13 = vmul.f32 %v3185_v26, %v3120_v9  ;;  %v1922_v43 = vmul.f32 %v3185_v26, %v3123_v18  ;;  %v1923_v44 = vmul.f32 %v3185_v26, %v3137_v24 }
 0x391   : > { %v1924_v52 = vmul.f32 %v3185_v26, %v3143_v11 }
 0x397   : > { %v3195_v50 = vpop.permute.xlu2 %1930 }
 0x398   : > { %v3198_v45 = vadd.f32 %v3195_v50, %v1920_v39  ;;  %v3201_v30 = vadd.f32 %v3195_v50, %v1921_v13  ;;  %v3204_v17 = vadd.f32 %v3195_v50, %v1922_v43  ;;  %v3207_v28 = vadd.f32 %v3195_v50, %v1923_v44 }
 0x399   : > { %v3254_v57 = vadd.f32 %v3195_v50, %v1924_v52  ;;  %v1925_v44 = vmul.f32 %v3185_v26, %v3153_v27 }
 0x39a   : > { %v3210_v9 = vmul.f32 0.70710677, %v3198_v45  ;;  %v3213_v18 = vmul.f32 0.70710677, %v3201_v30  ;;  %v3216_v24 = vmul.f32 0.70710677, %v3204_v17 }
 0x39b   : > { %v3219_v46 = vmul.f32 0.70710677, %v3207_v28 }
 0x39c   : > { %v1957_v47 = vmul.f32 %v3210_v9, %v3210_v9  ;;  %v1997_v25 = vmul.f32 %v3213_v18, %v3213_v18  ;;  %v2037_v51 = vmul.f32 %v3216_v24, %v3216_v24 }
 0x39d   : > { %v2077_v6 = vmul.f32 %v3219_v46, %v3219_v46 }
 0x39e   : > { %v3229_v49 = vmin.f32 %v1957_v47, 16.0  ;;  %v3231_v41 = vmin.f32 %v1997_v25, 16.0  ;;  %v3233_v48 = vmin.f32 %v2037_v51, 16.0  ;;  %v3267_v47 = vmul.f32 0.70710677, %v3254_v57 }
 0x39f   : > { %v3235_v60 = vmin.f32 %v2077_v6, 16.0 }
 0x3a0   : > { %v1959_v63 = vmul.f32 2.1237322e-06, %v3229_v49  ;;  %v1970_v0 = vmul.f32 3.8918573e-05, %v3229_v49  ;;  %v1999_v1 = vmul.f32 2.1237322e-06, %v3231_v41 }
 0x3a1   : > { %v2010_v3 = vmul.f32 3.8918573e-05, %v3231_v41  ;;  %v2039_v12 = vmul.f32 2.1237322e-06, %v3233_v48  ;;  %v2050_v29 = vmul.f32 3.8918573e-05, %v3233_v48 }
 0x3a2   : > { %v1960_v7 = vadd.f32 0.00028619796, %v1959_v63  ;;  %v1971_v8 = vadd.f32 0.001143296, %v1970_v0  ;;  %v2000_v19 = vadd.f32 0.00028619796, %v1999_v1  ;;  %v3273_v1 = vadd.f32 %v3195_v50, %v1925_v44 }
 0x3a3   : > { %v2011_v2 = vadd.f32 0.001143296, %v2010_v3  ;;  %v2040_v54 = vadd.f32 0.00028619796, %v2039_v12  ;;  %v2051_v5 = vadd.f32 0.001143296, %v2050_v29 }
 0x3a4   : > { %v1961_v53 = vmul.f32 %v1960_v7, %v3229_v49  ;;  %v1972_v36 = vmul.f32 %v1971_v8, %v3229_v49  ;;  %v2001_v42 = vmul.f32 %v2000_v19, %v3231_v41  ;;  %v2079_v16 = vmul.f32 2.1237322e-06, %v3235_v60 }
 0x3a5   : > { %v2012_v37 = vmul.f32 %v2011_v2, %v3231_v41  ;;  %v2041_v21 = vmul.f32 %v2040_v54, %v3233_v48  ;;  %v2052_v34 = vmul.f32 %v2051_v5, %v3233_v48  ;;  %v2090_v22 = vmul.f32 3.8918573e-05, %v3235_v60 }
 0x3a6   : > { %v1962_v58 = vadd.f32 0.0036580483, %v1961_v53  ;;  %v1973_v10 = vadd.f32 0.014752088, %v1972_v36  ;;  %v2002_v20 = vadd.f32 0.0036580483, %v2001_v42  ;;  %v1926_v2 = vmul.f32 %v3185_v26, %v3159_v23 }
 0x3a7   : > { %v2013_v32 = vadd.f32 0.014752088, %v2012_v37  ;;  %v2042_v33 = vadd.f32 0.0036580483, %v2041_v21  ;;  %v2053_v56 = vadd.f32 0.014752088, %v2052_v34  ;;  %v2117_v5 = vmul.f32 %v3267_v47, %v3267_v47 }
 0x3a8   : > { %v1963_v14 = vmul.f32 %v1962_v58, %v3229_v49  ;;  %v1974_v31 = vmul.f32 %v1973_v10, %v3229_v49  ;;  %v2080_v15 = vadd.f32 0.00028619796, %v2079_v16  ;;  %v2003_v35 = vmul.f32 %v2002_v20, %v3231_v41 }
 0x3a9   : > { %v2014_v40 = vmul.f32 %v2013_v32, %v3231_v41  ;;  %v2054_v11 = vmul.f32 %v2053_v56, %v3233_v48  ;;  %v2091_v61 = vadd.f32 0.001143296, %v2090_v22  ;;  %v2043_v55 = vmul.f32 %v2042_v33, %v3233_v48 }
 0x3aa   : > { %v1975_v59 = vadd.f32 0.112945676, %v1974_v31  ;;  %v2081_v62 = vmul.f32 %v2080_v15, %v3235_v60  ;;  %v1964_v38 = vadd.f32 0.05243302, %v1963_v14  ;;  %v2004_v51 = vadd.f32 0.05243302, %v2003_v35 }
 0x3ab   : > { %v2015_v39 = vadd.f32 0.112945676, %v2014_v40  ;;  %v2055_v13 = vadd.f32 0.112945676, %v2054_v11  ;;  %v2092_v43 = vmul.f32 %v2091_v61, %v3235_v60  ;;  %v2044_v12 = vadd.f32 0.05243302, %v2043_v55 }
 0x3ac   : > { %v1976_v25 = vmul.f32 %v1975_v59, %v3229_v49  ;;  %v2082_v29 = vadd.f32 0.0036580483, %v2081_v62  ;;  %v1965_v7 = vmul.f32 %v1964_v38, %v3229_v49  ;;  %v2005_v53 = vmul.f32 %v2004_v51, %v3231_v41 }
 0x3ad   : > { %v2016_v6 = vmul.f32 %v2015_v39, %v3231_v41  ;;  %v2056_v63 = vmul.f32 %v2055_v13, %v3233_v48  ;;  %v2093_v0 = vadd.f32 0.014752088, %v2092_v43  ;;  %v3286_v37 = vmul.f32 0.70710677, %v3273_v1 }
 0x3ae   : > { %v1977_v3 = vadd.f32 0.4994258, %v1976_v25  ;;  %v2045_v34 = vmul.f32 %v2044_v12, %v3233_v48  ;;  %v2083_v23 = vmul.f32 %v2082_v29, %v3235_v60  ;;  %v1966_v22 = vadd.f32 0.18741608, %v1965_v7 }
 0x3af   : > { %v2017_v27 = vadd.f32 0.4994258, %v2016_v6  ;;  %v2057_v8 = vadd.f32 0.4994258, %v2056_v63  ;;  %v2094_v19 = vmul.f32 %v2093_v0, %v3235_v60  ;;  %v3297_v10 = vadd.f32 %v3195_v50, %v1926_v2 }
 0x3b0   : > { %v1978_v54 = vmul.f32 %v1977_v3, %v3229_v49  ;;  %v2006_v20 = vadd.f32 0.18741608, %v2005_v53  ;;  %v3302_v33 = vmin.f32 %v2117_v5, 16.0  ;;  %v1927_v56 = vmul.f32 %v3185_v26, %v3161_v4 }
 0x3b1   : > { %v2018_v36 = vmul.f32 %v2017_v27, %v3231_v41  ;;  %v2058_v42 = vmul.f32 %v2057_v8, %v3233_v48  ;;  %v2095_v16 = vadd.f32 0.112945676, %v2094_v19  ;;  %v2046_v14 = vadd.f32 0.18741608, %v2045_v34 }
 0x3b2   : > { %v3288_v21 = vadd.f32 1.0, %v1978_v54  ;;  %v2084_v31 = vadd.f32 0.05243302, %v2083_v23  ;;  %v2157_v15 = vmul.f32 %v3286_v37, %v3286_v37  ;;  %v1967_v35 = vmul.f32 %v1966_v22, %v3229_v49 }
 0x3b3   : > { %v3292_v52 = vadd.f32 1.0, %v2018_v36  ;;  %v3294_v58 = vadd.f32 1.0, %v2058_v42  ;;  %v2096_v32 = vmul.f32 %v2095_v16, %v3235_v60  ;;  %v3311_v40 = vadd.f32 %v3195_v50, %v1927_v56 }
 0x3b4   : > { %2490 = vrcp.f32 %v3288_v21  ;;  %v3314_v11 = vmul.f32 0.70710677, %v3297_v10  ;;  %v2007_v61 = vmul.f32 %v2006_v20, %v3231_v41  ;;  %v2119_v4 = vmul.f32 2.1237322e-06, %v3302_v33 }
 0x3b5   : > { %2492 = vrcp.f32 %v3292_v52  ;;  %v2097_v59 = vadd.f32 0.4994258, %v2096_v32  ;;  %v2047_v55 = vmul.f32 %v2046_v14, %v3233_v48  ;;  %v2085_v62 = vmul.f32 %v2084_v31, %v3235_v60 }
 0x3b6   : > { %2494 = vrcp.f32 %v3294_v58  ;;  %v2130_v49 = vmul.f32 3.8918573e-05, %v3302_v33  ;;  %v3323_v38 = vmin.f32 %v2157_v15, 16.0  ;;  %v1968_v39 = vadd.f32 1.1283791, %v1967_v35 }
 0x3b7   : > { %v2098_v41 = vmul.f32 %v2097_v59, %v3235_v60  ;;  %v2120_v43 = vadd.f32 0.00028619796, %v2119_v4  ;;  %v3331_v44 = vmul.f32 0.5, %v3198_v45  ;;  %v3334_v48 = vmul.f32 0.5, %v3201_v30 }
 0x3b8   : > { %v3337_v25 = vmul.f32 0.5, %v3204_v17  ;;  %v3340_v51 = vmul.f32 0.70710677, %v3311_v40  ;;  %v2008_v63 = vadd.f32 1.1283791, %v2007_v61  ;;  %v2197_v17 = vmul.f32 %v3314_v11, %v3314_v11 }
 0x3b9   : > { %v3344_v0 = vadd.f32 1.0, %v2098_v41  ;;  %v2121_v3 = vmul.f32 %v2120_v43, %v3302_v33  ;;  %v2131_v12 = vadd.f32 0.001143296, %v2130_v49  ;;  %v2086_v30 = vadd.f32 0.18741608, %v2085_v62 }
 0x3ba   : > { %v3318_v26 = vpop.eup %2490  ;;  %v3352_v7 = vmul.f32 %v1968_v39, %v3210_v9  ;;  %v2048_v27 = vadd.f32 1.1283791, %v2047_v55  ;;  %v2159_v8 = vmul.f32 2.1237322e-06, %v3323_v38  ;;  %vm1985_vm14 = vweird.f32 %v3288_v21 }
 0x3bb   : > { %v3325_v50 = vpop.eup %2492  ;;  %v1981_v13 = vmul.f32 %v3318_v26, %v3288_v21  ;;  %2496 = vrcp.f32 %v3344_v0  ;;  %v1989_v19 = vand.u32 2147483647, %v3288_v21  ;;  %v1991_v2 = vand.u32 2147483648, %v3288_v21 }
 0x3bc   : > { %v3342_v6 = vpop.eup %2494  ;;  %v2021_v45 = vmul.f32 %v3325_v50, %v3292_v52  ;;  %v3362_v5 = vmul.f32 %v2008_v63, %v3213_v18  ;;  %v2029_v9 = vand.u32 2147483647, %v3292_v52  ;;  %v2122_v53 = vadd.f32 0.0036580483, %v2121_v3 }
 0x3bd   : > { %v1982_v29 = vsub.f32 1.0, %v1981_v13  ;;  %v2061_v54 = vmul.f32 %v3342_v6, %v3294_v58  ;;  %v2132_v36 = vmul.f32 %v2131_v12, %v3302_v33  ;;  %v2031_v34 = vand.u32 2147483648, %v3292_v52 }
 0x3be   : > { %v2022_v16 = vsub.f32 1.0, %v2021_v45  ;;  %v2087_v23 = vmul.f32 %v2086_v30, %v3235_v60  ;;  %v3370_v22 = vmul.f32 %v2048_v27, %v3216_v24  ;;  %v2071_v20 = vand.u32 2147483648, %v3294_v58 }
 0x3bf   : > { %v1983_v42 = vmul.f32 %v3318_v26, %v1982_v29  ;;  %v2133_v32 = vadd.f32 0.014752088, %v2132_v36  ;;  %v2160_v18 = vadd.f32 0.00028619796, %v2159_v8  ;;  %v1992_v56 = vor.u32 1.1754944e-38, %v1991_v2 }
 0x3c0   : > { %v2062_v14 = vsub.f32 1.0, %v2061_v54  ;;  %v2069_v31 = vand.u32 2147483647, %v3294_v58  ;;  %v3374_v15 = vmin.f32 %v2197_v17, 16.0  ;;  %vm1986_vm15 = vweird.f32 %v3318_v26 }
 0x3c1   : > { %v3376_v35 = vpop.eup %2496  ;;  %vm3379_vm0 = vcmp.eq.f32.partialorder %v1989_v19, 8.507059e+37  ;;  %vm2025_vm1 = vweird.f32 %v3292_v52  ;;  %v2123_v24 = vmul.f32 %v2122_v53, %v3302_v33  ;;  %v2134_v60 = vmul.f32 %v2133_v32, %v3302_v33  ;;  %vm3400_vm5 = vmor %vm1985_vm14, %vm1986_vm15 }
 0x3c2   : > { %v2170_v59 = vmul.f32 3.8918573e-05, %v3323_v38  ;;  %v1984_v4 = vadd.f32 %v3318_v26, %v1983_v42  ;;  %v2023_v55 = vmul.f32 %v3325_v50, %v2022_v16  ;;  %v2088_v62 = vadd.f32 1.1283791, %v2087_v23 }
 0x3c3   : > { %v2101_v49 = vmul.f32 %v3376_v35, %v3344_v0  ;;  %v2032_v39 = vor.u32 1.1754944e-38, %v2031_v34  ;;  %vm2065_vm2 = vweird.f32 %v3294_v58  ;;  %v2072_v13 = vor.u32 1.1754944e-38, %v2071_v20 }
 0x3c4   : > { %v2135_v41 = vadd.f32 0.112945676, %v2134_v60  ;;  %v2161_v43 = vmul.f32 %v2160_v18, %v3323_v38  ;;  %vm2026_vm3 = vweird.f32 %v3325_v50  ;;  %v2063_v63 = vmul.f32 %v3342_v6, %v2062_v14 }
 0x3c5   : > { %vm2066_vm4 = vweird.f32 %v3342_v6  ;;  %v2102_v3 = vsub.f32 1.0, %v2101_v49  ;;  %v2124_v29 = vadd.f32 0.05243302, %v2123_v24  ;;  %v2171_v30 = vadd.f32 0.001143296, %v2170_v59  ;;  %vm3436_vm8 = vmor %vm2025_vm1, %vm2026_vm3 }
 0x3c6   : > { %v2136_v45 = vmul.f32 %v2135_v41, %v3302_v33  ;;  %v2199_v17 = vmul.f32 2.1237322e-06, %v3374_v15  ;;  %v1988_v27 = vsel %vm3400_vm5, %v3318_v26, %v1984_v4  ;;  %v2024_v8 = vadd.f32 %v3325_v50, %v2023_v55  ;;  %vm3455_vm10 = vmor %vm2065_vm2, %vm2066_vm4 }
 0x3c7   : > { %vm3410_vm6 = vcmp.eq.f32.partialorder %v2029_v9, 8.507059e+37  ;;  %v3415_v21 = vmul.f32 %v2088_v62, %v3219_v46  ;;  %v2210_v2 = vmul.f32 3.8918573e-05, %v3374_v15  ;;  %vm3418_vm7 = vcmp.eq.f32.partialorder %v2069_v31, 8.507059e+37 }
 0x3c8   : > { %v2137_v53 = vadd.f32 0.4994258, %v2136_v45  ;;  %v2162_v36 = vadd.f32 0.0036580483, %v2161_v43  ;;  %v2172_v42 = vmul.f32 %v2171_v30, %v3323_v38  ;;  %v2200_v26 = vadd.f32 0.00028619796, %v2199_v17 }
 0x3c9   : > { %v2064_v16 = vadd.f32 %v3342_v6, %v2063_v63  ;;  %v2103_v9 = vmul.f32 %v3376_v35, %v2102_v3  ;;  %v2211_v34 = vadd.f32 0.001143296, %v2210_v2  ;;  %v2237_v46 = vmul.f32 %v3340_v51, %v3340_v51 }
 0x3ca   : > { %v2125_v23 = vmul.f32 %v2124_v29, %v3302_v33  ;;  %v2138_v20 = vmul.f32 %v2137_v53, %v3302_v33  ;;  %v2173_v32 = vadd.f32 0.014752088, %v2172_v42  ;;  %v2201_v18 = vmul.f32 %v2200_v26, %v3374_v15 }
 0x3cb   : > { %v1993_v14 = vsel %vm3379_vm0, %v1992_v56, %v1988_v27  ;;  %vm2105_vm9 = vweird.f32 %v3344_v0  ;;  %v2111_v24 = vand.u32 2147483648, %v3344_v0  ;;  %v2212_v60 = vmul.f32 %v2211_v34, %v3374_v15 }
 0x3cc   : > { %v2028_v59 = vsel %vm3436_vm8, %v3325_v50, %v2024_v8  ;;  %v3446_v61 = vadd.f32 1.0, %v2138_v20  ;;  %v2174_v56 = vmul.f32 %v2173_v32, %v3323_v38  ;;  %v3449_v4 = vmin.f32 %v2237_v46, 16.0 }
 0x3cd   : > { %v2104_v55 = vadd.f32 %v3376_v35, %v2103_v9  ;;  %vm2106_vm11 = vweird.f32 %v3376_v35  ;;  %v2202_v62 = vadd.f32 0.0036580483, %v2201_v18  ;;  %v2213_v50 = vadd.f32 0.014752088, %v2212_v60 }
 0x3ce   : > { %v2068_v49 = vsel %vm3455_vm10, %v3342_v6, %v2064_v16  ;;  %v2126_v41 = vadd.f32 0.18741608, %v2125_v23  ;;  %2498 = vrcp.f32 %v3446_v61  ;;  %v2163_v43 = vmul.f32 %v2162_v36, %v3323_v38  ;;  %vm3472_vm12 = vmor %vm2105_vm9, %vm2106_vm11 }
 0x3cf   : > { %v1994_v58 = vmul.f32 %v1993_v14, %v3352_v7  ;;  %v2109_v63 = vand.u32 2147483647, %v3344_v0  ;;  %v2112_v3 = vor.u32 1.1754944e-38, %v2111_v24  ;;  %v2175_v12 = vadd.f32 0.112945676, %v2174_v56 }
 0x3d0   : > { %v2033_v29 = vsel %vm3410_vm6, %v2032_v39, %v2028_v59  ;;  %v2203_v6 = vmul.f32 %v2202_v62, %v3374_v15  ;;  %v2214_v30 = vmul.f32 %v2213_v50, %v3374_v15  ;;  %v2239_v17 = vmul.f32 2.1237322e-06, %v3449_v4 }
 0x3d1   : > { %v2073_v7 = vsel %vm3418_vm7, %v2072_v13, %v2068_v49  ;;  %v2108_v27 = vsel %vm3472_vm12, %v3376_v35, %v2104_v55  ;;  %v2176_v39 = vmul.f32 %v2175_v12, %v3323_v38  ;;  %v2250_v0 = vmul.f32 3.8918573e-05, %v3449_v4 }
 0x3d2   : > { %v2127_v8 = vmul.f32 %v2126_v41, %v3302_v33  ;;  %v2164_v19 = vadd.f32 0.05243302, %v2163_v43  ;;  %v2215_v2 = vadd.f32 0.112945676, %v2214_v30  ;;  %v2240_v53 = vadd.f32 0.00028619796, %v2239_v17 }
 0x3d3   : > { %v2034_v36 = vmul.f32 %v2033_v29, %v3362_v5  ;;  %vm2110_vm13 = vcmp.eq.f32.partialorder %v2109_v63, 8.507059e+37  ;;  %v2177_v42 = vadd.f32 0.4994258, %v2176_v39  ;;  %v2251_v26 = vadd.f32 0.001143296, %v2250_v0 }
 0x3d4   : > { %v2499_v54 = vpop.eup %2498  ;;  %v2445_v13 = vclamps-f32 %v1994_v58, 1.0  ;;  %v2113_v16 = vsel %vm2110_vm13, %v2112_v3, %v2108_v27  ;;  %v2204_v9 = vadd.f32 0.05243302, %v2203_v6  ;;  %v2216_v35 = vmul.f32 %v2215_v2, %v3374_v15 }
 0x3d5   : > { %v2074_v34 = vmul.f32 %v2073_v7, %v3370_v22  ;;  %v2141_v46 = vmul.f32 %v2499_v54, %v3446_v61  ;;  %v2178_v33 = vmul.f32 %v2177_v42, %v3323_v38  ;;  %v2241_v23 = vmul.f32 %v2240_v53, %v3449_v4 }
 0x3d6   : > { %v2128_v20 = vadd.f32 1.1283791, %v2127_v8  ;;  %v2165_v5 = vmul.f32 %v2164_v19, %v3323_v38  ;;  %v2217_v32 = vadd.f32 0.4994258, %v2216_v35  ;;  %v2252_v18 = vmul.f32 %v2251_v26, %v3449_v4 }
 0x3d7   : > { %v2114_v14 = vmul.f32 %v2113_v16, %v3415_v21  ;;  %v2142_v31 = vsub.f32 1.0, %v2141_v46  ;;  %v2149_v24 = vand.u32 2147483647, %v3446_v61  ;;  %v3497_v60 = vadd.f32 1.0, %v2178_v33 }
 0x3d8   : > { %v2151_v22 = vand.u32 2147483648, %v3446_v61  ;;  %v2205_v59 = vmul.f32 %v2204_v9, %v3374_v15  ;;  %v2218_v56 = vmul.f32 %v2217_v32, %v3374_v15  ;;  %v2253_v52 = vadd.f32 0.014752088, %v2252_v18 }
 0x3d9   : > { %v2143_v55 = vmul.f32 %v2499_v54, %v2142_v31  ;;  %vm2146_vm14 = vweird.f32 %v2499_v54  ;;  %2500 = vrcp.f32 %v3497_v60  ;;  %v2242_v62 = vadd.f32 0.0036580483, %v2241_v23 }
 0x3da   : > { %v2446_v50 = vclamps-f32 %v2034_v36, 1.0  ;;  %v2447_v49 = vclamps-f32 %v2074_v34, 1.0  ;;  %v2166_v21 = vadd.f32 0.18741608, %v2165_v5  ;;  %v3503_v41 = vadd.f32 1.0, %v2218_v56 }
 0x3db   : > { %v2129_v43 = vmul.f32 %v2128_v20, %v3267_v47  ;;  %v2144_v58 = vadd.f32 %v2499_v54, %v2143_v55  ;;  %vm2145_vm15 = vweird.f32 %v3446_v61  ;;  %v2254_v63 = vmul.f32 %v2253_v52, %v3449_v4 }
 0x3dc   : > { %v2448_v3 = vclamps-f32 %v2114_v14, 1.0  ;;  %vm2147_vm0 = vmor %vm2145_vm15, %vm2146_vm14  ;;  %v2152_v12 = vor.u32 1.1754944e-38, %v2151_v22  ;;  %v2206_v29 = vadd.f32 0.18741608, %v2205_v59  ;;  %2502 = vrcp.f32 %v3503_v41 }
 0x3dd   : > { %v2148_v45 = vsel %vm2147_vm0, %v2499_v54, %v2144_v58  ;;  %vm2150_vm1 = vcmp.eq.f32.partialorder %v2149_v24, 8.507059e+37  ;;  %v2243_v6 = vmul.f32 %v2242_v62, %v3449_v4  ;;  %v2277_v30 = vadd.f32 1.0, %v2445_v13 }
 0x3de   : > { %v2153_v17 = vsel %vm2150_vm1, %v2152_v12, %v2148_v45  ;;  %v2255_v7 = vadd.f32 0.112945676, %v2254_v63  ;;  %v2278_v27 = vadd.f32 1.0, %v2446_v50  ;;  %v2279_v47 = vadd.f32 1.0, %v2447_v49 }
 0x3df   : > { %v2501_v39 = vpop.eup %2500  ;;  %v1944_v61 = vmul.f32 0.5, %v3207_v28  ;;  %v1945_v0 = vmul.f32 0.5, %v3254_v57  ;;  %v2154_v8 = vmul.f32 %v2153_v17, %v2129_v43  ;;  %v2167_v19 = vmul.f32 %v2166_v21, %v3323_v38 }
 0x3e0   : > { %v2181_v2 = vmul.f32 %v2501_v39, %v3497_v60  ;;  %v2207_v53 = vmul.f32 %v2206_v29, %v3374_v15  ;;  %v2256_v36 = vmul.f32 %v2255_v7, %v3449_v4  ;;  %v2280_v42 = vadd.f32 1.0, %v2448_v3 }
 0x3e1   : > { %v2449_v26 = vclamps-f32 %v2154_v8, 1.0  ;;  %v2244_v54 = vadd.f32 0.05243302, %v2243_v6  ;;  %v2285_v13 = vmul.f32 %v2277_v30, %v3331_v44  ;;  %v2286_v28 = vmul.f32 %v2278_v27, %v3334_v48 }
 0x3e2   : > { %v2503_v16 = vpop.eup %2502  ;;  %v2182_v57 = vsub.f32 1.0, %v2181_v2  ;;  %v2257_v9 = vadd.f32 0.4994258, %v2256_v36  ;;  %v2287_v38 = vmul.f32 %v2279_v47, %v3337_v25  ;;  %v2288_v35 = vmul.f32 %v2280_v42, %v1944_v61 }
 0x3e3   : > { %v2168_v34 = vadd.f32 1.1283791, %v2167_v19  ;;  %v2191_v15 = vand.u32 2147483648, %v3497_v60  ;;  %v2221_v46 = vmul.f32 %v2503_v16, %v3503_v41  ;;  %v2281_v33 = vadd.f32 1.0, %v2449_v26  ;;  %2294 = vst [vmem:[%s3181_s27 + $0x8] sm:$0xff] %v2285_v13 }
 0x3e4   : > { %v2183_v23 = vmul.f32 %v2501_v39, %v2182_v57  ;;  %vm2186_vm2 = vweird.f32 %v2501_v39  ;;  %v2189_v44 = vand.u32 2147483647, %v3497_v60  ;;  %v2258_v48 = vmul.f32 %v2257_v9, %v3449_v4  ;;  %2295 = vst [vmem:[%s3181_s27 + $0x10] sm:$0xff] %v2286_v28 }
 0x3e5   : > { %vm2185_vm3 = vweird.f32 %v3497_v60  ;;  %v2208_v25 = vadd.f32 1.1283791, %v2207_v53  ;;  %v2222_v20 = vsub.f32 1.0, %v2221_v46  ;;  %v2289_v5 = vmul.f32 %v2281_v33, %v1945_v0  ;;  %2296 = vst [vmem:[%s3181_s27 + $0x18] sm:$0xff] %v2287_v38 }
 0x3e6   : > { %v2184_v32 = vadd.f32 %v2501_v39, %v2183_v23  ;;  %v2231_v18 = vand.u32 2147483648, %v3503_v41  ;;  %v2245_v14 = vmul.f32 %v2244_v54, %v3449_v4  ;;  %v2259_v31 = vadd.f32 1.0, %v2258_v48  ;;  %2297 = vst [vmem:[%s3181_s27 + $0x20] sm:$0xff] %v2288_v35  ;;  %vm2187_vm4 = vmor %vm2185_vm3, %vm2186_vm2 }
 0x3e7   : > { %v2192_v24 = vor.u32 1.1754944e-38, %v2191_v15  ;;  %v2223_v22 = vmul.f32 %v2503_v16, %v2222_v20  ;;  %vm2226_vm5 = vweird.f32 %v2503_v16  ;;  %v2229_v59 = vand.u32 2147483647, %v3503_v41  ;;  %2298 = vst [vmem:[%s3181_s27 + $0x28] sm:$0xff] %v2289_v5 }
 0x3e8   : > { %v2169_v60 = vmul.f32 %v2168_v34, %v3286_v37  ;;  %v2188_v56 = vsel %vm2187_vm4, %v2501_v39, %v2184_v32  ;;  %vm2190_vm6 = vcmp.eq.f32.partialorder %v2189_v44, 8.507059e+37  ;;  %2504 = vrcp.f32 %v2259_v31 }
 0x3e9   : > { %v2193_v52 = vsel %vm2190_vm6, %v2192_v24, %v2188_v56  ;;  %v2224_v55 = vadd.f32 %v2503_v16, %v2223_v22  ;;  %vm2225_vm7 = vweird.f32 %v3503_v41  ;;  %v2232_v50 = vor.u32 1.1754944e-38, %v2231_v18 }
 0x3ea   : > { %v2194_v62 = vmul.f32 %v2193_v52, %v2169_v60  ;;  %vm2227_vm8 = vmor %vm2225_vm7, %vm2226_vm5  ;;  %v2246_v49 = vadd.f32 0.18741608, %v2245_v14  ;;  %v2209_v21 = vmul.f32 %v2208_v25, %v3314_v11  ;;  %vm2230_vm9 = vcmp.eq.f32.partialorder %v2229_v59, 8.507059e+37 }
 0x3eb   : > { %v2228_v43 = vsel %vm2227_vm8, %v2503_v16, %v2224_v55  ;;  %v1946_v12 = vmul.f32 0.5, %v3273_v1  ;;  %v1947_v17 = vmul.f32 0.5, %v3297_v10  ;;  %v2271_v47 = vand.u32 2147483648, %v2259_v31 }
 0x3ec   : > { %v2450_v58 = vclamps-f32 %v2194_v62, 1.0  ;;  %v2233_v63 = vsel %vm2230_vm9, %v2232_v50, %v2228_v43  ;;  %v2247_v29 = vmul.f32 %v2246_v49, %v3449_v4  ;;  %v2269_v61 = vand.u32 2147483647, %v2259_v31 }
 0x3ed   : > { %v2234_v3 = vmul.f32 %v2233_v63, %v2209_v21  ;;  %vm2265_vm11 = vweird.f32 %v2259_v31  ;;  %v2272_v4 = vor.u32 1.1754944e-38, %v2271_v47  ;;  %v1948_v36 = vmul.f32 0.5, %v3311_v40 }
 0x3ee   : > { %v2505_v37 = vpop.eup %2504  ;;  %v2282_v45 = vadd.f32 1.0, %v2450_v58  ;;  %v2248_v27 = vadd.f32 1.1283791, %v2247_v29  ;;  %vm2270_vm13 = vcmp.eq.f32.partialorder %v2269_v61, 8.507059e+37 }
 0x3ef   : > { %v2451_v41 = vclamps-f32 %v2234_v3, 1.0  ;;  %v2261_v6 = vmul.f32 %v2505_v37, %v2259_v31  ;;  %vm2266_vm10 = vweird.f32 %v2505_v37 }
 0x3f0   : > { %v2290_v30 = vmul.f32 %v2282_v45, %v1946_v12  ;;  %vm2267_vm12 = vmor %vm2265_vm11, %vm2266_vm10  ;;  %v2249_v8 = vmul.f32 %v2248_v27, %v3340_v51 }
 0x3f1   : > { %v2262_v7 = vsub.f32 1.0, %v2261_v6  ;;  %v2283_v11 = vadd.f32 1.0, %v2451_v41 }
 0x3f2   : > { %2299 = vst [vmem:[%s3181_s27 + $0x30] sm:$0xff] %v2290_v30 }
 0x3f3   : > { %v2263_v39 = vmul.f32 %v2505_v37, %v2262_v7  ;;  %v2291_v0 = vmul.f32 %v2283_v11, %v1947_v17 }
 0x3f5   : > { %v2264_v1 = vadd.f32 %v2505_v37, %v2263_v39  ;;  %2300 = vst [vmem:[%s3181_s27 + $0x38] sm:$0xff] %v2291_v0 }
 0x3f7   : > { %v2268_v19 = vsel %vm2267_vm12, %v2505_v37, %v2264_v1 }
 0x3f8   : > { %v2273_v10 = vsel %vm2270_vm13, %v2272_v4, %v2268_v19 }
 0x3f9   : > { %v2274_v2 = vmul.f32 %v2273_v10, %v2249_v8 }
 0x3fb   : > { %v2452_v53 = vclamps-f32 %v2274_v2, 1.0 }
 0x3fd   : > { %v2284_v42 = vadd.f32 1.0, %v2452_v53 }
 0x3ff   : > { %v2292_v26 = vmul.f32 %v2284_v42, %v1948_v36 }
 0x401   : > { %2301 = vst [vmem:[%s3181_s27 + $0x40] sm:$0xff] %v2292_v26 }
 0x402 PF: > { %s15_s18 = sadd.s32 1, %s2512_s18  }
 0x403   : > { %p12_p4 = scmp.ge.s32.totalorder %s15_s18, 4  }
 0x405   :  { %14 = sbr.rel (!%p12_p4) target bundleno = 1 (0x1), region = 78 }

// kernel: up_forward.6
= control target key start
LH: loop header
LB: loop body
LE: loop exit
PB: predicated region body
PF: predicated region fallthrough
CT: control target
= control target key end

     0   :  { %s2556_s18 = smov 0   ;;  %s3546_s0 = inlined_call_operand.vmem [shape: f32[2,8,1280], index: 0, kind: input, shape index: {}]   ;;  %s3547_s1 = inlined_call_operand.vmem [shape: f32[2,1024], index: 1, kind: input, shape index: {}]   ;;  %s3548_s2 = inlined_call_operand.vmem [shape: bf16[9,8,8], index: 2, kind: input, shape index: {}]   ;;  %s3549_s3 = inlined_call_operand.vmem [shape: f32[8,1], index: 3, kind: input, shape index: {}]   ;;  %s3550_s4 = inlined_call_operand.vmem [shape: f32[8,1], index: 4, kind: input, shape index: {}]   ;;  %s3551_s5 = inlined_call_operand.vmem [shape: f32[2,8,1280], index: 5, kind: output, shape index: {}]  }
   0x1 LB: > { %s2358_s19 = sadd.s32 4294967295, %s2512_s18   ;;  %p2362_p0 = scmp.ge.s32.totalorder %s2512_s18, 1  ;;  %s2512_s18 = sphi %s2556_s18, %s15_s18  }
   0x2   : > { %p187_p1 = scmp.lt.s32.totalorder %s2512_s18, 3 }
   0x4   : > { %p188_p2 = pnand %p2362_p0, %p187_p1 }
   0x5   : > { %p215_p3 = scmp.lt.s32.totalorder (!%p188_p2), %s2358_s19, 1  ;;  %s2514_s24 = smov (!%p188_p2), 33  }
   0x6   : > { %191 = sbr.rel (%p188_p2) target bundleno = 1026 (0x402), region = 40  ;;  %s2515_s25 = smov (!%p188_p2), 32  }
   0x7   : > { %s2516_s26 = smov (!%p188_p2), 31   ;;  %s2517_s27 = smov (!%p188_p2), 1  }
   0x8   : > { %s2518_s28 = smov (!%p188_p2), 127   ;;  %s2519_s29 = smov (!%p188_p2), 97  }
   0x9   : > { %s2520_s7 = smov (!%p188_p2), 96   ;;  %s2521_s10 = smov (!%p188_p2), 95  }
   0xa   : > { %s2523_s14 = smov (!%p188_p2), 0.0  }
   0xb   : > { %s3567_s19 = smov (!%p215_p3, %s2358_s19), 1  ;;  %vm275_vm0 = vcmask 269312   ;;  %vm288_vm1 = vcmask 1043456   ;;  %v247_v33 = vld [vmem:[%s3548_s2] sm:$0xf]  ;;  %vm284_vm2 = vcmask 64512  }
   0xc   : > { %s2455_s20 = smul.u32 80, %s3567_s19  ;;  %vm471_vm3 = vcmask 261120   ;;  %vm639_vm4 = vcmask 252928   ;;  %vm839_vm5 = vcmask 7168   ;;  %vm1158_vm6 = vcmask 1039360  }
   0xd   : > { %vm1334_vm7 = vcmask 793600   ;;  %vm1510_vm8 = vcmask 785408   ;;  %vm1678_vm9 = vcmask 777216  }
   0xe   : > { %s2572_s23 = scalar_lea.vmem %s3546_s0, %s2455_s20 }
   0xf   : > { %v228_v0 = vld [vmem:[%s2572_s23 + $0x10] sm:$0xff]  ;;  %v226_v1 = vld [vmem:[%s2572_s23] sm:$0xff]  ;;  %v229_v6 = vld [vmem:[%s2572_s23 + $0x18] sm:$0xff] }
  0x10   : > { %v2576_v2 = vpack.c.bf16 %v228_v0, %v228_v0  ;;  %v238_v3 = vpack.c.bf16 %v226_v1, %v226_v1  ;;  %v230_v4 = vld [vmem:[%s2572_s23 + $0x20] sm:$0xff]  ;;  %v227_v7 = vld [vmem:[%s2572_s23 + $0x8] sm:$0xff]  ;;  %v232_v8 = vld [vmem:[%s2572_s23 + $0x30] sm:$0xff]  ;;  %v2586_v9 = vpack.c.bf16 %v229_v6, %v229_v6 }
  0x11   : > { %v2580_v5 = vpack.c.bf16 %v230_v4, %v230_v4  ;;  %v2588_v10 = vpack.c.bf16 %v227_v7, %v227_v7  ;;  %v2590_v11 = vpack.c.bf16 %v232_v8, %v232_v8  ;;  %v233_v12 = vld [vmem:[%s2572_s23 + $0x38] sm:$0xff]  ;;  %v231_v13 = vld [vmem:[%s2572_s23 + $0x28] sm:$0xff]  ;;  %v234_v14 = vld [vmem:[%s2572_s23 + $0x40] sm:$0xff] }
  0x12   : > { %261 = vrot.lane.b32.xlu0 %v2576_v2, %s2514_s24  ;;  %257 = vrot.lane.b32.xlu1 %v238_v3, %s2514_s24  ;;  %v2598_v15 = vpack.c.bf16 %v233_v12, %v233_v12  ;;  %v2600_v16 = vpack.c.bf16 %v231_v13, %v231_v13  ;;  %v2602_v17 = vpack.c.bf16 %v234_v14, %v234_v14  ;;  %v2373_v8 = vld [vmem:[%s3548_s2 + $0x4] sm:$0xf]  ;;  %v235_v12 = vld [vmem:[%s2572_s23 + $0x48] sm:$0xff] }
  0x13   : > { %265 = vrot.lane.b32.xlu2 %v2580_v5, %s2514_s24 }
  0x1a   : > { %263 = vrot.lane.b32.xlu0 %v2586_v9, %s2514_s24  ;;  %259 = vrot.lane.b32.xlu1 %v2588_v10, %s2514_s24 }
  0x1b   : > { %269 = vrot.lane.b32.xlu2 %v2590_v11, %s2514_s24 }
  0x22   : > { %271 = vrot.lane.b32.xlu0 %v2598_v15, %s2514_s24  ;;  %267 = vrot.lane.b32.xlu1 %v2600_v16, %s2514_s24 }
  0x23   : > { %273 = vrot.lane.b32.xlu2 %v2602_v17, %s2514_s24 }
  0x2a   : > { %457 = vrot.lane.b32.xlu0 %v2576_v2, %s2515_s25  ;;  %459 = vrot.lane.b32.xlu1 %v2586_v9, %s2515_s25 }
  0x2b   : > { %453 = vrot.lane.b32.xlu2 %v238_v3, %s2515_s25 }
  0x32   : > { %455 = vrot.lane.b32.xlu0 %v2588_v10, %s2515_s25  ;;  %461 = vrot.lane.b32.xlu1 %v2580_v5, %s2515_s25 }
  0x33   : > { %465 = vrot.lane.b32.xlu2 %v2590_v11, %s2515_s25 }
  0x3a   : > { %463 = vrot.lane.b32.xlu1 %v2600_v16, %s2515_s25  ;;  %467 = vrot.lane.b32.xlu0 %v2598_v15, %s2515_s25 }
  0x3b   : > { %469 = vrot.lane.b32.xlu2 %v2602_v17, %s2515_s25 }
  0x42   : > { %625 = vrot.lane.b32.xlu0 %v2576_v2, %s2516_s26  ;;  %627 = vrot.lane.b32.xlu1 %v2586_v9, %s2516_s26 }
  0x43   : > { %621 = vrot.lane.b32.xlu2 %v238_v3, %s2516_s26 }
  0x4a   : > { %623 = vrot.lane.b32.xlu0 %v2588_v10, %s2516_s26  ;;  %629 = vrot.lane.b32.xlu1 %v2580_v5, %s2516_s26 }
  0x4b   : > { %633 = vrot.lane.b32.xlu2 %v2590_v11, %s2516_s26 }
  0x52   : > { %631 = vrot.lane.b32.xlu1 %v2600_v16, %s2516_s26  ;;  %635 = vrot.lane.b32.xlu0 %v2598_v15, %s2516_s26 }
  0x53   : > { %637 = vrot.lane.b32.xlu2 %v2602_v17, %s2516_s26 }
  0x5a   : > { %825 = vrot.lane.b32.xlu0 %v2576_v2, %s2517_s27  ;;  %827 = vrot.lane.b32.xlu1 %v2586_v9, %s2517_s27 }
  0x5b   : > { %821 = vrot.lane.b32.xlu2 %v238_v3, %s2517_s27 }
  0x62   : > { %823 = vrot.lane.b32.xlu0 %v2588_v10, %s2517_s27  ;;  %829 = vrot.lane.b32.xlu1 %v2580_v5, %s2517_s27 }
  0x63   : > { %833 = vrot.lane.b32.xlu2 %v2590_v11, %s2517_s27 }
  0x6a   : > { %831 = vrot.lane.b32.xlu1 %v2600_v16, %s2517_s27  ;;  %835 = vrot.lane.b32.xlu0 %v2598_v15, %s2517_s27 }
  0x6b   : > { %837 = vrot.lane.b32.xlu2 %v2602_v17, %s2517_s27  ;;  %s3181_s27 = scalar_lea.vmem %s3551_s5, %s2455_s20 }
  0x6d   : > { %v266_v18 = vpop.permute.xlu2 %265 }
  0x72   : > { %1144 = vrot.lane.b32.xlu0 %v2586_v9, %s2518_s28  ;;  %1146 = vrot.lane.b32.xlu1 %v2580_v5, %s2518_s28 }
  0x73   : > { %1140 = vrot.lane.b32.xlu2 %v2588_v10, %s2518_s28 }
  0x75   : > { %v270_v19 = vpop.permute.xlu2 %269 }
  0x7a   : > { %1142 = vrot.lane.b32.xlu0 %v2576_v2, %s2518_s28  ;;  %1148 = vrot.lane.b32.xlu1 %v2600_v16, %s2518_s28 }
  0x7b   : > { %1152 = vrot.lane.b32.xlu2 %v2598_v15, %s2518_s28 }
  0x7d   : > { %v274_v22 = vpop.permute.xlu2 %273 }
  0x82   : > { %1150 = vrot.lane.b32.xlu1 %v2590_v11, %s2518_s28  ;;  %1154 = vrot.lane.b32.xlu0 %v2602_v17, %s2518_s28 }
  0x84   : > { %v262_v20 = vpop.permute.xlu0 %261  ;;  %v258_v21 = vpop.permute.xlu1 %257 }
  0x85   : > { %v454_v34 = vpop.permute.xlu2 %453 }
  0x8a   : > { %1320 = vrot.lane.b32.xlu0 %v2586_v9, %s2519_s29  ;;  %1322 = vrot.lane.b32.xlu1 %v2580_v5, %s2519_s29 }
  0x8c   : > { %v264_v23 = vpop.permute.xlu0 %263  ;;  %v260_v24 = vpop.permute.xlu1 %259 }
  0x8d   : > { %v276_v25 = vsel %vm275_vm0, %v258_v21, %v260_v24  ;;  %v277_v26 = vsel %vm275_vm0, %v260_v24, %v262_v20  ;;  %v278_v27 = vsel %vm275_vm0, %v262_v20, %v264_v23  ;;  %v279_v28 = vsel %vm275_vm0, %v264_v23, %v266_v18  ;;  %v466_v45 = vpop.permute.xlu2 %465 }
  0x8e   : > { %v290_v29 = vsel %vm288_vm1, %v276_v25, 0  ;;  %v293_v30 = vsel %vm288_vm1, %v277_v26, 0  ;;  %v296_v31 = vsel %vm288_vm1, %v278_v27, 0  ;;  %v299_v32 = vsel %vm288_vm1, %v279_v28, 0 }
  0x8f   : > { %320 = vmatpush.bf16.msra.mxu0 %v290_v29  ;;  %333 = vmatpush.bf16.msra.mxu1 %v293_v30 }
  0x90   : > { %346 = vmatpush.bf16.msra.mxu2 %v296_v31  ;;  %359 = vmatpush.bf16.msra.mxu3 %v299_v32 }
  0x92   : > { %2365 = vmatmul.msk.bf16.vlgmr.msra.gmra.mxu0 %vm284_vm2, %v247_v33  ;;  %2366 = vmatmul.msk.bf16.vlgmr.msra.gmra.mxu1 %vm284_vm2, %v247_v33 }
  0x93   : > { %2367 = vmatmul.msk.bf16.vlgmr.msra.gmra.mxu2 %vm284_vm2, %v247_v33  ;;  %2368 = vmatmul.msk.bf16.vlgmr.msra.gmra.mxu3 %vm284_vm2, %v247_v33 }
  0x94   : > { %v272_v35 = vpop.permute.xlu0 %271  ;;  %v268_v36 = vpop.permute.xlu1 %267  ;;  %1318 = vrot.lane.b32.xlu0 %v2576_v2, %s2519_s29  ;;  %1324 = vrot.lane.b32.xlu1 %v2600_v16, %s2519_s29 }
  0x95   : > { %v280_v37 = vsel %vm275_vm0, %v266_v18, %v268_v36  ;;  %v281_v38 = vsel %vm275_vm0, %v268_v36, %v270_v19  ;;  %v282_v39 = vsel %vm275_vm0, %v270_v19, %v272_v35  ;;  %v283_v40 = vsel %vm275_vm0, %v272_v35, %v274_v22  ;;  %v470_v50 = vpop.permute.xlu2 %469 }
  0x96   : > { %v302_v41 = vsel %vm288_vm1, %v280_v37, 0  ;;  %v305_v42 = vsel %vm288_vm1, %v281_v38, 0  ;;  %v308_v43 = vsel %vm288_vm1, %v282_v39, 0  ;;  %v311_v44 = vsel %vm288_vm1, %v283_v40, 0 }
  0x97   : > { %372 = vmatpush.bf16.msrb.mxu0 %v302_v41  ;;  %385 = vmatpush.bf16.msrb.mxu1 %v305_v42  ;;  %v2718_v18 = vpack.c.bf16 %v235_v12, %v235_v12  ;;  %v1004_v12 = vsel %vm288_vm1, %v2576_v2, 0 }
  0x98   : > { %398 = vmatpush.bf16.msrb.mxu2 %v308_v43  ;;  %411 = vmatpush.bf16.msrb.mxu3 %v311_v44 }
  0x99   : > { %1156 = vrot.lane.b32.xlu2 %v2718_v18, %s2518_s28 }
  0x9c   : > { %v458_v46 = vpop.permute.xlu0 %457  ;;  %v460_v47 = vpop.permute.xlu1 %459  ;;  %1326 = vrot.lane.b32.xlu1 %v2590_v11, %s2519_s29  ;;  %1330 = vrot.lane.b32.xlu0 %v2602_v17, %s2519_s29 }
  0x9d   : > { %v474_v48 = vsel %vm471_vm3, %v458_v46, %v460_v47  ;;  %v622_v59 = vpop.permute.xlu2 %621 }
  0x9e   : > { %v490_v49 = vsel %vm288_vm1, %v474_v48, 0 }
  0x9f   : > { %540 = vmatpush.bf16.msra.mxu2 %v490_v49 }
  0xa1   : > { %1316 = vrot.lane.b32.xlu2 %v2588_v10, %s2519_s29 }
  0xa2   : > { %2369 = vmatmul.msk.bf16.vlgmr.msrb.gmra.mxu0 %vm284_vm2, %v247_v33  ;;  %2370 = vmatmul.msk.bf16.vlgmr.msrb.gmra.mxu1 %vm284_vm2, %v247_v33 }
  0xa3   : > { %2371 = vmatmul.msk.bf16.vlgmr.msrb.gmra.mxu2 %vm284_vm2, %v247_v33  ;;  %2372 = vmatmul.msk.bf16.vlgmr.msrb.gmra.mxu3 %vm284_vm2, %v247_v33 }
  0xa4   : > { %v456_v51 = vpop.permute.xlu0 %455  ;;  %v462_v52 = vpop.permute.xlu1 %461  ;;  %1496 = vrot.lane.b32.xlu0 %v2586_v9, %s2520_s7  ;;  %1498 = vrot.lane.b32.xlu1 %v2580_v5, %s2520_s7 }
  0xa5   : > { %v473_v53 = vsel %vm471_vm3, %v456_v51, %v458_v46  ;;  %v472_v54 = vsel %vm471_vm3, %v454_v34, %v456_v51  ;;  %v475_v55 = vsel %vm471_vm3, %v460_v47, %v462_v52  ;;  %v634_v20 = vpop.permute.xlu2 %633 }
  0xa6   : > { %v487_v56 = vsel %vm288_vm1, %v473_v53, 0  ;;  %v484_v57 = vsel %vm288_vm1, %v472_v54, 0  ;;  %v493_v58 = vsel %vm288_vm1, %v475_v55, 0 }
  0xa7   : > { %527 = vmatpush.bf16.msra.mxu1 %v487_v56  ;;  %553 = vmatpush.bf16.msra.mxu3 %v493_v58 }
  0xa8   : > { %514 = vmatpush.bf16.msra.mxu0 %v484_v57 }
  0xa9   : > { %1328 = vrot.lane.b32.xlu2 %v2598_v15, %s2519_s29 }
  0xac   : > { %v464_v60 = vpop.permute.xlu1 %463  ;;  %v468_v61 = vpop.permute.xlu0 %467  ;;  %1494 = vrot.lane.b32.xlu0 %v2576_v2, %s2520_s7  ;;  %1500 = vrot.lane.b32.xlu1 %v2600_v16, %s2520_s7 }
  0xad   : > { %v476_v62 = vsel %vm471_vm3, %v462_v52, %v464_v60  ;;  %v477_v63 = vsel %vm471_vm3, %v464_v60, %v466_v45  ;;  %v478_v0 = vsel %vm471_vm3, %v466_v45, %v468_v61  ;;  %v479_v1 = vsel %vm471_vm3, %v468_v61, %v470_v50  ;;  %v638_v30 = vpop.permute.xlu2 %637  ;;  %v2382_v45 = vld [vmem:[%s3548_s2 + $0x8] sm:$0xf] }
  0xae   : > { %v496_v3 = vsel %vm288_vm1, %v476_v62, 0  ;;  %v499_v4 = vsel %vm288_vm1, %v477_v63, 0  ;;  %v502_v6 = vsel %vm288_vm1, %v478_v0, 0  ;;  %v505_v7 = vsel %vm288_vm1, %v479_v1, 0 }
  0xaf   : > { %566 = vmatpush.bf16.msrb.mxu0 %v496_v3  ;;  %579 = vmatpush.bf16.msrb.mxu1 %v499_v4  ;;  %v2391_v4 = vld [vmem:[%s3548_s2 + $0xc] sm:$0xf] }
  0xb0   : > { %592 = vmatpush.bf16.msrb.mxu2 %v502_v6  ;;  %605 = vmatpush.bf16.msrb.mxu3 %v505_v7  ;;  %v1007_v6 = vsel %vm288_vm1, %v2586_v9, 0  ;;  %v1001_v7 = vsel %vm288_vm1, %v2588_v10, 0 }
  0xb1   : > { %1332 = vrot.lane.b32.xlu2 %v2718_v18, %s2519_s29 }
  0xb2   : > { %2374 = vmatmul.msk.bf16.vlgmr.msra.gmra.mxu0 %vm284_vm2, %v2373_v8  ;;  %2375 = vmatmul.msk.bf16.vlgmr.msra.gmra.mxu1 %vm284_vm2, %v2373_v8 }
  0xb3   : > { %2376 = vmatmul.msk.bf16.vlgmr.msra.gmra.mxu2 %vm284_vm2, %v2373_v8  ;;  %2377 = vmatmul.msk.bf16.vlgmr.msra.gmra.mxu3 %vm284_vm2, %v2373_v8 }
  0xb4   : > { %v626_v13 = vpop.permute.xlu0 %625  ;;  %v628_v14 = vpop.permute.xlu1 %627  ;;  %1502 = vrot.lane.b32.xlu1 %v2590_v11, %s2520_s7  ;;  %1506 = vrot.lane.b32.xlu0 %v2602_v17, %s2520_s7 }
  0xb5   : > { %v642_v19 = vsel %vm639_vm4, %v626_v13, %v628_v14  ;;  %v822_v41 = vpop.permute.xlu2 %821 }
  0xb6   : > { %v658_v21 = vsel %vm288_vm1, %v642_v19, 0 }
  0xb7   : > { %708 = vmatpush.bf16.msra.mxu2 %v658_v21 }
  0xb9   : > { %1492 = vrot.lane.b32.xlu2 %v2588_v10, %s2520_s7 }
  0xbc   : > { %v624_v22 = vpop.permute.xlu0 %623  ;;  %v630_v23 = vpop.permute.xlu1 %629  ;;  %1664 = vrot.lane.b32.xlu0 %v2586_v9, %s2521_s10  ;;  %1666 = vrot.lane.b32.xlu1 %v2580_v5, %s2521_s10 }
  0xbd   : > { %v641_v24 = vsel %vm639_vm4, %v624_v22, %v626_v13  ;;  %v643_v25 = vsel %vm639_vm4, %v628_v14, %v630_v23  ;;  %v640_v26 = vsel %vm639_vm4, %v622_v59, %v624_v22  ;;  %v834_v47 = vpop.permute.xlu2 %833  ;;  %v1022_v13 = vsel %vm288_vm1, %v2602_v17, 0 }
  0xbe   : > { %v655_v27 = vsel %vm288_vm1, %v641_v24, 0  ;;  %v661_v28 = vsel %vm288_vm1, %v643_v25, 0  ;;  %v652_v29 = vsel %vm288_vm1, %v640_v26, 0  ;;  %v1016_v14 = vsel %vm288_vm1, %v2590_v11, 0 }
  0xbf   : > { %695 = vmatpush.bf16.msra.mxu1 %v655_v27  ;;  %721 = vmatpush.bf16.msra.mxu3 %v661_v28 }
  0xc0   : > { %682 = vmatpush.bf16.msra.mxu0 %v652_v29 }
  0xc1   : > { %1504 = vrot.lane.b32.xlu2 %v2598_v15, %s2520_s7 }
  0xc2   : > { %2378 = vmatmul.msk.bf16.vlgmr.msrb.gmra.mxu0 %vm284_vm2, %v2373_v8  ;;  %2379 = vmatmul.msk.bf16.vlgmr.msrb.gmra.mxu1 %vm284_vm2, %v2373_v8 }
  0xc3   : > { %2380 = vmatmul.msk.bf16.vlgmr.msrb.gmra.mxu2 %vm284_vm2, %v2373_v8  ;;  %2381 = vmatmul.msk.bf16.vlgmr.msrb.gmra.mxu3 %vm284_vm2, %v2373_v8  ;;  %v1010_v8 = vsel %vm288_vm1, %v2580_v5, 0  ;;  %v1019_v5 = vsel %vm288_vm1, %v2598_v15, 0 }
  0xc4   : > { %v632_v31 = vpop.permute.xlu1 %631  ;;  %v636_v32 = vpop.permute.xlu0 %635  ;;  %1662 = vrot.lane.b32.xlu0 %v2576_v2, %s2521_s10  ;;  %1668 = vrot.lane.b32.xlu1 %v2600_v16, %s2521_s10  ;;  %v1013_v2 = vsel %vm288_vm1, %v2600_v16, 0 }
  0xc5   : > { %v644_v33 = vsel %vm639_vm4, %v630_v23, %v632_v31  ;;  %v645_v34 = vsel %vm639_vm4, %v632_v31, %v634_v20  ;;  %v646_v35 = vsel %vm639_vm4, %v634_v20, %v636_v32  ;;  %v647_v36 = vsel %vm639_vm4, %v636_v32, %v638_v30  ;;  %v838_v56 = vpop.permute.xlu2 %837 }
  0xc6   : > { %v664_v37 = vsel %vm288_vm1, %v644_v33, 0  ;;  %v667_v38 = vsel %vm288_vm1, %v645_v34, 0  ;;  %v670_v39 = vsel %vm288_vm1, %v646_v35, 0  ;;  %v673_v40 = vsel %vm288_vm1, %v647_v36, 0 }
  0xc7   : > { %734 = vmatpush.bf16.msrb.mxu0 %v664_v37  ;;  %747 = vmatpush.bf16.msrb.mxu1 %v667_v38 }
  0xc8   : > { %760 = vmatpush.bf16.msrb.mxu2 %v670_v39  ;;  %773 = vmatpush.bf16.msrb.mxu3 %v673_v40 }
  0xc9   : > { %1508 = vrot.lane.b32.xlu2 %v2718_v18, %s2520_s7 }
  0xcc   : > { %v826_v42 = vpop.permute.xlu0 %825  ;;  %v828_v43 = vpop.permute.xlu1 %827  ;;  %1670 = vrot.lane.b32.xlu1 %v2590_v11, %s2521_s10  ;;  %1674 = vrot.lane.b32.xlu0 %v2602_v17, %s2521_s10  ;;  %v2400_v11 = vld [vmem:[%s3548_s2 + $0x10] sm:$0xf] }
  0xcd   : > { %v842_v44 = vsel %vm839_vm5, %v826_v42, %v828_v43 }
  0xce   : > { %v858_v46 = vsel %vm288_vm1, %v842_v44, 0 }
  0xd1   : > { %1660 = vrot.lane.b32.xlu2 %v2588_v10, %s2521_s10 }
  0xd2   : > { %2383 = vmatmul.msk.bf16.vlgmr.msra.gmra.mxu0 %vm284_vm2, %v2382_v45  ;;  %2384 = vmatmul.msk.bf16.vlgmr.msra.gmra.mxu1 %vm284_vm2, %v2382_v45 }
  0xd3   : > { %2385 = vmatmul.msk.bf16.vlgmr.msra.gmra.mxu2 %vm284_vm2, %v2382_v45  ;;  %2386 = vmatmul.msk.bf16.vlgmr.msra.gmra.mxu3 %vm284_vm2, %v2382_v45 }
  0xd4   : > { %v824_v48 = vpop.permute.xlu0 %823  ;;  %v830_v49 = vpop.permute.xlu1 %829  ;;  %908 = vmatpush.bf16.msra.mxu2 %v858_v46 }
  0xd5   : > { %v841_v50 = vsel %vm839_vm5, %v824_v48, %v826_v42  ;;  %v843_v51 = vsel %vm839_vm5, %v828_v43, %v830_v49  ;;  %v840_v52 = vsel %vm839_vm5, %v822_v41, %v824_v48 }
  0xd6   : > { %v855_v53 = vsel %vm288_vm1, %v841_v50, 0  ;;  %v861_v54 = vsel %vm288_vm1, %v843_v51, 0  ;;  %v852_v55 = vsel %vm288_vm1, %v840_v52, 0  ;;  %v2866_v50 = vld [vmem:[%s3547_s1] sm:$0xff] }
  0xd7   : > { %895 = vmatpush.bf16.msra.mxu1 %v855_v53  ;;  %921 = vmatpush.bf16.msra.mxu3 %v861_v54  ;;  %v419_v51 = vperm.slane %v2866_v50, 0  ;;  %v420_v52 = vperm.slane %v2866_v50, 2 }
  0xd8   : > { %882 = vmatpush.bf16.msra.mxu0 %v852_v55 }
  0xd9   : > { %1672 = vrot.lane.b32.xlu2 %v2598_v15, %s2521_s10  ;;  %v1141_v15 = vpop.permute.xlu2 %1140 }
  0xdc   : > { %v832_v57 = vpop.permute.xlu1 %831  ;;  %v836_v58 = vpop.permute.xlu0 %835 }
  0xdd   : > { %v844_v59 = vsel %vm839_vm5, %v830_v49, %v832_v57  ;;  %v845_v60 = vsel %vm839_vm5, %v832_v57, %v834_v47  ;;  %v846_v61 = vsel %vm839_vm5, %v834_v47, %v836_v58  ;;  %v847_v62 = vsel %vm839_vm5, %v836_v58, %v838_v56 }
  0xde   : > { %v864_v63 = vsel %vm288_vm1, %v844_v59, 0  ;;  %v867_v0 = vsel %vm288_vm1, %v845_v60, 0  ;;  %v870_v1 = vsel %vm288_vm1, %v846_v61, 0  ;;  %v873_v3 = vsel %vm288_vm1, %v847_v62, 0 }
  0xdf   : > { %v2876_v58 = vperm.slane %v419_v51, 0  ;;  %v2878_v59 = vperm.slane %v420_v52, 0  ;;  %v421_v62 = vperm.slane %v2866_v50, 4 }
  0xe1   : > { %1676 = vrot.lane.b32.xlu2 %v2718_v18, %s2521_s10  ;;  %v1153_v28 = vpop.permute.xlu2 %1152 }
  0xe2   : > { %2387 = vmatmul.msk.bf16.vlgmr.msrb.gmra.mxu0 %vm284_vm2, %v2382_v45  ;;  %2388 = vmatmul.msk.bf16.vlgmr.msrb.gmra.mxu1 %vm284_vm2, %v2382_v45 }
  0xe3   : > { %2389 = vmatmul.msk.bf16.vlgmr.msrb.gmra.mxu2 %vm284_vm2, %v2382_v45  ;;  %2390 = vmatmul.msk.bf16.vlgmr.msrb.gmra.mxu3 %vm284_vm2, %v2382_v45 }
  0xe4   : > { %934 = vmatpush.bf16.msrb.mxu0 %v864_v63  ;;  %947 = vmatpush.bf16.msrb.mxu1 %v867_v0  ;;  %v1145_v9 = vpop.permute.xlu0 %1144  ;;  %v1147_v10 = vpop.permute.xlu1 %1146  ;;  %v422_v63 = vperm.slane %v2866_v50, 6 }
  0xe5   : > { %960 = vmatpush.bf16.msrb.mxu2 %v870_v1  ;;  %973 = vmatpush.bf16.msrb.mxu3 %v873_v3  ;;  %v1161_v19 = vsel %vm1158_vm6, %v1145_v9, %v1147_v10 }
  0xe6   : > { %v1177_v24 = vsel %vm288_vm1, %v1161_v19, 0 }
  0xec   : > { %v1143_v16 = vpop.permute.xlu0 %1142  ;;  %v1149_v18 = vpop.permute.xlu1 %1148 }
  0xed   : > { %v1160_v20 = vsel %vm1158_vm6, %v1143_v16, %v1145_v9  ;;  %v1162_v22 = vsel %vm1158_vm6, %v1147_v10, %v1149_v18  ;;  %v1159_v23 = vsel %vm1158_vm6, %v1141_v15, %v1143_v16  ;;  %v2409_v9 = vld [vmem:[%s3548_s2 + $0x14] sm:$0xf]  ;;  %v2897_v15 = vperm.slane %v422_v63, 0 }
  0xee   : > { %v1174_v25 = vsel %vm288_vm1, %v1160_v20, 0  ;;  %v1180_v26 = vsel %vm288_vm1, %v1162_v22, 0  ;;  %v1171_v27 = vsel %vm288_vm1, %v1159_v23, 0 }
  0xf2   : > { %2392 = vmatmul.msk.bf16.vlgmr.msra.gmra.mxu0 %vm284_vm2, %v2391_v4  ;;  %2393 = vmatmul.msk.bf16.vlgmr.msra.gmra.mxu1 %vm284_vm2, %v2391_v4 }
  0xf3   : > { %2394 = vmatmul.msk.bf16.vlgmr.msra.gmra.mxu2 %vm284_vm2, %v2391_v4  ;;  %2395 = vmatmul.msk.bf16.vlgmr.msra.gmra.mxu3 %vm284_vm2, %v2391_v4  ;;  %v1157_v35 = vpop.permute.xlu2 %1156 }
  0xf4   : > { %1057 = vmatpush.bf16.msra.mxu2 %v1007_v6  ;;  %1031 = vmatpush.bf16.msra.mxu0 %v1001_v7  ;;  %v1155_v29 = vpop.permute.xlu0 %1154  ;;  %v1151_v34 = vpop.permute.xlu1 %1150 }
  0xf5   : > { %1070 = vmatpush.bf16.msra.mxu3 %v1010_v8  ;;  %1044 = vmatpush.bf16.msra.mxu1 %v1004_v12  ;;  %v1163_v38 = vsel %vm1158_vm6, %v1149_v18, %v1151_v34  ;;  %v1164_v39 = vsel %vm1158_vm6, %v1151_v34, %v1153_v28  ;;  %v1165_v42 = vsel %vm1158_vm6, %v1153_v28, %v1155_v29 }
  0xf6   : > { %v1166_v43 = vsel %vm1158_vm6, %v1155_v29, %v1157_v35  ;;  %v1183_v44 = vsel %vm288_vm1, %v1163_v38, 0  ;;  %v1186_v45 = vsel %vm288_vm1, %v1164_v39, 0  ;;  %v1189_v47 = vsel %vm288_vm1, %v1165_v42, 0 }
  0xf7   : > { %v1192_v48 = vsel %vm288_vm1, %v1166_v43, 0 }
  0xfb   : > { %v1317_v57 = vpop.permute.xlu2 %1316 }
  0xfc   : > { %v1321_v46 = vpop.permute.xlu0 %1320  ;;  %v1323_v49 = vpop.permute.xlu1 %1322 }
  0xfd   : > { %v1337_v6 = vsel %vm1334_vm7, %v1321_v46, %v1323_v49 }
  0xfe   : > { %v1353_v16 = vsel %vm288_vm1, %v1337_v6, 0 }
 0x102   : > { %2396 = vmatmul.msk.bf16.vlgmr.msrb.gmra.mxu0 %vm284_vm2, %v2391_v4  ;;  %2397 = vmatmul.msk.bf16.vlgmr.msrb.gmra.mxu1 %vm284_vm2, %v2391_v4 }
 0x103   : > { %2398 = vmatmul.msk.bf16.vlgmr.msrb.gmra.mxu2 %vm284_vm2, %v2391_v4  ;;  %2399 = vmatmul.msk.bf16.vlgmr.msrb.gmra.mxu3 %vm284_vm2, %v2391_v4 }
 0x104   : > { %1109 = vmatpush.bf16.msrb.mxu2 %v1019_v5  ;;  %1083 = vmatpush.bf16.msrb.mxu0 %v1013_v2 }
 0x105   : > { %1122 = vmatpush.bf16.msrb.mxu3 %v1022_v13  ;;  %1096 = vmatpush.bf16.msrb.mxu1 %v1016_v14  ;;  %v2895_v14 = vperm.slane %v421_v62, 0 }
 0x106   : > { %v1319_v60 = vpop.permute.xlu0 %1318  ;;  %v1325_v61 = vpop.permute.xlu1 %1324 }
 0x107   : > { %v1336_v7 = vsel %vm1334_vm7, %v1319_v60, %v1321_v46  ;;  %v1338_v5 = vsel %vm1334_vm7, %v1323_v49, %v1325_v61  ;;  %v1335_v2 = vsel %vm1334_vm7, %v1317_v57, %v1319_v60 }
 0x108   : > { %v1350_v18 = vsel %vm288_vm1, %v1336_v7, 0  ;;  %v1356_v19 = vsel %vm288_vm1, %v1338_v5, 0  ;;  %v1347_v20 = vsel %vm288_vm1, %v1335_v2, 0 }
 0x10e   : > { %v1331_v23 = vpop.permute.xlu0 %1330 }
 0x10f   : > { %v322_v17 = vpop.f32.mrf.mxu0  ;;  %v335_v21 = vpop.f32.mrf.mxu1 }
 0x110   : > { %v443_v0 = vmul.f32 %v2876_v58, %v322_v17  ;;  %v444_v1 = vmul.f32 %v2878_v59, %v335_v21  ;;  %v1329_v17 = vpop.permute.xlu2 %1328  ;;  %v2908_v21 = vld [vmem:[%s3547_s1 + $0x8] sm:$0xff] }
 0x112   : > { %2401 = vmatmul.msk.bf16.vlgmr.msra.gmra.mxu0 %vm284_vm2, %v2400_v11  ;;  %2402 = vmatmul.msk.bf16.vlgmr.msra.gmra.mxu1 %vm284_vm2, %v2400_v11 }
 0x113   : > { %2403 = vmatmul.msk.bf16.vlgmr.msra.gmra.mxu2 %vm284_vm2, %v2400_v11  ;;  %2404 = vmatmul.msk.bf16.vlgmr.msra.gmra.mxu3 %vm284_vm2, %v2400_v11 }
 0x114   : > { %1214 = vmatpush.bf16.msra.mxu1 %v1174_v25  ;;  %1227 = vmatpush.bf16.msra.mxu2 %v1177_v24  ;;  %v423_v24 = vperm.slane %v2908_v21, 0  ;;  %v424_v25 = vperm.slane %v2908_v21, 2 }
 0x115   : > { %1240 = vmatpush.bf16.msra.mxu3 %v1180_v26  ;;  %1201 = vmatpush.bf16.msra.mxu0 %v1171_v27 }
 0x116   : > { %v2845_v30 = vpop.f32.mrf.mxu2  ;;  %v2847_v31 = vpop.f32.mrf.mxu3  ;;  %v2922_v34 = vperm.slane %v423_v24, 0  ;;  %v781_v24 = vperm.slane %v2866_v50, 5 }
 0x117   : > { %v324_v32 = vpop.f32.mrf.mxu0  ;;  %v337_v33 = vpop.f32.mrf.mxu1  ;;  %v446_v22 = vmul.f32 %v2897_v15, %v2847_v31 }
 0x118   : > { %v1327_v31 = vpop.permute.xlu1 %1326  ;;  %v1333_v35 = vpop.permute.xlu2 %1332 }
 0x119   : > { %v1342_v49 = vsel %vm1334_vm7, %v1331_v23, %v1333_v35  ;;  %v1497_v57 = vpop.permute.xlu0 %1496 }
 0x11e   : > { %v350_v36 = vpop.f32.mrf.mxu2  ;;  %v363_v37 = vpop.f32.mrf.mxu3 }
 0x11f   : > { %v2851_v40 = vpop.f32.mrf.mxu0  ;;  %v2853_v41 = vpop.f32.mrf.mxu1  ;;  %v425_v36 = vperm.slane %v2908_v21, 4  ;;  %v426_v37 = vperm.slane %v2908_v21, 6 }
 0x120   : > { %v447_v38 = vmul.f32 %v2922_v34, %v2851_v40  ;;  %v1499_v62 = vpop.permute.xlu1 %1498  ;;  %v1493_v5 = vpop.permute.xlu2 %1492 }
 0x121   : > { %v2940_v40 = vperm.slane %v425_v36, 0 }
 0x122   : > { %2405 = vmatmul.msk.bf16.vlgmr.msrb.gmra.mxu0 %vm284_vm2, %v2400_v11  ;;  %2406 = vmatmul.msk.bf16.vlgmr.msrb.gmra.mxu1 %vm284_vm2, %v2400_v11 }
 0x123   : > { %2407 = vmatmul.msk.bf16.vlgmr.msrb.gmra.mxu2 %vm284_vm2, %v2400_v11  ;;  %2408 = vmatmul.msk.bf16.vlgmr.msrb.gmra.mxu3 %vm284_vm2, %v2400_v11  ;;  %v445_v11 = vmul.f32 %v2895_v14, %v2845_v30  ;;  %v2924_v30 = vperm.slane %v424_v25, 0  ;;  %v782_v25 = vperm.slane %v2866_v50, 7 }
 0x124   : > { %1253 = vmatpush.bf16.msrb.mxu0 %v1183_v44  ;;  %1266 = vmatpush.bf16.msrb.mxu1 %v1186_v45  ;;  %v1339_v44 = vsel %vm1334_vm7, %v1325_v61, %v1327_v31  ;;  %v1340_v45 = vsel %vm1334_vm7, %v1327_v31, %v1329_v17  ;;  %v1368_v61 = vsel %vm288_vm1, %v1342_v49, 0  ;;  %v783_v49 = vperm.slane %v2908_v21, 1 }
 0x125   : > { %1279 = vmatpush.bf16.msrb.mxu2 %v1189_v47  ;;  %1292 = vmatpush.bf16.msrb.mxu3 %v1192_v48  ;;  %v448_v39 = vmul.f32 %v2924_v30, %v2853_v41  ;;  %v1341_v48 = vsel %vm1334_vm7, %v1329_v17, %v1331_v23  ;;  %v1359_v41 = vsel %vm288_vm1, %v1339_v44, 0  ;;  %v2418_v23 = vld [vmem:[%s3548_s2 + $0x18] sm:$0xf] }
 0x126   : > { %v2872_v53 = vpop.f32.mrf.mxu2  ;;  %v2874_v54 = vpop.f32.mrf.mxu3  ;;  %v1365_v60 = vsel %vm288_vm1, %v1341_v48, 0 }
 0x127   : > { %v376_v55 = vpop.f32.mrf.mxu0  ;;  %v389_v56 = vpop.f32.mrf.mxu1  ;;  %v449_v63 = vmul.f32 %v2940_v40, %v2872_v53 }
 0x128   : > { %v2942_v55 = vperm.slane %v426_v37, 0  ;;  %v1362_v56 = vsel %vm288_vm1, %v1340_v45, 0  ;;  %v1495_v53 = vpop.permute.xlu0 %1494 }
 0x129   : > { %v1512_v17 = vsel %vm1510_vm8, %v1495_v53, %v1497_v57 }
 0x12a   : > { %v1526_v35 = vsel %vm288_vm1, %v1512_v17, 0 }
 0x12e   : > { %v402_v3 = vpop.f32.mrf.mxu2  ;;  %v415_v4 = vpop.f32.mrf.mxu3 }
 0x12f   : > { %v516_v8 = vpop.f32.mrf.mxu0  ;;  %v529_v12 = vpop.f32.mrf.mxu1 }
 0x130   : > { %v2891_v10 = vadd.f32 %v516_v8, %v443_v0  ;;  %v2893_v13 = vadd.f32 %v529_v12, %v444_v1  ;;  %v450_v0 = vmul.f32 %v2942_v55, %v2874_v54  ;;  %v779_v12 = vperm.slane %v2866_v50, 1 }
 0x132   : > { %2410 = vmatmul.msk.bf16.vlgmr.msra.gmra.mxu0 %vm284_vm2, %v2409_v9  ;;  %2411 = vmatmul.msk.bf16.vlgmr.msra.gmra.mxu1 %vm284_vm2, %v2409_v9  ;;  %v2962_v2 = vperm.slane %v779_v12, 1 }
 0x133   : > { %2412 = vmatmul.msk.bf16.vlgmr.msra.gmra.mxu2 %vm284_vm2, %v2409_v9  ;;  %2413 = vmatmul.msk.bf16.vlgmr.msra.gmra.mxu3 %vm284_vm2, %v2409_v9 }
 0x134   : > { %1390 = vmatpush.bf16.msra.mxu1 %v1350_v18  ;;  %1403 = vmatpush.bf16.msra.mxu2 %v1353_v16  ;;  %v1501_v16 = vpop.permute.xlu1 %1500 }
 0x135   : > { %1416 = vmatpush.bf16.msra.mxu3 %v1356_v19  ;;  %1377 = vmatpush.bf16.msra.mxu0 %v1347_v20  ;;  %v1513_v20 = vsel %vm1510_vm8, %v1497_v57, %v1499_v62 }
 0x136   : > { %v542_v26 = vpop.f32.mrf.mxu2  ;;  %v555_v27 = vpop.f32.mrf.mxu3  ;;  %v1529_v31 = vsel %vm288_vm1, %v1513_v20, 0 }
 0x137   : > { %v2918_v28 = vadd.f32 %v542_v26, %v445_v11  ;;  %v2920_v29 = vadd.f32 %v555_v27, %v446_v22  ;;  %v518_v32 = vpop.f32.mrf.mxu0  ;;  %v531_v33 = vpop.f32.mrf.mxu1  ;;  %v1514_v26 = vsel %vm1510_vm8, %v1499_v62, %v1501_v16  ;;  %v1511_v27 = vsel %vm1510_vm8, %v1493_v5, %v1495_v53 }
 0x13e   : > { %v544_v42 = vpop.f32.mrf.mxu2  ;;  %v557_v43 = vpop.f32.mrf.mxu3 }
 0x13f   : > { %v568_v46 = vpop.f32.mrf.mxu0  ;;  %v581_v47 = vpop.f32.mrf.mxu1  ;;  %v2991_v42 = vperm.slane %v781_v24, 1 }
 0x140   : > { %v2936_v51 = vadd.f32 %v568_v46, %v447_v38  ;;  %v2938_v52 = vadd.f32 %v581_v47, %v448_v39  ;;  %v1523_v38 = vsel %vm288_vm1, %v1511_v27, 0  ;;  %v1505_v39 = vpop.permute.xlu2 %1504 }
 0x142   : > { %2414 = vmatmul.msk.bf16.vlgmr.msrb.gmra.mxu0 %vm284_vm2, %v2409_v9  ;;  %2415 = vmatmul.msk.bf16.vlgmr.msrb.gmra.mxu1 %vm284_vm2, %v2409_v9 }
 0x143   : > { %2416 = vmatmul.msk.bf16.vlgmr.msrb.gmra.mxu2 %vm284_vm2, %v2409_v9  ;;  %2417 = vmatmul.msk.bf16.vlgmr.msrb.gmra.mxu3 %vm284_vm2, %v2409_v9  ;;  %v780_v9 = vperm.slane %v2866_v50, 3  ;;  %v1532_v50 = vsel %vm288_vm1, %v1514_v26, 0 }
 0x144   : > { %1429 = vmatpush.bf16.msrb.mxu0 %v1359_v41  ;;  %1442 = vmatpush.bf16.msrb.mxu1 %v1362_v56  ;;  %v784_v41 = vperm.slane %v2908_v21, 3 }
 0x145   : > { %1455 = vmatpush.bf16.msrb.mxu2 %v1365_v60  ;;  %1468 = vmatpush.bf16.msrb.mxu3 %v1368_v61  ;;  %v2964_v54 = vperm.slane %v780_v9, 1  ;;  %v1503_v60 = vpop.permute.xlu1 %1502  ;;  %v3005_v61 = vperm.slane %v783_v49, 1  ;;  %v786_v9 = vperm.slane %v2908_v21, 7 }
 0x146   : > { %v594_v1 = vpop.f32.mrf.mxu2  ;;  %v607_v3 = vpop.f32.mrf.mxu3  ;;  %v3007_v62 = vperm.slane %v784_v41, 1 }
 0x147   : > { %v2956_v4 = vadd.f32 %v594_v1, %v449_v63  ;;  %v2958_v6 = vadd.f32 %v607_v3, %v450_v0  ;;  %v570_v7 = vpop.f32.mrf.mxu0  ;;  %v583_v8 = vpop.f32.mrf.mxu1  ;;  %v1515_v3 = vsel %vm1510_vm8, %v1501_v16, %v1503_v60 }
 0x148   : > { %v1509_v63 = vpop.permute.xlu2 %1508  ;;  %v1516_v7 = vsel %vm1510_vm8, %v1503_v60, %v1505_v39 }
 0x149   : > { %v1538_v16 = vsel %vm288_vm1, %v1516_v7, 0 }
 0x14d   : > { %v1667_v24 = vpop.permute.xlu1 %1666 }
 0x14e   : > { %v596_v18 = vpop.f32.mrf.mxu2  ;;  %v609_v19 = vpop.f32.mrf.mxu3 }
 0x14f   : > { %v684_v11 = vpop.f32.mrf.mxu0  ;;  %v697_v22 = vpop.f32.mrf.mxu1  ;;  %v1535_v19 = vsel %vm288_vm1, %v1515_v3, 0 }
 0x150   : > { %v803_v32 = vmul.f32 %v2962_v2, %v684_v11  ;;  %v804_v33 = vmul.f32 %v2964_v54, %v697_v22 }
 0x152   : > { %v2980_v36 = vadd.f32 %v803_v32, %v2891_v10  ;;  %v2983_v37 = vadd.f32 %v804_v33, %v2893_v13  ;;  %2419 = vmatmul.msk.bf16.vlgmr.msra.gmra.mxu0 %vm284_vm2, %v2418_v23  ;;  %2420 = vmatmul.msk.bf16.vlgmr.msra.gmra.mxu1 %vm284_vm2, %v2418_v23  ;;  %v2993_v10 = vperm.slane %v782_v25, 1  ;;  %v1507_v13 = vpop.permute.xlu0 %1506 }
 0x153   : > { %2421 = vmatmul.msk.bf16.vlgmr.msra.gmra.mxu2 %vm284_vm2, %v2418_v23  ;;  %2422 = vmatmul.msk.bf16.vlgmr.msra.gmra.mxu3 %vm284_vm2, %v2418_v23  ;;  %v1518_v5 = vsel %vm1510_vm8, %v1507_v13, %v1509_v63 }
 0x154   : > { %1566 = vmatpush.bf16.msra.mxu1 %v1526_v35  ;;  %1579 = vmatpush.bf16.msra.mxu2 %v1529_v31  ;;  %v1544_v22 = vsel %vm288_vm1, %v1518_v5, 0  ;;  %v1661_v35 = vpop.permute.xlu2 %1660 }
 0x155   : > { %1592 = vmatpush.bf16.msra.mxu3 %v1532_v50  ;;  %1553 = vmatpush.bf16.msra.mxu0 %v1523_v38 }
 0x156   : > { %v710_v43 = vpop.f32.mrf.mxu2  ;;  %v723_v44 = vpop.f32.mrf.mxu3 }
 0x157   : > { %v805_v45 = vmul.f32 %v2991_v42, %v710_v43  ;;  %v806_v46 = vmul.f32 %v2993_v10, %v723_v44  ;;  %v686_v47 = vpop.f32.mrf.mxu0  ;;  %v699_v48 = vpop.f32.mrf.mxu1 }
 0x158   : > { %v2427_v48 = vld [vmem:[%s3548_s2 + $0x1c] sm:$0xf] }
 0x159   : > { %v3000_v56 = vadd.f32 %v805_v45, %v2918_v28  ;;  %v3003_v57 = vadd.f32 %v806_v46, %v2920_v29  ;;  %v785_v28 = vperm.slane %v2908_v21, 5  ;;  %v1517_v29 = vsel %vm1510_vm8, %v1505_v39, %v1507_v13  ;;  %v1669_v39 = vpop.permute.xlu1 %1668 }
 0x15a   : > { %v1665_v20 = vpop.permute.xlu0 %1664  ;;  %v1541_v21 = vsel %vm288_vm1, %v1517_v29, 0 }
 0x15b   : > { %v3031_v25 = vperm.slane %v785_v28, 1  ;;  %v1681_v44 = vsel %vm1678_vm9, %v1665_v20, %v1667_v24 }
 0x15c   : > { %v1697_v60 = vsel %vm288_vm1, %v1681_v44, 0  ;;  %v1673_v3 = vpop.permute.xlu2 %1672 }
 0x15e   : > { %v712_v0 = vpop.f32.mrf.mxu2  ;;  %v725_v1 = vpop.f32.mrf.mxu3 }
 0x15f   : > { %v736_v8 = vpop.f32.mrf.mxu0  ;;  %v749_v12 = vpop.f32.mrf.mxu1 }
 0x160   : > { %v807_v53 = vmul.f32 %v3005_v61, %v736_v8  ;;  %v808_v18 = vmul.f32 %v3007_v62, %v749_v12 }
 0x162   : > { %v3020_v17 = vadd.f32 %v807_v53, %v2936_v51  ;;  %v3023_v11 = vadd.f32 %v808_v18, %v2938_v52  ;;  %2423 = vmatmul.msk.bf16.vlgmr.msrb.gmra.mxu0 %vm284_vm2, %v2418_v23  ;;  %2424 = vmatmul.msk.bf16.vlgmr.msrb.gmra.mxu1 %vm284_vm2, %v2418_v23  ;;  %v3033_v51 = vperm.slane %v786_v9, 1  ;;  %v1663_v38 = vpop.permute.xlu0 %1662  ;;  %v1671_v18 = vpop.permute.xlu1 %1670 }
 0x163   : > { %2425 = vmatmul.msk.bf16.vlgmr.msrb.gmra.mxu2 %vm284_vm2, %v2418_v23  ;;  %2426 = vmatmul.msk.bf16.vlgmr.msrb.gmra.mxu3 %vm284_vm2, %v2418_v23  ;;  %v1680_v45 = vsel %vm1678_vm9, %v1663_v38, %v1665_v20 }
 0x164   : > { %1605 = vmatpush.bf16.msrb.mxu0 %v1535_v19  ;;  %1618 = vmatpush.bf16.msrb.mxu1 %v1538_v16  ;;  %v1694_v63 = vsel %vm288_vm1, %v1680_v45, 0  ;;  %v1677_v16 = vpop.permute.xlu2 %1676 }
 0x165   : > { %1631 = vmatpush.bf16.msrb.mxu2 %v1541_v21  ;;  %1644 = vmatpush.bf16.msrb.mxu3 %v1544_v22  ;;  %v1683_v22 = vsel %vm1678_vm9, %v1669_v39, %v1671_v18 }
 0x166   : > { %v762_v52 = vpop.f32.mrf.mxu2  ;;  %v775_v26 = vpop.f32.mrf.mxu3 }
 0x167   : > { %v809_v27 = vmul.f32 %v3031_v25, %v762_v52  ;;  %v810_v32 = vmul.f32 %v3033_v51, %v775_v26  ;;  %v738_v33 = vpop.f32.mrf.mxu0  ;;  %v751_v31 = vpop.f32.mrf.mxu1 }
 0x169   : > { %v3038_v50 = vadd.f32 %v809_v27, %v2956_v4  ;;  %v3041_v23 = vadd.f32 %v810_v32, %v2958_v6  ;;  %v1682_v4 = vsel %vm1678_vm9, %v1667_v24, %v1669_v39  ;;  %v1679_v6 = vsel %vm1678_vm9, %v1661_v35, %v1663_v38 }
 0x16a   : > { %v1700_v0 = vsel %vm288_vm1, %v1682_v4, 0  ;;  %v1691_v1 = vsel %vm288_vm1, %v1679_v6, 0  ;;  %v1675_v19 = vpop.permute.xlu0 %1674  ;;  %v1684_v24 = vsel %vm1678_vm9, %v1671_v18, %v1673_v3 }
 0x16b   : > { %v1685_v27 = vsel %vm1678_vm9, %v1673_v3, %v1675_v19  ;;  %v1686_v32 = vsel %vm1678_vm9, %v1675_v19, %v1677_v16  ;;  %v1706_v31 = vsel %vm288_vm1, %v1684_v24, 0 }
 0x16c   : > { %v1709_v35 = vsel %vm288_vm1, %v1685_v27, 0  ;;  %v1712_v38 = vsel %vm288_vm1, %v1686_v32, 0 }
 0x16e   : > { %v764_v13 = vpop.f32.mrf.mxu2  ;;  %v777_v43 = vpop.f32.mrf.mxu3 }
 0x16f   : > { %v884_v46 = vpop.f32.mrf.mxu0  ;;  %v897_v47 = vpop.f32.mrf.mxu1 }
 0x170   : > { %v979_v49 = vmul.f32 %v884_v46, %v2876_v58  ;;  %v980_v41 = vmul.f32 %v897_v47, %v2878_v59 }
 0x172   : > { %2428 = vmatmul.msk.bf16.vlgmr.msra.gmra.mxu0 %vm284_vm2, %v2427_v48  ;;  %2429 = vmatmul.msk.bf16.vlgmr.msra.gmra.mxu1 %vm284_vm2, %v2427_v48  ;;  %v987_v7 = vadd.f32 %v979_v49, %v2980_v36  ;;  %v988_v8 = vadd.f32 %v980_v41, %v2983_v37 }
 0x173   : > { %2430 = vmatmul.msk.bf16.vlgmr.msra.gmra.mxu2 %vm284_vm2, %v2427_v48  ;;  %2431 = vmatmul.msk.bf16.vlgmr.msra.gmra.mxu3 %vm284_vm2, %v2427_v48 }
 0x174   : > { %1734 = vmatpush.bf16.msra.mxu1 %v1694_v63  ;;  %1747 = vmatpush.bf16.msra.mxu2 %v1697_v60  ;;  %v2436_v60 = vld [vmem:[%s3548_s2 + $0x20] sm:$0xf] }
 0x175   : > { %1760 = vmatpush.bf16.msra.mxu3 %v1700_v0  ;;  %1721 = vmatpush.bf16.msra.mxu0 %v1691_v1 }
 0x176   : > { %v910_v12 = vpop.f32.mrf.mxu2  ;;  %v923_v28 = vpop.f32.mrf.mxu3 }
 0x177   : > { %v981_v9 = vmul.f32 %v910_v12, %v2895_v14  ;;  %v982_v29 = vmul.f32 %v923_v28, %v2897_v15  ;;  %v886_v5 = vpop.f32.mrf.mxu0  ;;  %v899_v53 = vpop.f32.mrf.mxu1 }
 0x179   : > { %v989_v36 = vadd.f32 %v981_v9, %v3000_v56  ;;  %v990_v37 = vadd.f32 %v982_v29, %v3003_v57  ;;  %v1703_v57 = vsel %vm288_vm1, %v1683_v22, 0 }
 0x17e   : > { %v912_v20 = vpop.f32.mrf.mxu2  ;;  %v925_v21 = vpop.f32.mrf.mxu3 }
 0x17f   : > { %v936_v52 = vpop.f32.mrf.mxu0  ;;  %v949_v26 = vpop.f32.mrf.mxu1 }
 0x180   : > { %v983_v33 = vmul.f32 %v936_v52, %v2922_v34  ;;  %v984_v56 = vmul.f32 %v949_v26, %v2924_v30 }
 0x182   : > { %2432 = vmatmul.msk.bf16.vlgmr.msrb.gmra.mxu0 %vm284_vm2, %v2427_v48  ;;  %2433 = vmatmul.msk.bf16.vlgmr.msrb.gmra.mxu1 %vm284_vm2, %v2427_v48  ;;  %v991_v39 = vadd.f32 %v983_v33, %v3020_v17  ;;  %v992_v13 = vadd.f32 %v984_v56, %v3023_v11 }
 0x183   : > { %2434 = vmatmul.msk.bf16.vlgmr.msrb.gmra.mxu2 %vm284_vm2, %v2427_v48  ;;  %2435 = vmatmul.msk.bf16.vlgmr.msrb.gmra.mxu3 %vm284_vm2, %v2427_v48 }
 0x184   : > { %1773 = vmatpush.bf16.msrb.mxu0 %v1703_v57  ;;  %1786 = vmatpush.bf16.msrb.mxu1 %v1706_v31 }
 0x185   : > { %1799 = vmatpush.bf16.msrb.mxu2 %v1709_v35  ;;  %1812 = vmatpush.bf16.msrb.mxu3 %v1712_v38 }
 0x186   : > { %v962_v43 = vpop.f32.mrf.mxu2  ;;  %v975_v44 = vpop.f32.mrf.mxu3 }
 0x187   : > { %v985_v45 = vmul.f32 %v962_v43, %v2940_v40  ;;  %v986_v46 = vmul.f32 %v975_v44, %v2942_v55  ;;  %v938_v47 = vpop.f32.mrf.mxu0  ;;  %v951_v4 = vpop.f32.mrf.mxu1 }
 0x189   : > { %v993_v17 = vadd.f32 %v985_v45, %v3038_v50  ;;  %v994_v11 = vadd.f32 %v986_v46, %v3041_v23 }
 0x18e   : > { %v964_v6 = vpop.f32.mrf.mxu2  ;;  %v977_v49 = vpop.f32.mrf.mxu3 }
 0x18f   : > { %v1033_v41 = vpop.f32.mrf.mxu0  ;;  %v1046_v48 = vpop.f32.mrf.mxu1 }
 0x190   : > { %v1128_v63 = vadd.f32 %v1033_v41, %v987_v7  ;;  %v1129_v0 = vadd.f32 %v1046_v48, %v988_v8 }
 0x192   : > { %2437 = vmatmul.msk.bf16.vlgmr.msra.gmra.mxu0 %vm284_vm2, %v2436_v60  ;;  %2438 = vmatmul.msk.bf16.vlgmr.msra.gmra.mxu1 %vm284_vm2, %v2436_v60 }
 0x193   : > { %2439 = vmatmul.msk.bf16.vlgmr.msra.gmra.mxu2 %vm284_vm2, %v2436_v60  ;;  %2440 = vmatmul.msk.bf16.vlgmr.msra.gmra.mxu3 %vm284_vm2, %v2436_v60 }
 0x196   : > { %v1059_v50 = vpop.f32.mrf.mxu2  ;;  %v1072_v23 = vpop.f32.mrf.mxu3 }
 0x197   : > { %v1130_v1 = vadd.f32 %v1059_v50, %v989_v36  ;;  %v1131_v3 = vadd.f32 %v1072_v23, %v990_v37  ;;  %v1035_v12 = vpop.f32.mrf.mxu0  ;;  %v1048_v28 = vpop.f32.mrf.mxu1 }
 0x19e   : > { %v1061_v9 = vpop.f32.mrf.mxu2  ;;  %v1074_v29 = vpop.f32.mrf.mxu3 }
 0x19f   : > { %v1085_v5 = vpop.f32.mrf.mxu0  ;;  %v1098_v53 = vpop.f32.mrf.mxu1 }
 0x1a0   : > { %v1132_v7 = vadd.f32 %v1085_v5, %v991_v39  ;;  %v1133_v8 = vadd.f32 %v1098_v53, %v992_v13 }
 0x1a2   : > { %2441 = vmatmul.msk.bf16.vlgmr.msrb.gmra.mxu0 %vm284_vm2, %v2436_v60  ;;  %2442 = vmatmul.msk.bf16.vlgmr.msrb.gmra.mxu1 %vm284_vm2, %v2436_v60 }
 0x1a3   : > { %2443 = vmatmul.msk.bf16.vlgmr.msrb.gmra.mxu2 %vm284_vm2, %v2436_v60  ;;  %2444 = vmatmul.msk.bf16.vlgmr.msrb.gmra.mxu3 %vm284_vm2, %v2436_v60 }
 0x1a6   : > { %v1111_v18 = vpop.f32.mrf.mxu2  ;;  %v1124_v19 = vpop.f32.mrf.mxu3 }
 0x1a7   : > { %v1134_v36 = vadd.f32 %v1111_v18, %v993_v17  ;;  %v1135_v37 = vadd.f32 %v1124_v19, %v994_v11  ;;  %v1087_v16 = vpop.f32.mrf.mxu0  ;;  %v1100_v20 = vpop.f32.mrf.mxu1 }
 0x1ae   : > { %v1113_v21 = vpop.f32.mrf.mxu2  ;;  %v1126_v22 = vpop.f32.mrf.mxu3 }
 0x1af   : > { %v1203_v24 = vpop.f32.mrf.mxu0  ;;  %v1216_v52 = vpop.f32.mrf.mxu1 }
 0x1b0   : > { %v1298_v26 = vmul.f32 %v1203_v24, %v2962_v2  ;;  %v1299_v27 = vmul.f32 %v1216_v52, %v2964_v54 }
 0x1b2   : > { %v1306_v32 = vadd.f32 %v1298_v26, %v1128_v63  ;;  %v1307_v33 = vadd.f32 %v1299_v27, %v1129_v0 }
 0x1b6   : > { %v1229_v56 = vpop.f32.mrf.mxu2  ;;  %v1242_v57 = vpop.f32.mrf.mxu3 }
 0x1b7   : > { %v1300_v31 = vmul.f32 %v1229_v56, %v2991_v42  ;;  %v1301_v35 = vmul.f32 %v1242_v57, %v2993_v10  ;;  %v1205_v38 = vpop.f32.mrf.mxu0  ;;  %v1218_v39 = vpop.f32.mrf.mxu1 }
 0x1b9   : > { %v1308_v13 = vadd.f32 %v1300_v31, %v1130_v1  ;;  %v1309_v43 = vadd.f32 %v1301_v35, %v1131_v3 }
 0x1be   : > { %v1231_v44 = vpop.f32.mrf.mxu2  ;;  %v1244_v45 = vpop.f32.mrf.mxu3 }
 0x1bf   : > { %v1255_v46 = vpop.f32.mrf.mxu0  ;;  %v1268_v47 = vpop.f32.mrf.mxu1 }
 0x1c0   : > { %v1302_v4 = vmul.f32 %v1255_v46, %v3005_v61  ;;  %v1303_v17 = vmul.f32 %v1268_v47, %v3007_v62 }
 0x1c2   : > { %v3103_v11 = vadd.f32 %v1302_v4, %v1132_v7  ;;  %v1311_v6 = vadd.f32 %v1303_v17, %v1133_v8 }
 0x1c6   : > { %v1281_v49 = vpop.f32.mrf.mxu2  ;;  %v1294_v41 = vpop.f32.mrf.mxu3 }
 0x1c7   : > { %v1304_v48 = vmul.f32 %v1281_v49, %v3031_v25  ;;  %v1305_v60 = vmul.f32 %v1294_v41, %v3033_v51  ;;  %v1257_v63 = vpop.f32.mrf.mxu0  ;;  %v1270_v0 = vpop.f32.mrf.mxu1 }
 0x1c9   : > { %v3107_v50 = vadd.f32 %v1304_v48, %v1134_v36  ;;  %v3109_v23 = vadd.f32 %v1305_v60, %v1135_v37 }
 0x1ce   : > { %v1283_v1 = vpop.f32.mrf.mxu2  ;;  %v1296_v3 = vpop.f32.mrf.mxu3 }
 0x1cf   : > { %v1379_v12 = vpop.f32.mrf.mxu0  ;;  %v1392_v28 = vpop.f32.mrf.mxu1 }
 0x1d0   : > { %v1474_v9 = vmul.f32 %v1379_v12, %v2876_v58  ;;  %v1475_v29 = vmul.f32 %v1392_v28, %v2878_v59 }
 0x1d2   : > { %v1482_v5 = vadd.f32 %v1474_v9, %v1306_v32  ;;  %v1483_v53 = vadd.f32 %v1475_v29, %v1307_v33 }
 0x1d6   : > { %v1405_v7 = vpop.f32.mrf.mxu2  ;;  %v1418_v8 = vpop.f32.mrf.mxu3 }
 0x1d7   : > { %v1476_v18 = vmul.f32 %v1405_v7, %v2895_v14  ;;  %v1477_v19 = vmul.f32 %v1418_v8, %v2897_v15  ;;  %v1381_v36 = vpop.f32.mrf.mxu0  ;;  %v1394_v16 = vpop.f32.mrf.mxu1 }
 0x1d9   : > { %v1484_v37 = vadd.f32 %v1476_v18, %v1308_v13  ;;  %v1485_v20 = vadd.f32 %v1477_v19, %v1309_v43 }
 0x1de   : > { %v1407_v21 = vpop.f32.mrf.mxu2  ;;  %v1420_v22 = vpop.f32.mrf.mxu3 }
 0x1df   : > { %v1431_v24 = vpop.f32.mrf.mxu0  ;;  %v1444_v52 = vpop.f32.mrf.mxu1 }
 0x1e0   : > { %v1479_v58 = vmul.f32 %v1444_v52, %v2924_v30  ;;  %v1478_v19 = vmul.f32 %v1431_v24, %v2922_v34 }
 0x1e2   : > { %v1487_v26 = vadd.f32 %v1479_v58, %v1311_v6  ;;  %v1486_v16 = vadd.f32 %v1478_v19, %v3103_v11 }
 0x1e6   : > { %v1457_v59 = vpop.f32.mrf.mxu2  ;;  %v1470_v27 = vpop.f32.mrf.mxu3 }
 0x1e7   : > { %v1433_v32 = vpop.f32.mrf.mxu0  ;;  %v1446_v33 = vpop.f32.mrf.mxu1 }
 0x1e8   : > { %v1481_v33 = vmul.f32 %v1470_v27, %v2942_v55 }
 0x1ee   : > { %v1459_v56 = vpop.f32.mrf.mxu2  ;;  %v1472_v57 = vpop.f32.mrf.mxu3 }
 0x1ef   : > { %v1555_v14 = vpop.f32.mrf.mxu0  ;;  %v1568_v31 = vpop.f32.mrf.mxu1 }
 0x1f0   : > { %v1650_v63 = vadd.f32 %v1555_v14, %v1482_v5  ;;  %v1651_v0 = vadd.f32 %v1568_v31, %v1483_v53 }
 0x1f6   : > { %v1581_v15 = vpop.f32.mrf.mxu2  ;;  %v1594_v35 = vpop.f32.mrf.mxu3 }
 0x1f7   : > { %v1557_v38 = vpop.f32.mrf.mxu0  ;;  %v1570_v39 = vpop.f32.mrf.mxu1  ;;  %v1652_v12 = vadd.f32 %v1581_v15, %v1484_v37  ;;  %v1653_v53 = vadd.f32 %v1594_v35, %v1485_v20 }
 0x1fe   : > { %v1583_v13 = vpop.f32.mrf.mxu2  ;;  %v1596_v43 = vpop.f32.mrf.mxu3 }
 0x1ff   : > { %v1607_v44 = vpop.f32.mrf.mxu0  ;;  %v1620_v45 = vpop.f32.mrf.mxu1 }
 0x200   : > { %v1654_v20 = vadd.f32 %v1607_v44, %v1486_v16  ;;  %v1655_v14 = vadd.f32 %v1620_v45, %v1487_v26 }
 0x206   : > { %v1633_v46 = vpop.f32.mrf.mxu2  ;;  %v1646_v47 = vpop.f32.mrf.mxu3 }
 0x207   : > { %v1609_v30 = vpop.f32.mrf.mxu0  ;;  %v1622_v4 = vpop.f32.mrf.mxu1 }
 0x20e   : > { %v1635_v17 = vpop.f32.mrf.mxu2  ;;  %v1648_v6 = vpop.f32.mrf.mxu3 }
 0x20f   : > { %v1723_v49 = vpop.f32.mrf.mxu0  ;;  %v1736_v41 = vpop.f32.mrf.mxu1 }
 0x210   : > { %v1818_v48 = vmul.f32 %v1723_v49, %v2962_v2  ;;  %v1819_v60 = vmul.f32 %v1736_v41, %v2964_v54 }
 0x212   : > { %v3118_v28 = vadd.f32 %v1818_v48, %v1650_v63  ;;  %v3120_v9 = vadd.f32 %v1819_v60, %v1651_v0  ;;  %v2522_v63 = vmov 2048.0  }
 0x213   : > { %2486 = vrcp.f32 %v2522_v63 }
 0x214   : > { %v1850_v2 = vmul.f32 %v3118_v28, %v3118_v28  ;;  %v1851_v54 = vmul.f32 %v3120_v9, %v3120_v9  ;;  %v1834_v36 = vadd.f32 %v3120_v9, %v3118_v28 }
 0x216   : > { %v1749_v1 = vpop.f32.mrf.mxu2  ;;  %v1762_v3 = vpop.f32.mrf.mxu3  ;;  %v1858_v34 = vadd.f32 %v1851_v54, %v1850_v2 }
 0x217   : > { %v1820_v29 = vmul.f32 %v1749_v1, %v2991_v42  ;;  %v1725_v7 = vpop.f32.mrf.mxu0  ;;  %v1738_v8 = vpop.f32.mrf.mxu1  ;;  %v1821_v5 = vmul.f32 %v1762_v3, %v2993_v10  ;;  %v1480_v10 = vmul.f32 %v1457_v59, %v2940_v40 }
 0x219   : > { %v3123_v18 = vadd.f32 %v1820_v29, %v1652_v12  ;;  %v3137_v24 = vadd.f32 %v1821_v5, %v1653_v53  ;;  %v1488_v35 = vadd.f32 %v1480_v10, %v3107_v50  ;;  %v2487_v0 = vpop.eup %2486 }
 0x21a   : > { %v1875_v1 = vmul.f32 2048.0, %v2487_v0  ;;  %vm1879_vm10 = vweird.f32 %v2487_v0 }
 0x21b   : > { %v1852_v42 = vmul.f32 %v3123_v18, %v3123_v18  ;;  %v1835_v22 = vadd.f32 %v1834_v36, %v3123_v18  ;;  %v1853_v15 = vmul.f32 %v3137_v24, %v3137_v24 }
 0x21c   : > { %v1876_v29 = vsub.f32 1.0, %v1875_v1 }
 0x21d   : > { %v1859_v56 = vadd.f32 %v1858_v34, %v1852_v42  ;;  %v1836_v31 = vadd.f32 %v1835_v22, %v3137_v24 }
 0x21e   : > { %v1751_v37 = vpop.f32.mrf.mxu2  ;;  %v1764_v21 = vpop.f32.mrf.mxu3  ;;  %v1877_v5 = vmul.f32 %v2487_v0, %v1876_v29 }
 0x21f   : > { %v1775_v52 = vpop.f32.mrf.mxu0  ;;  %v1788_v58 = vpop.f32.mrf.mxu1  ;;  %v1860_v59 = vadd.f32 %v1859_v56, %v1853_v15  ;;  %v1895_v15 = vld [vmem:[%s3549_s3] sm:$0xff] }
 0x220   : > { %v1822_v32 = vmul.f32 %v1775_v52, %v3005_v61  ;;  %v1823_v57 = vmul.f32 %v1788_v58, %v3007_v62  ;;  %v1489_v61 = vadd.f32 %v1481_v33, %v3109_v23  ;;  %v1656_v62 = vadd.f32 %v1633_v46, %v1488_v35 }
 0x221   : > { %v1878_v37 = vadd.f32 %v2487_v0, %v1877_v5 }
 0x222   : > { %v3143_v11 = vadd.f32 %v1822_v32, %v1654_v20  ;;  %v3153_v27 = vadd.f32 %v1823_v57, %v1655_v14  ;;  %v1657_v39 = vadd.f32 %v1646_v47, %v1489_v61 }
 0x223   : > { %v1880_v52 = vsel %vm1879_vm10, %v2487_v0, %v1878_v37 }
 0x224   : > { %v1854_v40 = vmul.f32 %v3143_v11, %v3143_v11  ;;  %v1837_v55 = vadd.f32 %v1836_v31, %v3143_v11  ;;  %v1855_v30 = vmul.f32 %v3153_v27, %v3153_v27  ;;  %v2524_v31 = vmov 0  }
 0x225   : > { %2484 = vset.pattern.permute.xlu2 %v2524_v31  ;;  %2485 = vset.pattern.permute.xlu0 %v2524_v31 }
 0x226   : > { %v1801_v38 = vpop.f32.mrf.mxu2  ;;  %v1814_v26 = vpop.f32.mrf.mxu3  ;;  %v1861_v45 = vadd.f32 %v1860_v59, %v1854_v40  ;;  %v1838_v17 = vadd.f32 %v1837_v55, %v3153_v27  ;;  %v1911_v55 = vld [vmem:[%s3550_s4] sm:$0xff] }
 0x227   : > { %v1824_v13 = vmul.f32 %v1801_v38, %v3031_v25  ;;  %v1825_v43 = vmul.f32 %v1814_v26, %v3033_v51  ;;  %v1777_v44 = vpop.f32.mrf.mxu0  ;;  %v1790_v50 = vpop.f32.mrf.mxu1  ;;  %v2525_v38 = vmov 0.0  }
 0x228   : > { %v1862_v25 = vadd.f32 %v1861_v45, %v1855_v30  ;;  %2293 = vst [vmem:[%s3181_s27] sm:$0xff] %v2525_v38 }
 0x229   : > { %v3159_v23 = vadd.f32 %v1824_v13, %v1656_v62  ;;  %v3161_v4 = vadd.f32 %v1825_v43, %v1657_v39  ;;  %2302 = vst [vmem:[%s3181_s27 + $0x48] sm:$0xff] %v2525_v38 }
 0x22b   : > { %v1839_v46 = vadd.f32 %v1838_v17, %v3159_v23  ;;  %v1856_v47 = vmul.f32 %v3159_v23, %v3159_v23  ;;  %v1857_v6 = vmul.f32 %v3161_v4, %v3161_v4 }
 0x22d   : > { %v1840_v51 = vadd.f32 %v1839_v46, %v3161_v4  ;;  %v1863_v49 = vadd.f32 %v1862_v25, %v1856_v47 }
 0x22e   : > { %v1803_v41 = vpop.f32.mrf.mxu2  ;;  %v1816_v48 = vpop.f32.mrf.mxu3 }
 0x22f   : > { %1841 = vadd.xlane.f32.xlu0 %v1840_v51  ;;  %v1864_v60 = vadd.f32 %v1863_v49, %v1857_v6 }
 0x231   : > { %1865 = vadd.xlane.f32.xlu1 %v1864_v60 }
 0x2a2   : > { %v1842_v3 = vpop.xlane.xlu0 %1841 }
 0x2a3   : > { %v1843_v12 = vrot.slane %v1842_v3, 4 }
 0x2a4   : > { %v1866_v7 = vpop.xlane.xlu1 %1865 }
 0x2a5   : > { %v1844_v8 = vadd.f32 %v1843_v12, %v1842_v3  ;;  %v1867_v19 = vrot.slane %v1866_v7, 4 }
 0x2a7   : > { %v1845_v2 = vrot.slane %v1844_v8, 2  ;;  %v1868_v54 = vadd.f32 %v1867_v19, %v1866_v7 }
 0x2a9   : > { %v1869_v53 = vrot.slane %v1868_v54, 2  ;;  %v1846_v36 = vadd.f32 %v1845_v2, %v1844_v8 }
 0x2ab   : > { %v1870_v42 = vadd.f32 %v1869_v53, %v1868_v54  ;;  %v1847_v16 = vrot.slane %v1846_v36, 1 }
 0x2ad   : > { %v1848_v21 = vadd.f32 %v1847_v16, %v1846_v36  ;;  %v1871_v34 = vrot.slane %v1870_v42, 1 }
 0x2af   : > { %2456 = vpush %v1848_v21  ;;  %v1872_v22 = vadd.f32 %v1871_v34, %v1870_v42 }
 0x2b1   : > { %2458 = vpush %v1872_v22 }
 0x2b2   : > { %2460 = vpush %v1880_v52 }
 0x2e0   : > { %s2457_s7 = spop %2456 }
 0x2e2   : > { %s2459_s8 = spop %2458 }
 0x2e3   : > { %s2461_s9 = spop %2460 }
 0x2e4   : > { %s1882_s10 = smul.f32 %s2461_s9, %s2457_s7 }
 0x2e5   : > { %s1891_s11 = smul.f32 %s2461_s9, %s2459_s8 }
 0x2e6   : > { %s1892_s12 = smul.f32 %s1882_s10, %s1882_s10  ;;  %v1912_v61 = vstv %s1882_s10 }
 0x2e8   : > { %s1893_s13 = ssub.f32 %s1891_s11, %s1892_s12 }
 0x2ea   : > { %s1894_s15 = smax.f32 %s2523_s14, %s1893_s13 }
 0x2eb   : > { %s1896_s16 = sadd.f32 1e-05, %s1894_s15 }
 0x2ed   : > { %v1897_v58 = vstv %s1896_s16 }
 0x2ee   : > { %2488 = vrsqrt.f32 %v1897_v58  ;;  %vm1904_vm12 = vweird.f32 %v1897_v58 }
 0x2f4   : > { %v2489_v10 = vpop.eup %2488 }
 0x2f5   : > { %v1899_v20 = vmul.f32 %v2489_v10, %v1897_v58  ;;  %vm1905_vm11 = vweird.f32 %v2489_v10 }
 0x2f6   : > { %vm1906_vm13 = vmor %vm1904_vm12, %vm1905_vm11 }
 0x2f7   : > { %v1900_v32 = vmul.f32 %v2489_v10, %v1899_v20 }
 0x2f9   : > { %v1901_v33 = vmul.f32 0.5, %v1900_v32 }
 0x2fb   : > { %v1902_v56 = vsub.f32 1.5, %v1901_v33 }
 0x2fd   : > { %v1903_v57 = vmul.f32 %v2489_v10, %v1902_v56 }
 0x2ff   : > { %v1907_v14 = vsel %vm1906_vm13, %v2489_v10, %v1903_v57 }
 0x300   : > { %2462 = vpush %v1907_v14 }
 0x331   : > { %s2463_s22 = spop %2462 }
 0x332   : > { %v1909_v35 = vstv %s2463_s22 }
 0x333   : > { %v1910_v40 = vmul.f32 %v1909_v35, %v1895_v15 }
 0x335   : > { %1917 = vperm.xlu2 %2484, %v1910_v40   ;;  %v1913_v59 = vmul.f32 %v1912_v61, %v1910_v40 }
 0x337   : > { %v1914_v62 = vsub.f32 %v1911_v55, %v1913_v59 }
 0x33d   : > { %1930 = vperm.xlu2 %2484, %v1914_v62  }
 0x38f   : > { %v3185_v26 = vpop.permute.xlu2 %1917 }
 0x390   : > { %v1920_v39 = vmul.f32 %v3185_v26, %v3118_v28  ;;  %v1921_v13 = vmul.f32 %v3185_v26, %v3120_v9  ;;  %v1922_v43 = vmul.f32 %v3185_v26, %v3123_v18  ;;  %v1923_v44 = vmul.f32 %v3185_v26, %v3137_v24 }
 0x391   : > { %v1924_v52 = vmul.f32 %v3185_v26, %v3143_v11 }
 0x397   : > { %v3195_v50 = vpop.permute.xlu2 %1930 }
 0x398   : > { %v3198_v45 = vadd.f32 %v3195_v50, %v1920_v39  ;;  %v3201_v30 = vadd.f32 %v3195_v50, %v1921_v13  ;;  %v3204_v17 = vadd.f32 %v3195_v50, %v1922_v43  ;;  %v3207_v28 = vadd.f32 %v3195_v50, %v1923_v44 }
 0x399   : > { %v3254_v57 = vadd.f32 %v3195_v50, %v1924_v52  ;;  %v1925_v44 = vmul.f32 %v3185_v26, %v3153_v27 }
 0x39a   : > { %v3210_v9 = vmul.f32 0.70710677, %v3198_v45  ;;  %v3213_v18 = vmul.f32 0.70710677, %v3201_v30  ;;  %v3216_v24 = vmul.f32 0.70710677, %v3204_v17 }
 0x39b   : > { %v3219_v46 = vmul.f32 0.70710677, %v3207_v28 }
 0x39c   : > { %v1957_v47 = vmul.f32 %v3210_v9, %v3210_v9  ;;  %v1997_v25 = vmul.f32 %v3213_v18, %v3213_v18  ;;  %v2037_v51 = vmul.f32 %v3216_v24, %v3216_v24 }
 0x39d   : > { %v2077_v6 = vmul.f32 %v3219_v46, %v3219_v46 }
 0x39e   : > { %v3229_v49 = vmin.f32 %v1957_v47, 16.0  ;;  %v3231_v41 = vmin.f32 %v1997_v25, 16.0  ;;  %v3233_v48 = vmin.f32 %v2037_v51, 16.0  ;;  %v3267_v47 = vmul.f32 0.70710677, %v3254_v57 }
 0x39f   : > { %v3235_v60 = vmin.f32 %v2077_v6, 16.0 }
 0x3a0   : > { %v1959_v63 = vmul.f32 2.1237322e-06, %v3229_v49  ;;  %v1970_v0 = vmul.f32 3.8918573e-05, %v3229_v49  ;;  %v1999_v1 = vmul.f32 2.1237322e-06, %v3231_v41 }
 0x3a1   : > { %v2010_v3 = vmul.f32 3.8918573e-05, %v3231_v41  ;;  %v2039_v12 = vmul.f32 2.1237322e-06, %v3233_v48  ;;  %v2050_v29 = vmul.f32 3.8918573e-05, %v3233_v48 }
 0x3a2   : > { %v1960_v7 = vadd.f32 0.00028619796, %v1959_v63  ;;  %v1971_v8 = vadd.f32 0.001143296, %v1970_v0  ;;  %v2000_v19 = vadd.f32 0.00028619796, %v1999_v1  ;;  %v3273_v1 = vadd.f32 %v3195_v50, %v1925_v44 }
 0x3a3   : > { %v2011_v2 = vadd.f32 0.001143296, %v2010_v3  ;;  %v2040_v54 = vadd.f32 0.00028619796, %v2039_v12  ;;  %v2051_v5 = vadd.f32 0.001143296, %v2050_v29 }
 0x3a4   : > { %v1961_v53 = vmul.f32 %v1960_v7, %v3229_v49  ;;  %v1972_v36 = vmul.f32 %v1971_v8, %v3229_v49  ;;  %v2001_v42 = vmul.f32 %v2000_v19, %v3231_v41  ;;  %v2079_v16 = vmul.f32 2.1237322e-06, %v3235_v60 }
 0x3a5   : > { %v2012_v37 = vmul.f32 %v2011_v2, %v3231_v41  ;;  %v2041_v21 = vmul.f32 %v2040_v54, %v3233_v48  ;;  %v2052_v34 = vmul.f32 %v2051_v5, %v3233_v48  ;;  %v2090_v22 = vmul.f32 3.8918573e-05, %v3235_v60 }
 0x3a6   : > { %v1962_v58 = vadd.f32 0.0036580483, %v1961_v53  ;;  %v1973_v10 = vadd.f32 0.014752088, %v1972_v36  ;;  %v2002_v20 = vadd.f32 0.0036580483, %v2001_v42  ;;  %v1926_v2 = vmul.f32 %v3185_v26, %v3159_v23 }
 0x3a7   : > { %v2013_v32 = vadd.f32 0.014752088, %v2012_v37  ;;  %v2042_v33 = vadd.f32 0.0036580483, %v2041_v21  ;;  %v2053_v56 = vadd.f32 0.014752088, %v2052_v34  ;;  %v2117_v5 = vmul.f32 %v3267_v47, %v3267_v47 }
 0x3a8   : > { %v1963_v14 = vmul.f32 %v1962_v58, %v3229_v49  ;;  %v1974_v31 = vmul.f32 %v1973_v10, %v3229_v49  ;;  %v2080_v15 = vadd.f32 0.00028619796, %v2079_v16  ;;  %v2003_v35 = vmul.f32 %v2002_v20, %v3231_v41 }
 0x3a9   : > { %v2014_v40 = vmul.f32 %v2013_v32, %v3231_v41  ;;  %v2054_v11 = vmul.f32 %v2053_v56, %v3233_v48  ;;  %v2091_v61 = vadd.f32 0.001143296, %v2090_v22  ;;  %v2043_v55 = vmul.f32 %v2042_v33, %v3233_v48 }
 0x3aa   : > { %v1975_v59 = vadd.f32 0.112945676, %v1974_v31  ;;  %v2081_v62 = vmul.f32 %v2080_v15, %v3235_v60  ;;  %v1964_v38 = vadd.f32 0.05243302, %v1963_v14  ;;  %v2004_v51 = vadd.f32 0.05243302, %v2003_v35 }
 0x3ab   : > { %v2015_v39 = vadd.f32 0.112945676, %v2014_v40  ;;  %v2055_v13 = vadd.f32 0.112945676, %v2054_v11  ;;  %v2092_v43 = vmul.f32 %v2091_v61, %v3235_v60  ;;  %v2044_v12 = vadd.f32 0.05243302, %v2043_v55 }
 0x3ac   : > { %v1976_v25 = vmul.f32 %v1975_v59, %v3229_v49  ;;  %v2082_v29 = vadd.f32 0.0036580483, %v2081_v62  ;;  %v1965_v7 = vmul.f32 %v1964_v38, %v3229_v49  ;;  %v2005_v53 = vmul.f32 %v2004_v51, %v3231_v41 }
 0x3ad   : > { %v2016_v6 = vmul.f32 %v2015_v39, %v3231_v41  ;;  %v2056_v63 = vmul.f32 %v2055_v13, %v3233_v48  ;;  %v2093_v0 = vadd.f32 0.014752088, %v2092_v43  ;;  %v3286_v37 = vmul.f32 0.70710677, %v3273_v1 }
 0x3ae   : > { %v1977_v3 = vadd.f32 0.4994258, %v1976_v25  ;;  %v2045_v34 = vmul.f32 %v2044_v12, %v3233_v48  ;;  %v2083_v23 = vmul.f32 %v2082_v29, %v3235_v60  ;;  %v1966_v22 = vadd.f32 0.18741608, %v1965_v7 }
 0x3af   : > { %v2017_v27 = vadd.f32 0.4994258, %v2016_v6  ;;  %v2057_v8 = vadd.f32 0.4994258, %v2056_v63  ;;  %v2094_v19 = vmul.f32 %v2093_v0, %v3235_v60  ;;  %v3297_v10 = vadd.f32 %v3195_v50, %v1926_v2 }
 0x3b0   : > { %v1978_v54 = vmul.f32 %v1977_v3, %v3229_v49  ;;  %v2006_v20 = vadd.f32 0.18741608, %v2005_v53  ;;  %v3302_v33 = vmin.f32 %v2117_v5, 16.0  ;;  %v1927_v56 = vmul.f32 %v3185_v26, %v3161_v4 }
 0x3b1   : > { %v2018_v36 = vmul.f32 %v2017_v27, %v3231_v41  ;;  %v2058_v42 = vmul.f32 %v2057_v8, %v3233_v48  ;;  %v2095_v16 = vadd.f32 0.112945676, %v2094_v19  ;;  %v2046_v14 = vadd.f32 0.18741608, %v2045_v34 }
 0x3b2   : > { %v3288_v21 = vadd.f32 1.0, %v1978_v54  ;;  %v2084_v31 = vadd.f32 0.05243302, %v2083_v23  ;;  %v2157_v15 = vmul.f32 %v3286_v37, %v3286_v37  ;;  %v1967_v35 = vmul.f32 %v1966_v22, %v3229_v49 }
 0x3b3   : > { %v3292_v52 = vadd.f32 1.0, %v2018_v36  ;;  %v3294_v58 = vadd.f32 1.0, %v2058_v42  ;;  %v2096_v32 = vmul.f32 %v2095_v16, %v3235_v60  ;;  %v3311_v40 = vadd.f32 %v3195_v50, %v1927_v56 }
 0x3b4   : > { %2490 = vrcp.f32 %v3288_v21  ;;  %v3314_v11 = vmul.f32 0.70710677, %v3297_v10  ;;  %v2007_v61 = vmul.f32 %v2006_v20, %v3231_v41  ;;  %v2119_v4 = vmul.f32 2.1237322e-06, %v3302_v33 }
 0x3b5   : > { %2492 = vrcp.f32 %v3292_v52  ;;  %v2097_v59 = vadd.f32 0.4994258, %v2096_v32  ;;  %v2047_v55 = vmul.f32 %v2046_v14, %v3233_v48  ;;  %v2085_v62 = vmul.f32 %v2084_v31, %v3235_v60 }
 0x3b6   : > { %2494 = vrcp.f32 %v3294_v58  ;;  %v2130_v49 = vmul.f32 3.8918573e-05, %v3302_v33  ;;  %v3323_v38 = vmin.f32 %v2157_v15, 16.0  ;;  %v1968_v39 = vadd.f32 1.1283791, %v1967_v35 }
 0x3b7   : > { %v2098_v41 = vmul.f32 %v2097_v59, %v3235_v60  ;;  %v2120_v43 = vadd.f32 0.00028619796, %v2119_v4  ;;  %v3331_v44 = vmul.f32 0.5, %v3198_v45  ;;  %v3334_v48 = vmul.f32 0.5, %v3201_v30 }
 0x3b8   : > { %v3337_v25 = vmul.f32 0.5, %v3204_v17  ;;  %v3340_v51 = vmul.f32 0.70710677, %v3311_v40  ;;  %v2008_v63 = vadd.f32 1.1283791, %v2007_v61  ;;  %v2197_v17 = vmul.f32 %v3314_v11, %v3314_v11 }
 0x3b9   : > { %v3344_v0 = vadd.f32 1.0, %v2098_v41  ;;  %v2121_v3 = vmul.f32 %v2120_v43, %v3302_v33  ;;  %v2131_v12 = vadd.f32 0.001143296, %v2130_v49  ;;  %v2086_v30 = vadd.f32 0.18741608, %v2085_v62 }
 0x3ba   : > { %v3318_v26 = vpop.eup %2490  ;;  %v3352_v7 = vmul.f32 %v1968_v39, %v3210_v9  ;;  %v2048_v27 = vadd.f32 1.1283791, %v2047_v55  ;;  %v2159_v8 = vmul.f32 2.1237322e-06, %v3323_v38  ;;  %vm1985_vm14 = vweird.f32 %v3288_v21 }
 0x3bb   : > { %v3325_v50 = vpop.eup %2492  ;;  %v1981_v13 = vmul.f32 %v3318_v26, %v3288_v21  ;;  %2496 = vrcp.f32 %v3344_v0  ;;  %v1989_v19 = vand.u32 2147483647, %v3288_v21  ;;  %v1991_v2 = vand.u32 2147483648, %v3288_v21 }
 0x3bc   : > { %v3342_v6 = vpop.eup %2494  ;;  %v2021_v45 = vmul.f32 %v3325_v50, %v3292_v52  ;;  %v3362_v5 = vmul.f32 %v2008_v63, %v3213_v18  ;;  %v2029_v9 = vand.u32 2147483647, %v3292_v52  ;;  %v2122_v53 = vadd.f32 0.0036580483, %v2121_v3 }
 0x3bd   : > { %v1982_v29 = vsub.f32 1.0, %v1981_v13  ;;  %v2061_v54 = vmul.f32 %v3342_v6, %v3294_v58  ;;  %v2132_v36 = vmul.f32 %v2131_v12, %v3302_v33  ;;  %v2031_v34 = vand.u32 2147483648, %v3292_v52 }
 0x3be   : > { %v2022_v16 = vsub.f32 1.0, %v2021_v45  ;;  %v2087_v23 = vmul.f32 %v2086_v30, %v3235_v60  ;;  %v3370_v22 = vmul.f32 %v2048_v27, %v3216_v24  ;;  %v2071_v20 = vand.u32 2147483648, %v3294_v58 }
 0x3bf   : > { %v1983_v42 = vmul.f32 %v3318_v26, %v1982_v29  ;;  %v2133_v32 = vadd.f32 0.014752088, %v2132_v36  ;;  %v2160_v18 = vadd.f32 0.00028619796, %v2159_v8  ;;  %v1992_v56 = vor.u32 1.1754944e-38, %v1991_v2 }
 0x3c0   : > { %v2062_v14 = vsub.f32 1.0, %v2061_v54  ;;  %v2069_v31 = vand.u32 2147483647, %v3294_v58  ;;  %v3374_v15 = vmin.f32 %v2197_v17, 16.0  ;;  %vm1986_vm15 = vweird.f32 %v3318_v26 }
 0x3c1   : > { %v3376_v35 = vpop.eup %2496  ;;  %vm3379_vm0 = vcmp.eq.f32.partialorder %v1989_v19, 8.507059e+37  ;;  %vm2025_vm1 = vweird.f32 %v3292_v52  ;;  %v2123_v24 = vmul.f32 %v2122_v53, %v3302_v33  ;;  %v2134_v60 = vmul.f32 %v2133_v32, %v3302_v33  ;;  %vm3400_vm5 = vmor %vm1985_vm14, %vm1986_vm15 }
 0x3c2   : > { %v2170_v59 = vmul.f32 3.8918573e-05, %v3323_v38  ;;  %v1984_v4 = vadd.f32 %v3318_v26, %v1983_v42  ;;  %v2023_v55 = vmul.f32 %v3325_v50, %v2022_v16  ;;  %v2088_v62 = vadd.f32 1.1283791, %v2087_v23 }
 0x3c3   : > { %v2101_v49 = vmul.f32 %v3376_v35, %v3344_v0  ;;  %v2032_v39 = vor.u32 1.1754944e-38, %v2031_v34  ;;  %vm2065_vm2 = vweird.f32 %v3294_v58  ;;  %v2072_v13 = vor.u32 1.1754944e-38, %v2071_v20 }
 0x3c4   : > { %v2135_v41 = vadd.f32 0.112945676, %v2134_v60  ;;  %v2161_v43 = vmul.f32 %v2160_v18, %v3323_v38  ;;  %vm2026_vm3 = vweird.f32 %v3325_v50  ;;  %v2063_v63 = vmul.f32 %v3342_v6, %v2062_v14 }
 0x3c5   : > { %vm2066_vm4 = vweird.f32 %v3342_v6  ;;  %v2102_v3 = vsub.f32 1.0, %v2101_v49  ;;  %v2124_v29 = vadd.f32 0.05243302, %v2123_v24  ;;  %v2171_v30 = vadd.f32 0.001143296, %v2170_v59  ;;  %vm3436_vm8 = vmor %vm2025_vm1, %vm2026_vm3 }
 0x3c6   : > { %v2136_v45 = vmul.f32 %v2135_v41, %v3302_v33  ;;  %v2199_v17 = vmul.f32 2.1237322e-06, %v3374_v15  ;;  %v1988_v27 = vsel %vm3400_vm5, %v3318_v26, %v1984_v4  ;;  %v2024_v8 = vadd.f32 %v3325_v50, %v2023_v55  ;;  %vm3455_vm10 = vmor %vm2065_vm2, %vm2066_vm4 }
 0x3c7   : > { %vm3410_vm6 = vcmp.eq.f32.partialorder %v2029_v9, 8.507059e+37  ;;  %v3415_v21 = vmul.f32 %v2088_v62, %v3219_v46  ;;  %v2210_v2 = vmul.f32 3.8918573e-05, %v3374_v15  ;;  %vm3418_vm7 = vcmp.eq.f32.partialorder %v2069_v31, 8.507059e+37 }
 0x3c8   : > { %v2137_v53 = vadd.f32 0.4994258, %v2136_v45  ;;  %v2162_v36 = vadd.f32 0.0036580483, %v2161_v43  ;;  %v2172_v42 = vmul.f32 %v2171_v30, %v3323_v38  ;;  %v2200_v26 = vadd.f32 0.00028619796, %v2199_v17 }
 0x3c9   : > { %v2064_v16 = vadd.f32 %v3342_v6, %v2063_v63  ;;  %v2103_v9 = vmul.f32 %v3376_v35, %v2102_v3  ;;  %v2211_v34 = vadd.f32 0.001143296, %v2210_v2  ;;  %v2237_v46 = vmul.f32 %v3340_v51, %v3340_v51 }
 0x3ca   : > { %v2125_v23 = vmul.f32 %v2124_v29, %v3302_v33  ;;  %v2138_v20 = vmul.f32 %v2137_v53, %v3302_v33  ;;  %v2173_v32 = vadd.f32 0.014752088, %v2172_v42  ;;  %v2201_v18 = vmul.f32 %v2200_v26, %v3374_v15 }
 0x3cb   : > { %v1993_v14 = vsel %vm3379_vm0, %v1992_v56, %v1988_v27  ;;  %vm2105_vm9 = vweird.f32 %v3344_v0  ;;  %v2111_v24 = vand.u32 2147483648, %v3344_v0  ;;  %v2212_v60 = vmul.f32 %v2211_v34, %v3374_v15 }
 0x3cc   : > { %v2028_v59 = vsel %vm3436_vm8, %v3325_v50, %v2024_v8  ;;  %v3446_v61 = vadd.f32 1.0, %v2138_v20  ;;  %v2174_v56 = vmul.f32 %v2173_v32, %v3323_v38  ;;  %v3449_v4 = vmin.f32 %v2237_v46, 16.0 }
 0x3cd   : > { %v2104_v55 = vadd.f32 %v3376_v35, %v2103_v9  ;;  %vm2106_vm11 = vweird.f32 %v3376_v35  ;;  %v2202_v62 = vadd.f32 0.0036580483, %v2201_v18  ;;  %v2213_v50 = vadd.f32 0.014752088, %v2212_v60 }
 0x3ce   : > { %v2068_v49 = vsel %vm3455_vm10, %v3342_v6, %v2064_v16  ;;  %v2126_v41 = vadd.f32 0.18741608, %v2125_v23  ;;  %2498 = vrcp.f32 %v3446_v61  ;;  %v2163_v43 = vmul.f32 %v2162_v36, %v3323_v38  ;;  %vm3472_vm12 = vmor %vm2105_vm9, %vm2106_vm11 }
 0x3cf   : > { %v1994_v58 = vmul.f32 %v1993_v14, %v3352_v7  ;;  %v2109_v63 = vand.u32 2147483647, %v3344_v0  ;;  %v2112_v3 = vor.u32 1.1754944e-38, %v2111_v24  ;;  %v2175_v12 = vadd.f32 0.112945676, %v2174_v56 }
 0x3d0   : > { %v2033_v29 = vsel %vm3410_vm6, %v2032_v39, %v2028_v59  ;;  %v2203_v6 = vmul.f32 %v2202_v62, %v3374_v15  ;;  %v2214_v30 = vmul.f32 %v2213_v50, %v3374_v15  ;;  %v2239_v17 = vmul.f32 2.1237322e-06, %v3449_v4 }
 0x3d1   : > { %v2073_v7 = vsel %vm3418_vm7, %v2072_v13, %v2068_v49  ;;  %v2108_v27 = vsel %vm3472_vm12, %v3376_v35, %v2104_v55  ;;  %v2176_v39 = vmul.f32 %v2175_v12, %v3323_v38  ;;  %v2250_v0 = vmul.f32 3.8918573e-05, %v3449_v4 }
 0x3d2   : > { %v2127_v8 = vmul.f32 %v2126_v41, %v3302_v33  ;;  %v2164_v19 = vadd.f32 0.05243302, %v2163_v43  ;;  %v2215_v2 = vadd.f32 0.112945676, %v2214_v30  ;;  %v2240_v53 = vadd.f32 0.00028619796, %v2239_v17 }
 0x3d3   : > { %v2034_v36 = vmul.f32 %v2033_v29, %v3362_v5  ;;  %vm2110_vm13 = vcmp.eq.f32.partialorder %v2109_v63, 8.507059e+37  ;;  %v2177_v42 = vadd.f32 0.4994258, %v2176_v39  ;;  %v2251_v26 = vadd.f32 0.001143296, %v2250_v0 }
 0x3d4   : > { %v2499_v54 = vpop.eup %2498  ;;  %v2445_v13 = vclamps-f32 %v1994_v58, 1.0  ;;  %v2113_v16 = vsel %vm2110_vm13, %v2112_v3, %v2108_v27  ;;  %v2204_v9 = vadd.f32 0.05243302, %v2203_v6  ;;  %v2216_v35 = vmul.f32 %v2215_v2, %v3374_v15 }
 0x3d5   : > { %v2074_v34 = vmul.f32 %v2073_v7, %v3370_v22  ;;  %v2141_v46 = vmul.f32 %v2499_v54, %v3446_v61  ;;  %v2178_v33 = vmul.f32 %v2177_v42, %v3323_v38  ;;  %v2241_v23 = vmul.f32 %v2240_v53, %v3449_v4 }
 0x3d6   : > { %v2128_v20 = vadd.f32 1.1283791, %v2127_v8  ;;  %v2165_v5 = vmul.f32 %v2164_v19, %v3323_v38  ;;  %v2217_v32 = vadd.f32 0.4994258, %v2216_v35  ;;  %v2252_v18 = vmul.f32 %v2251_v26, %v3449_v4 }
 0x3d7   : > { %v2114_v14 = vmul.f32 %v2113_v16, %v3415_v21  ;;  %v2142_v31 = vsub.f32 1.0, %v2141_v46  ;;  %v2149_v24 = vand.u32 2147483647, %v3446_v61  ;;  %v3497_v60 = vadd.f32 1.0, %v2178_v33 }
 0x3d8   : > { %v2151_v22 = vand.u32 2147483648, %v3446_v61  ;;  %v2205_v59 = vmul.f32 %v2204_v9, %v3374_v15  ;;  %v2218_v56 = vmul.f32 %v2217_v32, %v3374_v15  ;;  %v2253_v52 = vadd.f32 0.014752088, %v2252_v18 }
 0x3d9   : > { %v2143_v55 = vmul.f32 %v2499_v54, %v2142_v31  ;;  %vm2146_vm14 = vweird.f32 %v2499_v54  ;;  %2500 = vrcp.f32 %v3497_v60  ;;  %v2242_v62 = vadd.f32 0.0036580483, %v2241_v23 }
 0x3da   : > { %v2446_v50 = vclamps-f32 %v2034_v36, 1.0  ;;  %v2447_v49 = vclamps-f32 %v2074_v34, 1.0  ;;  %v2166_v21 = vadd.f32 0.18741608, %v2165_v5  ;;  %v3503_v41 = vadd.f32 1.0, %v2218_v56 }
 0x3db   : > { %v2129_v43 = vmul.f32 %v2128_v20, %v3267_v47  ;;  %v2144_v58 = vadd.f32 %v2499_v54, %v2143_v55  ;;  %vm2145_vm15 = vweird.f32 %v3446_v61  ;;  %v2254_v63 = vmul.f32 %v2253_v52, %v3449_v4 }
 0x3dc   : > { %v2448_v3 = vclamps-f32 %v2114_v14, 1.0  ;;  %vm2147_vm0 = vmor %vm2145_vm15, %vm2146_vm14  ;;  %v2152_v12 = vor.u32 1.1754944e-38, %v2151_v22  ;;  %v2206_v29 = vadd.f32 0.18741608, %v2205_v59  ;;  %2502 = vrcp.f32 %v3503_v41 }
 0x3dd   : > { %v2148_v45 = vsel %vm2147_vm0, %v2499_v54, %v2144_v58  ;;  %vm2150_vm1 = vcmp.eq.f32.partialorder %v2149_v24, 8.507059e+37  ;;  %v2243_v6 = vmul.f32 %v2242_v62, %v3449_v4  ;;  %v2277_v30 = vadd.f32 1.0, %v2445_v13 }
 0x3de   : > { %v2153_v17 = vsel %vm2150_vm1, %v2152_v12, %v2148_v45  ;;  %v2255_v7 = vadd.f32 0.112945676, %v2254_v63  ;;  %v2278_v27 = vadd.f32 1.0, %v2446_v50  ;;  %v2279_v47 = vadd.f32 1.0, %v2447_v49 }
 0x3df   : > { %v2501_v39 = vpop.eup %2500  ;;  %v1944_v61 = vmul.f32 0.5, %v3207_v28  ;;  %v1945_v0 = vmul.f32 0.5, %v3254_v57  ;;  %v2154_v8 = vmul.f32 %v2153_v17, %v2129_v43  ;;  %v2167_v19 = vmul.f32 %v2166_v21, %v3323_v38 }
 0x3e0   : > { %v2181_v2 = vmul.f32 %v2501_v39, %v3497_v60  ;;  %v2207_v53 = vmul.f32 %v2206_v29, %v3374_v15  ;;  %v2256_v36 = vmul.f32 %v2255_v7, %v3449_v4  ;;  %v2280_v42 = vadd.f32 1.0, %v2448_v3 }
 0x3e1   : > { %v2449_v26 = vclamps-f32 %v2154_v8, 1.0  ;;  %v2244_v54 = vadd.f32 0.05243302, %v2243_v6  ;;  %v2285_v13 = vmul.f32 %v2277_v30, %v3331_v44  ;;  %v2286_v28 = vmul.f32 %v2278_v27, %v3334_v48 }
 0x3e2   : > { %v2503_v16 = vpop.eup %2502  ;;  %v2182_v57 = vsub.f32 1.0, %v2181_v2  ;;  %v2257_v9 = vadd.f32 0.4994258, %v2256_v36  ;;  %v2287_v38 = vmul.f32 %v2279_v47, %v3337_v25  ;;  %v2288_v35 = vmul.f32 %v2280_v42, %v1944_v61 }
 0x3e3   : > { %v2168_v34 = vadd.f32 1.1283791, %v2167_v19  ;;  %v2191_v15 = vand.u32 2147483648, %v3497_v60  ;;  %v2221_v46 = vmul.f32 %v2503_v16, %v3503_v41  ;;  %v2281_v33 = vadd.f32 1.0, %v2449_v26  ;;  %2294 = vst [vmem:[%s3181_s27 + $0x8] sm:$0xff] %v2285_v13 }
 0x3e4   : > { %v2183_v23 = vmul.f32 %v2501_v39, %v2182_v57  ;;  %vm2186_vm2 = vweird.f32 %v2501_v39  ;;  %v2189_v44 = vand.u32 2147483647, %v3497_v60  ;;  %v2258_v48 = vmul.f32 %v2257_v9, %v3449_v4  ;;  %2295 = vst [vmem:[%s3181_s27 + $0x10] sm:$0xff] %v2286_v28 }
 0x3e5   : > { %vm2185_vm3 = vweird.f32 %v3497_v60  ;;  %v2208_v25 = vadd.f32 1.1283791, %v2207_v53  ;;  %v2222_v20 = vsub.f32 1.0, %v2221_v46  ;;  %v2289_v5 = vmul.f32 %v2281_v33, %v1945_v0  ;;  %2296 = vst [vmem:[%s3181_s27 + $0x18] sm:$0xff] %v2287_v38 }
 0x3e6   : > { %v2184_v32 = vadd.f32 %v2501_v39, %v2183_v23  ;;  %v2231_v18 = vand.u32 2147483648, %v3503_v41  ;;  %v2245_v14 = vmul.f32 %v2244_v54, %v3449_v4  ;;  %v2259_v31 = vadd.f32 1.0, %v2258_v48  ;;  %2297 = vst [vmem:[%s3181_s27 + $0x20] sm:$0xff] %v2288_v35  ;;  %vm2187_vm4 = vmor %vm2185_vm3, %vm2186_vm2 }
 0x3e7   : > { %v2192_v24 = vor.u32 1.1754944e-38, %v2191_v15  ;;  %v2223_v22 = vmul.f32 %v2503_v16, %v2222_v20  ;;  %vm2226_vm5 = vweird.f32 %v2503_v16  ;;  %v2229_v59 = vand.u32 2147483647, %v3503_v41  ;;  %2298 = vst [vmem:[%s3181_s27 + $0x28] sm:$0xff] %v2289_v5 }
 0x3e8   : > { %v2169_v60 = vmul.f32 %v2168_v34, %v3286_v37  ;;  %v2188_v56 = vsel %vm2187_vm4, %v2501_v39, %v2184_v32  ;;  %vm2190_vm6 = vcmp.eq.f32.partialorder %v2189_v44, 8.507059e+37  ;;  %2504 = vrcp.f32 %v2259_v31 }
 0x3e9   : > { %v2193_v52 = vsel %vm2190_vm6, %v2192_v24, %v2188_v56  ;;  %v2224_v55 = vadd.f32 %v2503_v16, %v2223_v22  ;;  %vm2225_vm7 = vweird.f32 %v3503_v41  ;;  %v2232_v50 = vor.u32 1.1754944e-38, %v2231_v18 }
 0x3ea   : > { %v2194_v62 = vmul.f32 %v2193_v52, %v2169_v60  ;;  %vm2227_vm8 = vmor %vm2225_vm7, %vm2226_vm5  ;;  %v2246_v49 = vadd.f32 0.18741608, %v2245_v14  ;;  %v2209_v21 = vmul.f32 %v2208_v25, %v3314_v11  ;;  %vm2230_vm9 = vcmp.eq.f32.partialorder %v2229_v59, 8.507059e+37 }
 0x3eb   : > { %v2228_v43 = vsel %vm2227_vm8, %v2503_v16, %v2224_v55  ;;  %v1946_v12 = vmul.f32 0.5, %v3273_v1  ;;  %v1947_v17 = vmul.f32 0.5, %v3297_v10  ;;  %v2271_v47 = vand.u32 2147483648, %v2259_v31 }
 0x3ec   : > { %v2450_v58 = vclamps-f32 %v2194_v62, 1.0  ;;  %v2233_v63 = vsel %vm2230_vm9, %v2232_v50, %v2228_v43  ;;  %v2247_v29 = vmul.f32 %v2246_v49, %v3449_v4  ;;  %v2269_v61 = vand.u32 2147483647, %v2259_v31 }
 0x3ed   : > { %v2234_v3 = vmul.f32 %v2233_v63, %v2209_v21  ;;  %vm2265_vm11 = vweird.f32 %v2259_v31  ;;  %v2272_v4 = vor.u32 1.1754944e-38, %v2271_v47  ;;  %v1948_v36 = vmul.f32 0.5, %v3311_v40 }
 0x3ee   : > { %v2505_v37 = vpop.eup %2504  ;;  %v2282_v45 = vadd.f32 1.0, %v2450_v58  ;;  %v2248_v27 = vadd.f32 1.1283791, %v2247_v29  ;;  %vm2270_vm13 = vcmp.eq.f32.partialorder %v2269_v61, 8.507059e+37 }
 0x3ef   : > { %v2451_v41 = vclamps-f32 %v2234_v3, 1.0  ;;  %v2261_v6 = vmul.f32 %v2505_v37, %v2259_v31  ;;  %vm2266_vm10 = vweird.f32 %v2505_v37 }
 0x3f0   : > { %v2290_v30 = vmul.f32 %v2282_v45, %v1946_v12  ;;  %vm2267_vm12 = vmor %vm2265_vm11, %vm2266_vm10  ;;  %v2249_v8 = vmul.f32 %v2248_v27, %v3340_v51 }
 0x3f1   : > { %v2262_v7 = vsub.f32 1.0, %v2261_v6  ;;  %v2283_v11 = vadd.f32 1.0, %v2451_v41 }
 0x3f2   : > { %2299 = vst [vmem:[%s3181_s27 + $0x30] sm:$0xff] %v2290_v30 }
 0x3f3   : > { %v2263_v39 = vmul.f32 %v2505_v37, %v2262_v7  ;;  %v2291_v0 = vmul.f32 %v2283_v11, %v1947_v17 }
 0x3f5   : > { %v2264_v1 = vadd.f32 %v2505_v37, %v2263_v39  ;;  %2300 = vst [vmem:[%s3181_s27 + $0x38] sm:$0xff] %v2291_v0 }
 0x3f7   : > { %v2268_v19 = vsel %vm2267_vm12, %v2505_v37, %v2264_v1 }
 0x3f8   : > { %v2273_v10 = vsel %vm2270_vm13, %v2272_v4, %v2268_v19 }
 0x3f9   : > { %v2274_v2 = vmul.f32 %v2273_v10, %v2249_v8 }
 0x3fb   : > { %v2452_v53 = vclamps-f32 %v2274_v2, 1.0 }
 0x3fd   : > { %v2284_v42 = vadd.f32 1.0, %v2452_v53 }
 0x3ff   : > { %v2292_v26 = vmul.f32 %v2284_v42, %v1948_v36 }
 0x401   : > { %2301 = vst [vmem:[%s3181_s27 + $0x40] sm:$0xff] %v2292_v26 }
 0x402 PF: > { %s15_s18 = sadd.s32 1, %s2512_s18  }
 0x403   : > { %p12_p4 = scmp.ge.s32.totalorder %s15_s18, 4  }
 0x405   :  { %14 = sbr.rel (!%p12_p4) target bundleno = 1 (0x1), region = 78 }

// kernel: up_forward.7
= control target key start
LH: loop header
LB: loop body
LE: loop exit
PB: predicated region body
PF: predicated region fallthrough
CT: control target
= control target key end

     0   :  { %s2180_s18 = smov 0   ;;  %s2816_s0 = inlined_call_operand.vmem [shape: f32[2,8,1280], index: 0, kind: input, shape index: {}]   ;;  %s2817_s1 = inlined_call_operand.vmem [shape: f32[2,1024], index: 1, kind: input, shape index: {}]   ;;  %s2818_s2 = inlined_call_operand.vmem [shape: bf16[9,8,8], index: 2, kind: input, shape index: {}]   ;;  %s2819_s3 = inlined_call_operand.vmem [shape: f32[8,1], index: 3, kind: input, shape index: {}]   ;;  %s2820_s4 = inlined_call_operand.vmem [shape: f32[8,1], index: 4, kind: input, shape index: {}]   ;;  %s2821_s5 = inlined_call_operand.vmem [shape: f32[2,8,1280], index: 5, kind: output, shape index: {}]  }
   0x1 LB: > { %s2006_s19 = sadd.s32 4294967295, %s2136_s18   ;;  %p2010_p0 = scmp.ge.s32.totalorder %s2136_s18, 1  ;;  %s2136_s18 = sphi %s2180_s18, %s15_s18  }
   0x2   : > { %p187_p1 = scmp.lt.s32.totalorder %s2136_s18, 3 }
   0x4   : > { %p188_p2 = pnand %p2010_p0, %p187_p1 }
   0x5   : > { %p215_p3 = scmp.lt.s32.totalorder (!%p188_p2), %s2006_s19, 1  ;;  %s2138_s24 = smov (!%p188_p2), 33  }
   0x6   : > { %191 = sbr.rel (%p188_p2) target bundleno = 930 (0x3a2), region = 40  ;;  %s2139_s25 = smov (!%p188_p2), 32  }
   0x7   : > { %s2140_s26 = smov (!%p188_p2), 31   ;;  %s2141_s27 = smov (!%p188_p2), 1  }
   0x8   : > { %s2142_s28 = smov (!%p188_p2), 127   ;;  %s2143_s29 = smov (!%p188_p2), 97  }
   0x9   : > { %s2144_s7 = smov (!%p188_p2), 96   ;;  %s2145_s10 = smov (!%p188_p2), 95  }
   0xa   : > { %s2147_s14 = smov (!%p188_p2), 0.0  }
   0xb   : > { %s2823_s19 = smov (!%p215_p3, %s2006_s19), 1  ;;  %vm275_vm0 = vcmask 269312   ;;  %vm288_vm1 = vcmask 1043456   ;;  %v247_v33 = vld [vmem:[%s2818_s2] sm:$0xf]  ;;  %vm284_vm2 = vcmask 64512  }
   0xc   : > { %s2095_s20 = smul.u32 80, %s2823_s19  ;;  %vm471_vm3 = vcmask 261120   ;;  %vm639_vm4 = vcmask 252928   ;;  %vm839_vm5 = vcmask 7168   ;;  %vm1158_vm6 = vcmask 1039360  }
   0xd   : > { %vm1334_vm7 = vcmask 793600   ;;  %vm1510_vm8 = vcmask 785408   ;;  %vm1678_vm9 = vcmask 777216  }
   0xe   : > { %s2196_s23 = scalar_lea.vmem %s2816_s0, %s2095_s20 }
   0xf   : > { %v228_v0 = vld [vmem:[%s2196_s23 + $0x10] sm:$0xff]  ;;  %v226_v1 = vld [vmem:[%s2196_s23] sm:$0xff]  ;;  %v229_v6 = vld [vmem:[%s2196_s23 + $0x18] sm:$0xff] }
  0x10   : > { %v2200_v2 = vpack.c.bf16 %v228_v0, %v228_v0  ;;  %v238_v3 = vpack.c.bf16 %v226_v1, %v226_v1  ;;  %v230_v4 = vld [vmem:[%s2196_s23 + $0x20] sm:$0xff]  ;;  %v227_v7 = vld [vmem:[%s2196_s23 + $0x8] sm:$0xff]  ;;  %v232_v8 = vld [vmem:[%s2196_s23 + $0x30] sm:$0xff]  ;;  %v2210_v9 = vpack.c.bf16 %v229_v6, %v229_v6 }
  0x11   : > { %v2204_v5 = vpack.c.bf16 %v230_v4, %v230_v4  ;;  %v2212_v10 = vpack.c.bf16 %v227_v7, %v227_v7  ;;  %v2214_v11 = vpack.c.bf16 %v232_v8, %v232_v8  ;;  %v233_v12 = vld [vmem:[%s2196_s23 + $0x38] sm:$0xff]  ;;  %v231_v13 = vld [vmem:[%s2196_s23 + $0x28] sm:$0xff]  ;;  %v234_v14 = vld [vmem:[%s2196_s23 + $0x40] sm:$0xff] }
  0x12   : > { %261 = vrot.lane.b32.xlu0 %v2200_v2, %s2138_s24  ;;  %257 = vrot.lane.b32.xlu1 %v238_v3, %s2138_s24  ;;  %v2222_v15 = vpack.c.bf16 %v233_v12, %v233_v12  ;;  %v2224_v16 = vpack.c.bf16 %v231_v13, %v231_v13  ;;  %v2226_v17 = vpack.c.bf16 %v234_v14, %v234_v14  ;;  %v2021_v8 = vld [vmem:[%s2818_s2 + $0x4] sm:$0xf]  ;;  %v235_v12 = vld [vmem:[%s2196_s23 + $0x48] sm:$0xff] }
  0x13   : > { %265 = vrot.lane.b32.xlu2 %v2204_v5, %s2138_s24 }
  0x1a   : > { %263 = vrot.lane.b32.xlu0 %v2210_v9, %s2138_s24  ;;  %259 = vrot.lane.b32.xlu1 %v2212_v10, %s2138_s24 }
  0x1b   : > { %269 = vrot.lane.b32.xlu2 %v2214_v11, %s2138_s24 }
  0x22   : > { %271 = vrot.lane.b32.xlu0 %v2222_v15, %s2138_s24  ;;  %267 = vrot.lane.b32.xlu1 %v2224_v16, %s2138_s24 }
  0x23   : > { %273 = vrot.lane.b32.xlu2 %v2226_v17, %s2138_s24 }
  0x2a   : > { %457 = vrot.lane.b32.xlu0 %v2200_v2, %s2139_s25  ;;  %459 = vrot.lane.b32.xlu1 %v2210_v9, %s2139_s25 }
  0x2b   : > { %453 = vrot.lane.b32.xlu2 %v238_v3, %s2139_s25 }
  0x32   : > { %455 = vrot.lane.b32.xlu0 %v2212_v10, %s2139_s25  ;;  %461 = vrot.lane.b32.xlu1 %v2204_v5, %s2139_s25 }
  0x33   : > { %465 = vrot.lane.b32.xlu2 %v2214_v11, %s2139_s25 }
  0x3a   : > { %463 = vrot.lane.b32.xlu1 %v2224_v16, %s2139_s25  ;;  %467 = vrot.lane.b32.xlu0 %v2222_v15, %s2139_s25 }
  0x3b   : > { %469 = vrot.lane.b32.xlu2 %v2226_v17, %s2139_s25 }
  0x42   : > { %625 = vrot.lane.b32.xlu0 %v2200_v2, %s2140_s26  ;;  %627 = vrot.lane.b32.xlu1 %v2210_v9, %s2140_s26 }
  0x43   : > { %621 = vrot.lane.b32.xlu2 %v238_v3, %s2140_s26 }
  0x4a   : > { %623 = vrot.lane.b32.xlu0 %v2212_v10, %s2140_s26  ;;  %629 = vrot.lane.b32.xlu1 %v2204_v5, %s2140_s26 }
  0x4b   : > { %633 = vrot.lane.b32.xlu2 %v2214_v11, %s2140_s26 }
  0x52   : > { %631 = vrot.lane.b32.xlu1 %v2224_v16, %s2140_s26  ;;  %635 = vrot.lane.b32.xlu0 %v2222_v15, %s2140_s26 }
  0x53   : > { %637 = vrot.lane.b32.xlu2 %v2226_v17, %s2140_s26 }
  0x5a   : > { %825 = vrot.lane.b32.xlu0 %v2200_v2, %s2141_s27  ;;  %827 = vrot.lane.b32.xlu1 %v2210_v9, %s2141_s27 }
  0x5b   : > { %821 = vrot.lane.b32.xlu2 %v238_v3, %s2141_s27 }
  0x62   : > { %823 = vrot.lane.b32.xlu0 %v2212_v10, %s2141_s27  ;;  %829 = vrot.lane.b32.xlu1 %v2204_v5, %s2141_s27 }
  0x63   : > { %833 = vrot.lane.b32.xlu2 %v2214_v11, %s2141_s27 }
  0x6a   : > { %831 = vrot.lane.b32.xlu1 %v2224_v16, %s2141_s27  ;;  %835 = vrot.lane.b32.xlu0 %v2222_v15, %s2141_s27 }
  0x6b   : > { %837 = vrot.lane.b32.xlu2 %v2226_v17, %s2141_s27  ;;  %s224_s27 = scalar_lea.vmem %s2821_s5, %s2095_s20 }
  0x6d   : > { %v266_v18 = vpop.permute.xlu2 %265 }
  0x72   : > { %1144 = vrot.lane.b32.xlu0 %v2210_v9, %s2142_s28  ;;  %1146 = vrot.lane.b32.xlu1 %v2204_v5, %s2142_s28 }
  0x73   : > { %1140 = vrot.lane.b32.xlu2 %v2212_v10, %s2142_s28 }
  0x75   : > { %v270_v19 = vpop.permute.xlu2 %269 }
  0x7a   : > { %1142 = vrot.lane.b32.xlu0 %v2200_v2, %s2142_s28  ;;  %1148 = vrot.lane.b32.xlu1 %v2224_v16, %s2142_s28 }
  0x7b   : > { %1152 = vrot.lane.b32.xlu2 %v2222_v15, %s2142_s28 }
  0x7d   : > { %v274_v22 = vpop.permute.xlu2 %273 }
  0x82   : > { %1150 = vrot.lane.b32.xlu1 %v2214_v11, %s2142_s28  ;;  %1154 = vrot.lane.b32.xlu0 %v2226_v17, %s2142_s28 }
  0x84   : > { %v262_v20 = vpop.permute.xlu0 %261  ;;  %v258_v21 = vpop.permute.xlu1 %257 }
  0x85   : > { %v454_v34 = vpop.permute.xlu2 %453 }
  0x8a   : > { %1320 = vrot.lane.b32.xlu0 %v2210_v9, %s2143_s29  ;;  %1322 = vrot.lane.b32.xlu1 %v2204_v5, %s2143_s29 }
  0x8c   : > { %v264_v23 = vpop.permute.xlu0 %263  ;;  %v260_v24 = vpop.permute.xlu1 %259 }
  0x8d   : > { %v276_v25 = vsel %vm275_vm0, %v258_v21, %v260_v24  ;;  %v277_v26 = vsel %vm275_vm0, %v260_v24, %v262_v20  ;;  %v278_v27 = vsel %vm275_vm0, %v262_v20, %v264_v23  ;;  %v279_v28 = vsel %vm275_vm0, %v264_v23, %v266_v18  ;;  %v466_v45 = vpop.permute.xlu2 %465 }
  0x8e   : > { %v290_v29 = vsel %vm288_vm1, %v276_v25, 0  ;;  %v293_v30 = vsel %vm288_vm1, %v277_v26, 0  ;;  %v296_v31 = vsel %vm288_vm1, %v278_v27, 0  ;;  %v299_v32 = vsel %vm288_vm1, %v279_v28, 0 }
  0x8f   : > { %320 = vmatpush.bf16.msra.mxu0 %v290_v29  ;;  %333 = vmatpush.bf16.msra.mxu1 %v293_v30 }
  0x90   : > { %346 = vmatpush.bf16.msra.mxu2 %v296_v31  ;;  %359 = vmatpush.bf16.msra.mxu3 %v299_v32 }
  0x92   : > { %2013 = vmatmul.msk.bf16.vlgmr.msra.gmra.mxu0 %vm284_vm2, %v247_v33  ;;  %2014 = vmatmul.msk.bf16.vlgmr.msra.gmra.mxu1 %vm284_vm2, %v247_v33 }
  0x93   : > { %2015 = vmatmul.msk.bf16.vlgmr.msra.gmra.mxu2 %vm284_vm2, %v247_v33  ;;  %2016 = vmatmul.msk.bf16.vlgmr.msra.gmra.mxu3 %vm284_vm2, %v247_v33 }
  0x94   : > { %v272_v35 = vpop.permute.xlu0 %271  ;;  %v268_v36 = vpop.permute.xlu1 %267  ;;  %1318 = vrot.lane.b32.xlu0 %v2200_v2, %s2143_s29  ;;  %1324 = vrot.lane.b32.xlu1 %v2224_v16, %s2143_s29 }
  0x95   : > { %v280_v37 = vsel %vm275_vm0, %v266_v18, %v268_v36  ;;  %v281_v38 = vsel %vm275_vm0, %v268_v36, %v270_v19  ;;  %v282_v39 = vsel %vm275_vm0, %v270_v19, %v272_v35  ;;  %v283_v40 = vsel %vm275_vm0, %v272_v35, %v274_v22  ;;  %v470_v50 = vpop.permute.xlu2 %469 }
  0x96   : > { %v302_v41 = vsel %vm288_vm1, %v280_v37, 0  ;;  %v305_v42 = vsel %vm288_vm1, %v281_v38, 0  ;;  %v308_v43 = vsel %vm288_vm1, %v282_v39, 0  ;;  %v311_v44 = vsel %vm288_vm1, %v283_v40, 0 }
  0x97   : > { %372 = vmatpush.bf16.msrb.mxu0 %v302_v41  ;;  %385 = vmatpush.bf16.msrb.mxu1 %v305_v42  ;;  %v2342_v18 = vpack.c.bf16 %v235_v12, %v235_v12  ;;  %v1004_v12 = vsel %vm288_vm1, %v2200_v2, 0 }
  0x98   : > { %398 = vmatpush.bf16.msrb.mxu2 %v308_v43  ;;  %411 = vmatpush.bf16.msrb.mxu3 %v311_v44 }
  0x99   : > { %1156 = vrot.lane.b32.xlu2 %v2342_v18, %s2142_s28 }
  0x9c   : > { %v458_v46 = vpop.permute.xlu0 %457  ;;  %v460_v47 = vpop.permute.xlu1 %459  ;;  %1326 = vrot.lane.b32.xlu1 %v2214_v11, %s2143_s29  ;;  %1330 = vrot.lane.b32.xlu0 %v2226_v17, %s2143_s29 }
  0x9d   : > { %v474_v48 = vsel %vm471_vm3, %v458_v46, %v460_v47  ;;  %v622_v59 = vpop.permute.xlu2 %621 }
  0x9e   : > { %v490_v49 = vsel %vm288_vm1, %v474_v48, 0 }
  0x9f   : > { %540 = vmatpush.bf16.msra.mxu2 %v490_v49 }
  0xa1   : > { %1316 = vrot.lane.b32.xlu2 %v2212_v10, %s2143_s29 }
  0xa2   : > { %2017 = vmatmul.msk.bf16.vlgmr.msrb.gmra.mxu0 %vm284_vm2, %v247_v33  ;;  %2018 = vmatmul.msk.bf16.vlgmr.msrb.gmra.mxu1 %vm284_vm2, %v247_v33 }
  0xa3   : > { %2019 = vmatmul.msk.bf16.vlgmr.msrb.gmra.mxu2 %vm284_vm2, %v247_v33  ;;  %2020 = vmatmul.msk.bf16.vlgmr.msrb.gmra.mxu3 %vm284_vm2, %v247_v33 }
  0xa4   : > { %v456_v51 = vpop.permute.xlu0 %455  ;;  %v462_v52 = vpop.permute.xlu1 %461  ;;  %1496 = vrot.lane.b32.xlu0 %v2210_v9, %s2144_s7  ;;  %1498 = vrot.lane.b32.xlu1 %v2204_v5, %s2144_s7 }
  0xa5   : > { %v473_v53 = vsel %vm471_vm3, %v456_v51, %v458_v46  ;;  %v472_v54 = vsel %vm471_vm3, %v454_v34, %v456_v51  ;;  %v475_v55 = vsel %vm471_vm3, %v460_v47, %v462_v52  ;;  %v634_v20 = vpop.permute.xlu2 %633 }
  0xa6   : > { %v487_v56 = vsel %vm288_vm1, %v473_v53, 0  ;;  %v484_v57 = vsel %vm288_vm1, %v472_v54, 0  ;;  %v493_v58 = vsel %vm288_vm1, %v475_v55, 0 }
  0xa7   : > { %527 = vmatpush.bf16.msra.mxu1 %v487_v56  ;;  %553 = vmatpush.bf16.msra.mxu3 %v493_v58 }
  0xa8   : > { %514 = vmatpush.bf16.msra.mxu0 %v484_v57 }
  0xa9   : > { %1328 = vrot.lane.b32.xlu2 %v2222_v15, %s2143_s29 }
  0xac   : > { %v464_v60 = vpop.permute.xlu1 %463  ;;  %v468_v61 = vpop.permute.xlu0 %467  ;;  %1494 = vrot.lane.b32.xlu0 %v2200_v2, %s2144_s7  ;;  %1500 = vrot.lane.b32.xlu1 %v2224_v16, %s2144_s7 }
  0xad   : > { %v476_v62 = vsel %vm471_vm3, %v462_v52, %v464_v60  ;;  %v477_v63 = vsel %vm471_vm3, %v464_v60, %v466_v45  ;;  %v478_v0 = vsel %vm471_vm3, %v466_v45, %v468_v61  ;;  %v479_v1 = vsel %vm471_vm3, %v468_v61, %v470_v50  ;;  %v638_v30 = vpop.permute.xlu2 %637  ;;  %v2030_v45 = vld [vmem:[%s2818_s2 + $0x8] sm:$0xf] }
  0xae   : > { %v496_v3 = vsel %vm288_vm1, %v476_v62, 0  ;;  %v499_v4 = vsel %vm288_vm1, %v477_v63, 0  ;;  %v502_v6 = vsel %vm288_vm1, %v478_v0, 0  ;;  %v505_v7 = vsel %vm288_vm1, %v479_v1, 0 }
  0xaf   : > { %566 = vmatpush.bf16.msrb.mxu0 %v496_v3  ;;  %579 = vmatpush.bf16.msrb.mxu1 %v499_v4  ;;  %v2039_v4 = vld [vmem:[%s2818_s2 + $0xc] sm:$0xf] }
  0xb0   : > { %592 = vmatpush.bf16.msrb.mxu2 %v502_v6  ;;  %605 = vmatpush.bf16.msrb.mxu3 %v505_v7  ;;  %v1007_v6 = vsel %vm288_vm1, %v2210_v9, 0  ;;  %v1001_v7 = vsel %vm288_vm1, %v2212_v10, 0 }
  0xb1   : > { %1332 = vrot.lane.b32.xlu2 %v2342_v18, %s2143_s29 }
  0xb2   : > { %2022 = vmatmul.msk.bf16.vlgmr.msra.gmra.mxu0 %vm284_vm2, %v2021_v8  ;;  %2023 = vmatmul.msk.bf16.vlgmr.msra.gmra.mxu1 %vm284_vm2, %v2021_v8 }
  0xb3   : > { %2024 = vmatmul.msk.bf16.vlgmr.msra.gmra.mxu2 %vm284_vm2, %v2021_v8  ;;  %2025 = vmatmul.msk.bf16.vlgmr.msra.gmra.mxu3 %vm284_vm2, %v2021_v8 }
  0xb4   : > { %v626_v13 = vpop.permute.xlu0 %625  ;;  %v628_v14 = vpop.permute.xlu1 %627  ;;  %1502 = vrot.lane.b32.xlu1 %v2214_v11, %s2144_s7  ;;  %1506 = vrot.lane.b32.xlu0 %v2226_v17, %s2144_s7 }
  0xb5   : > { %v642_v19 = vsel %vm639_vm4, %v626_v13, %v628_v14  ;;  %v822_v41 = vpop.permute.xlu2 %821 }
  0xb6   : > { %v658_v21 = vsel %vm288_vm1, %v642_v19, 0 }
  0xb7   : > { %708 = vmatpush.bf16.msra.mxu2 %v658_v21 }
  0xb9   : > { %1492 = vrot.lane.b32.xlu2 %v2212_v10, %s2144_s7 }
  0xbc   : > { %v624_v22 = vpop.permute.xlu0 %623  ;;  %v630_v23 = vpop.permute.xlu1 %629  ;;  %1664 = vrot.lane.b32.xlu0 %v2210_v9, %s2145_s10  ;;  %1666 = vrot.lane.b32.xlu1 %v2204_v5, %s2145_s10 }
  0xbd   : > { %v641_v24 = vsel %vm639_vm4, %v624_v22, %v626_v13  ;;  %v643_v25 = vsel %vm639_vm4, %v628_v14, %v630_v23  ;;  %v640_v26 = vsel %vm639_vm4, %v622_v59, %v624_v22  ;;  %v834_v47 = vpop.permute.xlu2 %833  ;;  %v1022_v13 = vsel %vm288_vm1, %v2226_v17, 0 }
  0xbe   : > { %v655_v27 = vsel %vm288_vm1, %v641_v24, 0  ;;  %v661_v28 = vsel %vm288_vm1, %v643_v25, 0  ;;  %v652_v29 = vsel %vm288_vm1, %v640_v26, 0  ;;  %v1016_v14 = vsel %vm288_vm1, %v2214_v11, 0 }
  0xbf   : > { %695 = vmatpush.bf16.msra.mxu1 %v655_v27  ;;  %721 = vmatpush.bf16.msra.mxu3 %v661_v28 }
  0xc0   : > { %682 = vmatpush.bf16.msra.mxu0 %v652_v29 }
  0xc1   : > { %1504 = vrot.lane.b32.xlu2 %v2222_v15, %s2144_s7 }
  0xc2   : > { %2026 = vmatmul.msk.bf16.vlgmr.msrb.gmra.mxu0 %vm284_vm2, %v2021_v8  ;;  %2027 = vmatmul.msk.bf16.vlgmr.msrb.gmra.mxu1 %vm284_vm2, %v2021_v8 }
  0xc3   : > { %2028 = vmatmul.msk.bf16.vlgmr.msrb.gmra.mxu2 %vm284_vm2, %v2021_v8  ;;  %2029 = vmatmul.msk.bf16.vlgmr.msrb.gmra.mxu3 %vm284_vm2, %v2021_v8  ;;  %v1010_v8 = vsel %vm288_vm1, %v2204_v5, 0  ;;  %v1019_v5 = vsel %vm288_vm1, %v2222_v15, 0 }
  0xc4   : > { %v632_v31 = vpop.permute.xlu1 %631  ;;  %v636_v32 = vpop.permute.xlu0 %635  ;;  %1662 = vrot.lane.b32.xlu0 %v2200_v2, %s2145_s10  ;;  %1668 = vrot.lane.b32.xlu1 %v2224_v16, %s2145_s10  ;;  %v1013_v2 = vsel %vm288_vm1, %v2224_v16, 0 }
  0xc5   : > { %v644_v33 = vsel %vm639_vm4, %v630_v23, %v632_v31  ;;  %v645_v34 = vsel %vm639_vm4, %v632_v31, %v634_v20  ;;  %v646_v35 = vsel %vm639_vm4, %v634_v20, %v636_v32  ;;  %v647_v36 = vsel %vm639_vm4, %v636_v32, %v638_v30  ;;  %v838_v56 = vpop.permute.xlu2 %837 }
  0xc6   : > { %v664_v37 = vsel %vm288_vm1, %v644_v33, 0  ;;  %v667_v38 = vsel %vm288_vm1, %v645_v34, 0  ;;  %v670_v39 = vsel %vm288_vm1, %v646_v35, 0  ;;  %v673_v40 = vsel %vm288_vm1, %v647_v36, 0 }
  0xc7   : > { %734 = vmatpush.bf16.msrb.mxu0 %v664_v37  ;;  %747 = vmatpush.bf16.msrb.mxu1 %v667_v38 }
  0xc8   : > { %760 = vmatpush.bf16.msrb.mxu2 %v670_v39  ;;  %773 = vmatpush.bf16.msrb.mxu3 %v673_v40 }
  0xc9   : > { %1508 = vrot.lane.b32.xlu2 %v2342_v18, %s2144_s7 }
  0xcc   : > { %v826_v42 = vpop.permute.xlu0 %825  ;;  %v828_v43 = vpop.permute.xlu1 %827  ;;  %1670 = vrot.lane.b32.xlu1 %v2214_v11, %s2145_s10  ;;  %1674 = vrot.lane.b32.xlu0 %v2226_v17, %s2145_s10  ;;  %v2048_v11 = vld [vmem:[%s2818_s2 + $0x10] sm:$0xf] }
  0xcd   : > { %v842_v44 = vsel %vm839_vm5, %v826_v42, %v828_v43 }
  0xce   : > { %v858_v46 = vsel %vm288_vm1, %v842_v44, 0 }
  0xd1   : > { %1660 = vrot.lane.b32.xlu2 %v2212_v10, %s2145_s10 }
  0xd2   : > { %2031 = vmatmul.msk.bf16.vlgmr.msra.gmra.mxu0 %vm284_vm2, %v2030_v45  ;;  %2032 = vmatmul.msk.bf16.vlgmr.msra.gmra.mxu1 %vm284_vm2, %v2030_v45 }
  0xd3   : > { %2033 = vmatmul.msk.bf16.vlgmr.msra.gmra.mxu2 %vm284_vm2, %v2030_v45  ;;  %2034 = vmatmul.msk.bf16.vlgmr.msra.gmra.mxu3 %vm284_vm2, %v2030_v45 }
  0xd4   : > { %v824_v48 = vpop.permute.xlu0 %823  ;;  %v830_v49 = vpop.permute.xlu1 %829  ;;  %908 = vmatpush.bf16.msra.mxu2 %v858_v46 }
  0xd5   : > { %v841_v50 = vsel %vm839_vm5, %v824_v48, %v826_v42  ;;  %v843_v51 = vsel %vm839_vm5, %v828_v43, %v830_v49  ;;  %v840_v52 = vsel %vm839_vm5, %v822_v41, %v824_v48 }
  0xd6   : > { %v855_v53 = vsel %vm288_vm1, %v841_v50, 0  ;;  %v861_v54 = vsel %vm288_vm1, %v843_v51, 0  ;;  %v852_v55 = vsel %vm288_vm1, %v840_v52, 0  ;;  %v2490_v50 = vld [vmem:[%s2817_s1] sm:$0xff] }
  0xd7   : > { %895 = vmatpush.bf16.msra.mxu1 %v855_v53  ;;  %921 = vmatpush.bf16.msra.mxu3 %v861_v54  ;;  %v419_v51 = vperm.slane %v2490_v50, 0  ;;  %v420_v52 = vperm.slane %v2490_v50, 2 }
  0xd8   : > { %882 = vmatpush.bf16.msra.mxu0 %v852_v55 }
  0xd9   : > { %1672 = vrot.lane.b32.xlu2 %v2222_v15, %s2145_s10  ;;  %v1141_v15 = vpop.permute.xlu2 %1140 }
  0xdc   : > { %v832_v57 = vpop.permute.xlu1 %831  ;;  %v836_v58 = vpop.permute.xlu0 %835 }
  0xdd   : > { %v844_v59 = vsel %vm839_vm5, %v830_v49, %v832_v57  ;;  %v845_v60 = vsel %vm839_vm5, %v832_v57, %v834_v47  ;;  %v846_v61 = vsel %vm839_vm5, %v834_v47, %v836_v58  ;;  %v847_v62 = vsel %vm839_vm5, %v836_v58, %v838_v56 }
  0xde   : > { %v864_v63 = vsel %vm288_vm1, %v844_v59, 0  ;;  %v867_v0 = vsel %vm288_vm1, %v845_v60, 0  ;;  %v870_v1 = vsel %vm288_vm1, %v846_v61, 0  ;;  %v873_v3 = vsel %vm288_vm1, %v847_v62, 0 }
  0xdf   : > { %v2500_v58 = vperm.slane %v419_v51, 0  ;;  %v2502_v59 = vperm.slane %v420_v52, 0  ;;  %v421_v62 = vperm.slane %v2490_v50, 4 }
  0xe1   : > { %1676 = vrot.lane.b32.xlu2 %v2342_v18, %s2145_s10  ;;  %v1153_v28 = vpop.permute.xlu2 %1152 }
  0xe2   : > { %2035 = vmatmul.msk.bf16.vlgmr.msrb.gmra.mxu0 %vm284_vm2, %v2030_v45  ;;  %2036 = vmatmul.msk.bf16.vlgmr.msrb.gmra.mxu1 %vm284_vm2, %v2030_v45 }
  0xe3   : > { %2037 = vmatmul.msk.bf16.vlgmr.msrb.gmra.mxu2 %vm284_vm2, %v2030_v45  ;;  %2038 = vmatmul.msk.bf16.vlgmr.msrb.gmra.mxu3 %vm284_vm2, %v2030_v45 }
  0xe4   : > { %934 = vmatpush.bf16.msrb.mxu0 %v864_v63  ;;  %947 = vmatpush.bf16.msrb.mxu1 %v867_v0  ;;  %v1145_v9 = vpop.permute.xlu0 %1144  ;;  %v1147_v10 = vpop.permute.xlu1 %1146  ;;  %v422_v63 = vperm.slane %v2490_v50, 6 }
  0xe5   : > { %960 = vmatpush.bf16.msrb.mxu2 %v870_v1  ;;  %973 = vmatpush.bf16.msrb.mxu3 %v873_v3  ;;  %v1161_v19 = vsel %vm1158_vm6, %v1145_v9, %v1147_v10 }
  0xe6   : > { %v1177_v24 = vsel %vm288_vm1, %v1161_v19, 0 }
  0xec   : > { %v1143_v16 = vpop.permute.xlu0 %1142  ;;  %v1149_v18 = vpop.permute.xlu1 %1148 }
  0xed   : > { %v1160_v20 = vsel %vm1158_vm6, %v1143_v16, %v1145_v9  ;;  %v1162_v22 = vsel %vm1158_vm6, %v1147_v10, %v1149_v18  ;;  %v1159_v23 = vsel %vm1158_vm6, %v1141_v15, %v1143_v16  ;;  %v2057_v9 = vld [vmem:[%s2818_s2 + $0x14] sm:$0xf]  ;;  %v2521_v15 = vperm.slane %v422_v63, 0 }
  0xee   : > { %v1174_v25 = vsel %vm288_vm1, %v1160_v20, 0  ;;  %v1180_v26 = vsel %vm288_vm1, %v1162_v22, 0  ;;  %v1171_v27 = vsel %vm288_vm1, %v1159_v23, 0 }
  0xf2   : > { %2040 = vmatmul.msk.bf16.vlgmr.msra.gmra.mxu0 %vm284_vm2, %v2039_v4  ;;  %2041 = vmatmul.msk.bf16.vlgmr.msra.gmra.mxu1 %vm284_vm2, %v2039_v4 }
  0xf3   : > { %2042 = vmatmul.msk.bf16.vlgmr.msra.gmra.mxu2 %vm284_vm2, %v2039_v4  ;;  %2043 = vmatmul.msk.bf16.vlgmr.msra.gmra.mxu3 %vm284_vm2, %v2039_v4  ;;  %v1157_v35 = vpop.permute.xlu2 %1156 }
  0xf4   : > { %1057 = vmatpush.bf16.msra.mxu2 %v1007_v6  ;;  %1031 = vmatpush.bf16.msra.mxu0 %v1001_v7  ;;  %v1155_v29 = vpop.permute.xlu0 %1154  ;;  %v1151_v34 = vpop.permute.xlu1 %1150 }
  0xf5   : > { %1070 = vmatpush.bf16.msra.mxu3 %v1010_v8  ;;  %1044 = vmatpush.bf16.msra.mxu1 %v1004_v12  ;;  %v1163_v38 = vsel %vm1158_vm6, %v1149_v18, %v1151_v34  ;;  %v1164_v39 = vsel %vm1158_vm6, %v1151_v34, %v1153_v28  ;;  %v1165_v42 = vsel %vm1158_vm6, %v1153_v28, %v1155_v29 }
  0xf6   : > { %v1166_v43 = vsel %vm1158_vm6, %v1155_v29, %v1157_v35  ;;  %v1183_v44 = vsel %vm288_vm1, %v1163_v38, 0  ;;  %v1186_v45 = vsel %vm288_vm1, %v1164_v39, 0  ;;  %v1189_v47 = vsel %vm288_vm1, %v1165_v42, 0 }
  0xf7   : > { %v1192_v48 = vsel %vm288_vm1, %v1166_v43, 0 }
  0xfb   : > { %v1317_v57 = vpop.permute.xlu2 %1316 }
  0xfc   : > { %v1321_v46 = vpop.permute.xlu0 %1320  ;;  %v1323_v49 = vpop.permute.xlu1 %1322 }
  0xfd   : > { %v1337_v6 = vsel %vm1334_vm7, %v1321_v46, %v1323_v49 }
  0xfe   : > { %v1353_v16 = vsel %vm288_vm1, %v1337_v6, 0 }
 0x102   : > { %2044 = vmatmul.msk.bf16.vlgmr.msrb.gmra.mxu0 %vm284_vm2, %v2039_v4  ;;  %2045 = vmatmul.msk.bf16.vlgmr.msrb.gmra.mxu1 %vm284_vm2, %v2039_v4 }
 0x103   : > { %2046 = vmatmul.msk.bf16.vlgmr.msrb.gmra.mxu2 %vm284_vm2, %v2039_v4  ;;  %2047 = vmatmul.msk.bf16.vlgmr.msrb.gmra.mxu3 %vm284_vm2, %v2039_v4 }
 0x104   : > { %1109 = vmatpush.bf16.msrb.mxu2 %v1019_v5  ;;  %1083 = vmatpush.bf16.msrb.mxu0 %v1013_v2 }
 0x105   : > { %1122 = vmatpush.bf16.msrb.mxu3 %v1022_v13  ;;  %1096 = vmatpush.bf16.msrb.mxu1 %v1016_v14  ;;  %v2519_v14 = vperm.slane %v421_v62, 0 }
 0x106   : > { %v1319_v60 = vpop.permute.xlu0 %1318  ;;  %v1325_v61 = vpop.permute.xlu1 %1324 }
 0x107   : > { %v1336_v7 = vsel %vm1334_vm7, %v1319_v60, %v1321_v46  ;;  %v1338_v5 = vsel %vm1334_vm7, %v1323_v49, %v1325_v61  ;;  %v1335_v2 = vsel %vm1334_vm7, %v1317_v57, %v1319_v60 }
 0x108   : > { %v1350_v18 = vsel %vm288_vm1, %v1336_v7, 0  ;;  %v1356_v19 = vsel %vm288_vm1, %v1338_v5, 0  ;;  %v1347_v20 = vsel %vm288_vm1, %v1335_v2, 0 }
 0x10e   : > { %v1331_v23 = vpop.permute.xlu0 %1330 }
 0x10f   : > { %v322_v17 = vpop.f32.mrf.mxu0  ;;  %v335_v21 = vpop.f32.mrf.mxu1 }
 0x110   : > { %v443_v0 = vmul.f32 %v2500_v58, %v322_v17  ;;  %v444_v1 = vmul.f32 %v2502_v59, %v335_v21  ;;  %v1329_v17 = vpop.permute.xlu2 %1328  ;;  %v2532_v21 = vld [vmem:[%s2817_s1 + $0x8] sm:$0xff] }
 0x112   : > { %2049 = vmatmul.msk.bf16.vlgmr.msra.gmra.mxu0 %vm284_vm2, %v2048_v11  ;;  %2050 = vmatmul.msk.bf16.vlgmr.msra.gmra.mxu1 %vm284_vm2, %v2048_v11 }
 0x113   : > { %2051 = vmatmul.msk.bf16.vlgmr.msra.gmra.mxu2 %vm284_vm2, %v2048_v11  ;;  %2052 = vmatmul.msk.bf16.vlgmr.msra.gmra.mxu3 %vm284_vm2, %v2048_v11 }
 0x114   : > { %1214 = vmatpush.bf16.msra.mxu1 %v1174_v25  ;;  %1227 = vmatpush.bf16.msra.mxu2 %v1177_v24  ;;  %v423_v24 = vperm.slane %v2532_v21, 0  ;;  %v424_v25 = vperm.slane %v2532_v21, 2 }
 0x115   : > { %1240 = vmatpush.bf16.msra.mxu3 %v1180_v26  ;;  %1201 = vmatpush.bf16.msra.mxu0 %v1171_v27 }
 0x116   : > { %v2469_v30 = vpop.f32.mrf.mxu2  ;;  %v2471_v31 = vpop.f32.mrf.mxu3  ;;  %v2546_v34 = vperm.slane %v423_v24, 0  ;;  %v781_v24 = vperm.slane %v2490_v50, 5 }
 0x117   : > { %v324_v32 = vpop.f32.mrf.mxu0  ;;  %v337_v33 = vpop.f32.mrf.mxu1  ;;  %v446_v22 = vmul.f32 %v2521_v15, %v2471_v31 }
 0x118   : > { %v1327_v31 = vpop.permute.xlu1 %1326  ;;  %v1333_v35 = vpop.permute.xlu2 %1332 }
 0x119   : > { %v1342_v49 = vsel %vm1334_vm7, %v1331_v23, %v1333_v35  ;;  %v1497_v57 = vpop.permute.xlu0 %1496 }
 0x11e   : > { %v350_v36 = vpop.f32.mrf.mxu2  ;;  %v363_v37 = vpop.f32.mrf.mxu3 }
 0x11f   : > { %v2475_v40 = vpop.f32.mrf.mxu0  ;;  %v2477_v41 = vpop.f32.mrf.mxu1  ;;  %v425_v36 = vperm.slane %v2532_v21, 4  ;;  %v426_v37 = vperm.slane %v2532_v21, 6 }
 0x120   : > { %v447_v38 = vmul.f32 %v2546_v34, %v2475_v40  ;;  %v1499_v62 = vpop.permute.xlu1 %1498  ;;  %v1493_v5 = vpop.permute.xlu2 %1492 }
 0x121   : > { %v2564_v40 = vperm.slane %v425_v36, 0 }
 0x122   : > { %2053 = vmatmul.msk.bf16.vlgmr.msrb.gmra.mxu0 %vm284_vm2, %v2048_v11  ;;  %2054 = vmatmul.msk.bf16.vlgmr.msrb.gmra.mxu1 %vm284_vm2, %v2048_v11 }
 0x123   : > { %2055 = vmatmul.msk.bf16.vlgmr.msrb.gmra.mxu2 %vm284_vm2, %v2048_v11  ;;  %2056 = vmatmul.msk.bf16.vlgmr.msrb.gmra.mxu3 %vm284_vm2, %v2048_v11  ;;  %v445_v11 = vmul.f32 %v2519_v14, %v2469_v30  ;;  %v2548_v30 = vperm.slane %v424_v25, 0  ;;  %v782_v25 = vperm.slane %v2490_v50, 7 }
 0x124   : > { %1253 = vmatpush.bf16.msrb.mxu0 %v1183_v44  ;;  %1266 = vmatpush.bf16.msrb.mxu1 %v1186_v45  ;;  %v1339_v44 = vsel %vm1334_vm7, %v1325_v61, %v1327_v31  ;;  %v1340_v45 = vsel %vm1334_vm7, %v1327_v31, %v1329_v17  ;;  %v1368_v61 = vsel %vm288_vm1, %v1342_v49, 0  ;;  %v783_v49 = vperm.slane %v2532_v21, 1 }
 0x125   : > { %1279 = vmatpush.bf16.msrb.mxu2 %v1189_v47  ;;  %1292 = vmatpush.bf16.msrb.mxu3 %v1192_v48  ;;  %v448_v39 = vmul.f32 %v2548_v30, %v2477_v41  ;;  %v1341_v48 = vsel %vm1334_vm7, %v1329_v17, %v1331_v23  ;;  %v1359_v41 = vsel %vm288_vm1, %v1339_v44, 0  ;;  %v2066_v23 = vld [vmem:[%s2818_s2 + $0x18] sm:$0xf] }
 0x126   : > { %v2496_v53 = vpop.f32.mrf.mxu2  ;;  %v2498_v54 = vpop.f32.mrf.mxu3  ;;  %v1365_v60 = vsel %vm288_vm1, %v1341_v48, 0 }
 0x127   : > { %v376_v55 = vpop.f32.mrf.mxu0  ;;  %v389_v56 = vpop.f32.mrf.mxu1  ;;  %v449_v63 = vmul.f32 %v2564_v40, %v2496_v53 }
 0x128   : > { %v2566_v55 = vperm.slane %v426_v37, 0  ;;  %v1362_v56 = vsel %vm288_vm1, %v1340_v45, 0  ;;  %v1495_v53 = vpop.permute.xlu0 %1494 }
 0x129   : > { %v1512_v17 = vsel %vm1510_vm8, %v1495_v53, %v1497_v57 }
 0x12a   : > { %v1526_v35 = vsel %vm288_vm1, %v1512_v17, 0 }
 0x12e   : > { %v402_v3 = vpop.f32.mrf.mxu2  ;;  %v415_v4 = vpop.f32.mrf.mxu3 }
 0x12f   : > { %v516_v8 = vpop.f32.mrf.mxu0  ;;  %v529_v12 = vpop.f32.mrf.mxu1 }
 0x130   : > { %v2515_v10 = vadd.f32 %v516_v8, %v443_v0  ;;  %v2517_v13 = vadd.f32 %v529_v12, %v444_v1  ;;  %v450_v0 = vmul.f32 %v2566_v55, %v2498_v54  ;;  %v779_v12 = vperm.slane %v2490_v50, 1 }
 0x132   : > { %2058 = vmatmul.msk.bf16.vlgmr.msra.gmra.mxu0 %vm284_vm2, %v2057_v9  ;;  %2059 = vmatmul.msk.bf16.vlgmr.msra.gmra.mxu1 %vm284_vm2, %v2057_v9  ;;  %v2586_v2 = vperm.slane %v779_v12, 1 }
 0x133   : > { %2060 = vmatmul.msk.bf16.vlgmr.msra.gmra.mxu2 %vm284_vm2, %v2057_v9  ;;  %2061 = vmatmul.msk.bf16.vlgmr.msra.gmra.mxu3 %vm284_vm2, %v2057_v9 }
 0x134   : > { %1390 = vmatpush.bf16.msra.mxu1 %v1350_v18  ;;  %1403 = vmatpush.bf16.msra.mxu2 %v1353_v16  ;;  %v1501_v16 = vpop.permute.xlu1 %1500 }
 0x135   : > { %1416 = vmatpush.bf16.msra.mxu3 %v1356_v19  ;;  %1377 = vmatpush.bf16.msra.mxu0 %v1347_v20  ;;  %v1513_v20 = vsel %vm1510_vm8, %v1497_v57, %v1499_v62 }
 0x136   : > { %v542_v26 = vpop.f32.mrf.mxu2  ;;  %v555_v27 = vpop.f32.mrf.mxu3  ;;  %v1529_v31 = vsel %vm288_vm1, %v1513_v20, 0 }
 0x137   : > { %v2542_v28 = vadd.f32 %v542_v26, %v445_v11  ;;  %v2544_v29 = vadd.f32 %v555_v27, %v446_v22  ;;  %v518_v32 = vpop.f32.mrf.mxu0  ;;  %v531_v33 = vpop.f32.mrf.mxu1  ;;  %v1514_v26 = vsel %vm1510_vm8, %v1499_v62, %v1501_v16  ;;  %v1511_v27 = vsel %vm1510_vm8, %v1493_v5, %v1495_v53 }
 0x13e   : > { %v544_v42 = vpop.f32.mrf.mxu2  ;;  %v557_v43 = vpop.f32.mrf.mxu3 }
 0x13f   : > { %v568_v46 = vpop.f32.mrf.mxu0  ;;  %v581_v47 = vpop.f32.mrf.mxu1  ;;  %v2615_v42 = vperm.slane %v781_v24, 1 }
 0x140   : > { %v2560_v51 = vadd.f32 %v568_v46, %v447_v38  ;;  %v2562_v52 = vadd.f32 %v581_v47, %v448_v39  ;;  %v1523_v38 = vsel %vm288_vm1, %v1511_v27, 0  ;;  %v1505_v39 = vpop.permute.xlu2 %1504 }
 0x142   : > { %2062 = vmatmul.msk.bf16.vlgmr.msrb.gmra.mxu0 %vm284_vm2, %v2057_v9  ;;  %2063 = vmatmul.msk.bf16.vlgmr.msrb.gmra.mxu1 %vm284_vm2, %v2057_v9 }
 0x143   : > { %2064 = vmatmul.msk.bf16.vlgmr.msrb.gmra.mxu2 %vm284_vm2, %v2057_v9  ;;  %2065 = vmatmul.msk.bf16.vlgmr.msrb.gmra.mxu3 %vm284_vm2, %v2057_v9  ;;  %v780_v9 = vperm.slane %v2490_v50, 3  ;;  %v1532_v50 = vsel %vm288_vm1, %v1514_v26, 0 }
 0x144   : > { %1429 = vmatpush.bf16.msrb.mxu0 %v1359_v41  ;;  %1442 = vmatpush.bf16.msrb.mxu1 %v1362_v56  ;;  %v784_v41 = vperm.slane %v2532_v21, 3 }
 0x145   : > { %1455 = vmatpush.bf16.msrb.mxu2 %v1365_v60  ;;  %1468 = vmatpush.bf16.msrb.mxu3 %v1368_v61  ;;  %v2588_v54 = vperm.slane %v780_v9, 1  ;;  %v1503_v60 = vpop.permute.xlu1 %1502  ;;  %v2629_v61 = vperm.slane %v783_v49, 1  ;;  %v786_v9 = vperm.slane %v2532_v21, 7 }
 0x146   : > { %v594_v1 = vpop.f32.mrf.mxu2  ;;  %v607_v3 = vpop.f32.mrf.mxu3  ;;  %v2631_v62 = vperm.slane %v784_v41, 1 }
 0x147   : > { %v2580_v4 = vadd.f32 %v594_v1, %v449_v63  ;;  %v2582_v6 = vadd.f32 %v607_v3, %v450_v0  ;;  %v570_v7 = vpop.f32.mrf.mxu0  ;;  %v583_v8 = vpop.f32.mrf.mxu1  ;;  %v1515_v3 = vsel %vm1510_vm8, %v1501_v16, %v1503_v60 }
 0x148   : > { %v1509_v63 = vpop.permute.xlu2 %1508  ;;  %v1516_v7 = vsel %vm1510_vm8, %v1503_v60, %v1505_v39 }
 0x149   : > { %v1538_v16 = vsel %vm288_vm1, %v1516_v7, 0 }
 0x14d   : > { %v1667_v24 = vpop.permute.xlu1 %1666 }
 0x14e   : > { %v596_v18 = vpop.f32.mrf.mxu2  ;;  %v609_v19 = vpop.f32.mrf.mxu3 }
 0x14f   : > { %v684_v11 = vpop.f32.mrf.mxu0  ;;  %v697_v22 = vpop.f32.mrf.mxu1  ;;  %v1535_v19 = vsel %vm288_vm1, %v1515_v3, 0 }
 0x150   : > { %v803_v32 = vmul.f32 %v2586_v2, %v684_v11  ;;  %v804_v33 = vmul.f32 %v2588_v54, %v697_v22 }
 0x152   : > { %v2604_v36 = vadd.f32 %v803_v32, %v2515_v10  ;;  %v2607_v37 = vadd.f32 %v804_v33, %v2517_v13  ;;  %2067 = vmatmul.msk.bf16.vlgmr.msra.gmra.mxu0 %vm284_vm2, %v2066_v23  ;;  %2068 = vmatmul.msk.bf16.vlgmr.msra.gmra.mxu1 %vm284_vm2, %v2066_v23  ;;  %v2617_v10 = vperm.slane %v782_v25, 1  ;;  %v1507_v13 = vpop.permute.xlu0 %1506 }
 0x153   : > { %2069 = vmatmul.msk.bf16.vlgmr.msra.gmra.mxu2 %vm284_vm2, %v2066_v23  ;;  %2070 = vmatmul.msk.bf16.vlgmr.msra.gmra.mxu3 %vm284_vm2, %v2066_v23  ;;  %v1518_v5 = vsel %vm1510_vm8, %v1507_v13, %v1509_v63 }
 0x154   : > { %1566 = vmatpush.bf16.msra.mxu1 %v1526_v35  ;;  %1579 = vmatpush.bf16.msra.mxu2 %v1529_v31  ;;  %v1544_v22 = vsel %vm288_vm1, %v1518_v5, 0  ;;  %v1661_v35 = vpop.permute.xlu2 %1660 }
 0x155   : > { %1592 = vmatpush.bf16.msra.mxu3 %v1532_v50  ;;  %1553 = vmatpush.bf16.msra.mxu0 %v1523_v38 }
 0x156   : > { %v710_v43 = vpop.f32.mrf.mxu2  ;;  %v723_v44 = vpop.f32.mrf.mxu3 }
 0x157   : > { %v805_v45 = vmul.f32 %v2615_v42, %v710_v43  ;;  %v806_v46 = vmul.f32 %v2617_v10, %v723_v44  ;;  %v686_v47 = vpop.f32.mrf.mxu0  ;;  %v699_v48 = vpop.f32.mrf.mxu1 }
 0x158   : > { %v2075_v48 = vld [vmem:[%s2818_s2 + $0x1c] sm:$0xf] }
 0x159   : > { %v2624_v56 = vadd.f32 %v805_v45, %v2542_v28  ;;  %v2627_v57 = vadd.f32 %v806_v46, %v2544_v29  ;;  %v785_v28 = vperm.slane %v2532_v21, 5  ;;  %v1517_v29 = vsel %vm1510_vm8, %v1505_v39, %v1507_v13  ;;  %v1669_v39 = vpop.permute.xlu1 %1668 }
 0x15a   : > { %v1665_v20 = vpop.permute.xlu0 %1664  ;;  %v1541_v21 = vsel %vm288_vm1, %v1517_v29, 0 }
 0x15b   : > { %v2655_v25 = vperm.slane %v785_v28, 1  ;;  %v1681_v44 = vsel %vm1678_vm9, %v1665_v20, %v1667_v24 }
 0x15c   : > { %v1697_v60 = vsel %vm288_vm1, %v1681_v44, 0  ;;  %v1673_v3 = vpop.permute.xlu2 %1672 }
 0x15e   : > { %v712_v0 = vpop.f32.mrf.mxu2  ;;  %v725_v1 = vpop.f32.mrf.mxu3 }
 0x15f   : > { %v736_v8 = vpop.f32.mrf.mxu0  ;;  %v749_v12 = vpop.f32.mrf.mxu1 }
 0x160   : > { %v807_v53 = vmul.f32 %v2629_v61, %v736_v8  ;;  %v808_v18 = vmul.f32 %v2631_v62, %v749_v12 }
 0x162   : > { %v2644_v17 = vadd.f32 %v807_v53, %v2560_v51  ;;  %v2647_v11 = vadd.f32 %v808_v18, %v2562_v52  ;;  %2071 = vmatmul.msk.bf16.vlgmr.msrb.gmra.mxu0 %vm284_vm2, %v2066_v23  ;;  %2072 = vmatmul.msk.bf16.vlgmr.msrb.gmra.mxu1 %vm284_vm2, %v2066_v23  ;;  %v2657_v51 = vperm.slane %v786_v9, 1  ;;  %v1663_v38 = vpop.permute.xlu0 %1662  ;;  %v1671_v18 = vpop.permute.xlu1 %1670 }
 0x163   : > { %2073 = vmatmul.msk.bf16.vlgmr.msrb.gmra.mxu2 %vm284_vm2, %v2066_v23  ;;  %2074 = vmatmul.msk.bf16.vlgmr.msrb.gmra.mxu3 %vm284_vm2, %v2066_v23  ;;  %v1680_v45 = vsel %vm1678_vm9, %v1663_v38, %v1665_v20 }
 0x164   : > { %1605 = vmatpush.bf16.msrb.mxu0 %v1535_v19  ;;  %1618 = vmatpush.bf16.msrb.mxu1 %v1538_v16  ;;  %v1694_v63 = vsel %vm288_vm1, %v1680_v45, 0  ;;  %v1677_v16 = vpop.permute.xlu2 %1676 }
 0x165   : > { %1631 = vmatpush.bf16.msrb.mxu2 %v1541_v21  ;;  %1644 = vmatpush.bf16.msrb.mxu3 %v1544_v22  ;;  %v1683_v22 = vsel %vm1678_vm9, %v1669_v39, %v1671_v18 }
 0x166   : > { %v762_v52 = vpop.f32.mrf.mxu2  ;;  %v775_v26 = vpop.f32.mrf.mxu3 }
 0x167   : > { %v809_v27 = vmul.f32 %v2655_v25, %v762_v52  ;;  %v810_v32 = vmul.f32 %v2657_v51, %v775_v26  ;;  %v738_v33 = vpop.f32.mrf.mxu0  ;;  %v751_v31 = vpop.f32.mrf.mxu1 }
 0x169   : > { %v2662_v50 = vadd.f32 %v809_v27, %v2580_v4  ;;  %v2665_v23 = vadd.f32 %v810_v32, %v2582_v6  ;;  %v1682_v4 = vsel %vm1678_vm9, %v1667_v24, %v1669_v39  ;;  %v1679_v6 = vsel %vm1678_vm9, %v1661_v35, %v1663_v38 }
 0x16a   : > { %v1700_v0 = vsel %vm288_vm1, %v1682_v4, 0  ;;  %v1691_v1 = vsel %vm288_vm1, %v1679_v6, 0  ;;  %v1675_v19 = vpop.permute.xlu0 %1674  ;;  %v1684_v24 = vsel %vm1678_vm9, %v1671_v18, %v1673_v3 }
 0x16b   : > { %v1685_v27 = vsel %vm1678_vm9, %v1673_v3, %v1675_v19  ;;  %v1686_v32 = vsel %vm1678_vm9, %v1675_v19, %v1677_v16  ;;  %v1706_v31 = vsel %vm288_vm1, %v1684_v24, 0 }
 0x16c   : > { %v1709_v35 = vsel %vm288_vm1, %v1685_v27, 0  ;;  %v1712_v38 = vsel %vm288_vm1, %v1686_v32, 0 }
 0x16e   : > { %v764_v13 = vpop.f32.mrf.mxu2  ;;  %v777_v43 = vpop.f32.mrf.mxu3 }
 0x16f   : > { %v884_v46 = vpop.f32.mrf.mxu0  ;;  %v897_v47 = vpop.f32.mrf.mxu1 }
 0x170   : > { %v979_v49 = vmul.f32 %v884_v46, %v2500_v58  ;;  %v980_v41 = vmul.f32 %v897_v47, %v2502_v59 }
 0x172   : > { %2076 = vmatmul.msk.bf16.vlgmr.msra.gmra.mxu0 %vm284_vm2, %v2075_v48  ;;  %2077 = vmatmul.msk.bf16.vlgmr.msra.gmra.mxu1 %vm284_vm2, %v2075_v48  ;;  %v987_v7 = vadd.f32 %v979_v49, %v2604_v36  ;;  %v988_v8 = vadd.f32 %v980_v41, %v2607_v37 }
 0x173   : > { %2078 = vmatmul.msk.bf16.vlgmr.msra.gmra.mxu2 %vm284_vm2, %v2075_v48  ;;  %2079 = vmatmul.msk.bf16.vlgmr.msra.gmra.mxu3 %vm284_vm2, %v2075_v48 }
 0x174   : > { %1734 = vmatpush.bf16.msra.mxu1 %v1694_v63  ;;  %1747 = vmatpush.bf16.msra.mxu2 %v1697_v60  ;;  %v2084_v60 = vld [vmem:[%s2818_s2 + $0x20] sm:$0xf] }
 0x175   : > { %1760 = vmatpush.bf16.msra.mxu3 %v1700_v0  ;;  %1721 = vmatpush.bf16.msra.mxu0 %v1691_v1 }
 0x176   : > { %v910_v12 = vpop.f32.mrf.mxu2  ;;  %v923_v28 = vpop.f32.mrf.mxu3 }
 0x177   : > { %v981_v9 = vmul.f32 %v910_v12, %v2519_v14  ;;  %v982_v29 = vmul.f32 %v923_v28, %v2521_v15  ;;  %v886_v5 = vpop.f32.mrf.mxu0  ;;  %v899_v53 = vpop.f32.mrf.mxu1 }
 0x179   : > { %v989_v36 = vadd.f32 %v981_v9, %v2624_v56  ;;  %v990_v37 = vadd.f32 %v982_v29, %v2627_v57  ;;  %v1703_v57 = vsel %vm288_vm1, %v1683_v22, 0 }
 0x17e   : > { %v912_v20 = vpop.f32.mrf.mxu2  ;;  %v925_v21 = vpop.f32.mrf.mxu3 }
 0x17f   : > { %v936_v52 = vpop.f32.mrf.mxu0  ;;  %v949_v26 = vpop.f32.mrf.mxu1 }
 0x180   : > { %v983_v33 = vmul.f32 %v936_v52, %v2546_v34  ;;  %v984_v56 = vmul.f32 %v949_v26, %v2548_v30 }
 0x182   : > { %2080 = vmatmul.msk.bf16.vlgmr.msrb.gmra.mxu0 %vm284_vm2, %v2075_v48  ;;  %2081 = vmatmul.msk.bf16.vlgmr.msrb.gmra.mxu1 %vm284_vm2, %v2075_v48  ;;  %v991_v39 = vadd.f32 %v983_v33, %v2644_v17  ;;  %v992_v13 = vadd.f32 %v984_v56, %v2647_v11 }
 0x183   : > { %2082 = vmatmul.msk.bf16.vlgmr.msrb.gmra.mxu2 %vm284_vm2, %v2075_v48  ;;  %2083 = vmatmul.msk.bf16.vlgmr.msrb.gmra.mxu3 %vm284_vm2, %v2075_v48 }
 0x184   : > { %1773 = vmatpush.bf16.msrb.mxu0 %v1703_v57  ;;  %1786 = vmatpush.bf16.msrb.mxu1 %v1706_v31 }
 0x185   : > { %1799 = vmatpush.bf16.msrb.mxu2 %v1709_v35  ;;  %1812 = vmatpush.bf16.msrb.mxu3 %v1712_v38 }
 0x186   : > { %v962_v43 = vpop.f32.mrf.mxu2  ;;  %v975_v44 = vpop.f32.mrf.mxu3 }
 0x187   : > { %v985_v45 = vmul.f32 %v962_v43, %v2564_v40  ;;  %v986_v46 = vmul.f32 %v975_v44, %v2566_v55  ;;  %v938_v47 = vpop.f32.mrf.mxu0  ;;  %v951_v4 = vpop.f32.mrf.mxu1 }
 0x189   : > { %v993_v17 = vadd.f32 %v985_v45, %v2662_v50  ;;  %v994_v11 = vadd.f32 %v986_v46, %v2665_v23 }
 0x18e   : > { %v964_v6 = vpop.f32.mrf.mxu2  ;;  %v977_v49 = vpop.f32.mrf.mxu3 }
 0x18f   : > { %v1033_v41 = vpop.f32.mrf.mxu0  ;;  %v1046_v48 = vpop.f32.mrf.mxu1 }
 0x190   : > { %v1128_v63 = vadd.f32 %v1033_v41, %v987_v7  ;;  %v1129_v0 = vadd.f32 %v1046_v48, %v988_v8 }
 0x192   : > { %2085 = vmatmul.msk.bf16.vlgmr.msra.gmra.mxu0 %vm284_vm2, %v2084_v60  ;;  %2086 = vmatmul.msk.bf16.vlgmr.msra.gmra.mxu1 %vm284_vm2, %v2084_v60 }
 0x193   : > { %2087 = vmatmul.msk.bf16.vlgmr.msra.gmra.mxu2 %vm284_vm2, %v2084_v60  ;;  %2088 = vmatmul.msk.bf16.vlgmr.msra.gmra.mxu3 %vm284_vm2, %v2084_v60 }
 0x196   : > { %v1059_v50 = vpop.f32.mrf.mxu2  ;;  %v1072_v23 = vpop.f32.mrf.mxu3 }
 0x197   : > { %v1130_v1 = vadd.f32 %v1059_v50, %v989_v36  ;;  %v1131_v3 = vadd.f32 %v1072_v23, %v990_v37  ;;  %v1035_v12 = vpop.f32.mrf.mxu0  ;;  %v1048_v28 = vpop.f32.mrf.mxu1 }
 0x19e   : > { %v1061_v9 = vpop.f32.mrf.mxu2  ;;  %v1074_v29 = vpop.f32.mrf.mxu3 }
 0x19f   : > { %v1085_v5 = vpop.f32.mrf.mxu0  ;;  %v1098_v53 = vpop.f32.mrf.mxu1 }
 0x1a0   : > { %v1132_v7 = vadd.f32 %v1085_v5, %v991_v39  ;;  %v1133_v8 = vadd.f32 %v1098_v53, %v992_v13 }
 0x1a2   : > { %2089 = vmatmul.msk.bf16.vlgmr.msrb.gmra.mxu0 %vm284_vm2, %v2084_v60  ;;  %2090 = vmatmul.msk.bf16.vlgmr.msrb.gmra.mxu1 %vm284_vm2, %v2084_v60 }
 0x1a3   : > { %2091 = vmatmul.msk.bf16.vlgmr.msrb.gmra.mxu2 %vm284_vm2, %v2084_v60  ;;  %2092 = vmatmul.msk.bf16.vlgmr.msrb.gmra.mxu3 %vm284_vm2, %v2084_v60 }
 0x1a6   : > { %v1111_v18 = vpop.f32.mrf.mxu2  ;;  %v1124_v19 = vpop.f32.mrf.mxu3 }
 0x1a7   : > { %v1134_v36 = vadd.f32 %v1111_v18, %v993_v17  ;;  %v1135_v37 = vadd.f32 %v1124_v19, %v994_v11  ;;  %v1087_v16 = vpop.f32.mrf.mxu0  ;;  %v1100_v20 = vpop.f32.mrf.mxu1 }
 0x1ae   : > { %v1113_v21 = vpop.f32.mrf.mxu2  ;;  %v1126_v22 = vpop.f32.mrf.mxu3 }
 0x1af   : > { %v1203_v24 = vpop.f32.mrf.mxu0  ;;  %v1216_v52 = vpop.f32.mrf.mxu1 }
 0x1b0   : > { %v1298_v26 = vmul.f32 %v1203_v24, %v2586_v2  ;;  %v1299_v27 = vmul.f32 %v1216_v52, %v2588_v54 }
 0x1b2   : > { %v1306_v32 = vadd.f32 %v1298_v26, %v1128_v63  ;;  %v1307_v33 = vadd.f32 %v1299_v27, %v1129_v0 }
 0x1b6   : > { %v1229_v56 = vpop.f32.mrf.mxu2  ;;  %v1242_v57 = vpop.f32.mrf.mxu3 }
 0x1b7   : > { %v1300_v31 = vmul.f32 %v1229_v56, %v2615_v42  ;;  %v1301_v35 = vmul.f32 %v1242_v57, %v2617_v10  ;;  %v1205_v38 = vpop.f32.mrf.mxu0  ;;  %v1218_v39 = vpop.f32.mrf.mxu1 }
 0x1b9   : > { %v1308_v13 = vadd.f32 %v1300_v31, %v1130_v1  ;;  %v1309_v43 = vadd.f32 %v1301_v35, %v1131_v3 }
 0x1be   : > { %v1231_v44 = vpop.f32.mrf.mxu2  ;;  %v1244_v45 = vpop.f32.mrf.mxu3 }
 0x1bf   : > { %v1255_v46 = vpop.f32.mrf.mxu0  ;;  %v1268_v47 = vpop.f32.mrf.mxu1 }
 0x1c0   : > { %v1302_v4 = vmul.f32 %v1255_v46, %v2629_v61  ;;  %v1303_v17 = vmul.f32 %v1268_v47, %v2631_v62 }
 0x1c2   : > { %v2727_v11 = vadd.f32 %v1302_v4, %v1132_v7  ;;  %v1311_v6 = vadd.f32 %v1303_v17, %v1133_v8 }
 0x1c6   : > { %v1281_v49 = vpop.f32.mrf.mxu2  ;;  %v1294_v41 = vpop.f32.mrf.mxu3 }
 0x1c7   : > { %v1304_v48 = vmul.f32 %v1281_v49, %v2655_v25  ;;  %v1305_v60 = vmul.f32 %v1294_v41, %v2657_v51  ;;  %v1257_v63 = vpop.f32.mrf.mxu0  ;;  %v1270_v0 = vpop.f32.mrf.mxu1 }
 0x1c9   : > { %v2731_v50 = vadd.f32 %v1304_v48, %v1134_v36  ;;  %v2733_v23 = vadd.f32 %v1305_v60, %v1135_v37 }
 0x1ce   : > { %v1283_v1 = vpop.f32.mrf.mxu2  ;;  %v1296_v3 = vpop.f32.mrf.mxu3 }
 0x1cf   : > { %v1379_v12 = vpop.f32.mrf.mxu0  ;;  %v1392_v28 = vpop.f32.mrf.mxu1 }
 0x1d0   : > { %v1474_v9 = vmul.f32 %v1379_v12, %v2500_v58  ;;  %v1475_v29 = vmul.f32 %v1392_v28, %v2502_v59 }
 0x1d2   : > { %v1482_v5 = vadd.f32 %v1474_v9, %v1306_v32  ;;  %v1483_v53 = vadd.f32 %v1475_v29, %v1307_v33 }
 0x1d6   : > { %v1405_v7 = vpop.f32.mrf.mxu2  ;;  %v1418_v8 = vpop.f32.mrf.mxu3 }
 0x1d7   : > { %v1476_v18 = vmul.f32 %v1405_v7, %v2519_v14  ;;  %v1477_v19 = vmul.f32 %v1418_v8, %v2521_v15  ;;  %v1381_v36 = vpop.f32.mrf.mxu0  ;;  %v1394_v16 = vpop.f32.mrf.mxu1 }
 0x1d9   : > { %v1484_v37 = vadd.f32 %v1476_v18, %v1308_v13  ;;  %v1485_v20 = vadd.f32 %v1477_v19, %v1309_v43 }
 0x1de   : > { %v1407_v21 = vpop.f32.mrf.mxu2  ;;  %v1420_v22 = vpop.f32.mrf.mxu3 }
 0x1df   : > { %v1431_v24 = vpop.f32.mrf.mxu0  ;;  %v1444_v52 = vpop.f32.mrf.mxu1 }
 0x1e0   : > { %v1479_v58 = vmul.f32 %v1444_v52, %v2548_v30  ;;  %v1478_v19 = vmul.f32 %v1431_v24, %v2546_v34 }
 0x1e2   : > { %v1487_v26 = vadd.f32 %v1479_v58, %v1311_v6  ;;  %v1486_v16 = vadd.f32 %v1478_v19, %v2727_v11 }
 0x1e6   : > { %v1457_v59 = vpop.f32.mrf.mxu2  ;;  %v1470_v27 = vpop.f32.mrf.mxu3 }
 0x1e7   : > { %v1433_v32 = vpop.f32.mrf.mxu0  ;;  %v1446_v33 = vpop.f32.mrf.mxu1 }
 0x1e8   : > { %v1481_v33 = vmul.f32 %v1470_v27, %v2566_v55 }
 0x1ee   : > { %v1459_v56 = vpop.f32.mrf.mxu2  ;;  %v1472_v57 = vpop.f32.mrf.mxu3 }
 0x1ef   : > { %v1555_v14 = vpop.f32.mrf.mxu0  ;;  %v1568_v31 = vpop.f32.mrf.mxu1 }
 0x1f0   : > { %v1650_v63 = vadd.f32 %v1555_v14, %v1482_v5  ;;  %v1651_v0 = vadd.f32 %v1568_v31, %v1483_v53 }
 0x1f6   : > { %v1581_v15 = vpop.f32.mrf.mxu2  ;;  %v1594_v35 = vpop.f32.mrf.mxu3 }
 0x1f7   : > { %v1557_v38 = vpop.f32.mrf.mxu0  ;;  %v1570_v39 = vpop.f32.mrf.mxu1  ;;  %v1652_v12 = vadd.f32 %v1581_v15, %v1484_v37  ;;  %v1653_v53 = vadd.f32 %v1594_v35, %v1485_v20 }
 0x1fe   : > { %v1583_v13 = vpop.f32.mrf.mxu2  ;;  %v1596_v43 = vpop.f32.mrf.mxu3 }
 0x1ff   : > { %v1607_v44 = vpop.f32.mrf.mxu0  ;;  %v1620_v45 = vpop.f32.mrf.mxu1 }
 0x200   : > { %v1654_v20 = vadd.f32 %v1607_v44, %v1486_v16  ;;  %v1655_v14 = vadd.f32 %v1620_v45, %v1487_v26 }
 0x206   : > { %v1633_v46 = vpop.f32.mrf.mxu2  ;;  %v1646_v47 = vpop.f32.mrf.mxu3 }
 0x207   : > { %v1609_v30 = vpop.f32.mrf.mxu0  ;;  %v1622_v4 = vpop.f32.mrf.mxu1 }
 0x20e   : > { %v1635_v17 = vpop.f32.mrf.mxu2  ;;  %v1648_v6 = vpop.f32.mrf.mxu3 }
 0x20f   : > { %v1723_v49 = vpop.f32.mrf.mxu0  ;;  %v1736_v41 = vpop.f32.mrf.mxu1 }
 0x210   : > { %v1818_v48 = vmul.f32 %v1723_v49, %v2586_v2  ;;  %v1819_v60 = vmul.f32 %v1736_v41, %v2588_v54 }
 0x212   : > { %v2742_v28 = vadd.f32 %v1818_v48, %v1650_v63  ;;  %v2744_v9 = vadd.f32 %v1819_v60, %v1651_v0  ;;  %v2146_v63 = vmov 8192.0  }
 0x213   : > { %2126 = vrcp.f32 %v2146_v63 }
 0x214   : > { %v1850_v2 = vmul.f32 %v2742_v28, %v2742_v28  ;;  %v1851_v54 = vmul.f32 %v2744_v9, %v2744_v9  ;;  %v1834_v36 = vadd.f32 %v2744_v9, %v2742_v28 }
 0x216   : > { %v1749_v1 = vpop.f32.mrf.mxu2  ;;  %v1762_v3 = vpop.f32.mrf.mxu3  ;;  %v1858_v34 = vadd.f32 %v1851_v54, %v1850_v2 }
 0x217   : > { %v1820_v29 = vmul.f32 %v1749_v1, %v2615_v42  ;;  %v1725_v7 = vpop.f32.mrf.mxu0  ;;  %v1738_v8 = vpop.f32.mrf.mxu1  ;;  %v1821_v5 = vmul.f32 %v1762_v3, %v2617_v10  ;;  %v1480_v10 = vmul.f32 %v1457_v59, %v2564_v40 }
 0x219   : > { %v2747_v18 = vadd.f32 %v1820_v29, %v1652_v12  ;;  %v2761_v24 = vadd.f32 %v1821_v5, %v1653_v53  ;;  %v1488_v35 = vadd.f32 %v1480_v10, %v2731_v50  ;;  %v2127_v0 = vpop.eup %2126 }
 0x21a   : > { %v1875_v1 = vmul.f32 8192.0, %v2127_v0  ;;  %vm1879_vm10 = vweird.f32 %v2127_v0 }
 0x21b   : > { %v1852_v42 = vmul.f32 %v2747_v18, %v2747_v18  ;;  %v1835_v22 = vadd.f32 %v1834_v36, %v2747_v18  ;;  %v1853_v15 = vmul.f32 %v2761_v24, %v2761_v24 }
 0x21c   : > { %v1876_v29 = vsub.f32 1.0, %v1875_v1 }
 0x21d   : > { %v1859_v56 = vadd.f32 %v1858_v34, %v1852_v42  ;;  %v1836_v31 = vadd.f32 %v1835_v22, %v2761_v24 }
 0x21e   : > { %v1751_v37 = vpop.f32.mrf.mxu2  ;;  %v1764_v21 = vpop.f32.mrf.mxu3  ;;  %v1877_v5 = vmul.f32 %v2127_v0, %v1876_v29 }
 0x21f   : > { %v1775_v52 = vpop.f32.mrf.mxu0  ;;  %v1788_v58 = vpop.f32.mrf.mxu1  ;;  %v1860_v59 = vadd.f32 %v1859_v56, %v1853_v15  ;;  %v1895_v15 = vld [vmem:[%s2819_s3] sm:$0xff] }
 0x220   : > { %v1822_v32 = vmul.f32 %v1775_v52, %v2629_v61  ;;  %v1823_v57 = vmul.f32 %v1788_v58, %v2631_v62  ;;  %v1489_v61 = vadd.f32 %v1481_v33, %v2733_v23  ;;  %v1656_v62 = vadd.f32 %v1633_v46, %v1488_v35 }
 0x221   : > { %v1878_v37 = vadd.f32 %v2127_v0, %v1877_v5 }
 0x222   : > { %v2767_v11 = vadd.f32 %v1822_v32, %v1654_v20  ;;  %v2777_v27 = vadd.f32 %v1823_v57, %v1655_v14  ;;  %v1657_v39 = vadd.f32 %v1646_v47, %v1489_v61 }
 0x223   : > { %v1880_v52 = vsel %vm1879_vm10, %v2127_v0, %v1878_v37 }
 0x224   : > { %v1854_v40 = vmul.f32 %v2767_v11, %v2767_v11  ;;  %v1837_v55 = vadd.f32 %v1836_v31, %v2767_v11  ;;  %v1855_v30 = vmul.f32 %v2777_v27, %v2777_v27  ;;  %v2148_v31 = vmov 0  }
 0x225   : > { %2124 = vset.pattern.permute.xlu2 %v2148_v31  ;;  %2125 = vset.pattern.permute.xlu0 %v2148_v31 }
 0x226   : > { %v1801_v38 = vpop.f32.mrf.mxu2  ;;  %v1814_v26 = vpop.f32.mrf.mxu3  ;;  %v1861_v45 = vadd.f32 %v1860_v59, %v1854_v40  ;;  %v1838_v17 = vadd.f32 %v1837_v55, %v2777_v27  ;;  %v1911_v55 = vld [vmem:[%s2820_s4] sm:$0xff] }
 0x227   : > { %v1824_v13 = vmul.f32 %v1801_v38, %v2655_v25  ;;  %v1825_v43 = vmul.f32 %v1814_v26, %v2657_v51  ;;  %v1777_v44 = vpop.f32.mrf.mxu0  ;;  %v1790_v50 = vpop.f32.mrf.mxu1  ;;  %v2149_v38 = vmov 0.0  }
 0x228   : > { %v1862_v25 = vadd.f32 %v1861_v45, %v1855_v30  ;;  %1941 = vst [vmem:[%s224_s27] sm:$0xff] %v2149_v38 }
 0x229   : > { %v2783_v23 = vadd.f32 %v1824_v13, %v1656_v62  ;;  %v2785_v4 = vadd.f32 %v1825_v43, %v1657_v39  ;;  %1950 = vst [vmem:[%s224_s27 + $0x48] sm:$0xff] %v2149_v38 }
 0x22b   : > { %v1839_v46 = vadd.f32 %v1838_v17, %v2783_v23  ;;  %v1856_v47 = vmul.f32 %v2783_v23, %v2783_v23  ;;  %v1857_v6 = vmul.f32 %v2785_v4, %v2785_v4 }
 0x22d   : > { %v1840_v51 = vadd.f32 %v1839_v46, %v2785_v4  ;;  %v1863_v49 = vadd.f32 %v1862_v25, %v1856_v47 }
 0x22e   : > { %v1803_v41 = vpop.f32.mrf.mxu2  ;;  %v1816_v48 = vpop.f32.mrf.mxu3 }
 0x22f   : > { %1841 = vadd.xlane.f32.xlu0 %v1840_v51  ;;  %v1864_v60 = vadd.f32 %v1863_v49, %v1857_v6 }
 0x231   : > { %1865 = vadd.xlane.f32.xlu1 %v1864_v60 }
 0x2a2   : > { %v1842_v3 = vpop.xlane.xlu0 %1841 }
 0x2a3   : > { %v1843_v12 = vrot.slane %v1842_v3, 4 }
 0x2a4   : > { %v1866_v7 = vpop.xlane.xlu1 %1865 }
 0x2a5   : > { %v1844_v8 = vadd.f32 %v1843_v12, %v1842_v3  ;;  %v1867_v19 = vrot.slane %v1866_v7, 4 }
 0x2a7   : > { %v1845_v2 = vrot.slane %v1844_v8, 2  ;;  %v1868_v54 = vadd.f32 %v1867_v19, %v1866_v7 }
 0x2a9   : > { %v1869_v53 = vrot.slane %v1868_v54, 2  ;;  %v1846_v36 = vadd.f32 %v1845_v2, %v1844_v8 }
 0x2ab   : > { %v1870_v42 = vadd.f32 %v1869_v53, %v1868_v54  ;;  %v1847_v16 = vrot.slane %v1846_v36, 1 }
 0x2ad   : > { %v1848_v21 = vadd.f32 %v1847_v16, %v1846_v36  ;;  %v1871_v34 = vrot.slane %v1870_v42, 1 }
 0x2af   : > { %2096 = vpush %v1848_v21  ;;  %v1872_v22 = vadd.f32 %v1871_v34, %v1870_v42 }
 0x2b1   : > { %2098 = vpush %v1872_v22 }
 0x2b2   : > { %2100 = vpush %v1880_v52 }
 0x2e0   : > { %s2097_s7 = spop %2096 }
 0x2e2   : > { %s2099_s8 = spop %2098 }
 0x2e3   : > { %s2101_s9 = spop %2100 }
 0x2e4   : > { %s1882_s10 = smul.f32 %s2101_s9, %s2097_s7 }
 0x2e5   : > { %s1891_s11 = smul.f32 %s2101_s9, %s2099_s8 }
 0x2e6   : > { %s1892_s12 = smul.f32 %s1882_s10, %s1882_s10  ;;  %v1912_v61 = vstv %s1882_s10 }
 0x2e8   : > { %s1893_s13 = ssub.f32 %s1891_s11, %s1892_s12 }
 0x2ea   : > { %s1894_s15 = smax.f32 %s2147_s14, %s1893_s13 }
 0x2eb   : > { %s1896_s16 = sadd.f32 1e-05, %s1894_s15 }
 0x2ed   : > { %v1897_v58 = vstv %s1896_s16 }
 0x2ee   : > { %2128 = vrsqrt.f32 %v1897_v58  ;;  %vm1904_vm12 = vweird.f32 %v1897_v58 }
 0x2f4   : > { %v2129_v10 = vpop.eup %2128 }
 0x2f5   : > { %v1899_v20 = vmul.f32 %v2129_v10, %v1897_v58  ;;  %vm1905_vm11 = vweird.f32 %v2129_v10 }
 0x2f6   : > { %vm1906_vm13 = vmor %vm1904_vm12, %vm1905_vm11 }
 0x2f7   : > { %v1900_v32 = vmul.f32 %v2129_v10, %v1899_v20 }
 0x2f9   : > { %v1901_v33 = vmul.f32 0.5, %v1900_v32 }
 0x2fb   : > { %v1902_v56 = vsub.f32 1.5, %v1901_v33 }
 0x2fd   : > { %v1903_v57 = vmul.f32 %v2129_v10, %v1902_v56 }
 0x2ff   : > { %v1907_v14 = vsel %vm1906_vm13, %v2129_v10, %v1903_v57 }
 0x300   : > { %2102 = vpush %v1907_v14 }
 0x331   : > { %s2103_s22 = spop %2102 }
 0x332   : > { %v1909_v35 = vstv %s2103_s22 }
 0x333   : > { %v1910_v40 = vmul.f32 %v1909_v35, %v1895_v15 }
 0x335   : > { %1917 = vperm.xlu2 %2124, %v1910_v40   ;;  %v1913_v59 = vmul.f32 %v1912_v61, %v1910_v40 }
 0x337   : > { %v1914_v62 = vsub.f32 %v1911_v55, %v1913_v59 }
 0x33d   : > { %1930 = vperm.xlu2 %2124, %v1914_v62  }
 0x38f   : > { %v1918_v26 = vpop.permute.xlu2 %1917 }
 0x390   : > { %v1920_v39 = vmul.f32 %v1918_v26, %v2742_v28  ;;  %v1921_v13 = vmul.f32 %v1918_v26, %v2744_v9  ;;  %v1922_v43 = vmul.f32 %v1918_v26, %v2747_v18  ;;  %v1923_v44 = vmul.f32 %v1918_v26, %v2761_v24 }
 0x391   : > { %v1924_v45 = vmul.f32 %v1918_v26, %v2767_v11  ;;  %v1925_v47 = vmul.f32 %v1918_v26, %v2777_v27  ;;  %v1926_v51 = vmul.f32 %v1918_v26, %v2783_v23  ;;  %v1927_v28 = vmul.f32 %v1918_v26, %v2785_v4 }
 0x397   : > { %v1931_v50 = vpop.permute.xlu2 %1930 }
 0x398   : > { %v1933_v30 = vadd.f32 %v1931_v50, %v1920_v39  ;;  %v1934_v17 = vadd.f32 %v1931_v50, %v1921_v13  ;;  %v1935_v46 = vadd.f32 %v1931_v50, %v1922_v43  ;;  %v1936_v25 = vadd.f32 %v1931_v50, %v1923_v44 }
 0x399   : > { %v1937_v6 = vadd.f32 %v1931_v50, %v1924_v45  ;;  %v1938_v9 = vadd.f32 %v1931_v50, %v1925_v47  ;;  %v1939_v18 = vadd.f32 %v1931_v50, %v1926_v51  ;;  %v1940_v24 = vadd.f32 %v1931_v50, %v1927_v28 }
 0x39a   : > { %1942 = vst [vmem:[%s224_s27 + $0x8] sm:$0xff] %v1933_v30 }
 0x39b   : > { %1943 = vst [vmem:[%s224_s27 + $0x10] sm:$0xff] %v1934_v17 }
 0x39c   : > { %1944 = vst [vmem:[%s224_s27 + $0x18] sm:$0xff] %v1935_v46 }
 0x39d   : > { %1945 = vst [vmem:[%s224_s27 + $0x20] sm:$0xff] %v1936_v25 }
 0x39e   : > { %1946 = vst [vmem:[%s224_s27 + $0x28] sm:$0xff] %v1937_v6 }
 0x39f   : > { %1947 = vst [vmem:[%s224_s27 + $0x30] sm:$0xff] %v1938_v9 }
 0x3a0   : > { %1948 = vst [vmem:[%s224_s27 + $0x38] sm:$0xff] %v1939_v18 }
 0x3a1   : > { %1949 = vst [vmem:[%s224_s27 + $0x40] sm:$0xff] %v1940_v24 }
 0x3a2 PF: > { %s15_s18 = sadd.s32 1, %s2136_s18  }
 0x3a3   : > { %p12_p4 = scmp.ge.s32.totalorder %s15_s18, 4  }
 0x3a5   :  { %14 = sbr.rel (!%p12_p4) target bundleno = 1 (0x1), region = 78 }

</bundles_post_ra>
